<compile_context>
chip_gen: v7x
topology: tpu7x:2x2x1
jax: 0.10.0
libtpu: 0.0.40
codegen_flags: <defaults>
</compile_context>

<pallas_src>
import functools

import jax
import jax.numpy as jnp
from jax import lax
from jax.experimental import pallas as pl
from jax.experimental.pallas import tpu as pltpu


_COMPUTE_DTYPE = jnp.bfloat16          # MXU fast path on v5e/v6e/v7x
_FAT_STACK_MAX_CIN = 256               # below this, lane-stack taps into one fat matmul
_VMEM_LIMIT_BYTES = 64 * 1024 * 1024   # explicit scoped-VMEM limit (v5e default is only
                                       # 16 MiB; 64 MiB also fits v7x's physical VMEM)


# ----------------------------------------------------------------------------
# In-kernel helpers (operate on per-batch (T, C) VMEM values)
# ----------------------------------------------------------------------------
def _conv3(x, w, b, dilation):
    """'same' K=3 Conv1d on a (T, C_in) f32 tile.

    w: (3*C_in, C_out) bf16, tap-major rows; b: (1, C_out) f32.  Zero halo rows are
    built in VMEM; matmuls run bf16 x bf16 with f32 accumulation.
    """
    T, C_in = x.shape
    pad = dilation
    z = jnp.zeros((pad, C_in), x.dtype)
    xpad = jnp.concatenate([z, x, z], axis=0)               # (T + 2*pad, C_in)
    taps = [xpad[k * dilation:k * dilation + T, :] for k in range(3)]
    if C_in < _FAT_STACK_MAX_CIN:
        # Small C_in: one fat (T, 3*C_in) matmul.
        xs = jnp.concatenate(taps, axis=1).astype(w.dtype)
        y = jnp.dot(xs, w, preferred_element_type=jnp.float32)
    else:
        # Large C_in: 3 accumulating dots; avoids the 3x live activation copy.
        y = jnp.zeros((T, w.shape[1]), jnp.float32)
        for k in range(3):
            wk = w[k * C_in:(k + 1) * C_in, :]
            y = y + jnp.dot(taps[k].astype(w.dtype), wk,
                            preferred_element_type=jnp.float32)
    return y + b


def _upsample2x(h):
    """Nearest-neighbour 2x upsample (T, C) -> (2T, C), entirely in VMEM.

    Implemented as a (2T, T) 0/1 selection matmul (exact in bf16): out[j] = h[j // 2].
    """
    T, _ = h.shape
    rows = lax.broadcasted_iota(jnp.int32, (2 * T, T), 0)
    cols = lax.broadcasted_iota(jnp.int32, (2 * T, T), 1)
    d = rows - 2 * cols                                     # in {0,1} iff cols == rows//2
    sel = jnp.where((d >= 0) & (d <= 1), 1.0, 0.0).astype(_COMPUTE_DTYPE)
    return jnp.dot(sel, h.astype(_COMPUTE_DTYPE), preferred_element_type=jnp.float32)


# ----------------------------------------------------------------------------
# The single fused decoder kernel (one batch element per grid step)
# ----------------------------------------------------------------------------
def _decoder_kernel(x_ref, *refs, down_t, dilations):
    o_ref = refs[-1]
    wr = refs[:-1]
    # Weight-ref layout: [conv_in w, b] + down_t * [rw1, rb1, rw2, rb2, up w, up b]
    #                    + [mid w, mid b, out w, out b]
    ciw, cib = wr[0], wr[1]
    stage_refs = [wr[2 + 6 * s: 2 + 6 * (s + 1)] for s in range(down_t)]
    wm, bm, wo, bo = wr[2 + 6 * down_t: 6 + 6 * down_t]

    # conv_in + ReLU  (input tile is (T0, C_lat), already NTC)
    h = jnp.maximum(_conv3(x_ref[...].astype(jnp.float32), ciw[...], cib[...], 1), 0.0)

    for s in range(down_t):
        rw1, rb1, rw2, rb2, uw, ub = stage_refs[s]
        # ---- Resnet1D: `depth` ResConv1DBlocks (relu -> dilated 3-conv -> relu ->
        #      1x1 conv -> residual add); the residual stream stays f32 in VMEM -------
        for bi, dil in enumerate(dilations):
            if s == 0 and bi == 0:
                # conv_in output is already ReLU'd (ReLU is idempotent).  Only valid
                # because activation == 'relu'.
                xin = h
            else:
                xin = jnp.maximum(h, 0.0)
            t = _conv3(xin, rw1[bi], rb1[bi], dil)
            t = jnp.maximum(t, 0.0)
            t = jnp.dot(t.astype(_COMPUTE_DTYPE), rw2[bi],
                        preferred_element_type=jnp.float32) + rb2[bi]
            h = h + t
        # ---- nn.Upsample(2, 'nearest') + stage Conv1d(width, width, 3, 1, 1) --------
        h = _conv3(_upsample2x(h), uw[...], ub[...], 1)

    # ---- head: conv_mid + ReLU + conv_out ---------------------------------------
    m = jnp.maximum(_conv3(h, wm[...], bm[...], 1), 0.0)
    y = _conv3(m, wo[...], bo[...], 1)                      # (T_final, C_out)
    o_ref[...] = y.astype(o_ref.dtype)


# ----------------------------------------------------------------------------
# Wrapper
# ----------------------------------------------------------------------------
def _weight_spec(a, single_buffer):
    nd = a.ndim
    index_map = lambda n: (0,) * nd
    if single_buffer:
        # Grid-invariant weights: single-buffer them so the pipeline does not allocate
        # them twice in VMEM (double-buffering is pointless for a constant index_map).
        return pl.BlockSpec(a.shape, index_map, pipeline_mode=pl.Buffered(1))
    return pl.BlockSpec(a.shape, index_map)


@functools.partial(jax.jit, static_argnames=("down_t", "depth", "dilation_growth_rate",
                                              "single_buffer_weights"))
def _decoder_forward(packed, x, *, down_t, depth, dilation_growth_rate,
                     single_buffer_weights):
    N, C_lat, T0 = x.shape
    C_out = packed[-2].shape[1]
    T_final = T0 * (2 ** down_t)
    dilations = tuple([dilation_growth_rate ** d for d in range(depth)][::-1])

    kernel = functools.partial(_decoder_kernel, down_t=down_t, dilations=dilations)

    h = jnp.transpose(x, (0, 2, 1))                         # NCT -> NTC (time -> sublanes)
    out = pl.pallas_call(
        kernel,
        out_shape=jax.ShapeDtypeStruct((N, T_final, C_out), x.dtype),
        grid=(N,),
        in_specs=[pl.BlockSpec((None, T0, C_lat), lambda n: (n, 0, 0))]
                 + [_weight_spec(a, single_buffer_weights) for a in packed],
        out_specs=pl.BlockSpec((None, T_final, C_out), lambda n: (n, 0, 0)),
        compiler_params=pltpu.CompilerParams(
            dimension_semantics=("parallel",),
            vmem_limit_bytes=_VMEM_LIMIT_BYTES),
    )(h, *packed)
    return jnp.transpose(out, (0, 2, 1))                    # NTC -> NCT


def decoder_forward(packed, x, *, down_t, depth, dilation_growth_rate):
    try:
        return _decoder_forward(packed, x, down_t=down_t, depth=depth,
                                dilation_growth_rate=dilation_growth_rate,
                                single_buffer_weights=True)
    except Exception:
        # Graceful degradation: if this Pallas version rejects pipeline_mode=Buffered(1),
        # fall back to default (double-buffered) weight specs — functionally identical.
        return _decoder_forward(packed, x, down_t=down_t, depth=depth,
                                dilation_growth_rate=dilation_growth_rate,
                                single_buffer_weights=False)


# ----------------------------------------------------------------------------
# Parameter construction (deterministic, synthetic) and one-time packing
# ----------------------------------------------------------------------------
def _conv_params(key, c_in, c_out, K):
    kw, kb = jax.random.split(key)
    w = jax.random.normal(kw, (K, c_out, c_in), jnp.float32) * (1.0 / (c_in * K)) ** 0.5
    b = jax.random.normal(kb, (c_out,), jnp.float32) * 0.01
    # Round params to bf16-representable values so the bf16 kernel packing is lossless
    # and the f32 reference uses exactly the same effective weights.
    w = w.astype(jnp.bfloat16).astype(jnp.float32)
    b = b.astype(jnp.bfloat16).astype(jnp.float32)
    return {"w": w, "b": b}


def make_decoder_params(key, input_emb_width, output_emb_width, down_t, width, depth):
    keys = iter(jax.random.split(key, 4 + down_t * (2 * depth + 1)))
    params = {"conv_in": _conv_params(next(keys), output_emb_width, width, 3),
              "stages": []}
    for _ in range(down_t):
        res = [{"conv1": _conv_params(next(keys), width, width, 3),
                "conv2": _conv_params(next(keys), width, width, 1)}
               for _ in range(depth)]
        params["stages"].append({"res": res,
                                 "conv_up": _conv_params(next(keys), width, width, 3)})
    params["conv_mid"] = _conv_params(next(keys), width, width, 3)
    params["conv_out"] = _conv_params(next(keys), width, input_emb_width, 3)
    return params


def _pack_w(w):  # (K, C_out, C_in) -> (K*C_in, C_out), tap-major rows
    K, c_out, c_in = w.shape
    return jnp.transpose(w, (0, 2, 1)).reshape(K * c_in, c_out)


def _pack_b(b):  # (C_out,) -> (1, C_out)
    return b.reshape(1, b.shape[0])


def pack_decoder_params(params):
    """Host-side, ONE-TIME packing into the kernel's flat weight list (hoisted out of
    the jitted forward).  Weights -> bf16 (MXU fast path, halves weight HBM/VMEM);
    biases stay f32 (added on the VPU in f32)."""
    def pw(p): return _pack_w(p["w"]).astype(_COMPUTE_DTYPE)
    def pb(p): return _pack_b(p["b"]).astype(jnp.float32)
    flat = [pw(params["conv_in"]), pb(params["conv_in"])]
    for stage in params["stages"]:
        flat.append(jnp.stack([_pack_w(blk["conv1"]["w"]) for blk in stage["res"]])
                    .astype(_COMPUTE_DTYPE))
        flat.append(jnp.stack([_pack_b(blk["conv1"]["b"]) for blk in stage["res"]])
                    .astype(jnp.float32))
        flat.append(jnp.stack([_pack_w(blk["conv2"]["w"]) for blk in stage["res"]])
                    .astype(_COMPUTE_DTYPE))
        flat.append(jnp.stack([_pack_b(blk["conv2"]["b"]) for blk in stage["res"]])
                    .astype(jnp.float32))
        flat.append(pw(stage["conv_up"]))
        flat.append(pb(stage["conv_up"]))
    flat += [pw(params["conv_mid"]), pb(params["conv_mid"]),
             pw(params["conv_out"]), pb(params["conv_out"])]
    return tuple(flat)


# ----------------------------------------------------------------------------
# Pure-JAX reference (NCT, all-f32, for correctness check)
# ----------------------------------------------------------------------------
def _ref_conv1d(x, w, b, *, dilation=1, relu_in=False, relu_out=False):
    if relu_in:
        x = jnp.maximum(x, 0.0)
    K = w.shape[0]
    pad = dilation * (K - 1) // 2
    w_oik = jnp.transpose(w, (1, 2, 0))                     # (O, I, K)
    y = lax.conv_general_dilated(
        x, w_oik, window_strides=(1,), padding=[(pad, pad)],
        rhs_dilation=(dilation,), dimension_numbers=("NCH", "OIH", "NCH"))
    y = y + b[None, :, None]
    if relu_out:
        y = jnp.maximum(y, 0.0)
    return y


def decoder_forward_ref(params, x, *, dilation_growth_rate):
    depth = len(params["stages"][0]["res"]) if params["stages"] else 0
    dilations = [dilation_growth_rate ** d for d in range(depth)][::-1]
    h = _ref_conv1d(x, params["conv_in"]["w"], params["conv_in"]["b"], relu_out=True)
    for stage in params["stages"]:
        for blk, dil in zip(stage["res"], dilations):
            h_in = h
            t = _ref_conv1d(h_in, blk["conv1"]["w"], blk["conv1"]["b"],
                            dilation=dil, relu_in=True)
            t = _ref_conv1d(t, blk["conv2"]["w"], blk["conv2"]["b"], relu_in=True)
            h = h_in + t
        h = jnp.repeat(h, 2, axis=-1)                       # nn.Upsample(2, 'nearest')
        h = _ref_conv1d(h, stage["conv_up"]["w"], stage["conv_up"]["b"])
    h = _ref_conv1d(h, params["conv_mid"]["w"], params["conv_mid"]["b"], relu_out=True)
    h = _ref_conv1d(h, params["conv_out"]["w"], params["conv_out"]["b"])
    return h


# ----------------------------------------------------------------------------
if __name__ == "__main__":
    # Small, decoder-consistent config (activation='relu', norm=None assumed):
    input_emb_width = 8      # final output channels (e.g. motion feature dim)
    output_emb_width = 16    # latent channels (decoder input)
    down_t = 2
    stride_t = 2             # only sets (unused) filter_t/pad_t in the reference module
    width = 32
    depth = 2
    dilation_growth_rate = 3

    key = jax.random.PRNGKey(0)
    kp, kx = jax.random.split(key)
    params = make_decoder_params(kp, input_emb_width, output_emb_width, down_t,
                                 width, depth)
    packed = pack_decoder_params(params)     # packed ONCE on the host, reused every call

    N, T = 2, 16
    x = jax.random.normal(kx, (N, output_emb_width, T), jnp.float32)

    out = decoder_forward(packed, x, down_t=down_t, depth=depth,
                          dilation_growth_rate=dilation_growth_rate)
    out = jax.block_until_ready(out)
    assert out.shape == (N, input_emb_width, T * (2 ** down_t)), out.shape

    ref = jax.block_until_ready(
        decoder_forward_ref(params, x, dilation_growth_rate=dilation_growth_rate))
    max_err = float(jnp.max(jnp.abs(out - ref)))
    # bf16 matmul inputs (f32 accumulation) in the kernel vs the all-f32 reference.
    assert jnp.allclose(out, ref, atol=5e-2, rtol=5e-2), max_err

    print("KERNEL_OK")
</pallas_src>

<mosaic_0001>
module attributes {stable_mosaic.version = 11 : i64} {
  func.func @_decoder_kernel(%arg0: i32, %arg1: memref<1x16x16xf32, #tpu.memory_space<vmem>>, %arg2: memref<48x32xbf16, #tpu.memory_space<vmem>>, %arg3: memref<1x32xf32, #tpu.memory_space<vmem>>, %arg4: memref<2x96x32xbf16, #tpu.memory_space<vmem>>, %arg5: memref<2x1x32xf32, #tpu.memory_space<vmem>>, %arg6: memref<2x32x32xbf16, #tpu.memory_space<vmem>>, %arg7: memref<2x1x32xf32, #tpu.memory_space<vmem>>, %arg8: memref<96x32xbf16, #tpu.memory_space<vmem>>, %arg9: memref<1x32xf32, #tpu.memory_space<vmem>>, %arg10: memref<2x96x32xbf16, #tpu.memory_space<vmem>>, %arg11: memref<2x1x32xf32, #tpu.memory_space<vmem>>, %arg12: memref<2x32x32xbf16, #tpu.memory_space<vmem>>, %arg13: memref<2x1x32xf32, #tpu.memory_space<vmem>>, %arg14: memref<96x32xbf16, #tpu.memory_space<vmem>>, %arg15: memref<1x32xf32, #tpu.memory_space<vmem>>, %arg16: memref<96x32xbf16, #tpu.memory_space<vmem>>, %arg17: memref<1x32xf32, #tpu.memory_space<vmem>>, %arg18: memref<96x8xbf16, #tpu.memory_space<vmem>>, %arg19: memref<1x8xf32, #tpu.memory_space<vmem>>, %arg20: memref<1x64x8xf32, #tpu.memory_space<vmem>>) attributes {dimension_semantics = [#tpu.dimension_semantics<parallel>], iteration_bounds = array<i64: 2>, scalar_prefetch = 0 : i64, scratch_operands = 0 : i64, tpu.core_type = #tpu.core_type<tc>, window_params = [{transform_indices = @transform_0, window_bounds = array<i64: 1, 16, 16>}, {pipeline_mode = #tpu.pipeline_mode<synchronous>, transform_indices = @transform_1, window_bounds = array<i64: 48, 32>}, {pipeline_mode = #tpu.pipeline_mode<synchronous>, transform_indices = @transform_2, window_bounds = array<i64: 1, 32>}, {pipeline_mode = #tpu.pipeline_mode<synchronous>, transform_indices = @transform_3, window_bounds = array<i64: 2, 96, 32>}, {pipeline_mode = #tpu.pipeline_mode<synchronous>, transform_indices = @transform_4, window_bounds = array<i64: 2, 1, 32>}, {pipeline_mode = #tpu.pipeline_mode<synchronous>, transform_indices = @transform_5, window_bounds = array<i64: 2, 32, 32>}, {pipeline_mode = #tpu.pipeline_mode<synchronous>, transform_indices = @transform_6, window_bounds = array<i64: 2, 1, 32>}, {pipeline_mode = #tpu.pipeline_mode<synchronous>, transform_indices = @transform_7, window_bounds = array<i64: 96, 32>}, {pipeline_mode = #tpu.pipeline_mode<synchronous>, transform_indices = @transform_8, window_bounds = array<i64: 1, 32>}, {pipeline_mode = #tpu.pipeline_mode<synchronous>, transform_indices = @transform_9, window_bounds = array<i64: 2, 96, 32>}, {pipeline_mode = #tpu.pipeline_mode<synchronous>, transform_indices = @transform_10, window_bounds = array<i64: 2, 1, 32>}, {pipeline_mode = #tpu.pipeline_mode<synchronous>, transform_indices = @transform_11, window_bounds = array<i64: 2, 32, 32>}, {pipeline_mode = #tpu.pipeline_mode<synchronous>, transform_indices = @transform_12, window_bounds = array<i64: 2, 1, 32>}, {pipeline_mode = #tpu.pipeline_mode<synchronous>, transform_indices = @transform_13, window_bounds = array<i64: 96, 32>}, {pipeline_mode = #tpu.pipeline_mode<synchronous>, transform_indices = @transform_14, window_bounds = array<i64: 1, 32>}, {pipeline_mode = #tpu.pipeline_mode<synchronous>, transform_indices = @transform_15, window_bounds = array<i64: 96, 32>}, {pipeline_mode = #tpu.pipeline_mode<synchronous>, transform_indices = @transform_16, window_bounds = array<i64: 1, 32>}, {pipeline_mode = #tpu.pipeline_mode<synchronous>, transform_indices = @transform_17, window_bounds = array<i64: 96, 8>}, {pipeline_mode = #tpu.pipeline_mode<synchronous>, transform_indices = @transform_18, window_bounds = array<i64: 1, 8>}, {transform_indices = @transform_19, window_bounds = array<i64: 1, 64, 8>}]} {
    %c0 = arith.constant 0 : index
    %c0_0 = arith.constant 0 : index
    %c0_1 = arith.constant 0 : index
    %0 = vector.load %arg1[%c0, %c0_0, %c0_1] : memref<1x16x16xf32, #tpu.memory_space<vmem>>, vector<1x16x16xf32>
    %1 = vector.shape_cast %0 : vector<1x16x16xf32> to vector<16x16xf32>
    %c0_2 = arith.constant 0 : index
    %c0_3 = arith.constant 0 : index
    %2 = vector.load %arg2[%c0_2, %c0_3] : memref<48x32xbf16, #tpu.memory_space<vmem>>, vector<48x32xbf16>
    %c0_4 = arith.constant 0 : index
    %c0_5 = arith.constant 0 : index
    %3 = vector.load %arg3[%c0_4, %c0_5] : memref<1x32xf32, #tpu.memory_space<vmem>>, vector<1x32xf32>
    %cst = arith.constant 0.000000e+00 : f32
    %4 = vector.broadcast %cst : f32 to vector<1x16xf32>
    %5 = tpu.concatenate %4, %1, %4 in 0 : vector<1x16xf32>, vector<16x16xf32>, vector<1x16xf32> -> vector<18x16xf32>
    %6 = vector.extract_strided_slice %5 {offsets = [0, 0], sizes = [16, 16], strides = [1, 1]} : vector<18x16xf32> to vector<16x16xf32>
    %7 = vector.extract_strided_slice %5 {offsets = [1, 0], sizes = [16, 16], strides = [1, 1]} : vector<18x16xf32> to vector<16x16xf32>
    %8 = vector.extract_strided_slice %5 {offsets = [2, 0], sizes = [16, 16], strides = [1, 1]} : vector<18x16xf32> to vector<16x16xf32>
    %9 = tpu.concatenate %6, %7, %8 in 1 : vector<16x16xf32>, vector<16x16xf32>, vector<16x16xf32> -> vector<16x48xf32>
    %10 = arith.truncf %9 : vector<16x48xf32> to vector<16x48xbf16>
    %cst_6 = arith.constant dense<0.000000e+00> : vector<16x32xf32>
    %11 = tpu.matmul %10, %2, %cst_6 {dimension_numbers = #tpu.dot_dimension_numbers<[1], [0], [0], [1], [0, 0, 1, 1], [], []>} : vector<16x48xbf16>, vector<48x32xbf16>, vector<16x32xf32> -> vector<16x32xf32>
    %12 = vector.broadcast %3 : vector<1x32xf32> to vector<16x32xf32>
    %13 = arith.addf %11, %12 : vector<16x32xf32>
    %cst_7 = arith.constant 0.000000e+00 : f32
    %14 = vector.broadcast %cst_7 : f32 to vector<16x32xf32>
    %15 = arith.maximumf %13, %14 : vector<16x32xf32>
    %c0_8 = arith.constant 0 : index
    %c0_9 = arith.constant 0 : index
    %c0_10 = arith.constant 0 : index
    %16 = vector.load %arg4[%c0_8, %c0_9, %c0_10] : memref<2x96x32xbf16, #tpu.memory_space<vmem>>, vector<1x96x32xbf16>
    %17 = vector.shape_cast %16 : vector<1x96x32xbf16> to vector<96x32xbf16>
    %c0_11 = arith.constant 0 : index
    %c0_12 = arith.constant 0 : index
    %c0_13 = arith.constant 0 : index
    %18 = vector.load %arg5[%c0_11, %c0_12, %c0_13] : memref<2x1x32xf32, #tpu.memory_space<vmem>>, vector<1x1x32xf32>
    %19 = vector.shape_cast %18 : vector<1x1x32xf32> to vector<1x32xf32>
    %cst_14 = arith.constant 0.000000e+00 : f32
    %20 = vector.broadcast %cst_14 : f32 to vector<3x32xf32>
    %21 = tpu.concatenate %20, %15, %20 in 0 : vector<3x32xf32>, vector<16x32xf32>, vector<3x32xf32> -> vector<22x32xf32>
    %22 = vector.extract_strided_slice %21 {offsets = [0, 0], sizes = [16, 32], strides = [1, 1]} : vector<22x32xf32> to vector<16x32xf32>
    %23 = vector.extract_strided_slice %21 {offsets = [3, 0], sizes = [16, 32], strides = [1, 1]} : vector<22x32xf32> to vector<16x32xf32>
    %24 = vector.extract_strided_slice %21 {offsets = [6, 0], sizes = [16, 32], strides = [1, 1]} : vector<22x32xf32> to vector<16x32xf32>
    %25 = tpu.concatenate %22, %23, %24 in 1 : vector<16x32xf32>, vector<16x32xf32>, vector<16x32xf32> -> vector<16x96xf32>
    %26 = arith.truncf %25 : vector<16x96xf32> to vector<16x96xbf16>
    %cst_15 = arith.constant dense<0.000000e+00> : vector<16x32xf32>
    %27 = tpu.matmul %26, %17, %cst_15 {dimension_numbers = #tpu.dot_dimension_numbers<[1], [0], [0], [1], [0, 0, 1, 1], [], []>} : vector<16x96xbf16>, vector<96x32xbf16>, vector<16x32xf32> -> vector<16x32xf32>
    %28 = vector.broadcast %19 : vector<1x32xf32> to vector<16x32xf32>
    %29 = arith.addf %27, %28 : vector<16x32xf32>
    %cst_16 = arith.constant 0.000000e+00 : f32
    %30 = vector.broadcast %cst_16 : f32 to vector<16x32xf32>
    %31 = arith.maximumf %29, %30 : vector<16x32xf32>
    %32 = arith.truncf %31 : vector<16x32xf32> to vector<16x32xbf16>
    %c0_17 = arith.constant 0 : index
    %c0_18 = arith.constant 0 : index
    %c0_19 = arith.constant 0 : index
    %33 = vector.load %arg6[%c0_17, %c0_18, %c0_19] : memref<2x32x32xbf16, #tpu.memory_space<vmem>>, vector<1x32x32xbf16>
    %34 = vector.shape_cast %33 : vector<1x32x32xbf16> to vector<32x32xbf16>
    %cst_20 = arith.constant dense<0.000000e+00> : vector<16x32xf32>
    %35 = tpu.matmul %32, %34, %cst_20 {dimension_numbers = #tpu.dot_dimension_numbers<[1], [0], [0], [1], [0, 0, 1, 1], [], []>} : vector<16x32xbf16>, vector<32x32xbf16>, vector<16x32xf32> -> vector<16x32xf32>
    %c0_21 = arith.constant 0 : index
    %c0_22 = arith.constant 0 : index
    %c0_23 = arith.constant 0 : index
    %36 = vector.load %arg7[%c0_21, %c0_22, %c0_23] : memref<2x1x32xf32, #tpu.memory_space<vmem>>, vector<1x1x32xf32>
    %37 = vector.shape_cast %36 : vector<1x1x32xf32> to vector<1x32xf32>
    %38 = vector.broadcast %37 : vector<1x32xf32> to vector<16x32xf32>
    %39 = arith.addf %35, %38 : vector<16x32xf32>
    %40 = arith.addf %15, %39 : vector<16x32xf32>
    %cst_24 = arith.constant 0.000000e+00 : f32
    %41 = vector.broadcast %cst_24 : f32 to vector<16x32xf32>
    %42 = arith.maximumf %40, %41 : vector<16x32xf32>
    %c1 = arith.constant 1 : index
    %c0_25 = arith.constant 0 : index
    %c0_26 = arith.constant 0 : index
    %43 = vector.load %arg4[%c1, %c0_25, %c0_26] : memref<2x96x32xbf16, #tpu.memory_space<vmem>>, vector<1x96x32xbf16>
    %44 = vector.shape_cast %43 : vector<1x96x32xbf16> to vector<96x32xbf16>
    %c1_27 = arith.constant 1 : index
    %c0_28 = arith.constant 0 : index
    %c0_29 = arith.constant 0 : index
    %45 = vector.load %arg5[%c1_27, %c0_28, %c0_29] : memref<2x1x32xf32, #tpu.memory_space<vmem>>, vector<1x1x32xf32>
    %46 = vector.shape_cast %45 : vector<1x1x32xf32> to vector<1x32xf32>
    %cst_30 = arith.constant 0.000000e+00 : f32
    %47 = vector.broadcast %cst_30 : f32 to vector<1x32xf32>
    %48 = tpu.concatenate %47, %42, %47 in 0 : vector<1x32xf32>, vector<16x32xf32>, vector<1x32xf32> -> vector<18x32xf32>
    %49 = vector.extract_strided_slice %48 {offsets = [0, 0], sizes = [16, 32], strides = [1, 1]} : vector<18x32xf32> to vector<16x32xf32>
    %50 = vector.extract_strided_slice %48 {offsets = [1, 0], sizes = [16, 32], strides = [1, 1]} : vector<18x32xf32> to vector<16x32xf32>
    %51 = vector.extract_strided_slice %48 {offsets = [2, 0], sizes = [16, 32], strides = [1, 1]} : vector<18x32xf32> to vector<16x32xf32>
    %52 = tpu.concatenate %49, %50, %51 in 1 : vector<16x32xf32>, vector<16x32xf32>, vector<16x32xf32> -> vector<16x96xf32>
    %53 = arith.truncf %52 : vector<16x96xf32> to vector<16x96xbf16>
    %cst_31 = arith.constant dense<0.000000e+00> : vector<16x32xf32>
    %54 = tpu.matmul %53, %44, %cst_31 {dimension_numbers = #tpu.dot_dimension_numbers<[1], [0], [0], [1], [0, 0, 1, 1], [], []>} : vector<16x96xbf16>, vector<96x32xbf16>, vector<16x32xf32> -> vector<16x32xf32>
    %55 = vector.broadcast %46 : vector<1x32xf32> to vector<16x32xf32>
    %56 = arith.addf %54, %55 : vector<16x32xf32>
    %cst_32 = arith.constant 0.000000e+00 : f32
    %57 = vector.broadcast %cst_32 : f32 to vector<16x32xf32>
    %58 = arith.maximumf %56, %57 : vector<16x32xf32>
    %59 = arith.truncf %58 : vector<16x32xf32> to vector<16x32xbf16>
    %c1_33 = arith.constant 1 : index
    %c0_34 = arith.constant 0 : index
    %c0_35 = arith.constant 0 : index
    %60 = vector.load %arg6[%c1_33, %c0_34, %c0_35] : memref<2x32x32xbf16, #tpu.memory_space<vmem>>, vector<1x32x32xbf16>
    %61 = vector.shape_cast %60 : vector<1x32x32xbf16> to vector<32x32xbf16>
    %cst_36 = arith.constant dense<0.000000e+00> : vector<16x32xf32>
    %62 = tpu.matmul %59, %61, %cst_36 {dimension_numbers = #tpu.dot_dimension_numbers<[1], [0], [0], [1], [0, 0, 1, 1], [], []>} : vector<16x32xbf16>, vector<32x32xbf16>, vector<16x32xf32> -> vector<16x32xf32>
    %c1_37 = arith.constant 1 : index
    %c0_38 = arith.constant 0 : index
    %c0_39 = arith.constant 0 : index
    %63 = vector.load %arg7[%c1_37, %c0_38, %c0_39] : memref<2x1x32xf32, #tpu.memory_space<vmem>>, vector<1x1x32xf32>
    %64 = vector.shape_cast %63 : vector<1x1x32xf32> to vector<1x32xf32>
    %65 = vector.broadcast %64 : vector<1x32xf32> to vector<16x32xf32>
    %66 = arith.addf %62, %65 : vector<16x32xf32>
    %67 = arith.addf %40, %66 : vector<16x32xf32>
    %68 = tpu.iota {dimensions = array<i32: 0>} : vector<32x16xi32>
    %69 = tpu.iota {dimensions = array<i32: 1>} : vector<32x16xi32>
    %c2_i32 = arith.constant 2 : i32
    %70 = vector.broadcast %c2_i32 : i32 to vector<32x16xi32>
    %71 = arith.muli %70, %69 : vector<32x16xi32>
    %72 = arith.subi %68, %71 : vector<32x16xi32>
    %c0_i32 = arith.constant 0 : i32
    %73 = vector.broadcast %c0_i32 : i32 to vector<32x16xi32>
    %74 = arith.cmpi sge, %72, %73 : vector<32x16xi32>
    %c1_i32 = arith.constant 1 : i32
    %75 = vector.broadcast %c1_i32 : i32 to vector<32x16xi32>
    %76 = arith.cmpi sle, %72, %75 : vector<32x16xi32>
    %77 = arith.andi %74, %76 : vector<32x16xi1>
    %cst_40 = arith.constant 1.000000e+00 : f32
    %cst_41 = arith.constant 0.000000e+00 : f32
    %78 = vector.broadcast %cst_40 : f32 to vector<32x16xf32>
    %79 = vector.broadcast %cst_41 : f32 to vector<32x16xf32>
    %80 = arith.select %77, %78, %79 : vector<32x16xi1>, vector<32x16xf32>
    %81 = arith.truncf %80 : vector<32x16xf32> to vector<32x16xbf16>
    %82 = arith.truncf %67 : vector<16x32xf32> to vector<16x32xbf16>
    %cst_42 = arith.constant dense<0.000000e+00> : vector<32x32xf32>
    %83 = tpu.matmul %81, %82, %cst_42 {dimension_numbers = #tpu.dot_dimension_numbers<[1], [0], [0], [1], [0, 0, 1, 1], [], []>} : vector<32x16xbf16>, vector<16x32xbf16>, vector<32x32xf32> -> vector<32x32xf32>
    %c0_43 = arith.constant 0 : index
    %c0_44 = arith.constant 0 : index
    %84 = vector.load %arg8[%c0_43, %c0_44] : memref<96x32xbf16, #tpu.memory_space<vmem>>, vector<96x32xbf16>
    %c0_45 = arith.constant 0 : index
    %c0_46 = arith.constant 0 : index
    %85 = vector.load %arg9[%c0_45, %c0_46] : memref<1x32xf32, #tpu.memory_space<vmem>>, vector<1x32xf32>
    %cst_47 = arith.constant 0.000000e+00 : f32
    %86 = vector.broadcast %cst_47 : f32 to vector<1x32xf32>
    %87 = tpu.concatenate %86, %83, %86 in 0 : vector<1x32xf32>, vector<32x32xf32>, vector<1x32xf32> -> vector<34x32xf32>
    %88 = vector.extract_strided_slice %87 {offsets = [0, 0], sizes = [32, 32], strides = [1, 1]} : vector<34x32xf32> to vector<32x32xf32>
    %89 = vector.extract_strided_slice %87 {offsets = [1, 0], sizes = [32, 32], strides = [1, 1]} : vector<34x32xf32> to vector<32x32xf32>
    %90 = vector.extract_strided_slice %87 {offsets = [2, 0], sizes = [32, 32], strides = [1, 1]} : vector<34x32xf32> to vector<32x32xf32>
    %91 = tpu.concatenate %88, %89, %90 in 1 : vector<32x32xf32>, vector<32x32xf32>, vector<32x32xf32> -> vector<32x96xf32>
    %92 = arith.truncf %91 : vector<32x96xf32> to vector<32x96xbf16>
    %cst_48 = arith.constant dense<0.000000e+00> : vector<32x32xf32>
    %93 = tpu.matmul %92, %84, %cst_48 {dimension_numbers = #tpu.dot_dimension_numbers<[1], [0], [0], [1], [0, 0, 1, 1], [], []>} : vector<32x96xbf16>, vector<96x32xbf16>, vector<32x32xf32> -> vector<32x32xf32>
    %94 = vector.broadcast %85 : vector<1x32xf32> to vector<32x32xf32>
    %95 = arith.addf %93, %94 : vector<32x32xf32>
    %cst_49 = arith.constant 0.000000e+00 : f32
    %96 = vector.broadcast %cst_49 : f32 to vector<32x32xf32>
    %97 = arith.maximumf %95, %96 : vector<32x32xf32>
    %c0_50 = arith.constant 0 : index
    %c0_51 = arith.constant 0 : index
    %c0_52 = arith.constant 0 : index
    %98 = vector.load %arg10[%c0_50, %c0_51, %c0_52] : memref<2x96x32xbf16, #tpu.memory_space<vmem>>, vector<1x96x32xbf16>
    %99 = vector.shape_cast %98 : vector<1x96x32xbf16> to vector<96x32xbf16>
    %c0_53 = arith.constant 0 : index
    %c0_54 = arith.constant 0 : index
    %c0_55 = arith.constant 0 : index
    %100 = vector.load %arg11[%c0_53, %c0_54, %c0_55] : memref<2x1x32xf32, #tpu.memory_space<vmem>>, vector<1x1x32xf32>
    %101 = vector.shape_cast %100 : vector<1x1x32xf32> to vector<1x32xf32>
    %cst_56 = arith.constant 0.000000e+00 : f32
    %102 = vector.broadcast %cst_56 : f32 to vector<3x32xf32>
    %103 = tpu.concatenate %102, %97, %102 in 0 : vector<3x32xf32>, vector<32x32xf32>, vector<3x32xf32> -> vector<38x32xf32>
    %104 = vector.extract_strided_slice %103 {offsets = [0, 0], sizes = [32, 32], strides = [1, 1]} : vector<38x32xf32> to vector<32x32xf32>
    %105 = vector.extract_strided_slice %103 {offsets = [3, 0], sizes = [32, 32], strides = [1, 1]} : vector<38x32xf32> to vector<32x32xf32>
    %106 = vector.extract_strided_slice %103 {offsets = [6, 0], sizes = [32, 32], strides = [1, 1]} : vector<38x32xf32> to vector<32x32xf32>
    %107 = tpu.concatenate %104, %105, %106 in 1 : vector<32x32xf32>, vector<32x32xf32>, vector<32x32xf32> -> vector<32x96xf32>
    %108 = arith.truncf %107 : vector<32x96xf32> to vector<32x96xbf16>
    %cst_57 = arith.constant dense<0.000000e+00> : vector<32x32xf32>
    %109 = tpu.matmul %108, %99, %cst_57 {dimension_numbers = #tpu.dot_dimension_numbers<[1], [0], [0], [1], [0, 0, 1, 1], [], []>} : vector<32x96xbf16>, vector<96x32xbf16>, vector<32x32xf32> -> vector<32x32xf32>
    %110 = vector.broadcast %101 : vector<1x32xf32> to vector<32x32xf32>
    %111 = arith.addf %109, %110 : vector<32x32xf32>
    %cst_58 = arith.constant 0.000000e+00 : f32
    %112 = vector.broadcast %cst_58 : f32 to vector<32x32xf32>
    %113 = arith.maximumf %111, %112 : vector<32x32xf32>
    %114 = arith.truncf %113 : vector<32x32xf32> to vector<32x32xbf16>
    %c0_59 = arith.constant 0 : index
    %c0_60 = arith.constant 0 : index
    %c0_61 = arith.constant 0 : index
    %115 = vector.load %arg12[%c0_59, %c0_60, %c0_61] : memref<2x32x32xbf16, #tpu.memory_space<vmem>>, vector<1x32x32xbf16>
    %116 = vector.shape_cast %115 : vector<1x32x32xbf16> to vector<32x32xbf16>
    %cst_62 = arith.constant dense<0.000000e+00> : vector<32x32xf32>
    %117 = tpu.matmul %114, %116, %cst_62 {dimension_numbers = #tpu.dot_dimension_numbers<[1], [0], [0], [1], [0, 0, 1, 1], [], []>} : vector<32x32xbf16>, vector<32x32xbf16>, vector<32x32xf32> -> vector<32x32xf32>
    %c0_63 = arith.constant 0 : index
    %c0_64 = arith.constant 0 : index
    %c0_65 = arith.constant 0 : index
    %118 = vector.load %arg13[%c0_63, %c0_64, %c0_65] : memref<2x1x32xf32, #tpu.memory_space<vmem>>, vector<1x1x32xf32>
    %119 = vector.shape_cast %118 : vector<1x1x32xf32> to vector<1x32xf32>
    %120 = vector.broadcast %119 : vector<1x32xf32> to vector<32x32xf32>
    %121 = arith.addf %117, %120 : vector<32x32xf32>
    %122 = arith.addf %95, %121 : vector<32x32xf32>
    %cst_66 = arith.constant 0.000000e+00 : f32
    %123 = vector.broadcast %cst_66 : f32 to vector<32x32xf32>
    %124 = arith.maximumf %122, %123 : vector<32x32xf32>
    %c1_67 = arith.constant 1 : index
    %c0_68 = arith.constant 0 : index
    %c0_69 = arith.constant 0 : index
    %125 = vector.load %arg10[%c1_67, %c0_68, %c0_69] : memref<2x96x32xbf16, #tpu.memory_space<vmem>>, vector<1x96x32xbf16>
    %126 = vector.shape_cast %125 : vector<1x96x32xbf16> to vector<96x32xbf16>
    %c1_70 = arith.constant 1 : index
    %c0_71 = arith.constant 0 : index
    %c0_72 = arith.constant 0 : index
    %127 = vector.load %arg11[%c1_70, %c0_71, %c0_72] : memref<2x1x32xf32, #tpu.memory_space<vmem>>, vector<1x1x32xf32>
    %128 = vector.shape_cast %127 : vector<1x1x32xf32> to vector<1x32xf32>
    %cst_73 = arith.constant 0.000000e+00 : f32
    %129 = vector.broadcast %cst_73 : f32 to vector<1x32xf32>
    %130 = tpu.concatenate %129, %124, %129 in 0 : vector<1x32xf32>, vector<32x32xf32>, vector<1x32xf32> -> vector<34x32xf32>
    %131 = vector.extract_strided_slice %130 {offsets = [0, 0], sizes = [32, 32], strides = [1, 1]} : vector<34x32xf32> to vector<32x32xf32>
    %132 = vector.extract_strided_slice %130 {offsets = [1, 0], sizes = [32, 32], strides = [1, 1]} : vector<34x32xf32> to vector<32x32xf32>
    %133 = vector.extract_strided_slice %130 {offsets = [2, 0], sizes = [32, 32], strides = [1, 1]} : vector<34x32xf32> to vector<32x32xf32>
    %134 = tpu.concatenate %131, %132, %133 in 1 : vector<32x32xf32>, vector<32x32xf32>, vector<32x32xf32> -> vector<32x96xf32>
    %135 = arith.truncf %134 : vector<32x96xf32> to vector<32x96xbf16>
    %cst_74 = arith.constant dense<0.000000e+00> : vector<32x32xf32>
    %136 = tpu.matmul %135, %126, %cst_74 {dimension_numbers = #tpu.dot_dimension_numbers<[1], [0], [0], [1], [0, 0, 1, 1], [], []>} : vector<32x96xbf16>, vector<96x32xbf16>, vector<32x32xf32> -> vector<32x32xf32>
    %137 = vector.broadcast %128 : vector<1x32xf32> to vector<32x32xf32>
    %138 = arith.addf %136, %137 : vector<32x32xf32>
    %cst_75 = arith.constant 0.000000e+00 : f32
    %139 = vector.broadcast %cst_75 : f32 to vector<32x32xf32>
    %140 = arith.maximumf %138, %139 : vector<32x32xf32>
    %141 = arith.truncf %140 : vector<32x32xf32> to vector<32x32xbf16>
    %c1_76 = arith.constant 1 : index
    %c0_77 = arith.constant 0 : index
    %c0_78 = arith.constant 0 : index
    %142 = vector.load %arg12[%c1_76, %c0_77, %c0_78] : memref<2x32x32xbf16, #tpu.memory_space<vmem>>, vector<1x32x32xbf16>
    %143 = vector.shape_cast %142 : vector<1x32x32xbf16> to vector<32x32xbf16>
    %cst_79 = arith.constant dense<0.000000e+00> : vector<32x32xf32>
    %144 = tpu.matmul %141, %143, %cst_79 {dimension_numbers = #tpu.dot_dimension_numbers<[1], [0], [0], [1], [0, 0, 1, 1], [], []>} : vector<32x32xbf16>, vector<32x32xbf16>, vector<32x32xf32> -> vector<32x32xf32>
    %c1_80 = arith.constant 1 : index
    %c0_81 = arith.constant 0 : index
    %c0_82 = arith.constant 0 : index
    %145 = vector.load %arg13[%c1_80, %c0_81, %c0_82] : memref<2x1x32xf32, #tpu.memory_space<vmem>>, vector<1x1x32xf32>
    %146 = vector.shape_cast %145 : vector<1x1x32xf32> to vector<1x32xf32>
    %147 = vector.broadcast %146 : vector<1x32xf32> to vector<32x32xf32>
    %148 = arith.addf %144, %147 : vector<32x32xf32>
    %149 = arith.addf %122, %148 : vector<32x32xf32>
    %150 = tpu.iota {dimensions = array<i32: 0>} : vector<64x32xi32>
    %151 = tpu.iota {dimensions = array<i32: 1>} : vector<64x32xi32>
    %c2_i32_83 = arith.constant 2 : i32
    %152 = vector.broadcast %c2_i32_83 : i32 to vector<64x32xi32>
    %153 = arith.muli %152, %151 : vector<64x32xi32>
    %154 = arith.subi %150, %153 : vector<64x32xi32>
    %c0_i32_84 = arith.constant 0 : i32
    %155 = vector.broadcast %c0_i32_84 : i32 to vector<64x32xi32>
    %156 = arith.cmpi sge, %154, %155 : vector<64x32xi32>
    %c1_i32_85 = arith.constant 1 : i32
    %157 = vector.broadcast %c1_i32_85 : i32 to vector<64x32xi32>
    %158 = arith.cmpi sle, %154, %157 : vector<64x32xi32>
    %159 = arith.andi %156, %158 : vector<64x32xi1>
    %cst_86 = arith.constant 1.000000e+00 : f32
    %cst_87 = arith.constant 0.000000e+00 : f32
    %160 = vector.broadcast %cst_86 : f32 to vector<64x32xf32>
    %161 = vector.broadcast %cst_87 : f32 to vector<64x32xf32>
    %162 = arith.select %159, %160, %161 : vector<64x32xi1>, vector<64x32xf32>
    %163 = arith.truncf %162 : vector<64x32xf32> to vector<64x32xbf16>
    %164 = arith.truncf %149 : vector<32x32xf32> to vector<32x32xbf16>
    %cst_88 = arith.constant dense<0.000000e+00> : vector<64x32xf32>
    %165 = tpu.matmul %163, %164, %cst_88 {dimension_numbers = #tpu.dot_dimension_numbers<[1], [0], [0], [1], [0, 0, 1, 1], [], []>} : vector<64x32xbf16>, vector<32x32xbf16>, vector<64x32xf32> -> vector<64x32xf32>
    %c0_89 = arith.constant 0 : index
    %c0_90 = arith.constant 0 : index
    %166 = vector.load %arg14[%c0_89, %c0_90] : memref<96x32xbf16, #tpu.memory_space<vmem>>, vector<96x32xbf16>
    %c0_91 = arith.constant 0 : index
    %c0_92 = arith.constant 0 : index
    %167 = vector.load %arg15[%c0_91, %c0_92] : memref<1x32xf32, #tpu.memory_space<vmem>>, vector<1x32xf32>
    %cst_93 = arith.constant 0.000000e+00 : f32
    %168 = vector.broadcast %cst_93 : f32 to vector<1x32xf32>
    %169 = tpu.concatenate %168, %165, %168 in 0 : vector<1x32xf32>, vector<64x32xf32>, vector<1x32xf32> -> vector<66x32xf32>
    %170 = vector.extract_strided_slice %169 {offsets = [0, 0], sizes = [64, 32], strides = [1, 1]} : vector<66x32xf32> to vector<64x32xf32>
    %171 = vector.extract_strided_slice %169 {offsets = [1, 0], sizes = [64, 32], strides = [1, 1]} : vector<66x32xf32> to vector<64x32xf32>
    %172 = vector.extract_strided_slice %169 {offsets = [2, 0], sizes = [64, 32], strides = [1, 1]} : vector<66x32xf32> to vector<64x32xf32>
    %173 = tpu.concatenate %170, %171, %172 in 1 : vector<64x32xf32>, vector<64x32xf32>, vector<64x32xf32> -> vector<64x96xf32>
    %174 = arith.truncf %173 : vector<64x96xf32> to vector<64x96xbf16>
    %cst_94 = arith.constant dense<0.000000e+00> : vector<64x32xf32>
    %175 = tpu.matmul %174, %166, %cst_94 {dimension_numbers = #tpu.dot_dimension_numbers<[1], [0], [0], [1], [0, 0, 1, 1], [], []>} : vector<64x96xbf16>, vector<96x32xbf16>, vector<64x32xf32> -> vector<64x32xf32>
    %176 = vector.broadcast %167 : vector<1x32xf32> to vector<64x32xf32>
    %177 = arith.addf %175, %176 : vector<64x32xf32>
    %c0_95 = arith.constant 0 : index
    %c0_96 = arith.constant 0 : index
    %178 = vector.load %arg16[%c0_95, %c0_96] : memref<96x32xbf16, #tpu.memory_space<vmem>>, vector<96x32xbf16>
    %c0_97 = arith.constant 0 : index
    %c0_98 = arith.constant 0 : index
    %179 = vector.load %arg17[%c0_97, %c0_98] : memref<1x32xf32, #tpu.memory_space<vmem>>, vector<1x32xf32>
    %cst_99 = arith.constant 0.000000e+00 : f32
    %180 = vector.broadcast %cst_99 : f32 to vector<1x32xf32>
    %181 = tpu.concatenate %180, %177, %180 in 0 : vector<1x32xf32>, vector<64x32xf32>, vector<1x32xf32> -> vector<66x32xf32>
    %182 = vector.extract_strided_slice %181 {offsets = [0, 0], sizes = [64, 32], strides = [1, 1]} : vector<66x32xf32> to vector<64x32xf32>
    %183 = vector.extract_strided_slice %181 {offsets = [1, 0], sizes = [64, 32], strides = [1, 1]} : vector<66x32xf32> to vector<64x32xf32>
    %184 = vector.extract_strided_slice %181 {offsets = [2, 0], sizes = [64, 32], strides = [1, 1]} : vector<66x32xf32> to vector<64x32xf32>
    %185 = tpu.concatenate %182, %183, %184 in 1 : vector<64x32xf32>, vector<64x32xf32>, vector<64x32xf32> -> vector<64x96xf32>
    %186 = arith.truncf %185 : vector<64x96xf32> to vector<64x96xbf16>
    %cst_100 = arith.constant dense<0.000000e+00> : vector<64x32xf32>
    %187 = tpu.matmul %186, %178, %cst_100 {dimension_numbers = #tpu.dot_dimension_numbers<[1], [0], [0], [1], [0, 0, 1, 1], [], []>} : vector<64x96xbf16>, vector<96x32xbf16>, vector<64x32xf32> -> vector<64x32xf32>
    %188 = vector.broadcast %179 : vector<1x32xf32> to vector<64x32xf32>
    %189 = arith.addf %187, %188 : vector<64x32xf32>
    %cst_101 = arith.constant 0.000000e+00 : f32
    %190 = vector.broadcast %cst_101 : f32 to vector<64x32xf32>
    %191 = arith.maximumf %189, %190 : vector<64x32xf32>
    %c0_102 = arith.constant 0 : index
    %c0_103 = arith.constant 0 : index
    %192 = vector.load %arg18[%c0_102, %c0_103] : memref<96x8xbf16, #tpu.memory_space<vmem>>, vector<96x8xbf16>
    %c0_104 = arith.constant 0 : index
    %c0_105 = arith.constant 0 : index
    %193 = vector.load %arg19[%c0_104, %c0_105] : memref<1x8xf32, #tpu.memory_space<vmem>>, vector<1x8xf32>
    %cst_106 = arith.constant 0.000000e+00 : f32
    %194 = vector.broadcast %cst_106 : f32 to vector<1x32xf32>
    %195 = tpu.concatenate %194, %191, %194 in 0 : vector<1x32xf32>, vector<64x32xf32>, vector<1x32xf32> -> vector<66x32xf32>
    %196 = vector.extract_strided_slice %195 {offsets = [0, 0], sizes = [64, 32], strides = [1, 1]} : vector<66x32xf32> to vector<64x32xf32>
    %197 = vector.extract_strided_slice %195 {offsets = [1, 0], sizes = [64, 32], strides = [1, 1]} : vector<66x32xf32> to vector<64x32xf32>
    %198 = vector.extract_strided_slice %195 {offsets = [2, 0], sizes = [64, 32], strides = [1, 1]} : vector<66x32xf32> to vector<64x32xf32>
    %199 = tpu.concatenate %196, %197, %198 in 1 : vector<64x32xf32>, vector<64x32xf32>, vector<64x32xf32> -> vector<64x96xf32>
    %200 = arith.truncf %199 : vector<64x96xf32> to vector<64x96xbf16>
    %cst_107 = arith.constant dense<0.000000e+00> : vector<64x8xf32>
    %201 = tpu.matmul %200, %192, %cst_107 {dimension_numbers = #tpu.dot_dimension_numbers<[1], [0], [0], [1], [0, 0, 1, 1], [], []>} : vector<64x96xbf16>, vector<96x8xbf16>, vector<64x8xf32> -> vector<64x8xf32>
    %202 = vector.broadcast %193 : vector<1x8xf32> to vector<64x8xf32>
    %203 = arith.addf %201, %202 : vector<64x8xf32>
    %c0_108 = arith.constant 0 : index
    %c0_109 = arith.constant 0 : index
    %c0_110 = arith.constant 0 : index
    %204 = vector.load %arg20[%c0_108, %c0_109, %c0_110] : memref<1x64x8xf32, #tpu.memory_space<vmem>>, vector<1x64x8xf32>
    %205 = vector.shape_cast %204 : vector<1x64x8xf32> to vector<64x8xf32>
    %206 = vector.shape_cast %203 : vector<64x8xf32> to vector<1x64x8xf32>
    tpu.vector_store %arg20[%c0_108, %c0_109, %c0_110], %206 {strides = array<i32>} : memref<1x64x8xf32, #tpu.memory_space<vmem>>, vector<1x64x8xf32>,
    return
  }
  func.func @transform_0(%arg0: i32) -> (i32, i32, i32) {
    %c0_i32 = arith.constant 0 : i32
    %c0_i32_0 = arith.constant 0 : i32
    %c0_i32_1 = arith.constant 0 : i32
    return %arg0, %c0_i32, %c0_i32_0 : i32, i32, i32
  }
  func.func @transform_1(%arg0: i32) -> (i32, i32) {
    %c0_i32 = arith.constant 0 : i32
    %c0_i32_0 = arith.constant 0 : i32
    %c0_i32_1 = arith.constant 0 : i32
    return %c0_i32, %c0_i32_0 : i32, i32
  }
  func.func @transform_2(%arg0: i32) -> (i32, i32) {
    %c0_i32 = arith.constant 0 : i32
    %c0_i32_0 = arith.constant 0 : i32
    %c0_i32_1 = arith.constant 0 : i32
    return %c0_i32, %c0_i32_0 : i32, i32
  }
  func.func @transform_3(%arg0: i32) -> (i32, i32, i32) {
    %c0_i32 = arith.constant 0 : i32
    %c0_i32_0 = arith.constant 0 : i32
    %c0_i32_1 = arith.constant 0 : i32
    %c0_i32_2 = arith.constant 0 : i32
    return %c0_i32, %c0_i32_0, %c0_i32_1 : i32, i32, i32
  }
  func.func @transform_4(%arg0: i32) -> (i32, i32, i32) {
    %c0_i32 = arith.constant 0 : i32
    %c0_i32_0 = arith.constant 0 : i32
    %c0_i32_1 = arith.constant 0 : i32
    %c0_i32_2 = arith.constant 0 : i32
    return %c0_i32, %c0_i32_0, %c0_i32_1 : i32, i32, i32
  }
  func.func @transform_5(%arg0: i32) -> (i32, i32, i32) {
    %c0_i32 = arith.constant 0 : i32
    %c0_i32_0 = arith.constant 0 : i32
    %c0_i32_1 = arith.constant 0 : i32
    %c0_i32_2 = arith.constant 0 : i32
    return %c0_i32, %c0_i32_0, %c0_i32_1 : i32, i32, i32
  }
  func.func @transform_6(%arg0: i32) -> (i32, i32, i32) {
    %c0_i32 = arith.constant 0 : i32
    %c0_i32_0 = arith.constant 0 : i32
    %c0_i32_1 = arith.constant 0 : i32
    %c0_i32_2 = arith.constant 0 : i32
    return %c0_i32, %c0_i32_0, %c0_i32_1 : i32, i32, i32
  }
  func.func @transform_7(%arg0: i32) -> (i32, i32) {
    %c0_i32 = arith.constant 0 : i32
    %c0_i32_0 = arith.constant 0 : i32
    %c0_i32_1 = arith.constant 0 : i32
    return %c0_i32, %c0_i32_0 : i32, i32
  }
  func.func @transform_8(%arg0: i32) -> (i32, i32) {
    %c0_i32 = arith.constant 0 : i32
    %c0_i32_0 = arith.constant 0 : i32
    %c0_i32_1 = arith.constant 0 : i32
    return %c0_i32, %c0_i32_0 : i32, i32
  }
  func.func @transform_9(%arg0: i32) -> (i32, i32, i32) {
    %c0_i32 = arith.constant 0 : i32
    %c0_i32_0 = arith.constant 0 : i32
    %c0_i32_1 = arith.constant 0 : i32
    %c0_i32_2 = arith.constant 0 : i32
    return %c0_i32, %c0_i32_0, %c0_i32_1 : i32, i32, i32
  }
  func.func @transform_10(%arg0: i32) -> (i32, i32, i32) {
    %c0_i32 = arith.constant 0 : i32
    %c0_i32_0 = arith.constant 0 : i32
    %c0_i32_1 = arith.constant 0 : i32
    %c0_i32_2 = arith.constant 0 : i32
    return %c0_i32, %c0_i32_0, %c0_i32_1 : i32, i32, i32
  }
  func.func @transform_11(%arg0: i32) -> (i32, i32, i32) {
    %c0_i32 = arith.constant 0 : i32
    %c0_i32_0 = arith.constant 0 : i32
    %c0_i32_1 = arith.constant 0 : i32
    %c0_i32_2 = arith.constant 0 : i32
    return %c0_i32, %c0_i32_0, %c0_i32_1 : i32, i32, i32
  }
  func.func @transform_12(%arg0: i32) -> (i32, i32, i32) {
    %c0_i32 = arith.constant 0 : i32
    %c0_i32_0 = arith.constant 0 : i32
    %c0_i32_1 = arith.constant 0 : i32
    %c0_i32_2 = arith.constant 0 : i32
    return %c0_i32, %c0_i32_0, %c0_i32_1 : i32, i32, i32
  }
  func.func @transform_13(%arg0: i32) -> (i32, i32) {
    %c0_i32 = arith.constant 0 : i32
    %c0_i32_0 = arith.constant 0 : i32
    %c0_i32_1 = arith.constant 0 : i32
    return %c0_i32, %c0_i32_0 : i32, i32
  }
  func.func @transform_14(%arg0: i32) -> (i32, i32) {
    %c0_i32 = arith.constant 0 : i32
    %c0_i32_0 = arith.constant 0 : i32
    %c0_i32_1 = arith.constant 0 : i32
    return %c0_i32, %c0_i32_0 : i32, i32
  }
  func.func @transform_15(%arg0: i32) -> (i32, i32) {
    %c0_i32 = arith.constant 0 : i32
    %c0_i32_0 = arith.constant 0 : i32
    %c0_i32_1 = arith.constant 0 : i32
    return %c0_i32, %c0_i32_0 : i32, i32
  }
  func.func @transform_16(%arg0: i32) -> (i32, i32) {
    %c0_i32 = arith.constant 0 : i32
    %c0_i32_0 = arith.constant 0 : i32
    %c0_i32_1 = arith.constant 0 : i32
    return %c0_i32, %c0_i32_0 : i32, i32
  }
  func.func @transform_17(%arg0: i32) -> (i32, i32) {
    %c0_i32 = arith.constant 0 : i32
    %c0_i32_0 = arith.constant 0 : i32
    %c0_i32_1 = arith.constant 0 : i32
    return %c0_i32, %c0_i32_0 : i32, i32
  }
  func.func @transform_18(%arg0: i32) -> (i32, i32) {
    %c0_i32 = arith.constant 0 : i32
    %c0_i32_0 = arith.constant 0 : i32
    %c0_i32_1 = arith.constant 0 : i32
    return %c0_i32, %c0_i32_0 : i32, i32
  }
  func.func @transform_19(%arg0: i32) -> (i32, i32, i32) {
    %c0_i32 = arith.constant 0 : i32
    %c0_i32_0 = arith.constant 0 : i32
    %c0_i32_1 = arith.constant 0 : i32
    return %arg0, %c0_i32, %c0_i32_0 : i32, i32, i32
  }
}

module attributes {stable_mosaic.version = 11 : i64} {
  func.func @_decoder_kernel(%arg0: i32, %arg1: memref<1x16x16xf32, #tpu.memory_space<vmem>>, %arg2: memref<48x32xbf16, #tpu.memory_space<vmem>>, %arg3: memref<1x32xf32, #tpu.memory_space<vmem>>, %arg4: memref<2x96x32xbf16, #tpu.memory_space<vmem>>, %arg5: memref<2x1x32xf32, #tpu.memory_space<vmem>>, %arg6: memref<2x32x32xbf16, #tpu.memory_space<vmem>>, %arg7: memref<2x1x32xf32, #tpu.memory_space<vmem>>, %arg8: memref<96x32xbf16, #tpu.memory_space<vmem>>, %arg9: memref<1x32xf32, #tpu.memory_space<vmem>>, %arg10: memref<2x96x32xbf16, #tpu.memory_space<vmem>>, %arg11: memref<2x1x32xf32, #tpu.memory_space<vmem>>, %arg12: memref<2x32x32xbf16, #tpu.memory_space<vmem>>, %arg13: memref<2x1x32xf32, #tpu.memory_space<vmem>>, %arg14: memref<96x32xbf16, #tpu.memory_space<vmem>>, %arg15: memref<1x32xf32, #tpu.memory_space<vmem>>, %arg16: memref<96x32xbf16, #tpu.memory_space<vmem>>, %arg17: memref<1x32xf32, #tpu.memory_space<vmem>>, %arg18: memref<96x8xbf16, #tpu.memory_space<vmem>>, %arg19: memref<1x8xf32, #tpu.memory_space<vmem>>, %arg20: memref<1x64x8xf32, #tpu.memory_space<vmem>>) attributes {dimension_semantics = [#tpu.dimension_semantics<parallel>], iteration_bounds = array<i64: 2>, scalar_prefetch = 0 : i64, scratch_operands = 0 : i64, tpu.core_type = #tpu.core_type<tc>, window_params = [{transform_indices = @transform_0, window_bounds = array<i64: 1, 16, 16>}, {pipeline_mode = #tpu.pipeline_mode<synchronous>, transform_indices = @transform_1, window_bounds = array<i64: 48, 32>}, {pipeline_mode = #tpu.pipeline_mode<synchronous>, transform_indices = @transform_2, window_bounds = array<i64: 1, 32>}, {pipeline_mode = #tpu.pipeline_mode<synchronous>, transform_indices = @transform_3, window_bounds = array<i64: 2, 96, 32>}, {pipeline_mode = #tpu.pipeline_mode<synchronous>, transform_indices = @transform_4, window_bounds = array<i64: 2, 1, 32>}, {pipeline_mode = #tpu.pipeline_mode<synchronous>, transform_indices = @transform_5, window_bounds = array<i64: 2, 32, 32>}, {pipeline_mode = #tpu.pipeline_mode<synchronous>, transform_indices = @transform_6, window_bounds = array<i64: 2, 1, 32>}, {pipeline_mode = #tpu.pipeline_mode<synchronous>, transform_indices = @transform_7, window_bounds = array<i64: 96, 32>}, {pipeline_mode = #tpu.pipeline_mode<synchronous>, transform_indices = @transform_8, window_bounds = array<i64: 1, 32>}, {pipeline_mode = #tpu.pipeline_mode<synchronous>, transform_indices = @transform_9, window_bounds = array<i64: 2, 96, 32>}, {pipeline_mode = #tpu.pipeline_mode<synchronous>, transform_indices = @transform_10, window_bounds = array<i64: 2, 1, 32>}, {pipeline_mode = #tpu.pipeline_mode<synchronous>, transform_indices = @transform_11, window_bounds = array<i64: 2, 32, 32>}, {pipeline_mode = #tpu.pipeline_mode<synchronous>, transform_indices = @transform_12, window_bounds = array<i64: 2, 1, 32>}, {pipeline_mode = #tpu.pipeline_mode<synchronous>, transform_indices = @transform_13, window_bounds = array<i64: 96, 32>}, {pipeline_mode = #tpu.pipeline_mode<synchronous>, transform_indices = @transform_14, window_bounds = array<i64: 1, 32>}, {pipeline_mode = #tpu.pipeline_mode<synchronous>, transform_indices = @transform_15, window_bounds = array<i64: 96, 32>}, {pipeline_mode = #tpu.pipeline_mode<synchronous>, transform_indices = @transform_16, window_bounds = array<i64: 1, 32>}, {pipeline_mode = #tpu.pipeline_mode<synchronous>, transform_indices = @transform_17, window_bounds = array<i64: 96, 8>}, {pipeline_mode = #tpu.pipeline_mode<synchronous>, transform_indices = @transform_18, window_bounds = array<i64: 1, 8>}, {transform_indices = @transform_19, window_bounds = array<i64: 1, 64, 8>}]} {
    %c0 = arith.constant 0 : index
    %c0_0 = arith.constant 0 : index
    %c0_1 = arith.constant 0 : index
    %0 = vector.load %arg1[%c0, %c0_0, %c0_1] : memref<1x16x16xf32, #tpu.memory_space<vmem>>, vector<1x16x16xf32>
    %1 = vector.shape_cast %0 : vector<1x16x16xf32> to vector<16x16xf32>
    %c0_2 = arith.constant 0 : index
    %c0_3 = arith.constant 0 : index
    %2 = vector.load %arg2[%c0_2, %c0_3] : memref<48x32xbf16, #tpu.memory_space<vmem>>, vector<48x32xbf16>
    %c0_4 = arith.constant 0 : index
    %c0_5 = arith.constant 0 : index
    %3 = vector.load %arg3[%c0_4, %c0_5] : memref<1x32xf32, #tpu.memory_space<vmem>>, vector<1x32xf32>
    %cst = arith.constant 0.000000e+00 : f32
    %4 = vector.broadcast %cst : f32 to vector<1x16xf32>
    %5 = tpu.concatenate %4, %1, %4 in 0 : vector<1x16xf32>, vector<16x16xf32>, vector<1x16xf32> -> vector<18x16xf32>
    %6 = vector.extract_strided_slice %5 {offsets = [0, 0], sizes = [16, 16], strides = [1, 1]} : vector<18x16xf32> to vector<16x16xf32>
    %7 = vector.extract_strided_slice %5 {offsets = [1, 0], sizes = [16, 16], strides = [1, 1]} : vector<18x16xf32> to vector<16x16xf32>
    %8 = vector.extract_strided_slice %5 {offsets = [2, 0], sizes = [16, 16], strides = [1, 1]} : vector<18x16xf32> to vector<16x16xf32>
    %9 = tpu.concatenate %6, %7, %8 in 1 : vector<16x16xf32>, vector<16x16xf32>, vector<16x16xf32> -> vector<16x48xf32>
    %10 = arith.truncf %9 : vector<16x48xf32> to vector<16x48xbf16>
    %cst_6 = arith.constant dense<0.000000e+00> : vector<16x32xf32>
    %11 = tpu.matmul %10, %2, %cst_6 {dimension_numbers = #tpu.dot_dimension_numbers<[1], [0], [0], [1], [0, 0, 1, 1], [], []>} : vector<16x48xbf16>, vector<48x32xbf16>, vector<16x32xf32> -> vector<16x32xf32>
    %12 = vector.broadcast %3 : vector<1x32xf32> to vector<16x32xf32>
    %13 = arith.addf %11, %12 : vector<16x32xf32>
    %cst_7 = arith.constant 0.000000e+00 : f32
    %14 = vector.broadcast %cst_7 : f32 to vector<16x32xf32>
    %15 = arith.maximumf %13, %14 : vector<16x32xf32>
    %c0_8 = arith.constant 0 : index
    %c0_9 = arith.constant 0 : index
    %c0_10 = arith.constant 0 : index
    %16 = vector.load %arg4[%c0_8, %c0_9, %c0_10] : memref<2x96x32xbf16, #tpu.memory_space<vmem>>, vector<1x96x32xbf16>
    %17 = vector.shape_cast %16 : vector<1x96x32xbf16> to vector<96x32xbf16>
    %c0_11 = arith.constant 0 : index
    %c0_12 = arith.constant 0 : index
    %c0_13 = arith.constant 0 : index
    %18 = vector.load %arg5[%c0_11, %c0_12, %c0_13] : memref<2x1x32xf32, #tpu.memory_space<vmem>>, vector<1x1x32xf32>
    %19 = vector.shape_cast %18 : vector<1x1x32xf32> to vector<1x32xf32>
    %cst_14 = arith.constant 0.000000e+00 : f32
    %20 = vector.broadcast %cst_14 : f32 to vector<3x32xf32>
    %21 = tpu.concatenate %20, %15, %20 in 0 : vector<3x32xf32>, vector<16x32xf32>, vector<3x32xf32> -> vector<22x32xf32>
    %22 = vector.extract_strided_slice %21 {offsets = [0, 0], sizes = [16, 32], strides = [1, 1]} : vector<22x32xf32> to vector<16x32xf32>
    %23 = vector.extract_strided_slice %21 {offsets = [3, 0], sizes = [16, 32], strides = [1, 1]} : vector<22x32xf32> to vector<16x32xf32>
    %24 = vector.extract_strided_slice %21 {offsets = [6, 0], sizes = [16, 32], strides = [1, 1]} : vector<22x32xf32> to vector<16x32xf32>
    %25 = tpu.concatenate %22, %23, %24 in 1 : vector<16x32xf32>, vector<16x32xf32>, vector<16x32xf32> -> vector<16x96xf32>
    %26 = arith.truncf %25 : vector<16x96xf32> to vector<16x96xbf16>
    %cst_15 = arith.constant dense<0.000000e+00> : vector<16x32xf32>
    %27 = tpu.matmul %26, %17, %cst_15 {dimension_numbers = #tpu.dot_dimension_numbers<[1], [0], [0], [1], [0, 0, 1, 1], [], []>} : vector<16x96xbf16>, vector<96x32xbf16>, vector<16x32xf32> -> vector<16x32xf32>
    %28 = vector.broadcast %19 : vector<1x32xf32> to vector<16x32xf32>
    %29 = arith.addf %27, %28 : vector<16x32xf32>
    %cst_16 = arith.constant 0.000000e+00 : f32
    %30 = vector.broadcast %cst_16 : f32 to vector<16x32xf32>
    %31 = arith.maximumf %29, %30 : vector<16x32xf32>
    %32 = arith.truncf %31 : vector<16x32xf32> to vector<16x32xbf16>
    %c0_17 = arith.constant 0 : index
    %c0_18 = arith.constant 0 : index
    %c0_19 = arith.constant 0 : index
    %33 = vector.load %arg6[%c0_17, %c0_18, %c0_19] : memref<2x32x32xbf16, #tpu.memory_space<vmem>>, vector<1x32x32xbf16>
    %34 = vector.shape_cast %33 : vector<1x32x32xbf16> to vector<32x32xbf16>
    %cst_20 = arith.constant dense<0.000000e+00> : vector<16x32xf32>
    %35 = tpu.matmul %32, %34, %cst_20 {dimension_numbers = #tpu.dot_dimension_numbers<[1], [0], [0], [1], [0, 0, 1, 1], [], []>} : vector<16x32xbf16>, vector<32x32xbf16>, vector<16x32xf32> -> vector<16x32xf32>
    %c0_21 = arith.constant 0 : index
    %c0_22 = arith.constant 0 : index
    %c0_23 = arith.constant 0 : index
    %36 = vector.load %arg7[%c0_21, %c0_22, %c0_23] : memref<2x1x32xf32, #tpu.memory_space<vmem>>, vector<1x1x32xf32>
    %37 = vector.shape_cast %36 : vector<1x1x32xf32> to vector<1x32xf32>
    %38 = vector.broadcast %37 : vector<1x32xf32> to vector<16x32xf32>
    %39 = arith.addf %35, %38 : vector<16x32xf32>
    %40 = arith.addf %15, %39 : vector<16x32xf32>
    %cst_24 = arith.constant 0.000000e+00 : f32
    %41 = vector.broadcast %cst_24 : f32 to vector<16x32xf32>
    %42 = arith.maximumf %40, %41 : vector<16x32xf32>
    %c1 = arith.constant 1 : index
    %c0_25 = arith.constant 0 : index
    %c0_26 = arith.constant 0 : index
    %43 = vector.load %arg4[%c1, %c0_25, %c0_26] : memref<2x96x32xbf16, #tpu.memory_space<vmem>>, vector<1x96x32xbf16>
    %44 = vector.shape_cast %43 : vector<1x96x32xbf16> to vector<96x32xbf16>
    %c1_27 = arith.constant 1 : index
    %c0_28 = arith.constant 0 : index
    %c0_29 = arith.constant 0 : index
    %45 = vector.load %arg5[%c1_27, %c0_28, %c0_29] : memref<2x1x32xf32, #tpu.memory_space<vmem>>, vector<1x1x32xf32>
    %46 = vector.shape_cast %45 : vector<1x1x32xf32> to vector<1x32xf32>
    %cst_30 = arith.constant 0.000000e+00 : f32
    %47 = vector.broadcast %cst_30 : f32 to vector<1x32xf32>
    %48 = tpu.concatenate %47, %42, %47 in 0 : vector<1x32xf32>, vector<16x32xf32>, vector<1x32xf32> -> vector<18x32xf32>
    %49 = vector.extract_strided_slice %48 {offsets = [0, 0], sizes = [16, 32], strides = [1, 1]} : vector<18x32xf32> to vector<16x32xf32>
    %50 = vector.extract_strided_slice %48 {offsets = [1, 0], sizes = [16, 32], strides = [1, 1]} : vector<18x32xf32> to vector<16x32xf32>
    %51 = vector.extract_strided_slice %48 {offsets = [2, 0], sizes = [16, 32], strides = [1, 1]} : vector<18x32xf32> to vector<16x32xf32>
    %52 = tpu.concatenate %49, %50, %51 in 1 : vector<16x32xf32>, vector<16x32xf32>, vector<16x32xf32> -> vector<16x96xf32>
    %53 = arith.truncf %52 : vector<16x96xf32> to vector<16x96xbf16>
    %cst_31 = arith.constant dense<0.000000e+00> : vector<16x32xf32>
    %54 = tpu.matmul %53, %44, %cst_31 {dimension_numbers = #tpu.dot_dimension_numbers<[1], [0], [0], [1], [0, 0, 1, 1], [], []>} : vector<16x96xbf16>, vector<96x32xbf16>, vector<16x32xf32> -> vector<16x32xf32>
    %55 = vector.broadcast %46 : vector<1x32xf32> to vector<16x32xf32>
    %56 = arith.addf %54, %55 : vector<16x32xf32>
    %cst_32 = arith.constant 0.000000e+00 : f32
    %57 = vector.broadcast %cst_32 : f32 to vector<16x32xf32>
    %58 = arith.maximumf %56, %57 : vector<16x32xf32>
    %59 = arith.truncf %58 : vector<16x32xf32> to vector<16x32xbf16>
    %c1_33 = arith.constant 1 : index
    %c0_34 = arith.constant 0 : index
    %c0_35 = arith.constant 0 : index
    %60 = vector.load %arg6[%c1_33, %c0_34, %c0_35] : memref<2x32x32xbf16, #tpu.memory_space<vmem>>, vector<1x32x32xbf16>
    %61 = vector.shape_cast %60 : vector<1x32x32xbf16> to vector<32x32xbf16>
    %cst_36 = arith.constant dense<0.000000e+00> : vector<16x32xf32>
    %62 = tpu.matmul %59, %61, %cst_36 {dimension_numbers = #tpu.dot_dimension_numbers<[1], [0], [0], [1], [0, 0, 1, 1], [], []>} : vector<16x32xbf16>, vector<32x32xbf16>, vector<16x32xf32> -> vector<16x32xf32>
    %c1_37 = arith.constant 1 : index
    %c0_38 = arith.constant 0 : index
    %c0_39 = arith.constant 0 : index
    %63 = vector.load %arg7[%c1_37, %c0_38, %c0_39] : memref<2x1x32xf32, #tpu.memory_space<vmem>>, vector<1x1x32xf32>
    %64 = vector.shape_cast %63 : vector<1x1x32xf32> to vector<1x32xf32>
    %65 = vector.broadcast %64 : vector<1x32xf32> to vector<16x32xf32>
    %66 = arith.addf %62, %65 : vector<16x32xf32>
    %67 = arith.addf %40, %66 : vector<16x32xf32>
    %68 = tpu.iota {dimensions = array<i32: 0>} : vector<32x16xi32>
    %69 = tpu.iota {dimensions = array<i32: 1>} : vector<32x16xi32>
    %c2_i32 = arith.constant 2 : i32
    %70 = vector.broadcast %c2_i32 : i32 to vector<32x16xi32>
    %71 = arith.muli %70, %69 : vector<32x16xi32>
    %72 = arith.subi %68, %71 : vector<32x16xi32>
    %c0_i32 = arith.constant 0 : i32
    %73 = vector.broadcast %c0_i32 : i32 to vector<32x16xi32>
    %74 = arith.cmpi sge, %72, %73 : vector<32x16xi32>
    %c1_i32 = arith.constant 1 : i32
    %75 = vector.broadcast %c1_i32 : i32 to vector<32x16xi32>
    %76 = arith.cmpi sle, %72, %75 : vector<32x16xi32>
    %77 = arith.andi %74, %76 : vector<32x16xi1>
    %cst_40 = arith.constant 1.000000e+00 : f32
    %cst_41 = arith.constant 0.000000e+00 : f32
    %78 = vector.broadcast %cst_40 : f32 to vector<32x16xf32>
    %79 = vector.broadcast %cst_41 : f32 to vector<32x16xf32>
    %80 = arith.select %77, %78, %79 : vector<32x16xi1>, vector<32x16xf32>
    %81 = arith.truncf %80 : vector<32x16xf32> to vector<32x16xbf16>
    %82 = arith.truncf %67 : vector<16x32xf32> to vector<16x32xbf16>
    %cst_42 = arith.constant dense<0.000000e+00> : vector<32x32xf32>
    %83 = tpu.matmul %81, %82, %cst_42 {dimension_numbers = #tpu.dot_dimension_numbers<[1], [0], [0], [1], [0, 0, 1, 1], [], []>} : vector<32x16xbf16>, vector<16x32xbf16>, vector<32x32xf32> -> vector<32x32xf32>
    %c0_43 = arith.constant 0 : index
    %c0_44 = arith.constant 0 : index
    %84 = vector.load %arg8[%c0_43, %c0_44] : memref<96x32xbf16, #tpu.memory_space<vmem>>, vector<96x32xbf16>
    %c0_45 = arith.constant 0 : index
    %c0_46 = arith.constant 0 : index
    %85 = vector.load %arg9[%c0_45, %c0_46] : memref<1x32xf32, #tpu.memory_space<vmem>>, vector<1x32xf32>
    %cst_47 = arith.constant 0.000000e+00 : f32
    %86 = vector.broadcast %cst_47 : f32 to vector<1x32xf32>
    %87 = tpu.concatenate %86, %83, %86 in 0 : vector<1x32xf32>, vector<32x32xf32>, vector<1x32xf32> -> vector<34x32xf32>
    %88 = vector.extract_strided_slice %87 {offsets = [0, 0], sizes = [32, 32], strides = [1, 1]} : vector<34x32xf32> to vector<32x32xf32>
    %89 = vector.extract_strided_slice %87 {offsets = [1, 0], sizes = [32, 32], strides = [1, 1]} : vector<34x32xf32> to vector<32x32xf32>
    %90 = vector.extract_strided_slice %87 {offsets = [2, 0], sizes = [32, 32], strides = [1, 1]} : vector<34x32xf32> to vector<32x32xf32>
    %91 = tpu.concatenate %88, %89, %90 in 1 : vector<32x32xf32>, vector<32x32xf32>, vector<32x32xf32> -> vector<32x96xf32>
    %92 = arith.truncf %91 : vector<32x96xf32> to vector<32x96xbf16>
    %cst_48 = arith.constant dense<0.000000e+00> : vector<32x32xf32>
    %93 = tpu.matmul %92, %84, %cst_48 {dimension_numbers = #tpu.dot_dimension_numbers<[1], [0], [0], [1], [0, 0, 1, 1], [], []>} : vector<32x96xbf16>, vector<96x32xbf16>, vector<32x32xf32> -> vector<32x32xf32>
    %94 = vector.broadcast %85 : vector<1x32xf32> to vector<32x32xf32>
    %95 = arith.addf %93, %94 : vector<32x32xf32>
    %cst_49 = arith.constant 0.000000e+00 : f32
    %96 = vector.broadcast %cst_49 : f32 to vector<32x32xf32>
    %97 = arith.maximumf %95, %96 : vector<32x32xf32>
    %c0_50 = arith.constant 0 : index
    %c0_51 = arith.constant 0 : index
    %c0_52 = arith.constant 0 : index
    %98 = vector.load %arg10[%c0_50, %c0_51, %c0_52] : memref<2x96x32xbf16, #tpu.memory_space<vmem>>, vector<1x96x32xbf16>
    %99 = vector.shape_cast %98 : vector<1x96x32xbf16> to vector<96x32xbf16>
    %c0_53 = arith.constant 0 : index
    %c0_54 = arith.constant 0 : index
    %c0_55 = arith.constant 0 : index
    %100 = vector.load %arg11[%c0_53, %c0_54, %c0_55] : memref<2x1x32xf32, #tpu.memory_space<vmem>>, vector<1x1x32xf32>
    %101 = vector.shape_cast %100 : vector<1x1x32xf32> to vector<1x32xf32>
    %cst_56 = arith.constant 0.000000e+00 : f32
    %102 = vector.broadcast %cst_56 : f32 to vector<3x32xf32>
    %103 = tpu.concatenate %102, %97, %102 in 0 : vector<3x32xf32>, vector<32x32xf32>, vector<3x32xf32> -> vector<38x32xf32>
    %104 = vector.extract_strided_slice %103 {offsets = [0, 0], sizes = [32, 32], strides = [1, 1]} : vector<38x32xf32> to vector<32x32xf32>
    %105 = vector.extract_strided_slice %103 {offsets = [3, 0], sizes = [32, 32], strides = [1, 1]} : vector<38x32xf32> to vector<32x32xf32>
    %106 = vector.extract_strided_slice %103 {offsets = [6, 0], sizes = [32, 32], strides = [1, 1]} : vector<38x32xf32> to vector<32x32xf32>
    %107 = tpu.concatenate %104, %105, %106 in 1 : vector<32x32xf32>, vector<32x32xf32>, vector<32x32xf32> -> vector<32x96xf32>
    %108 = arith.truncf %107 : vector<32x96xf32> to vector<32x96xbf16>
    %cst_57 = arith.constant dense<0.000000e+00> : vector<32x32xf32>
    %109 = tpu.matmul %108, %99, %cst_57 {dimension_numbers = #tpu.dot_dimension_numbers<[1], [0], [0], [1], [0, 0, 1, 1], [], []>} : vector<32x96xbf16>, vector<96x32xbf16>, vector<32x32xf32> -> vector<32x32xf32>
    %110 = vector.broadcast %101 : vector<1x32xf32> to vector<32x32xf32>
    %111 = arith.addf %109, %110 : vector<32x32xf32>
    %cst_58 = arith.constant 0.000000e+00 : f32
    %112 = vector.broadcast %cst_58 : f32 to vector<32x32xf32>
    %113 = arith.maximumf %111, %112 : vector<32x32xf32>
    %114 = arith.truncf %113 : vector<32x32xf32> to vector<32x32xbf16>
    %c0_59 = arith.constant 0 : index
    %c0_60 = arith.constant 0 : index
    %c0_61 = arith.constant 0 : index
    %115 = vector.load %arg12[%c0_59, %c0_60, %c0_61] : memref<2x32x32xbf16, #tpu.memory_space<vmem>>, vector<1x32x32xbf16>
    %116 = vector.shape_cast %115 : vector<1x32x32xbf16> to vector<32x32xbf16>
    %cst_62 = arith.constant dense<0.000000e+00> : vector<32x32xf32>
    %117 = tpu.matmul %114, %116, %cst_62 {dimension_numbers = #tpu.dot_dimension_numbers<[1], [0], [0], [1], [0, 0, 1, 1], [], []>} : vector<32x32xbf16>, vector<32x32xbf16>, vector<32x32xf32> -> vector<32x32xf32>
    %c0_63 = arith.constant 0 : index
    %c0_64 = arith.constant 0 : index
    %c0_65 = arith.constant 0 : index
    %118 = vector.load %arg13[%c0_63, %c0_64, %c0_65] : memref<2x1x32xf32, #tpu.memory_space<vmem>>, vector<1x1x32xf32>
    %119 = vector.shape_cast %118 : vector<1x1x32xf32> to vector<1x32xf32>
    %120 = vector.broadcast %119 : vector<1x32xf32> to vector<32x32xf32>
    %121 = arith.addf %117, %120 : vector<32x32xf32>
    %122 = arith.addf %95, %121 : vector<32x32xf32>
    %cst_66 = arith.constant 0.000000e+00 : f32
    %123 = vector.broadcast %cst_66 : f32 to vector<32x32xf32>
    %124 = arith.maximumf %122, %123 : vector<32x32xf32>
    %c1_67 = arith.constant 1 : index
    %c0_68 = arith.constant 0 : index
    %c0_69 = arith.constant 0 : index
    %125 = vector.load %arg10[%c1_67, %c0_68, %c0_69] : memref<2x96x32xbf16, #tpu.memory_space<vmem>>, vector<1x96x32xbf16>
    %126 = vector.shape_cast %125 : vector<1x96x32xbf16> to vector<96x32xbf16>
    %c1_70 = arith.constant 1 : index
    %c0_71 = arith.constant 0 : index
    %c0_72 = arith.constant 0 : index
    %127 = vector.load %arg11[%c1_70, %c0_71, %c0_72] : memref<2x1x32xf32, #tpu.memory_space<vmem>>, vector<1x1x32xf32>
    %128 = vector.shape_cast %127 : vector<1x1x32xf32> to vector<1x32xf32>
    %cst_73 = arith.constant 0.000000e+00 : f32
    %129 = vector.broadcast %cst_73 : f32 to vector<1x32xf32>
    %130 = tpu.concatenate %129, %124, %129 in 0 : vector<1x32xf32>, vector<32x32xf32>, vector<1x32xf32> -> vector<34x32xf32>
    %131 = vector.extract_strided_slice %130 {offsets = [0, 0], sizes = [32, 32], strides = [1, 1]} : vector<34x32xf32> to vector<32x32xf32>
    %132 = vector.extract_strided_slice %130 {offsets = [1, 0], sizes = [32, 32], strides = [1, 1]} : vector<34x32xf32> to vector<32x32xf32>
    %133 = vector.extract_strided_slice %130 {offsets = [2, 0], sizes = [32, 32], strides = [1, 1]} : vector<34x32xf32> to vector<32x32xf32>
    %134 = tpu.concatenate %131, %132, %133 in 1 : vector<32x32xf32>, vector<32x32xf32>, vector<32x32xf32> -> vector<32x96xf32>
    %135 = arith.truncf %134 : vector<32x96xf32> to vector<32x96xbf16>
    %cst_74 = arith.constant dense<0.000000e+00> : vector<32x32xf32>
    %136 = tpu.matmul %135, %126, %cst_74 {dimension_numbers = #tpu.dot_dimension_numbers<[1], [0], [0], [1], [0, 0, 1, 1], [], []>} : vector<32x96xbf16>, vector<96x32xbf16>, vector<32x32xf32> -> vector<32x32xf32>
    %137 = vector.broadcast %128 : vector<1x32xf32> to vector<32x32xf32>
    %138 = arith.addf %136, %137 : vector<32x32xf32>
    %cst_75 = arith.constant 0.000000e+00 : f32
    %139 = vector.broadcast %cst_75 : f32 to vector<32x32xf32>
    %140 = arith.maximumf %138, %139 : vector<32x32xf32>
    %141 = arith.truncf %140 : vector<32x32xf32> to vector<32x32xbf16>
    %c1_76 = arith.constant 1 : index
    %c0_77 = arith.constant 0 : index
    %c0_78 = arith.constant 0 : index
    %142 = vector.load %arg12[%c1_76, %c0_77, %c0_78] : memref<2x32x32xbf16, #tpu.memory_space<vmem>>, vector<1x32x32xbf16>
    %143 = vector.shape_cast %142 : vector<1x32x32xbf16> to vector<32x32xbf16>
    %cst_79 = arith.constant dense<0.000000e+00> : vector<32x32xf32>
    %144 = tpu.matmul %141, %143, %cst_79 {dimension_numbers = #tpu.dot_dimension_numbers<[1], [0], [0], [1], [0, 0, 1, 1], [], []>} : vector<32x32xbf16>, vector<32x32xbf16>, vector<32x32xf32> -> vector<32x32xf32>
    %c1_80 = arith.constant 1 : index
    %c0_81 = arith.constant 0 : index
    %c0_82 = arith.constant 0 : index
    %145 = vector.load %arg13[%c1_80, %c0_81, %c0_82] : memref<2x1x32xf32, #tpu.memory_space<vmem>>, vector<1x1x32xf32>
    %146 = vector.shape_cast %145 : vector<1x1x32xf32> to vector<1x32xf32>
    %147 = vector.broadcast %146 : vector<1x32xf32> to vector<32x32xf32>
    %148 = arith.addf %144, %147 : vector<32x32xf32>
    %149 = arith.addf %122, %148 : vector<32x32xf32>
    %150 = tpu.iota {dimensions = array<i32: 0>} : vector<64x32xi32>
    %151 = tpu.iota {dimensions = array<i32: 1>} : vector<64x32xi32>
    %c2_i32_83 = arith.constant 2 : i32
    %152 = vector.broadcast %c2_i32_83 : i32 to vector<64x32xi32>
    %153 = arith.muli %152, %151 : vector<64x32xi32>
    %154 = arith.subi %150, %153 : vector<64x32xi32>
    %c0_i32_84 = arith.constant 0 : i32
    %155 = vector.broadcast %c0_i32_84 : i32 to vector<64x32xi32>
    %156 = arith.cmpi sge, %154, %155 : vector<64x32xi32>
    %c1_i32_85 = arith.constant 1 : i32
    %157 = vector.broadcast %c1_i32_85 : i32 to vector<64x32xi32>
    %158 = arith.cmpi sle, %154, %157 : vector<64x32xi32>
    %159 = arith.andi %156, %158 : vector<64x32xi1>
    %cst_86 = arith.constant 1.000000e+00 : f32
    %cst_87 = arith.constant 0.000000e+00 : f32
    %160 = vector.broadcast %cst_86 : f32 to vector<64x32xf32>
    %161 = vector.broadcast %cst_87 : f32 to vector<64x32xf32>
    %162 = arith.select %159, %160, %161 : vector<64x32xi1>, vector<64x32xf32>
    %163 = arith.truncf %162 : vector<64x32xf32> to vector<64x32xbf16>
    %164 = arith.truncf %149 : vector<32x32xf32> to vector<32x32xbf16>
    %cst_88 = arith.constant dense<0.000000e+00> : vector<64x32xf32>
    %165 = tpu.matmul %163, %164, %cst_88 {dimension_numbers = #tpu.dot_dimension_numbers<[1], [0], [0], [1], [0, 0, 1, 1], [], []>} : vector<64x32xbf16>, vector<32x32xbf16>, vector<64x32xf32> -> vector<64x32xf32>
    %c0_89 = arith.constant 0 : index
    %c0_90 = arith.constant 0 : index
    %166 = vector.load %arg14[%c0_89, %c0_90] : memref<96x32xbf16, #tpu.memory_space<vmem>>, vector<96x32xbf16>
    %c0_91 = arith.constant 0 : index
    %c0_92 = arith.constant 0 : index
    %167 = vector.load %arg15[%c0_91, %c0_92] : memref<1x32xf32, #tpu.memory_space<vmem>>, vector<1x32xf32>
    %cst_93 = arith.constant 0.000000e+00 : f32
    %168 = vector.broadcast %cst_93 : f32 to vector<1x32xf32>
    %169 = tpu.concatenate %168, %165, %168 in 0 : vector<1x32xf32>, vector<64x32xf32>, vector<1x32xf32> -> vector<66x32xf32>
    %170 = vector.extract_strided_slice %169 {offsets = [0, 0], sizes = [64, 32], strides = [1, 1]} : vector<66x32xf32> to vector<64x32xf32>
    %171 = vector.extract_strided_slice %169 {offsets = [1, 0], sizes = [64, 32], strides = [1, 1]} : vector<66x32xf32> to vector<64x32xf32>
    %172 = vector.extract_strided_slice %169 {offsets = [2, 0], sizes = [64, 32], strides = [1, 1]} : vector<66x32xf32> to vector<64x32xf32>
    %173 = tpu.concatenate %170, %171, %172 in 1 : vector<64x32xf32>, vector<64x32xf32>, vector<64x32xf32> -> vector<64x96xf32>
    %174 = arith.truncf %173 : vector<64x96xf32> to vector<64x96xbf16>
    %cst_94 = arith.constant dense<0.000000e+00> : vector<64x32xf32>
    %175 = tpu.matmul %174, %166, %cst_94 {dimension_numbers = #tpu.dot_dimension_numbers<[1], [0], [0], [1], [0, 0, 1, 1], [], []>} : vector<64x96xbf16>, vector<96x32xbf16>, vector<64x32xf32> -> vector<64x32xf32>
    %176 = vector.broadcast %167 : vector<1x32xf32> to vector<64x32xf32>
    %177 = arith.addf %175, %176 : vector<64x32xf32>
    %c0_95 = arith.constant 0 : index
    %c0_96 = arith.constant 0 : index
    %178 = vector.load %arg16[%c0_95, %c0_96] : memref<96x32xbf16, #tpu.memory_space<vmem>>, vector<96x32xbf16>
    %c0_97 = arith.constant 0 : index
    %c0_98 = arith.constant 0 : index
    %179 = vector.load %arg17[%c0_97, %c0_98] : memref<1x32xf32, #tpu.memory_space<vmem>>, vector<1x32xf32>
    %cst_99 = arith.constant 0.000000e+00 : f32
    %180 = vector.broadcast %cst_99 : f32 to vector<1x32xf32>
    %181 = tpu.concatenate %180, %177, %180 in 0 : vector<1x32xf32>, vector<64x32xf32>, vector<1x32xf32> -> vector<66x32xf32>
    %182 = vector.extract_strided_slice %181 {offsets = [0, 0], sizes = [64, 32], strides = [1, 1]} : vector<66x32xf32> to vector<64x32xf32>
    %183 = vector.extract_strided_slice %181 {offsets = [1, 0], sizes = [64, 32], strides = [1, 1]} : vector<66x32xf32> to vector<64x32xf32>
    %184 = vector.extract_strided_slice %181 {offsets = [2, 0], sizes = [64, 32], strides = [1, 1]} : vector<66x32xf32> to vector<64x32xf32>
    %185 = tpu.concatenate %182, %183, %184 in 1 : vector<64x32xf32>, vector<64x32xf32>, vector<64x32xf32> -> vector<64x96xf32>
    %186 = arith.truncf %185 : vector<64x96xf32> to vector<64x96xbf16>
    %cst_100 = arith.constant dense<0.000000e+00> : vector<64x32xf32>
    %187 = tpu.matmul %186, %178, %cst_100 {dimension_numbers = #tpu.dot_dimension_numbers<[1], [0], [0], [1], [0, 0, 1, 1], [], []>} : vector<64x96xbf16>, vector<96x32xbf16>, vector<64x32xf32> -> vector<64x32xf32>
    %188 = vector.broadcast %179 : vector<1x32xf32> to vector<64x32xf32>
    %189 = arith.addf %187, %188 : vector<64x32xf32>
    %cst_101 = arith.constant 0.000000e+00 : f32
    %190 = vector.broadcast %cst_101 : f32 to vector<64x32xf32>
    %191 = arith.maximumf %189, %190 : vector<64x32xf32>
    %c0_102 = arith.constant 0 : index
    %c0_103 = arith.constant 0 : index
    %192 = vector.load %arg18[%c0_102, %c0_103] : memref<96x8xbf16, #tpu.memory_space<vmem>>, vector<96x8xbf16>
    %c0_104 = arith.constant 0 : index
    %c0_105 = arith.constant 0 : index
    %193 = vector.load %arg19[%c0_104, %c0_105] : memref<1x8xf32, #tpu.memory_space<vmem>>, vector<1x8xf32>
    %cst_106 = arith.constant 0.000000e+00 : f32
    %194 = vector.broadcast %cst_106 : f32 to vector<1x32xf32>
    %195 = tpu.concatenate %194, %191, %194 in 0 : vector<1x32xf32>, vector<64x32xf32>, vector<1x32xf32> -> vector<66x32xf32>
    %196 = vector.extract_strided_slice %195 {offsets = [0, 0], sizes = [64, 32], strides = [1, 1]} : vector<66x32xf32> to vector<64x32xf32>
    %197 = vector.extract_strided_slice %195 {offsets = [1, 0], sizes = [64, 32], strides = [1, 1]} : vector<66x32xf32> to vector<64x32xf32>
    %198 = vector.extract_strided_slice %195 {offsets = [2, 0], sizes = [64, 32], strides = [1, 1]} : vector<66x32xf32> to vector<64x32xf32>
    %199 = tpu.concatenate %196, %197, %198 in 1 : vector<64x32xf32>, vector<64x32xf32>, vector<64x32xf32> -> vector<64x96xf32>
    %200 = arith.truncf %199 : vector<64x96xf32> to vector<64x96xbf16>
    %cst_107 = arith.constant dense<0.000000e+00> : vector<64x8xf32>
    %201 = tpu.matmul %200, %192, %cst_107 {dimension_numbers = #tpu.dot_dimension_numbers<[1], [0], [0], [1], [0, 0, 1, 1], [], []>} : vector<64x96xbf16>, vector<96x8xbf16>, vector<64x8xf32> -> vector<64x8xf32>
    %202 = vector.broadcast %193 : vector<1x8xf32> to vector<64x8xf32>
    %203 = arith.addf %201, %202 : vector<64x8xf32>
    %c0_108 = arith.constant 0 : index
    %c0_109 = arith.constant 0 : index
    %c0_110 = arith.constant 0 : index
    %204 = vector.load %arg20[%c0_108, %c0_109, %c0_110] : memref<1x64x8xf32, #tpu.memory_space<vmem>>, vector<1x64x8xf32>
    %205 = vector.shape_cast %204 : vector<1x64x8xf32> to vector<64x8xf32>
    %206 = vector.shape_cast %203 : vector<64x8xf32> to vector<1x64x8xf32>
    tpu.vector_store %arg20[%c0_108, %c0_109, %c0_110], %206 {strides = array<i32>} : memref<1x64x8xf32, #tpu.memory_space<vmem>>, vector<1x64x8xf32>,
    return
  }
  func.func @transform_0(%arg0: i32) -> (i32, i32, i32) {
    %c0_i32 = arith.constant 0 : i32
    %c0_i32_0 = arith.constant 0 : i32
    %c0_i32_1 = arith.constant 0 : i32
    return %arg0, %c0_i32, %c0_i32_0 : i32, i32, i32
  }
  func.func @transform_1(%arg0: i32) -> (i32, i32) {
    %c0_i32 = arith.constant 0 : i32
    %c0_i32_0 = arith.constant 0 : i32
    %c0_i32_1 = arith.constant 0 : i32
    return %c0_i32, %c0_i32_0 : i32, i32
  }
  func.func @transform_2(%arg0: i32) -> (i32, i32) {
    %c0_i32 = arith.constant 0 : i32
    %c0_i32_0 = arith.constant 0 : i32
    %c0_i32_1 = arith.constant 0 : i32
    return %c0_i32, %c0_i32_0 : i32, i32
  }
  func.func @transform_3(%arg0: i32) -> (i32, i32, i32) {
    %c0_i32 = arith.constant 0 : i32
    %c0_i32_0 = arith.constant 0 : i32
    %c0_i32_1 = arith.constant 0 : i32
    %c0_i32_2 = arith.constant 0 : i32
    return %c0_i32, %c0_i32_0, %c0_i32_1 : i32, i32, i32
  }
  func.func @transform_4(%arg0: i32) -> (i32, i32, i32) {
    %c0_i32 = arith.constant 0 : i32
    %c0_i32_0 = arith.constant 0 : i32
    %c0_i32_1 = arith.constant 0 : i32
    %c0_i32_2 = arith.constant 0 : i32
    return %c0_i32, %c0_i32_0, %c0_i32_1 : i32, i32, i32
  }
  func.func @transform_5(%arg0: i32) -> (i32, i32, i32) {
    %c0_i32 = arith.constant 0 : i32
    %c0_i32_0 = arith.constant 0 : i32
    %c0_i32_1 = arith.constant 0 : i32
    %c0_i32_2 = arith.constant 0 : i32
    return %c0_i32, %c0_i32_0, %c0_i32_1 : i32, i32, i32
  }
  func.func @transform_6(%arg0: i32) -> (i32, i32, i32) {
    %c0_i32 = arith.constant 0 : i32
    %c0_i32_0 = arith.constant 0 : i32
    %c0_i32_1 = arith.constant 0 : i32
    %c0_i32_2 = arith.constant 0 : i32
    return %c0_i32, %c0_i32_0, %c0_i32_1 : i32, i32, i32
  }
  func.func @transform_7(%arg0: i32) -> (i32, i32) {
    %c0_i32 = arith.constant 0 : i32
    %c0_i32_0 = arith.constant 0 : i32
    %c0_i32_1 = arith.constant 0 : i32
    return %c0_i32, %c0_i32_0 : i32, i32
  }
  func.func @transform_8(%arg0: i32) -> (i32, i32) {
    %c0_i32 = arith.constant 0 : i32
    %c0_i32_0 = arith.constant 0 : i32
    %c0_i32_1 = arith.constant 0 : i32
    return %c0_i32, %c0_i32_0 : i32, i32
  }
  func.func @transform_9(%arg0: i32) -> (i32, i32, i32) {
    %c0_i32 = arith.constant 0 : i32
    %c0_i32_0 = arith.constant 0 : i32
    %c0_i32_1 = arith.constant 0 : i32
    %c0_i32_2 = arith.constant 0 : i32
    return %c0_i32, %c0_i32_0, %c0_i32_1 : i32, i32, i32
  }
  func.func @transform_10(%arg0: i32) -> (i32, i32, i32) {
    %c0_i32 = arith.constant 0 : i32
    %c0_i32_0 = arith.constant 0 : i32
    %c0_i32_1 = arith.constant 0 : i32
    %c0_i32_2 = arith.constant 0 : i32
    return %c0_i32, %c0_i32_0, %c0_i32_1 : i32, i32, i32
  }
  func.func @transform_11(%arg0: i32) -> (i32, i32, i32) {
    %c0_i32 = arith.constant 0 : i32
    %c0_i32_0 = arith.constant 0 : i32
    %c0_i32_1 = arith.constant 0 : i32
    %c0_i32_2 = arith.constant 0 : i32
    return %c0_i32, %c0_i32_0, %c0_i32_1 : i32, i32, i32
  }
  func.func @transform_12(%arg0: i32) -> (i32, i32, i32) {
    %c0_i32 = arith.constant 0 : i32
    %c0_i32_0 = arith.constant 0 : i32
    %c0_i32_1 = arith.constant 0 : i32
    %c0_i32_2 = arith.constant 0 : i32
    return %c0_i32, %c0_i32_0, %c0_i32_1 : i32, i32, i32
  }
  func.func @transform_13(%arg0: i32) -> (i32, i32) {
    %c0_i32 = arith.constant 0 : i32
    %c0_i32_0 = arith.constant 0 : i32
    %c0_i32_1 = arith.constant 0 : i32
    return %c0_i32, %c0_i32_0 : i32, i32
  }
  func.func @transform_14(%arg0: i32) -> (i32, i32) {
    %c0_i32 = arith.constant 0 : i32
    %c0_i32_0 = arith.constant 0 : i32
    %c0_i32_1 = arith.constant 0 : i32
    return %c0_i32, %c0_i32_0 : i32, i32
  }
  func.func @transform_15(%arg0: i32) -> (i32, i32) {
    %c0_i32 = arith.constant 0 : i32
    %c0_i32_0 = arith.constant 0 : i32
    %c0_i32_1 = arith.constant 0 : i32
    return %c0_i32, %c0_i32_0 : i32, i32
  }
  func.func @transform_16(%arg0: i32) -> (i32, i32) {
    %c0_i32 = arith.constant 0 : i32
    %c0_i32_0 = arith.constant 0 : i32
    %c0_i32_1 = arith.constant 0 : i32
    return %c0_i32, %c0_i32_0 : i32, i32
  }
  func.func @transform_17(%arg0: i32) -> (i32, i32) {
    %c0_i32 = arith.constant 0 : i32
    %c0_i32_0 = arith.constant 0 : i32
    %c0_i32_1 = arith.constant 0 : i32
    return %c0_i32, %c0_i32_0 : i32, i32
  }
  func.func @transform_18(%arg0: i32) -> (i32, i32) {
    %c0_i32 = arith.constant 0 : i32
    %c0_i32_0 = arith.constant 0 : i32
    %c0_i32_1 = arith.constant 0 : i32
    return %c0_i32, %c0_i32_0 : i32, i32
  }
  func.func @transform_19(%arg0: i32) -> (i32, i32, i32) {
    %c0_i32 = arith.constant 0 : i32
    %c0_i32_0 = arith.constant 0 : i32
    %c0_i32_1 = arith.constant 0 : i32
    return %arg0, %c0_i32, %c0_i32_0 : i32, i32, i32
  }
}

</mosaic_0001>

<bundles_post_ra>
// kernel: _decoder_forward.1
= control target key start
LH: loop header
LB: loop body
LE: loop exit
PB: predicated region body
PF: predicated region fallthrough
CT: control target
= control target key end

     0   :  { %s6312_s0 = inlined_call_operand.hbm [shape: f32[2,16,16], index: 0, kind: input, shape index: {}]   ;;  %s6313_s1 = inlined_call_operand.hbm [shape: bf16[48,32], index: 1, kind: input, shape index: {}]   ;;  %s6314_s2 = inlined_call_operand.hbm [shape: f32[1,32], index: 2, kind: input, shape index: {}]   ;;  %s6315_s3 = inlined_call_operand.hbm [shape: bf16[2,96,32], index: 3, kind: input, shape index: {}]   ;;  %s6316_s4 = inlined_call_operand.hbm [shape: f32[2,1,32], index: 4, kind: input, shape index: {}]   ;;  %s6317_s5 = inlined_call_operand.hbm [shape: bf16[2,32,32], index: 5, kind: input, shape index: {}]   ;;  %s6318_s6 = inlined_call_operand.hbm [shape: f32[2,1,32], index: 6, kind: input, shape index: {}]   ;;  %s6319_s7 = inlined_call_operand.hbm [shape: bf16[96,32], index: 7, kind: input, shape index: {}]   ;;  %s6320_s8 = inlined_call_operand.hbm [shape: f32[1,32], index: 8, kind: input, shape index: {}]   ;;  %s6321_s9 = inlined_call_operand.hbm [shape: bf16[2,96,32], index: 9, kind: input, shape index: {}]   ;;  %s6322_s10 = inlined_call_operand.hbm [shape: f32[2,1,32], index: 10, kind: input, shape index: {}]   ;;  %s6323_s11 = inlined_call_operand.hbm [shape: bf16[2,32,32], index: 11, kind: input, shape index: {}]   ;;  %s6324_s12 = inlined_call_operand.hbm [shape: f32[2,1,32], index: 12, kind: input, shape index: {}]   ;;  %s6325_s13 = inlined_call_operand.hbm [shape: bf16[96,32], index: 13, kind: input, shape index: {}]   ;;  %s6326_s14 = inlined_call_operand.hbm [shape: f32[1,32], index: 14, kind: input, shape index: {}]   ;;  %s6327_s15 = inlined_call_operand.hbm [shape: bf16[96,32], index: 15, kind: input, shape index: {}]   ;;  %s6328_s16 = inlined_call_operand.hbm [shape: f32[1,32], index: 16, kind: input, shape index: {}]   ;;  %s6329_s17 = inlined_call_operand.hbm [shape: bf16[96,8], index: 17, kind: input, shape index: {}]   ;;  %s6330_s18 = inlined_call_operand.hbm [shape: f32[1,8], index: 18, kind: input, shape index: {}]   ;;  %s6331_s19 = inlined_call_operand.hbm [shape: f32[2,64,8], index: 19, kind: output, shape index: {}]  }
   0x1   :  { %6353 = sst [smem:[#allocation50_spill]] %s6312_s0 }
   0x2   :  { %6354 = sst [smem:[#allocation51_spill]] %s6313_s1 }
   0x3   :  { %6355 = sst [smem:[#allocation52_spill]] %s6314_s2 }
   0x4   :  { %6356 = sst [smem:[#allocation53_spill]] %s6315_s3 }
   0x5   :  { %6357 = sst [smem:[#allocation54_spill]] %s6316_s4 }
   0x6   :  { %6358 = sst [smem:[#allocation55_spill]] %s6317_s5 }
   0x7   :  { %6359 = sst [smem:[#allocation56_spill]] %s6318_s6 }
   0x8   :  { %6360 = sst [smem:[#allocation57_spill]] %s6319_s7 }
   0x9   :  { %6361 = sst [smem:[#allocation58_spill]] %s6320_s8 }
   0xa   :  { %6362 = sst [smem:[#allocation59_spill]] %s6326_s14 }
   0xb   :  { %6363 = sst [smem:[#allocation60_spill]] %s6328_s16 }
   0xc   :  { %6364 = sst [smem:[#allocation61_spill]] %s6330_s18 }
   0xd   :  { %6365 = sst [smem:[#allocation62_spill]] %s6331_s19 }
   0xe   :  { %24 = vsyncpa [#allocation3], 0 }
   0xf   :  { %26 = vsyncpa [#allocation3 + $0x1], 0 }
  0x10   :  { %27 = vsyncpa [#allocation6], 0 }
  0x11   :  { %28 = vsyncpa [#allocation9], 0 }
  0x12   :  { %29 = vsyncpa [#allocation12], 0 }
  0x13   :  { %30 = vsyncpa [#allocation15], 0 }
  0x14   :  { %31 = vsyncpa [#allocation18], 0 }
  0x15   :  { %32 = vsyncpa [#allocation21], 0 }
  0x16   :  { %33 = vsyncpa [#allocation24], 0 }
  0x17   :  { %34 = vsyncpa [#allocation27], 0 }
  0x18   :  { %35 = vsyncpa [#allocation30], 0 }
  0x19   :  { %36 = vsyncpa [#allocation4], 0 }
  0x1a   :  { %38 = vsyncpa [#allocation4 + $0x1], 0  ;;  %s5168_s0 = smov 0   ;;  %s5170_s30 = smov 0  }
  0x1b   :  { %s5172_s20 = smov 0   ;;  %s5174_s21 = smov 0  }
  0x1c LB: > { %6366 = sst [smem:[#allocation44_spill]] %s5021_s0  ;;  %s5035_s1 = smov [#allocation5]   ;;  %s5033_s21 = sphi %s5174_s21, %s6446_s21   ;;  %s5029_s20 = sphi %s5172_s20, %s6445_s20   ;;  %s5025_s30 = sphi %s5170_s30, %s6442_s30   ;;  %s5021_s0 = sphi %s5168_s0, %s6444_s0  }
  0x1d   : > { %6367 = sst [smem:[#allocation45_spill]] %s5025_s30  ;;  %s491_s22 = sshll.u32 %s5035_s1, 4  ;;  %s5194_s22 = int_to_ptr.vmem [resolvable:$true] %s491_s22 }
  0x1e   : > { %6368 = sst [smem:[#allocation46_spill]] %s5029_s20  ;;  %s5189_s2 = sadd.s32 4294967295, %s5033_s21  }
  0x1f   : > { %6369 = sst [smem:[#allocation47_spill]] %s5033_s21  ;;  %p3437_p0 = scmp.ge.s32.totalorder %s5033_s21, 1 }
  0x20   : > { %6370 = sst [smem:[#allocation48_spill]] %s5189_s2  ;;  %p6348_p1 = scmp.eq.s32.totalorder %s5189_s2, 0 }
  0x21   : > { %p479_p2 = scmp.lt.s32.totalorder %s5033_s21, 3  ;;  %s5036_s24 = smov [#allocation8]  }
  0x22   : > { %s515_s25 = sshll.u32 %s5036_s24, 4  ;;  %s5037_s26 = smov [#allocation11]   ;;  %s5209_s25 = int_to_ptr.vmem [resolvable:$true] %s515_s25 }
  0x23   : > { %p5196_p3 = pnand %p3437_p0, %p479_p2  ;;  %s541_s27 = sshll.u32 %s5037_s26, 4  ;;  %s5211_s27 = int_to_ptr.vmem [resolvable:$true] %s541_s27 }
  0x24   : > { %s6374_s1 = sld [smem:[#allocation51_spill]] }
  0x25   : > { %s6371_s23 = scalar_select %p5196_p3, 1, 0 }
  0x26   : > { %p3964_p5 = pneg %p5196_p3 }
  0x27   : > { %6372 = sst [smem:[#allocation49_spill]] %s6371_s23 }
  0x28   : > { %p5205_p6 = pnand %p3964_p5, %p6348_p1 }
  0x2a   : > { %s4397_s19 = scalar_lea.hbm %s6374_s1, 384  ;;  %p5221_p8 = pneg %p5205_p6 }
  0x2b   : > { %p4398_p7 = scmp.ne.s32.totalorder %s6374_s1, %s4397_s19  ;;  %p4404_p11 = scmp.lt.u32.totalorder %s4397_s19, %s6374_s1 }
  0x2d   : > { %p4400_p9 = pnand %p5221_p8, %p4398_p7 }
  0x2f   : > { %p4401_p10 = pneg %p4400_p9 }
  0x31   : > { %p4406_p12 = pnand %p4404_p11, %p4401_p10 }
  0x33   : > { %4409 = shalt.err (!%p4406_p12)
}
  0x34   : > { %s4410_s0 = scalar_lea.vmem %s5194_s22, 384  ;;  %p4418_p5 = scmp.lt.s32.totalorder %s5194_s22, %s5194_s22 }
  0x35   : > { %p4411_p13 = scmp.ne.s32.totalorder %s5194_s22, %s4410_s0  ;;  %p4419_p4 = scmp.lt.s32.totalorder %s4410_s0, %s4410_s0 }
  0x37   : > { %p4413_p0 = pnand %p4411_p13, %p5221_p8  ;;  %p4420_p7 = por %p4419_p4, %p4418_p5 }
  0x39   : > { %p4414_p2 = pneg %p4413_p0 }
  0x3b   : > { %p4421_p9 = pnand %p4420_p7, %p4414_p2 }
  0x3d   : > { %4424 = shalt.err (!%p4421_p9)
}
  0x3e   : > { %s5038_s23 = smov 64   ;;  %s5039_s19 = smov 4  }
  0x3f   : > { %3967 = dma.hbm_to_vmem [thread:$0]  (!%p5205_p6), %s6374_s1, 384, %s5194_s22, [#allocation6], %s5038_s23, %s5038_s23, %s5039_s19  }
  0x40   : > { %s6376_s30 = sld [smem:[#allocation53_spill]] }
  0x46   : > { %s6377_s18 = smov %s6376_s30  ;;  %s4425_s0 = scalar_lea.hbm %s6376_s30, 1536 }
  0x47   : > { %p4426_p4 = scmp.ne.s32.totalorder %s6377_s18, %s4425_s0  ;;  %p4432_p12 = scmp.lt.u32.totalorder %s4425_s0, %s6377_s18 }
  0x49   : > { %p4428_p10 = pnand %p4426_p4, %p5221_p8 }
  0x4b   : > { %p4429_p11 = pneg %p4428_p10 }
  0x4d   : > { %p4434_p13 = pnand %p4432_p12, %p4429_p11 }
  0x4f   : > { %4437 = shalt.err (!%p4434_p13)
}
  0x50   : > { %s4438_s22 = scalar_lea.vmem %s5209_s25, 1536  ;;  %p4446_p7 = scmp.lt.s32.totalorder %s5209_s25, %s5209_s25 }
  0x51   : > { %p4439_p0 = scmp.ne.s32.totalorder %s5209_s25, %s4438_s22  ;;  %p4447_p9 = scmp.lt.s32.totalorder %s4438_s22, %s4438_s22 }
  0x53   : > { %p4441_p2 = pnand %p4439_p0, %p5221_p8  ;;  %p4448_p4 = por %p4447_p9, %p4446_p7 }
  0x55   : > { %p4442_p5 = pneg %p4441_p2 }
  0x57   : > { %p4449_p10 = pnand %p4448_p4, %p4442_p5 }
  0x59   : > { %4452 = shalt.err (!%p4449_p10)
}
  0x5a   : > { %3973 = dma.hbm_to_vmem [thread:$0]  (!%p5205_p6), %s6377_s18, 1536, %s5209_s25, [#allocation9], %s5038_s23, %s5038_s23, %s5039_s19  }
  0x5b   : > { %s6378_s5 = sld [smem:[#allocation55_spill]] }
  0x61   : > { %s4453_s21 = scalar_lea.hbm %s6378_s5, 512 }
  0x62   : > { %p4454_p11 = scmp.ne.s32.totalorder %s6378_s5, %s4453_s21  ;;  %p4460_p0 = scmp.lt.u32.totalorder %s4453_s21, %s6378_s5 }
  0x64   : > { %p4456_p12 = pnand %p4454_p11, %p5221_p8 }
  0x66   : > { %p4457_p13 = pneg %p4456_p12 }
  0x68   : > { %p4462_p2 = pnand %p4460_p0, %p4457_p13 }
  0x6a   : > { %4465 = shalt.err (!%p4462_p2)
}
  0x6b   : > { %s4466_s25 = scalar_lea.vmem %s5211_s27, 512  ;;  %p4474_p4 = scmp.lt.s32.totalorder %s5211_s27, %s5211_s27 }
  0x6c   : > { %p4467_p5 = scmp.ne.s32.totalorder %s5211_s27, %s4466_s25  ;;  %p4475_p10 = scmp.lt.s32.totalorder %s4466_s25, %s4466_s25 }
  0x6e   : > { %p4469_p7 = pnand %p4467_p5, %p5221_p8  ;;  %p4476_p11 = por %p4475_p10, %p4474_p4 }
  0x70   : > { %p4470_p9 = pneg %p4469_p7 }
  0x72   : > { %p4477_p12 = pnand %p4476_p11, %p4470_p9 }
  0x74   : > { %4480 = shalt.err (!%p4477_p12)
}
  0x75   : > { %3979 = dma.hbm_to_vmem [thread:$0]  (!%p5205_p6), %s6378_s5, 512, %s5211_s27, [#allocation12], %s5038_s23, %s5038_s23, %s5039_s19  }
  0x76   : > { %s5040_s14 = smov [#allocation14]   ;;  %s5041_s30 = smov [#allocation17]  }
  0x77   : > { %s567_s16 = sshll.u32 %s5040_s14, 4  ;;  %s591_s20 = sshll.u32 %s5041_s30, 4  ;;  %s568_s16 = int_to_ptr.vmem [resolvable:$true] %s567_s16  ;;  %s592_s20 = int_to_ptr.vmem [resolvable:$true] %s591_s20 }
  0x78   : > { %s6379_s7 = sld [smem:[#allocation57_spill]] }
  0x7e   : > { %s4481_s28 = scalar_lea.hbm %s6379_s7, 768 }
  0x7f   : > { %p4482_p13 = scmp.ne.s32.totalorder %s6379_s7, %s4481_s28  ;;  %p4488_p5 = scmp.lt.u32.totalorder %s4481_s28, %s6379_s7 }
  0x81   : > { %p4484_p0 = pnand %p4482_p13, %p5221_p8 }
  0x83   : > { %p4485_p2 = pneg %p4484_p0 }
  0x85   : > { %p4490_p7 = pnand %p4488_p5, %p4485_p2 }
  0x87   : > { %4493 = shalt.err (!%p4490_p7)
}
  0x88   : > { %s4494_s27 = scalar_lea.vmem %s568_s16, 768  ;;  %p4502_p11 = scmp.lt.s32.totalorder %s568_s16, %s568_s16 }
  0x89   : > { %p4495_p9 = scmp.ne.s32.totalorder %s568_s16, %s4494_s27  ;;  %p4503_p12 = scmp.lt.s32.totalorder %s4494_s27, %s4494_s27 }
  0x8b   : > { %p4497_p4 = pnand %p4495_p9, %p5221_p8  ;;  %p4504_p1 = por %p4503_p12, %p4502_p11 }
  0x8d   : > { %p4498_p10 = pneg %p4497_p4 }
  0x8f   : > { %p4505_p3 = pnand %p4504_p1, %p4498_p10 }
  0x91   : > { %4508 = shalt.err (!%p4505_p3)
}
  0x92   : > { %3985 = dma.hbm_to_vmem [thread:$0]  (!%p5205_p6), %s6379_s7, 768, %s568_s16, [#allocation15], %s5038_s23, %s5038_s23, %s5039_s19  }
  0x93   : > { %s4509_s2 = scalar_lea.hbm %s6321_s9, 1536 }
  0x94   : > { %p4510_p1 = scmp.ne.s32.totalorder %s6321_s9, %s4509_s2  ;;  %p4516_p0 = scmp.lt.u32.totalorder %s4509_s2, %s6321_s9 }
  0x96   : > { %p4512_p3 = pnand %p4510_p1, %p5221_p8 }
  0x98   : > { %p4513_p13 = pneg %p4512_p3 }
  0x9a   : > { %p4518_p2 = pnand %p4516_p0, %p4513_p13 }
  0x9c   : > { %4521 = shalt.err (!%p4518_p2)
}
  0x9d   : > { %s4522_s0 = scalar_lea.vmem %s592_s20, 1536  ;;  %p4530_p4 = scmp.lt.s32.totalorder %s592_s20, %s592_s20 }
  0x9e   : > { %p4523_p5 = scmp.ne.s32.totalorder %s592_s20, %s4522_s0  ;;  %p4531_p10 = scmp.lt.s32.totalorder %s4522_s0, %s4522_s0 }
  0xa0   : > { %p4525_p7 = pnand %p4523_p5, %p5221_p8  ;;  %p4532_p11 = por %p4531_p10, %p4530_p4 }
  0xa2   : > { %p4526_p9 = pneg %p4525_p7 }
  0xa4   : > { %p4533_p12 = pnand %p4532_p11, %p4526_p9 }
  0xa6   : > { %4536 = shalt.err (!%p4533_p12)
}
  0xa7   : > { %3991 = dma.hbm_to_vmem [thread:$0]  (!%p5205_p6), %s6321_s9, 1536, %s592_s20, [#allocation18], %s5038_s23, %s5038_s23, %s5039_s19  }
  0xa8   : > { %s5042_s22 = smov [#allocation20]   ;;  %s5043_s30 = smov [#allocation23]  }
  0xa9   : > { %s617_s14 = sshll.u32 %s5042_s22, 4  ;;  %s643_s21 = sshll.u32 %s5043_s30, 4  ;;  %s618_s14 = int_to_ptr.vmem [resolvable:$true] %s617_s14  ;;  %s644_s21 = int_to_ptr.vmem [resolvable:$true] %s643_s21 }
  0xaa   : > { %s4537_s29 = scalar_lea.hbm %s6323_s11, 512 }
  0xab   : > { %p4538_p1 = scmp.ne.s32.totalorder %s6323_s11, %s4537_s29  ;;  %p4544_p0 = scmp.lt.u32.totalorder %s4537_s29, %s6323_s11 }
  0xad   : > { %p4540_p3 = pnand %p4538_p1, %p5221_p8 }
  0xaf   : > { %p4541_p13 = pneg %p4540_p3 }
  0xb1   : > { %p4546_p2 = pnand %p4544_p0, %p4541_p13 }
  0xb3   : > { %4549 = shalt.err (!%p4546_p2)
}
  0xb4   : > { %s4550_s20 = scalar_lea.vmem %s618_s14, 512  ;;  %p4558_p4 = scmp.lt.s32.totalorder %s618_s14, %s618_s14 }
  0xb5   : > { %p4551_p5 = scmp.ne.s32.totalorder %s618_s14, %s4550_s20  ;;  %p4559_p10 = scmp.lt.s32.totalorder %s4550_s20, %s4550_s20 }
  0xb7   : > { %p4553_p7 = pnand %p4551_p5, %p5221_p8  ;;  %p4560_p11 = por %p4559_p10, %p4558_p4 }
  0xb9   : > { %p4554_p9 = pneg %p4553_p7 }
  0xbb   : > { %p4561_p12 = pnand %p4560_p11, %p4554_p9 }
  0xbd   : > { %4564 = shalt.err (!%p4561_p12)
}
  0xbe   : > { %3997 = dma.hbm_to_vmem [thread:$0]  (!%p5205_p6), %s6323_s11, 512, %s618_s14, [#allocation21], %s5038_s23, %s5038_s23, %s5039_s19  }
  0xbf   : > { %s4565_s28 = scalar_lea.hbm %s6325_s13, 768 }
  0xc0   : > { %p4566_p1 = scmp.ne.s32.totalorder %s6325_s13, %s4565_s28  ;;  %p4572_p0 = scmp.lt.u32.totalorder %s4565_s28, %s6325_s13 }
  0xc2   : > { %p4568_p3 = pnand %p4566_p1, %p5221_p8 }
  0xc4   : > { %p4569_p13 = pneg %p4568_p3 }
  0xc6   : > { %p4574_p2 = pnand %p4572_p0, %p4569_p13 }
  0xc8   : > { %4577 = shalt.err (!%p4574_p2)
}
  0xc9   : > { %s4578_s16 = scalar_lea.vmem %s644_s21, 768  ;;  %p4586_p4 = scmp.lt.s32.totalorder %s644_s21, %s644_s21 }
  0xca   : > { %p4579_p5 = scmp.ne.s32.totalorder %s644_s21, %s4578_s16  ;;  %p4587_p10 = scmp.lt.s32.totalorder %s4578_s16, %s4578_s16 }
  0xcc   : > { %p4581_p7 = pnand %p4579_p5, %p5221_p8  ;;  %p4588_p11 = por %p4587_p10, %p4586_p4 }
  0xce   : > { %p4582_p9 = pneg %p4581_p7 }
  0xd0   : > { %p4589_p12 = pnand %p4588_p11, %p4582_p9 }
  0xd2   : > { %4592 = shalt.err (!%p4589_p12)
}
  0xd3   : > { %4003 = dma.hbm_to_vmem [thread:$0]  (!%p5205_p6), %s6325_s13, 768, %s644_s21, [#allocation24], %s5038_s23, %s5038_s23, %s5039_s19  }
  0xd4   : > { %s5044_s27 = smov [#allocation26]   ;;  %s5045_s30 = smov [#allocation29]  }
  0xd5   : > { %s667_s22 = sshll.u32 %s5044_s27, 4  ;;  %s691_s2 = sshll.u32 %s5045_s30, 4  ;;  %s668_s22 = int_to_ptr.vmem [resolvable:$true] %s667_s22  ;;  %s692_s2 = int_to_ptr.vmem [resolvable:$true] %s691_s2 }
  0xd6   : > { %s4593_s26 = scalar_lea.hbm %s6327_s15, 768 }
  0xd7   : > { %p4594_p1 = scmp.ne.s32.totalorder %s6327_s15, %s4593_s26  ;;  %p4600_p0 = scmp.lt.u32.totalorder %s4593_s26, %s6327_s15 }
  0xd9   : > { %p4596_p3 = pnand %p4594_p1, %p5221_p8 }
  0xdb   : > { %p4597_p13 = pneg %p4596_p3 }
  0xdd   : > { %p4602_p2 = pnand %p4600_p0, %p4597_p13 }
  0xdf   : > { %4605 = shalt.err (!%p4602_p2)
}
  0xe0   : > { %s4606_s21 = scalar_lea.vmem %s668_s22, 768  ;;  %p4614_p4 = scmp.lt.s32.totalorder %s668_s22, %s668_s22 }
  0xe1   : > { %p4607_p5 = scmp.ne.s32.totalorder %s668_s22, %s4606_s21  ;;  %p4615_p10 = scmp.lt.s32.totalorder %s4606_s21, %s4606_s21 }
  0xe3   : > { %p4609_p7 = pnand %p4607_p5, %p5221_p8  ;;  %p4616_p11 = por %p4615_p10, %p4614_p4 }
  0xe5   : > { %p4610_p9 = pneg %p4609_p7 }
  0xe7   : > { %p4617_p12 = pnand %p4616_p11, %p4610_p9 }
  0xe9   : > { %4620 = shalt.err (!%p4617_p12)
}
  0xea   : > { %4009 = dma.hbm_to_vmem [thread:$0]  (!%p5205_p6), %s6327_s15, 768, %s668_s22, [#allocation27], %s5038_s23, %s5038_s23, %s5039_s19  }
  0xeb   : > { %s4621_s29 = scalar_lea.hbm %s6329_s17, 768 }
  0xec   : > { %p4622_p1 = scmp.ne.s32.totalorder %s6329_s17, %s4621_s29  ;;  %p4628_p0 = scmp.lt.u32.totalorder %s4621_s29, %s6329_s17 }
  0xee   : > { %p4624_p3 = pnand %p4622_p1, %p5221_p8 }
  0xf0   : > { %p4625_p13 = pneg %p4624_p3 }
  0xf2   : > { %p4630_p2 = pnand %p4628_p0, %p4625_p13 }
  0xf4   : > { %4633 = shalt.err (!%p4630_p2)
}
  0xf5   : > { %s4634_s14 = scalar_lea.vmem %s692_s2, 768  ;;  %p4642_p4 = scmp.lt.s32.totalorder %s692_s2, %s692_s2 }
  0xf6   : > { %p4635_p5 = scmp.ne.s32.totalorder %s692_s2, %s4634_s14  ;;  %p4643_p10 = scmp.lt.s32.totalorder %s4634_s14, %s4634_s14 }
  0xf8   : > { %p4637_p7 = pnand %p4635_p5, %p5221_p8  ;;  %p4644_p11 = por %p4643_p10, %p4642_p4 }
  0xfa   : > { %p4638_p9 = pneg %p4637_p7 }
  0xfc   : > { %p4645_p12 = pnand %p4644_p11, %p4638_p9 }
  0xfe   : > { %4648 = shalt.err (!%p4645_p12)
}
  0xff   : > { %4015 = dma.hbm_to_vmem [thread:$0]  (!%p5205_p6), %s6329_s17, 768, %s692_s2, [#allocation30], %s5038_s23, %s5038_s23, %s5039_s19  }
 0x100   : > { %s5046_s20 = smov [#allocation7]   ;;  %s5047_s30 = smov [#allocation10]  }
 0x101   : > { %s505_s27 = sshll.u32 %s5046_s20, 4  ;;  %s528_s28 = sshll.u32 %s5047_s30, 4  ;;  %s506_s27 = int_to_ptr.vmem [resolvable:$true] %s505_s27  ;;  %s529_s28 = int_to_ptr.vmem [resolvable:$true] %s528_s28 }
 0x102   : > { %s6380_s25 = sld [smem:[#allocation52_spill]] }
 0x108   : > { %s4649_s0 = scalar_lea.hbm %s6380_s25, 16 }
 0x109   : > { %p4650_p1 = scmp.ne.s32.totalorder %s6380_s25, %s4649_s0  ;;  %p4656_p0 = scmp.lt.u32.totalorder %s4649_s0, %s6380_s25 }
 0x10b   : > { %p4652_p3 = pnand %p4650_p1, %p5221_p8 }
 0x10d   : > { %p4653_p13 = pneg %p4652_p3 }
 0x10f   : > { %p4658_p2 = pnand %p4656_p0, %p4653_p13 }
 0x111   : > { %4661 = shalt.err (!%p4658_p2)
}
 0x112   : > { %s4662_s23 = scalar_lea.vmem %s506_s27, 16  ;;  %s4669_s19 = scalar_lea.vmem %s506_s27, 32 }
 0x113   : > { %p4663_p5 = scmp.ne.s32.totalorder %s506_s27, %s4662_s23  ;;  %p4670_p4 = scmp.lt.s32.totalorder %s506_s27, %s506_s27 }
 0x114   : > { %p4671_p10 = scmp.lt.s32.totalorder %s4669_s19, %s4662_s23 }
 0x115   : > { %p4665_p7 = pnand %p4663_p5, %p5221_p8 }
 0x116   : > { %p4672_p11 = por %p4671_p10, %p4670_p4 }
 0x117   : > { %p4666_p9 = pneg %p4665_p7 }
 0x119   : > { %p4673_p12 = pnand %p4672_p11, %p4666_p9 }
 0x11b   : > { %4676 = shalt.err (!%p4673_p12)
}
 0x11c   : > { %3970 = dma.hbm_to_vmem [thread:$0]  (!%p5205_p6), %s6380_s25, 16, %s506_s27, [#allocation6]  }
 0x11d   : > { %s6381_s4 = sld [smem:[#allocation54_spill]] }
 0x123   : > { %s4677_s30 = scalar_lea.hbm %s6381_s4, 32 }
 0x124   : > { %p4678_p1 = scmp.ne.s32.totalorder %s6381_s4, %s4677_s30  ;;  %p4684_p0 = scmp.lt.u32.totalorder %s4677_s30, %s6381_s4 }
 0x126   : > { %p4680_p3 = pnand %p4678_p1, %p5221_p8 }
 0x128   : > { %p4681_p13 = pneg %p4680_p3 }
 0x12a   : > { %p4686_p2 = pnand %p4684_p0, %p4681_p13 }
 0x12c   : > { %4689 = shalt.err (!%p4686_p2)
}
 0x12d   : > { %s4690_s14 = scalar_lea.vmem %s529_s28, 32  ;;  %p4698_p4 = scmp.lt.s32.totalorder %s529_s28, %s529_s28 }
 0x12e   : > { %p4691_p5 = scmp.ne.s32.totalorder %s529_s28, %s4690_s14  ;;  %p4699_p10 = scmp.lt.s32.totalorder %s4690_s14, %s4690_s14 }
 0x130   : > { %p4693_p7 = pnand %p4691_p5, %p5221_p8  ;;  %p4700_p11 = por %p4699_p10, %p4698_p4 }
 0x132   : > { %p4694_p9 = pneg %p4693_p7 }
 0x134   : > { %p4701_p12 = pnand %p4700_p11, %p4694_p9 }
 0x136   : > { %4704 = shalt.err (!%p4701_p12)
}
 0x137   : > { %s5048_s27 = smov 16   ;;  %s5049_s22 = smov 1  }
 0x138   : > { %3976 = dma.hbm_to_vmem [thread:$0]  (!%p5205_p6), %s6381_s4, 32, %s529_s28, [#allocation9], %s5048_s27, %s5048_s27, %s5049_s22  }
 0x139   : > { %s5050_s2 = smov [#allocation13]   ;;  %s5051_s1 = smov [#allocation16]  }
 0x13a   : > { %s554_s21 = sshll.u32 %s5050_s2, 4  ;;  %s581_s20 = sshll.u32 %s5051_s1, 4  ;;  %s555_s21 = int_to_ptr.vmem [resolvable:$true] %s554_s21  ;;  %s582_s20 = int_to_ptr.vmem [resolvable:$true] %s581_s20 }
 0x13b   : > { %s6382_s6 = sld [smem:[#allocation56_spill]] }
 0x141   : > { %s4705_s26 = scalar_lea.hbm %s6382_s6, 32 }
 0x142   : > { %p4706_p1 = scmp.ne.s32.totalorder %s6382_s6, %s4705_s26  ;;  %p4712_p0 = scmp.lt.u32.totalorder %s4705_s26, %s6382_s6 }
 0x144   : > { %p4708_p3 = pnand %p4706_p1, %p5221_p8 }
 0x146   : > { %p4709_p13 = pneg %p4708_p3 }
 0x148   : > { %p4714_p2 = pnand %p4712_p0, %p4709_p13 }
 0x14a   : > { %4717 = shalt.err (!%p4714_p2)
}
 0x14b   : > { %s4718_s28 = scalar_lea.vmem %s555_s21, 32  ;;  %p4726_p4 = scmp.lt.s32.totalorder %s555_s21, %s555_s21 }
 0x14c   : > { %p4719_p5 = scmp.ne.s32.totalorder %s555_s21, %s4718_s28  ;;  %p4727_p10 = scmp.lt.s32.totalorder %s4718_s28, %s4718_s28 }
 0x14e   : > { %p4721_p7 = pnand %p4719_p5, %p5221_p8  ;;  %p4728_p11 = por %p4727_p10, %p4726_p4 }
 0x150   : > { %p4722_p9 = pneg %p4721_p7 }
 0x152   : > { %p4729_p12 = pnand %p4728_p11, %p4722_p9 }
 0x154   : > { %4732 = shalt.err (!%p4729_p12)
}
 0x155   : > { %3982 = dma.hbm_to_vmem [thread:$0]  (!%p5205_p6), %s6382_s6, 32, %s555_s21, [#allocation12], %s5048_s27, %s5048_s27, %s5049_s22  }
 0x156   : > { %s6383_s8 = sld [smem:[#allocation58_spill]] }
 0x15c   : > { %s4733_s1 = scalar_lea.hbm %s6383_s8, 16 }
 0x15d   : > { %p4734_p1 = scmp.ne.s32.totalorder %s6383_s8, %s4733_s1  ;;  %p4740_p0 = scmp.lt.u32.totalorder %s4733_s1, %s6383_s8 }
 0x15f   : > { %p4736_p3 = pnand %p4734_p1, %p5221_p8 }
 0x161   : > { %p4737_p13 = pneg %p4736_p3 }
 0x163   : > { %p4742_p2 = pnand %p4740_p0, %p4737_p13 }
 0x165   : > { %4745 = shalt.err (!%p4742_p2)
}
 0x166   : > { %s4746_s16 = scalar_lea.vmem %s582_s20, 16  ;;  %s4753_s21 = scalar_lea.vmem %s582_s20, 32 }
 0x167   : > { %p4747_p5 = scmp.ne.s32.totalorder %s582_s20, %s4746_s16  ;;  %p4754_p4 = scmp.lt.s32.totalorder %s582_s20, %s582_s20 }
 0x168   : > { %p4755_p10 = scmp.lt.s32.totalorder %s4753_s21, %s4746_s16 }
 0x169   : > { %p4749_p7 = pnand %p4747_p5, %p5221_p8 }
 0x16a   : > { %p4756_p11 = por %p4755_p10, %p4754_p4 }
 0x16b   : > { %p4750_p9 = pneg %p4749_p7 }
 0x16d   : > { %p4757_p12 = pnand %p4756_p11, %p4750_p9 }
 0x16f   : > { %4760 = shalt.err (!%p4757_p12)
}
 0x170   : > { %3988 = dma.hbm_to_vmem [thread:$0]  (!%p5205_p6), %s6383_s8, 16, %s582_s20, [#allocation15]  }
 0x171   : > { %s5052_s5 = smov [#allocation19]   ;;  %s5053_s19 = smov [#allocation22]  }
 0x172   : > { %s604_s23 = sshll.u32 %s5052_s5, 4  ;;  %s630_s2 = sshll.u32 %s5053_s19, 4  ;;  %s605_s23 = int_to_ptr.vmem [resolvable:$true] %s604_s23  ;;  %s631_s2 = int_to_ptr.vmem [resolvable:$true] %s630_s2 }
 0x173   : > { %s4761_s29 = scalar_lea.hbm %s6322_s10, 32 }
 0x174   : > { %p4762_p1 = scmp.ne.s32.totalorder %s6322_s10, %s4761_s29  ;;  %p4768_p0 = scmp.lt.u32.totalorder %s4761_s29, %s6322_s10 }
 0x176   : > { %p4764_p3 = pnand %p4762_p1, %p5221_p8 }
 0x178   : > { %p4765_p13 = pneg %p4764_p3 }
 0x17a   : > { %p4770_p2 = pnand %p4768_p0, %p4765_p13 }
 0x17c   : > { %4773 = shalt.err (!%p4770_p2)
}
 0x17d   : > { %s4774_s20 = scalar_lea.vmem %s605_s23, 32  ;;  %p4782_p4 = scmp.lt.s32.totalorder %s605_s23, %s605_s23 }
 0x17e   : > { %p4775_p5 = scmp.ne.s32.totalorder %s605_s23, %s4774_s20  ;;  %p4783_p10 = scmp.lt.s32.totalorder %s4774_s20, %s4774_s20 }
 0x180   : > { %p4777_p7 = pnand %p4775_p5, %p5221_p8  ;;  %p4784_p11 = por %p4783_p10, %p4782_p4 }
 0x182   : > { %p4778_p9 = pneg %p4777_p7 }
 0x184   : > { %p4785_p12 = pnand %p4784_p11, %p4778_p9 }
 0x186   : > { %4788 = shalt.err (!%p4785_p12)
}
 0x187   : > { %3994 = dma.hbm_to_vmem [thread:$0]  (!%p5205_p6), %s6322_s10, 32, %s605_s23, [#allocation18], %s5048_s27, %s5048_s27, %s5049_s22  }
 0x188   : > { %s4789_s1 = scalar_lea.hbm %s6324_s12, 32 }
 0x189   : > { %p4790_p1 = scmp.ne.s32.totalorder %s6324_s12, %s4789_s1  ;;  %p4796_p0 = scmp.lt.u32.totalorder %s4789_s1, %s6324_s12 }
 0x18b   : > { %p4792_p3 = pnand %p4790_p1, %p5221_p8 }
 0x18d   : > { %p4793_p13 = pneg %p4792_p3 }
 0x18f   : > { %p4798_p2 = pnand %p4796_p0, %p4793_p13 }
 0x191   : > { %4801 = shalt.err (!%p4798_p2)
}
 0x192   : > { %s4802_s16 = scalar_lea.vmem %s631_s2, 32  ;;  %p4810_p4 = scmp.lt.s32.totalorder %s631_s2, %s631_s2 }
 0x193   : > { %p4803_p5 = scmp.ne.s32.totalorder %s631_s2, %s4802_s16  ;;  %p4811_p10 = scmp.lt.s32.totalorder %s4802_s16, %s4802_s16 }
 0x195   : > { %p4805_p7 = pnand %p4803_p5, %p5221_p8  ;;  %p4812_p11 = por %p4811_p10, %p4810_p4 }
 0x197   : > { %p4806_p9 = pneg %p4805_p7 }
 0x199   : > { %p4813_p12 = pnand %p4812_p11, %p4806_p9 }
 0x19b   : > { %4816 = shalt.err (!%p4813_p12)
}
 0x19c   : > { %4000 = dma.hbm_to_vmem [thread:$0]  (!%p5205_p6), %s6324_s12, 32, %s631_s2, [#allocation21], %s5048_s27, %s5048_s27, %s5049_s22  }
 0x19d   : > { %s5054_s20 = smov [#allocation25]   ;;  %s5055_s28 = smov [#allocation28]  }
 0x19e   : > { %s657_s14 = sshll.u32 %s5054_s20, 4  ;;  %s681_s5 = sshll.u32 %s5055_s28, 4  ;;  %s658_s14 = int_to_ptr.vmem [resolvable:$true] %s657_s14  ;;  %s682_s5 = int_to_ptr.vmem [resolvable:$true] %s681_s5 }
 0x19f   : > { %s6384_s30 = sld [smem:[#allocation59_spill]] }
 0x1a5   : > { %s6385_s29 = smov %s6384_s30  ;;  %s4817_s26 = scalar_lea.hbm %s6384_s30, 16 }
 0x1a6   : > { %p4818_p1 = scmp.ne.s32.totalorder %s6385_s29, %s4817_s26  ;;  %p4824_p0 = scmp.lt.u32.totalorder %s4817_s26, %s6385_s29 }
 0x1a8   : > { %p4820_p3 = pnand %p4818_p1, %p5221_p8 }
 0x1aa   : > { %p4821_p13 = pneg %p4820_p3 }
 0x1ac   : > { %p4826_p2 = pnand %p4824_p0, %p4821_p13 }
 0x1ae   : > { %4829 = shalt.err (!%p4826_p2)
}
 0x1af   : > { %s4830_s27 = scalar_lea.vmem %s658_s14, 16  ;;  %s4837_s22 = scalar_lea.vmem %s658_s14, 32 }
 0x1b0   : > { %p4831_p5 = scmp.ne.s32.totalorder %s658_s14, %s4830_s27  ;;  %p4838_p4 = scmp.lt.s32.totalorder %s658_s14, %s658_s14 }
 0x1b1   : > { %p4839_p10 = scmp.lt.s32.totalorder %s4837_s22, %s4830_s27 }
 0x1b2   : > { %p4833_p7 = pnand %p4831_p5, %p5221_p8 }
 0x1b3   : > { %p4840_p11 = por %p4839_p10, %p4838_p4 }
 0x1b4   : > { %p4834_p9 = pneg %p4833_p7 }
 0x1b6   : > { %p4841_p12 = pnand %p4840_p11, %p4834_p9 }
 0x1b8   : > { %4844 = shalt.err (!%p4841_p12)
}
 0x1b9   : > { %4006 = dma.hbm_to_vmem [thread:$0]  (!%p5205_p6), %s6385_s29, 16, %s658_s14, [#allocation24]  }
 0x1ba   : > { %s6386_s28 = sld [smem:[#allocation60_spill]] }
 0x1c0   : > { %s4845_s19 = scalar_lea.hbm %s6386_s28, 16 }
 0x1c1   : > { %p4846_p1 = scmp.ne.s32.totalorder %s6386_s28, %s4845_s19  ;;  %p4852_p0 = scmp.lt.u32.totalorder %s4845_s19, %s6386_s28 }
 0x1c3   : > { %p4848_p3 = pnand %p4846_p1, %p5221_p8 }
 0x1c5   : > { %p4849_p13 = pneg %p4848_p3 }
 0x1c7   : > { %p4854_p2 = pnand %p4852_p0, %p4849_p13 }
 0x1c9   : > { %4857 = shalt.err (!%p4854_p2)
}
 0x1ca   : > { %s4858_s16 = scalar_lea.vmem %s682_s5, 16  ;;  %s4865_s14 = scalar_lea.vmem %s682_s5, 32 }
 0x1cb   : > { %p4859_p5 = scmp.ne.s32.totalorder %s682_s5, %s4858_s16  ;;  %p4866_p4 = scmp.lt.s32.totalorder %s682_s5, %s682_s5 }
 0x1cc   : > { %p4867_p10 = scmp.lt.s32.totalorder %s4865_s14, %s4858_s16 }
 0x1cd   : > { %p4861_p7 = pnand %p4859_p5, %p5221_p8 }
 0x1ce   : > { %p4868_p11 = por %p4867_p10, %p4866_p4 }
 0x1cf   : > { %p4862_p9 = pneg %p4861_p7 }
 0x1d1   : > { %p4869_p12 = pnand %p4868_p11, %p4862_p9 }
 0x1d3   : > { %4872 = shalt.err (!%p4869_p12)
}
 0x1d4   : > { %4012 = dma.hbm_to_vmem [thread:$0]  (!%p5205_p6), %s6386_s28, 16, %s682_s5, [#allocation27]  }
 0x1d5   : > { %s5056_s22 = smov [#allocation31]   ;;  %s6387_s20 = sld [smem:[#allocation61_spill]] }
 0x1d6   : > { %s705_s2 = sshll.u32 %s5056_s22, 4  ;;  %s706_s2 = int_to_ptr.vmem [resolvable:$true] %s705_s2 }
 0x1db   : > { %s6388_s19 = smov %s6387_s20  ;;  %s4873_s1 = scalar_lea.hbm %s6387_s20, 16 }
 0x1dc   : > { %p4874_p1 = scmp.ne.s32.totalorder %s6388_s19, %s4873_s1  ;;  %p4880_p0 = scmp.lt.u32.totalorder %s4873_s1, %s6388_s19 }
 0x1de   : > { %p4876_p3 = pnand %p4874_p1, %p5221_p8 }
 0x1e0   : > { %p4877_p13 = pneg %p4876_p3 }
 0x1e2   : > { %p4882_p2 = pnand %p4880_p0, %p4877_p13 }
 0x1e4   : > { %4885 = shalt.err (!%p4882_p2)
}
 0x1e5   : > { %s4886_s5 = scalar_lea.vmem %s706_s2, 16  ;;  %s4893_s14 = scalar_lea.vmem %s706_s2, 32 }
 0x1e6   : > { %p4887_p5 = scmp.ne.s32.totalorder %s706_s2, %s4886_s5  ;;  %p4894_p4 = scmp.lt.s32.totalorder %s706_s2, %s706_s2 }
 0x1e7   : > { %p4895_p10 = scmp.lt.s32.totalorder %s4893_s14, %s4886_s5 }
 0x1e8   : > { %p4889_p7 = pnand %p4887_p5, %p5221_p8 }
 0x1e9   : > { %p4896_p11 = por %p4895_p10, %p4894_p4 }
 0x1ea   : > { %p4890_p9 = pneg %p4889_p7 }
 0x1ec   : > { %p4897_p12 = pnand %p4896_p11, %p4890_p9 }
 0x1ee   : > { %4900 = shalt.err (!%p4897_p12)
}
 0x1ef   : > { %s6389_s22 = sld [smem:[#allocation47_spill]]  ;;  %s6390_s21 = sld [smem:[#allocation46_spill]] }
 0x1f0   : > { %s6391_s4 = sld [smem:[#allocation45_spill]]  ;;  %s6392_s24 = sld [smem:[#allocation44_spill]] }
 0x1f1   : > { %s6393_s20 = sld [smem:[#allocation48_spill]] }
 0x1f2   : > { %4018 = dma.hbm_to_vmem [thread:$0]  (!%p5205_p6), %s6388_s19, 16, %s706_s2, [#allocation30]  }
 0x1f5   : > { %s3436_s1 = sadd.s32 4294967294, %s6389_s22   ;;  %s5599_s3 = sadd.s32 1, %s6389_s22  }
 0x1f6   : > { %s48_s30 = ssub.s32 %s6389_s22, %s5599_s3  ;;  %s51_s26 = sadd.s32 1, %s6390_s21 }
 0x1f7   : > { %p49_p8 = scmp.eq.s32.totalorder %s48_s30, 0  ;;  %p58_p1 = scmp.ne.s32.totalorder %s6390_s21, %s6391_s4 }
 0x1f8   : > { %p59_p3 = scmp.eq.s32.totalorder %s6389_s22, 0  ;;  %p64_p13 = scmp.ne.s32.totalorder %s6391_s4, %s6392_s24 }
 0x1f9   : > { %s5610_s0 = scalar_select %p49_p8, %s6390_s21, %s51_s26  }
 0x1fa   : > { %p5612_p0 = por %p59_p3, %p58_p1  ;;  %p6395_p2 = scmp.eq.s32.totalorder %s6393_s20, 0 }
 0x1fb   : > { %p466_p5 = scmp.eq.s32.totalorder %s6393_s20, 1  ;;  %p472_p7 = scmp.eq.s32.totalorder %s3436_s1, 1 }
 0x1fc   : > { %p5618_p6 = por %p6395_p2, %p64_p13  ;;  %p4045_p9 = scmp.lt.s32.totalorder %s6389_s22, 2 }
 0x1fd   : > { %s716_s5 = sand.u32 1, %s6390_s21   ;;  %p5625_p4 = por %p466_p5, %p58_p1 }
 0x1fe   : > { %p5629_p10 = por %p472_p7, %p64_p13  ;;  %s3457_s27 = sshll.u32 %s716_s5, 4 }
 0x1ff   : > { %s6397_s14 = scalar_select %p5625_p4, 1, 0 }
 0x200   : > { %s6398_s23 = scalar_select %p5629_p10, 1, 0 }
 0x201   : > { %s3591_s4 = sshll.u32 %s6389_s22, 8  ;;  %s6399_s26 = sld [smem:[#allocation50_spill]] }
 0x202   : > { %s720_s21 = scalar_lea.vmem [#allocation2], %s3457_s27  ;;  %p5643_p11 = pnand %p4045_p9, %p5612_p0 }
 0x203   : > { %s727_s20 = sshll.u32 %s720_s21, 4  ;;  %s5647_s22 = scalar_lea.sflag [#allocation3], %s716_s5  ;;  %s5639_s20 = int_to_ptr.vmem [resolvable:$true] %s727_s20 }
 0x204   : > { %p4903_p8 = pneg %p5643_p11 }
 0x207   : > { %s5637_s6 = scalar_lea.hbm %s6399_s26, %s3591_s4  ;;  %s4906_s16 = scalar_lea.hbm %s6399_s26, 512 }
 0x208   : > { %s4901_s24 = scalar_lea.hbm %s5637_s6, 256  ;;  %p4907_p13 = scmp.lt.u32.totalorder %s5637_s6, %s6399_s26 }
 0x209   : > { %p4902_p12 = scmp.ne.s32.totalorder %s5637_s6, %s4901_s24  ;;  %p4908_p0 = scmp.lt.u32.totalorder %s4906_s16, %s4901_s24 }
 0x20a   : > { %p4910_p5 = scmp.lt.u32.totalorder %s4901_s24, %s5637_s6 }
 0x20b   : > { %p4904_p1 = pnand %p4903_p8, %p4902_p12  ;;  %p4909_p2 = por %p4908_p0, %p4907_p13 }
 0x20d   : > { %p4905_p3 = pneg %p4904_p1  ;;  %p4911_p7 = por %p4910_p5, %p4909_p2 }
 0x20f   : > { %p4912_p9 = pnand %p4911_p7, %p4905_p3 }
 0x211   : > { %4915 = shalt.err (!%p4912_p9)
}
 0x212   : > { %s4916_s5 = scalar_lea.vmem %s5639_s20, 256  ;;  %s5057_s27 = smov [#allocation2]  }
 0x213   : > { %p4917_p12 = scmp.ne.s32.totalorder %s5639_s20, %s4916_s5  ;;  %s4921_s4 = sshll.u32 %s5057_s27, 4  ;;  %s4922_s4 = int_to_ptr.vmem [resolvable:$false] %s4921_s4 }
 0x214   : > { %s4923_s30 = scalar_lea.vmem %s4922_s4, 512  ;;  %p4924_p4 = scmp.lt.s32.totalorder %s5639_s20, %s4922_s4 }
 0x215   : > { %p4919_p1 = pnand %p4917_p12, %p4903_p8  ;;  %p4925_p13 = scmp.lt.s32.totalorder %s4923_s30, %s4916_s5 }
 0x217   : > { %p4920_p10 = pneg %p4919_p1  ;;  %p4926_p0 = por %p4925_p13, %p4924_p4 }
 0x219   : > { %p4927_p2 = pnand %p4926_p0, %p4920_p10 }
 0x21b   : > { %4930 = shalt.err (!%p4927_p2)
}
 0x21c   : > { %s5058_s24 = smov 128   ;;  %s5059_s16 = smov 8  }
 0x21d   : > { %4022 = dma.hbm_to_vmem [thread:$0]  (!%p5643_p11), %s5637_s6, 256, %s5639_s20, %s5647_s22, %s5058_s24, %s5058_s24, %s5059_s16  }
 0x21e   : > { %s6401_s21 = sld [smem:[#allocation49_spill]] }
 0x224   : > { %p6402_p8 = scmp.ne.s32.totalorder %s6401_s21, 0 }
 0x225   : > { %s6403_s7 = sld [smem:[#allocation45_spill]] (!%p6402_p8) }
 0x226   : > { %739 = sbr.rel (%p6402_p8) target bundleno = 5123 (0x1403), region = 96 }
 0x22b   : > { %s5678_s27 = sand.u32 (!%p6402_p8), 1, %s6403_s7  }
 0x22c   : > { %s3461_s5 = sshll.u32 (!%p6402_p8), %s5678_s27, 4  ;;  %s742_s4 = scalar_lea.sflag (!%p6402_p8), [#allocation3], %s5678_s27 }
 0x22d   : > { %s745_s30 = scalar_lea.vmem [#allocation2], %s3461_s5 }
 0x22e   : > { %4976 = dma.done.wait (%p5618_p6), %s742_s4, 256  }
 0x22f   : > { %4978 = vsyncadd (%p5618_p6), %s742_s4, 4294967040  ;;  %s6404_s8 = sld [smem:[#allocation48_spill]] }
 0x235   : > { %p6405_p4 = scmp.eq.s32.totalorder %s6404_s8, 0 }
 0x237   : > { %4980 = dma.done.wait (%p6405_p4), [#allocation6], 400   ;;  %p6406_p10 = pmov %p6405_p4 }
 0x238   : > { %p6407_p11 = pmov %p6405_p4 }
 0x239   : > { %4982 = vsyncadd (%p6406_p10), [#allocation6], 4294966896 }
 0x23a   : > { %4984 = dma.done.wait (%p6407_p11), [#allocation9], 1568   ;;  %p6408_p3 = pmov %p6405_p4 }
 0x23c   : > { %4986 = vsyncadd (%p6408_p3), [#allocation9], 4294965728  ;;  %p6409_p5 = pmov %p6408_p3 }
 0x23d   : > { %p6410_p7 = pmov %p6408_p3 }
 0x23e   : > { %4988 = dma.done.wait (%p6409_p5), [#allocation12], 544  }
 0x23f   : > { %4990 = vsyncadd (%p6410_p7), [#allocation12], 4294966752  ;;  %p6411_p6 = pmov %p6408_p3 }
 0x240   : > { %p6412_p9 = pmov %p6408_p3 }
 0x241   : > { %4992 = dma.done.wait (%p6411_p6), [#allocation15], 784  }
 0x242   : > { %4994 = vsyncadd (%p6412_p9), [#allocation15], 4294966512  ;;  %p6413_p12 = pmov %p6408_p3 }
 0x243   : > { %p6414_p1 = pmov %p6408_p3 }
 0x244   : > { %4996 = dma.done.wait (%p6413_p12), [#allocation18], 1568  }
 0x245   : > { %4998 = vsyncadd (%p6414_p1), [#allocation18], 4294965728  ;;  %p6415_p13 = pmov %p6414_p1 }
 0x246   : > { %p6416_p0 = pmov %p6414_p1 }
 0x247   : > { %5000 = dma.done.wait (%p6415_p13), [#allocation21], 544  }
 0x248   : > { %5002 = vsyncadd (%p6416_p0), [#allocation21], 4294966752  ;;  %p6417_p2 = pmov %p6416_p0 }
 0x249   : > { %p6418_p8 = pmov %p6416_p0 }
 0x24a   : > { %5004 = dma.done.wait (%p6417_p2), [#allocation24], 784  }
 0x24b   : > { %5006 = vsyncadd (%p6418_p8), [#allocation24], 4294966512  ;;  %p6419_p4 = pmov %p6416_p0 }
 0x24c   : > { %p6420_p10 = pmov %p6416_p0 }
 0x24d   : > { %5008 = dma.done.wait (%p6419_p4), [#allocation27], 784  }
 0x24e   : > { %5010 = vsyncadd (%p6420_p10), [#allocation27], 4294966512  ;;  %p6421_p11 = pmov %p6416_p0 }
 0x24f   : > { %p6422_p3 = pmov %p6416_p0 }
 0x250   : > { %5012 = dma.done.wait (%p6421_p11), [#allocation30], 784  }
 0x251   : > { %5014 = vsyncadd (%p6422_p3), [#allocation30], 4294966512  ;;  %v5060_v0 = vmov 0.0   ;;  %v873_v1 = vld [vmem:[%s745_s30] sm:$0xff]  ;;  %v874_v2 = vld [vmem:[%s745_s30 + $0x8] sm:$0xff]  ;;  %vm884_vm0 = vcmask 1040384  }
 0x252   : > { %3688 = vmatprep.subr.bf16.mxu0 %v5060_v0  ;;  %3698 = vmatprep.subr.bf16.mxu1 %v5060_v0  ;;  %vm895_vm1 = vcmask 1046528   ;;  %v885_v3 = vrot.slane %v873_v1, 7  ;;  %v886_v4 = vrot.slane %v874_v2, 7  ;;  %vm907_vm2 = vcmask 1045504   ;;  %v4338_v5 = vld [vmem:[#allocation5] sm:$0xff]   ;;  %v4339_v9 = vld [vmem:[#allocation5 + $0x8] sm:$0xff]  }
 0x253   : > { %3689 = vmatpush3.bf16.msra.mxu0 %v4338_v5  ;;  %vm5061_vm3 = vmmov 0   ;;  %v4340_v16 = vld [vmem:[#allocation5 + $0x10] sm:$0xff]   ;;  %s5062_s6 = smov 16   ;;  %s5063_s7 = smov 32   ;;  %vm919_vm4 = vcmask 130048   ;;  %vm922_vm5 = vcmask 261120  }
 0x254   : > { %v887_v6 = vsel %vm884_vm0, %v885_v3, %v886_v4  ;;  %v891_v7 = vsel %vm884_vm0, 0.0, %v885_v3  ;;  %v892_v8 = vsel %vm884_vm0, %v886_v4, 0.0  ;;  %3690 = vmatprep.subr.bf16.mxu0 %v5060_v0  ;;  %3694 = vmatprep.mubr.msk.bf16.mxu0 %vm5061_vm3, %v5060_v0  ;;  %vm950_vm6 = vcmask 392192   ;;  %v4341_v34 = vld [vmem:[#allocation8] sm:$0xff]   ;;  %v4342_v35 = vld [vmem:[#allocation8 + $0x8] sm:$0xff]   ;;  %v4343_v36 = vld [vmem:[#allocation8 + $0x10] sm:$0xff]  }
 0x255   : > { %v896_v10 = vrot.slane %v891_v7, 1  ;;  %v897_v11 = vrot.slane %v887_v6, 1  ;;  %v899_v12 = vrot.slane %v892_v8, 1  ;;  %v911_v13 = vrot.slane %v892_v8, 2  ;;  %3710 = vmatprep.mubr.msk.bf16.mxu1 %vm5061_vm3, %v5060_v0  ;;  %3699 = vmatpush3.bf16.msra.mxu1 %v4341_v34  ;;  %v4344_v37 = vld [vmem:[#allocation8 + $0x18] sm:$0xff]   ;;  %v4345_v43 = vld [vmem:[#allocation8 + $0x20] sm:$0xff]  }
 0x256   : > { %v908_v14 = vrot.slane %v891_v7, 2  ;;  %v909_v15 = vrot.slane %v887_v6, 2  ;;  %3700 = vmatprep.subr.bf16.mxu1 %v5060_v0  ;;  %v3481_v38 = vld [vmem:[#allocation7] ss:$0 sm:$0xff]  ;;  %vm1012_vm7 = vcmask 1042432   ;;  %v4346_v49 = vld [vmem:[#allocation8 + $0x28] sm:$0xff]  }
 0x257   : > { %v898_v17 = vsel %vm895_vm1, %v896_v10, %v897_v11  ;;  %v900_v18 = vsel %vm895_vm1, %v897_v11, %v899_v12  ;;  %3691 = vmatpush3.bf16.msra.mxu0 %v4339_v9  ;;  %vm1023_vm8 = vcmask 1044480   ;;  %vm1035_vm9 = vcmask 1041408   ;;  %s5064_s2 = smov 64   ;;  %s3480_s20 = sshll.u32 %s5678_s27, 6 }
 0x258   : > { %v4128_v19 = vpack.i.bf16 %v900_v18, %v898_v17  ;;  %v910_v20 = vsel %vm907_vm2, %v908_v14, %v909_v15  ;;  %v912_v21 = vsel %vm907_vm2, %v909_v15, %v911_v13  ;;  %3692 = vmatprep.subr.bf16.mxu0 %v5060_v0  ;;  %vm1049_vm10 = vcmask 523264   ;;  %v4347_v14 = vld [vmem:[#allocation11] sm:$0xff]   ;;  %v4348_v15 = vld [vmem:[#allocation11 + $0x8] sm:$0xff]   ;;  %s871_s1 = scalar_lea.vmem [#allocation32], %s3480_s20  ;;  %s3592_s22 = sshll.u32 %s6404_s8, 10 }
 0x259   : > { %v4133_v22 = vpack.i.bf16 %v912_v21, %v910_v20  ;;  %3701 = vmatpush3.bf16.msra.mxu1 %v4342_v35  ;;  %vm6352_vm11 = vcmask 785408   ;;  %s3192_s24 = sshll.u32 %s871_s1, 4  ;;  %s6435_s5 = sld [smem:[#allocation62_spill]]  ;;  %s6265_s24 = int_to_ptr.vmem [resolvable:$true] %s3192_s24 }
 0x25a   : > { %4129 = vrot.lane.b32.xlu0 %v4128_v19, %s5062_s6  ;;  %3702 = vmatprep.subr.bf16.mxu1 %v5060_v0  ;;  %s3179_s8 = scalar_lea.sflag [#allocation4], %s5678_s27  ;;  %s4931_s30 = scalar_lea.vmem %s6265_s24, 1024 }
 0x25b   : > { %3693 = vmatpush3.bf16.msra.mxu0 %v4340_v16  ;;  %v3486_v16 = vld [vmem:[#allocation10] ss:$0 sm:$0xff]  ;;  %p4932_p5 = scmp.ne.s32.totalorder %s6265_s24, %s4931_s30  ;;  %p6436_p7 = scmp.ne.s32.totalorder %s6397_s14, 0 }
 0x25c   : > { %3714 = vmatprep.subr.bf16.mxu0 %v5060_v0  ;;  %s5065_s6 = smov [#allocation32]  }
 0x25d   : > { %3703 = vmatpush3.bf16.msra.mxu1 %v4343_v36  ;;  %p4933_p6 = pnand %p4932_p5, %p6436_p7 }
 0x25e   : > { %4134 = vrot.lane.b32.xlu0 %v4133_v22, %s5063_s7  ;;  %3704 = vmatprep.subr.bf16.mxu1 %v5060_v0 }
 0x25f   : > { %s6263_s4 = scalar_lea.hbm %s6435_s5, %s3592_s22  ;;  %p4934_p9 = pneg %p4933_p6 }
 0x261   : > { %3705 = vmatpush3.bf16.msra.mxu1 %v4344_v37 }
 0x262   : > { %3706 = vmatprep.subr.bf16.mxu1 %v5060_v0 }
 0x265   : > { %3707 = vmatpush3.bf16.msra.mxu1 %v4345_v43 }
 0x266   : > { %3708 = vmatprep.subr.bf16.mxu1 %v5060_v0 }
 0x269   : > { %3709 = vmatpush3.bf16.msra.mxu1 %v4346_v49 }
 0x2cc   : > { %v4130_v23 = vpop.permute.xlu0 %4129 }
 0x2cd   : > { %v4132_v24 = vunpack.i.h.bf16 %v4130_v23  ;;  %v4131_v25 = vunpack.i.l.bf16 %v4130_v23 }
 0x2cf   : > { %v921_v29 = vsel %vm919_vm4, %v887_v6, %v4132_v24  ;;  %v920_v30 = vsel %vm919_vm4, %v891_v7, %v4131_v25 }
 0x2d0   : > { %v4135_v26 = vpop.permute.xlu0 %4134 }
 0x2d1   : > { %v4137_v27 = vunpack.i.h.bf16 %v4135_v26  ;;  %v4136_v28 = vunpack.i.l.bf16 %v4135_v26  ;;  %v4349_v26 = vld [vmem:[#allocation8 + $0x30] sm:$0xff]  }
 0x2d3   : > { %v923_v31 = vsel %vm922_vm5, %v920_v30, %v4136_v28  ;;  %v924_v32 = vsel %vm922_vm5, %v921_v29, %v4137_v27  ;;  %v4350_v27 = vld [vmem:[#allocation8 + $0x38] sm:$0xff]   ;;  %v4351_v28 = vld [vmem:[#allocation8 + $0x40] sm:$0xff]   ;;  %v4352_v29 = vld [vmem:[#allocation8 + $0x48] sm:$0xff]  }
 0x2d4   : > { %v925_v33 = vpack.c.bf16 %v924_v32, %v923_v31  ;;  %v4353_v30 = vld [vmem:[#allocation8 + $0x50] sm:$0xff]   ;;  %v3494_v31 = vld [vmem:[#allocation13] ss:$0 sm:$0xff] }
 0x2d6   : > { %3695 = vmatmul.mubr.msk.bf16.vlgmr.msra.gmra.mrb[0].mxu0 %vm950_vm6, %v925_v33 }
 0x2d7   : > { %3718 = vmatprep.mubr.msk.bf16.mxu0 %vm5061_vm3, %v5060_v0  ;;  %3715 = vmatpush3.bf16.msra.mxu0 %v4347_v14 }
 0x2d8   : > { %3716 = vmatprep.subr.bf16.mxu0 %v5060_v0 }
 0x2db   : > { %3717 = vmatpush3.bf16.msra.mxu0 %v4348_v15 }
 0x2dc   : > { %3722 = vmatprep.subr.bf16.mxu0 %v5060_v0 }
 0x3a9   : > { %v988_v39 = vpop.f32.mrb[0].mxu0 }
 0x3aa   : > { %v5749_v40 = vadd.f32 %v3481_v38, %v988_v39  ;;  %v3696_v41 = vpop.f32.mrb[1].mxu0 }
 0x3ab   : > { %v991_v42 = vpop.f32.mrb[2].mxu0 }
 0x3ac   : > { %v995_v44 = vmax.f32 %v5749_v40, 0.0  ;;  %v5752_v45 = vadd.f32 %v3481_v38, %v991_v42  ;;  %v3697_v46 = vpop.f32.mrb[3].mxu0  ;;  %v4354_v42 = vld [vmem:[#allocation8 + $0x58] sm:$0xff]  }
 0x3ae   : > { %v1013_v47 = vrot.slane %v995_v44, 5  ;;  %v996_v48 = vmax.f32 %v5752_v45, 0.0 }
 0x3b0   : > { %v1019_v50 = vsel %vm1012_vm7, 0.0, %v1013_v47  ;;  %v1014_v51 = vrot.slane %v996_v48, 5 }
 0x3b1   : > { %v1024_v54 = vrot.slane %v1019_v50, 3  ;;  %v1036_v59 = vrot.slane %v1019_v50, 6 }
 0x3b2   : > { %v1015_v52 = vsel %vm1012_vm7, %v1013_v47, %v1014_v51  ;;  %v1020_v53 = vsel %vm1012_vm7, %v1014_v51, 0.0 }
 0x3b3   : > { %v1027_v55 = vrot.slane %v1020_v53, 3  ;;  %v1039_v56 = vrot.slane %v1020_v53, 6  ;;  %v1025_v57 = vrot.slane %v1015_v52, 3  ;;  %v1037_v58 = vrot.slane %v1015_v52, 6 }
 0x3b5   : > { %v1026_v60 = vsel %vm1023_vm8, %v1024_v54, %v1025_v57  ;;  %v1028_v61 = vsel %vm1023_vm8, %v1025_v57, %v1027_v55  ;;  %v1038_v63 = vsel %vm1035_vm9, %v1036_v59, %v1037_v58  ;;  %v1040_v1 = vsel %vm1035_vm9, %v1037_v58, %v1039_v56 }
 0x3b6   : > { %v4138_v62 = vpack.i.bf16 %v1028_v61, %v1026_v60  ;;  %v4143_v2 = vpack.i.bf16 %v1040_v1, %v1038_v63 }
 0x3b8   : > { %4139 = vrot.lane.b32.xlu1 %v4138_v62, %s5063_s7 }
 0x3bc   : > { %4144 = vrot.lane.b32.xlu1 %v4143_v2, %s5064_s2 }
 0x42a   : > { %v4140_v3 = vpop.permute.xlu1 %4139 }
 0x42b   : > { %v4142_v4 = vunpack.i.h.bf16 %v4140_v3  ;;  %v4141_v5 = vunpack.i.l.bf16 %v4140_v3 }
 0x42d   : > { %v1048_v9 = vsel %vm922_vm5, %v1015_v52, %v4142_v4  ;;  %v1047_v10 = vsel %vm922_vm5, %v1019_v50, %v4141_v5 }
 0x42e   : > { %v4145_v6 = vpop.permute.xlu1 %4144 }
 0x42f   : > { %v4147_v7 = vunpack.i.h.bf16 %v4145_v6  ;;  %v4146_v8 = vunpack.i.l.bf16 %v4145_v6 }
 0x431   : > { %v1050_v11 = vsel %vm1049_vm10, %v1047_v10, %v4146_v8  ;;  %v1051_v12 = vsel %vm1049_vm10, %v1048_v9, %v4147_v7  ;;  %v4355_v8 = vld [vmem:[#allocation11 + $0x10] sm:$0xff]   ;;  %v4356_v9 = vld [vmem:[#allocation11 + $0x18] sm:$0xff]  }
 0x432   : > { %v1052_v13 = vpack.c.bf16 %v1051_v12, %v1050_v11  ;;  %v3498_v10 = vld [vmem:[#allocation10 + $0x1] ss:$0 sm:$0xff] }
 0x434   : > { %3711 = vmatmul.mubr.msk.bf16.vlgmr.msra.gmra.mrb[0].mxu1 %vm6352_vm11, %v1052_v13 }
 0x507   : > { %v1133_v17 = vpop.f32.mrb[0].mxu1 }
 0x508   : > { %v1134_v18 = vadd.f32 %v3486_v16, %v1133_v17  ;;  %v3712_v19 = vpop.f32.mrb[1].mxu1 }
 0x509   : > { %v1136_v20 = vpop.f32.mrb[2].mxu1 }
 0x50a   : > { %v1137_v21 = vadd.f32 %v3486_v16, %v1136_v20  ;;  %v3713_v22 = vpop.f32.mrb[3].mxu1  ;;  %v1140_v23 = vmax.f32 %v1134_v18, 0.0  ;;  %v1428_v20 = vlaneseq }
 0x50c   : > { %v1141_v24 = vmax.f32 %v1137_v21, 0.0  ;;  %v5813_v21 = vshrl.u32 %v1428_v20, 7  ;;  %v1434_v22 = vand.u32 127, %v1428_v20 }
 0x50e   : > { %v1142_v25 = vpack.c.bf16 %v1141_v24, %v1140_v23  ;;  %v1430_v23 = vadd.s32 8, %v5813_v21  ;;  %v5816_v24 = vmul.u32 2, %v1434_v22 }
 0x510   : > { %3719 = vmatmul.mubr.msk.bf16.vlgmr.msra.gmra.mrb[4].mxu0 %vm922_vm5, %v1142_v25  ;;  %v1436_v25 = vsub.s32 %v5813_v21, %v5816_v24 }
 0x511   : > { %3734 = vmatprep.mubr.msk.bf16.mxu0 %vm5061_vm3, %v5060_v0  ;;  %3723 = vmatpush3.bf16.msra.mxu0 %v4349_v26  ;;  %v1437_v26 = vsub.s32 %v1430_v23, %v5816_v24 }
 0x512   : > { %3724 = vmatprep.subr.bf16.mxu0 %v5060_v0  ;;  %vm1440_vm12 = vcmp.ge.s32.totalorder %v1436_v25, 0  ;;  %vm1444_vm14 = vcmp.le.s32.totalorder %v1436_v25, 1 }
 0x513   : > { %vm1441_vm13 = vcmp.ge.s32.totalorder %v1437_v26, 0  ;;  %vm1445_vm15 = vcmp.le.s32.totalorder %v1437_v26, 1 }
 0x514   : > { %vm1449_vm6 = vmand %vm1441_vm13, %vm1445_vm15 }
 0x515   : > { %3725 = vmatpush3.bf16.msra.mxu0 %v4350_v27 }
 0x516   : > { %3726 = vmatprep.subr.bf16.mxu0 %v5060_v0 }
 0x519   : > { %3727 = vmatpush3.bf16.msra.mxu0 %v4351_v28  ;;  %v1453_v28 = vsel %vm1449_vm6, 1.0, %v5060_v0 }
 0x51a   : > { %3728 = vmatprep.subr.bf16.mxu0 %v5060_v0 }
 0x51d   : > { %3729 = vmatpush3.bf16.msra.mxu0 %v4352_v29 }
 0x51e   : > { %3730 = vmatprep.subr.bf16.mxu0 %v5060_v0 }
 0x521   : > { %3731 = vmatpush3.bf16.msra.mxu0 %v4353_v30  ;;  %v1431_v30 = vadd.s32 16, %v5813_v21 }
 0x522   : > { %3732 = vmatprep.subr.bf16.mxu0 %v5060_v0 }
 0x525   : > { %3733 = vmatpush3.bf16.msra.mxu0 %v4354_v42 }
 0x526   : > { %3738 = vmatprep.subr.bf16.mxu0 %v5060_v0 }
 0x5e3   : > { %v1203_v32 = vpop.f32.mrb[4].mxu0 }
 0x5e4   : > { %v1204_v33 = vadd.f32 %v3494_v31, %v1203_v32  ;;  %v3720_v34 = vpop.f32.mrb[5].mxu0  ;;  %v1438_v32 = vsub.s32 %v1431_v30, %v5816_v24 }
 0x5e5   : > { %v1206_v35 = vpop.f32.mrb[6].mxu0  ;;  %v3506_v34 = vld [vmem:[#allocation13 + $0x1] ss:$0 sm:$0xff] }
 0x5e6   : > { %v5786_v36 = vadd.f32 %v1204_v33, %v995_v44  ;;  %v1207_v37 = vadd.f32 %v3494_v31, %v1206_v35  ;;  %v3721_v38 = vpop.f32.mrb[7].mxu0  ;;  %v1432_v31 = vadd.s32 24, %v5813_v21  ;;  %vm1446_vm13 = vcmp.le.s32.totalorder %v1438_v32, 1 }
 0x5e8   : > { %v1212_v39 = vmax.f32 %v5786_v36, 0.0  ;;  %v5791_v41 = vadd.f32 %v1207_v37, %v996_v48  ;;  %v1439_v33 = vsub.s32 %v1432_v31, %v5816_v24 }
 0x5ea   : > { %v1231_v43 = vrot.slane %v1212_v39, 7  ;;  %v1213_v46 = vmax.f32 %v5791_v41, 0.0  ;;  %vm1447_vm15 = vcmp.le.s32.totalorder %v1439_v33, 1 }
 0x5ec   : > { %v1237_v47 = vsel %vm884_vm0, 0.0, %v1231_v43  ;;  %v1232_v40 = vrot.slane %v1213_v46, 7 }
 0x5ed   : > { %v1241_v44 = vrot.slane %v1237_v47, 1  ;;  %v1252_v49 = vrot.slane %v1237_v47, 2 }
 0x5ee   : > { %v1233_v50 = vsel %vm884_vm0, %v1231_v43, %v1232_v40  ;;  %v1238_v51 = vsel %vm884_vm0, %v1232_v40, 0.0 }
 0x5ef   : > { %v1244_v52 = vrot.slane %v1238_v51, 1  ;;  %v1255_v45 = vrot.slane %v1238_v51, 2  ;;  %v1253_v48 = vrot.slane %v1233_v50, 2  ;;  %v1242_v53 = vrot.slane %v1233_v50, 1  ;;  %v4357_v51 = vld [vmem:[#allocation14] sm:$0xff]  }
 0x5f1   : > { %v1254_v54 = vsel %vm907_vm2, %v1252_v49, %v1253_v48  ;;  %v1256_v55 = vsel %vm907_vm2, %v1253_v48, %v1255_v45  ;;  %v1243_v56 = vsel %vm895_vm1, %v1241_v44, %v1242_v53  ;;  %v1245_v57 = vsel %vm895_vm1, %v1242_v53, %v1244_v52  ;;  %v4358_v52 = vld [vmem:[#allocation14 + $0x8] sm:$0xff]  }
 0x5f2   : > { %v4153_v58 = vpack.i.bf16 %v1256_v55, %v1254_v54  ;;  %v4148_v59 = vpack.i.bf16 %v1245_v57, %v1243_v56  ;;  %v4361_v55 = vld [vmem:[#allocation14 + $0x20] sm:$0xff]  }
 0x5f4   : > { %4154 = vrot.lane.b32.xlu1 %v4153_v58, %s5064_s2  ;;  %4149 = vrot.lane.b32.xlu0 %v4148_v59, %s5063_s7 }
 0x666   : > { %v4155_v60 = vpop.permute.xlu1 %4154  ;;  %v4150_v61 = vpop.permute.xlu0 %4149 }
 0x667   : > { %v4157_v62 = vunpack.i.h.bf16 %v4155_v60  ;;  %v4156_v63 = vunpack.i.l.bf16 %v4155_v60  ;;  %v4152_v1 = vunpack.i.h.bf16 %v4150_v61  ;;  %v4151_v2 = vunpack.i.l.bf16 %v4150_v61 }
 0x669   : > { %v1264_v3 = vsel %vm922_vm5, %v1233_v50, %v4152_v1  ;;  %v1263_v4 = vsel %vm922_vm5, %v1237_v47, %v4151_v2 }
 0x66a   : > { %v1266_v5 = vsel %vm1049_vm10, %v1264_v3, %v4157_v62  ;;  %v1265_v6 = vsel %vm1049_vm10, %v1263_v4, %v4156_v63  ;;  %v4362_v3 = vld [vmem:[#allocation14 + $0x28] sm:$0xff]  }
 0x66b   : > { %v1267_v7 = vpack.c.bf16 %v1266_v5, %v1265_v6 }
 0x66d   : > { %3735 = vmatmul.mubr.msk.bf16.vlgmr.msra.gmra.mrb[8].mxu0 %vm6352_vm11, %v1267_v7 }
 0x66e   : > { %3742 = vmatprep.mubr.msk.bf16.mxu0 %vm5061_vm3, %v5060_v0  ;;  %3739 = vmatpush3.bf16.msra.mxu0 %v4355_v8  ;;  %vm1448_vm3 = vmand %vm1440_vm12, %vm1444_vm14  ;;  %vm1442_vm12 = vcmp.ge.s32.totalorder %v1438_v32, 0  ;;  %vm1443_vm14 = vcmp.ge.s32.totalorder %v1439_v33, 0 }
 0x66f   : > { %3740 = vmatprep.subr.bf16.mxu0 %v5060_v0  ;;  %v1452_v27 = vsel %vm1448_vm3, 1.0, %v5060_v0  ;;  %vm1450_vm3 = vmand %vm1442_vm12, %vm1446_vm13 }
 0x670   : > { %v5823_v29 = vpack.c.bf16 %v1453_v28, %v1452_v27  ;;  %vm1451_vm6 = vmand %vm1443_vm14, %vm1447_vm15  ;;  %v1454_v40 = vsel %vm1450_vm3, 1.0, %v5060_v0 }
 0x671   : > { %v1455_v44 = vsel %vm1451_vm6, 1.0, %v5060_v0 }
 0x672   : > { %3741 = vmatpush3.bf16.msra.mxu0 %v4356_v9  ;;  %3748 = vmatprep.mubr.msk.bf16.mxu1 %vm919_vm4, %v5823_v29  ;;  %v5835_v50 = vpack.c.bf16 %v1455_v44, %v1454_v40 }
 0x740   : > { %v1347_v11 = vpop.f32.mrb[8].mxu0 }
 0x741   : > { %v1348_v12 = vadd.f32 %v3498_v10, %v1347_v11  ;;  %v3736_v13 = vpop.f32.mrb[9].mxu0 }
 0x742   : > { %v1350_v14 = vpop.f32.mrb[10].mxu0 }
 0x743   : > { %v1351_v15 = vadd.f32 %v3498_v10, %v1350_v14  ;;  %v3737_v16 = vpop.f32.mrb[11].mxu0  ;;  %v1354_v17 = vmax.f32 %v1348_v12, 0.0 }
 0x745   : > { %v1355_v18 = vmax.f32 %v1351_v15, 0.0 }
 0x747   : > { %v1356_v19 = vpack.c.bf16 %v1355_v18, %v1354_v17 }
 0x749   : > { %3743 = vmatmul.mubr.msk.bf16.vlgmr.msra.gmra.mrb[12].mxu0 %vm922_vm5, %v1356_v19 }
 0x81c   : > { %v1419_v35 = vpop.f32.mrb[12].mxu0 }
 0x81d   : > { %v1420_v37 = vadd.f32 %v3506_v34, %v1419_v35  ;;  %v3744_v38 = vpop.f32.mrb[13].mxu0 }
 0x81e   : > { %v1422_v39 = vpop.f32.mrb[14].mxu0 }
 0x81f   : > { %v1423_v42 = vadd.f32 %v3506_v34, %v1422_v39  ;;  %v3745_v43 = vpop.f32.mrb[15].mxu0  ;;  %v1426_v46 = vadd.f32 %v1420_v37, %v5786_v36  ;;  %v4359_v36 = vld [vmem:[#allocation14 + $0x10] sm:$0xff]  }
 0x821   : > { %v1427_v47 = vadd.f32 %v1423_v42, %v5791_v41  ;;  %v4360_v41 = vld [vmem:[#allocation14 + $0x18] sm:$0xff]  }
 0x823   : > { %v1458_v49 = vpack.c.bf16 %v1427_v47, %v1426_v46 }
 0x825   : > { %3746 = vmatprep.subr.bf16.mxu1 %v1458_v49 }
 0x826   : > { %3747 = vmatpush3.bf16.msra.mxu1 %v1458_v49 }
 0x827   : > { %3752 = vmatprep.subr.bf16.mxu1 %v4357_v51 }
 0x829   : > { %3749 = vmatmul.mubr.msk.bf16.vlgmr.msra.gmra.mrb[4].mxu1 %vm919_vm4, %v5835_v50 }
 0x82a   : > { %3753 = vmatpush3.bf16.msra.mxu1 %v4357_v51 }
 0x82b   : > { %3754 = vmatprep.subr.bf16.mxu1 %v4358_v52 }
 0x82e   : > { %3755 = vmatpush3.bf16.msra.mxu1 %v4358_v52 }
 0x82f   : > { %3756 = vmatprep.subr.bf16.mxu1 %v4359_v36 }
 0x832   : > { %3757 = vmatpush3.bf16.msra.mxu1 %v4359_v36 }
 0x833   : > { %3758 = vmatprep.subr.bf16.mxu1 %v4360_v41 }
 0x836   : > { %3759 = vmatpush3.bf16.msra.mxu1 %v4360_v41 }
 0x837   : > { %3760 = vmatprep.subr.bf16.mxu1 %v4361_v55 }
 0x83a   : > { %3761 = vmatpush3.bf16.msra.mxu1 %v4361_v55  ;;  %v3512_v55 = vld [vmem:[#allocation16] ss:$0 sm:$0xff] }
 0x83b   : > { %3762 = vmatprep.subr.bf16.mxu1 %v4362_v3 }
 0x83e   : > { %3763 = vmatpush3.bf16.msra.mxu1 %v4362_v3 }
 0x8fc   : > { %v3750_v45 = vpop.f32.mrb[4].mxu1 }
 0x8fd   : > { %v1499_v48 = vpop.f32.mrb[5].mxu1  ;;  %v1534_v56 = vrot.slane %v3750_v45, 7  ;;  %v4363_v45 = vld [vmem:[#allocation17] sm:$0xff]  }
 0x8fe   : > { %v1531_v53 = vrot.slane %v1499_v48, 7  ;;  %v3751_v54 = vpop.f32.mrb[6].mxu1  ;;  %v4364_v48 = vld [vmem:[#allocation17 + $0x8] sm:$0xff]   ;;  %3768 = vmatprep.subr.bf16.mxu0 %v4363_v45 }
 0x8ff   : > { %v1536_v57 = vrot.slane %v3751_v54, 7  ;;  %v1502_v58 = vpop.f32.mrb[7].mxu1  ;;  %3769 = vmatpush3.bf16.msra.mxu0 %v4363_v45  ;;  %v4366_v54 = vld [vmem:[#allocation17 + $0x18] sm:$0xff]  }
 0x900   : > { %v1543_v59 = vsel %vm884_vm0, 0.0, %v1531_v53  ;;  %v1532_v60 = vrot.slane %v1502_v58, 7  ;;  %3770 = vmatprep.subr.bf16.mxu0 %v4364_v48 }
 0x901   : > { %v1537_v61 = vsel %vm884_vm0, %v1534_v56, %v1536_v57  ;;  %v1544_v62 = vsel %vm884_vm0, %v1536_v57, 0.0  ;;  %v1547_v63 = vrot.slane %v1543_v59, 1  ;;  %v1568_v13 = vrot.slane %v1543_v59, 2 }
 0x902   : > { %v1552_v1 = vrot.slane %v1537_v61, 1  ;;  %v1554_v2 = vrot.slane %v1544_v62, 1  ;;  %v1573_v4 = vrot.slane %v1537_v61, 2  ;;  %v1575_v5 = vrot.slane %v1544_v62, 2 }
 0x903   : > { %v1533_v6 = vsel %vm884_vm0, %v1531_v53, %v1532_v60  ;;  %v1535_v7 = vsel %vm884_vm0, %v1532_v60, %v1534_v56  ;;  %v4365_v53 = vld [vmem:[#allocation17 + $0x10] sm:$0xff]   ;;  %3771 = vmatpush3.bf16.msra.mxu0 %v4364_v48 }
 0x904   : > { %v1548_v8 = vrot.slane %v1533_v6, 1  ;;  %v1550_v9 = vrot.slane %v1535_v7, 1  ;;  %v1569_v10 = vrot.slane %v1533_v6, 2  ;;  %v1571_v11 = vrot.slane %v1535_v7, 2  ;;  %3772 = vmatprep.subr.bf16.mxu0 %v4365_v53 }
 0x905   : > { %v1555_v12 = vsel %vm895_vm1, %v1552_v1, %v1554_v2  ;;  %v1576_v20 = vsel %vm907_vm2, %v1573_v4, %v1575_v5 }
 0x906   : > { %v1553_v14 = vsel %vm895_vm1, %v1550_v9, %v1552_v1  ;;  %v1549_v15 = vsel %vm895_vm1, %v1547_v63, %v1548_v8  ;;  %v1551_v16 = vsel %vm895_vm1, %v1548_v8, %v1550_v9  ;;  %v1574_v19 = vsel %vm907_vm2, %v1571_v11, %v1573_v4  ;;  %v4367_v4 = vld [vmem:[#allocation17 + $0x20] sm:$0xff]  }
 0x907   : > { %v4163_v17 = vpack.i.bf16 %v1555_v12, %v1553_v14  ;;  %v4158_v18 = vpack.i.bf16 %v1551_v16, %v1549_v15  ;;  %v1570_v22 = vsel %vm907_vm2, %v1568_v13, %v1569_v10  ;;  %v1572_v23 = vsel %vm907_vm2, %v1569_v10, %v1571_v11  ;;  %3773 = vmatpush3.bf16.msra.mxu0 %v4365_v53  ;;  %v4368_v14 = vld [vmem:[#allocation17 + $0x28] sm:$0xff]  }
 0x908   : > { %v4173_v25 = vpack.i.bf16 %v1576_v20, %v1574_v19  ;;  %v4168_v26 = vpack.i.bf16 %v1572_v23, %v1570_v22  ;;  %3774 = vmatprep.subr.bf16.mxu0 %v4366_v54 }
 0x909   : > { %4164 = vrot.lane.b32.xlu1 %v4163_v17, %s5063_s7  ;;  %4159 = vrot.lane.b32.xlu0 %v4158_v18, %s5063_s7 }
 0x90b   : > { %3775 = vmatpush3.bf16.msra.mxu0 %v4366_v54 }
 0x90c   : > { %3776 = vmatprep.subr.bf16.mxu0 %v4367_v4 }
 0x90d   : > { %4174 = vrot.lane.b32.xlu1 %v4173_v25, %s5064_s2  ;;  %4169 = vrot.lane.b32.xlu0 %v4168_v26, %s5064_s2 }
 0x90f   : > { %3777 = vmatpush3.bf16.msra.mxu0 %v4367_v4 }
 0x910   : > { %3778 = vmatprep.subr.bf16.mxu0 %v4368_v14 }
 0x913   : > { %3779 = vmatpush3.bf16.msra.mxu0 %v4368_v14 }
 0x97b   : > { %v4165_v27 = vpop.permute.xlu1 %4164  ;;  %v4160_v28 = vpop.permute.xlu0 %4159 }
 0x97c   : > { %v4167_v30 = vunpack.i.h.bf16 %v4165_v27  ;;  %v4166_v31 = vunpack.i.l.bf16 %v4165_v27  ;;  %v4162_v32 = vunpack.i.h.bf16 %v4160_v28  ;;  %v4161_v33 = vunpack.i.l.bf16 %v4160_v28 }
 0x97e   : > { %v1592_v43 = vsel %vm922_vm5, %v1537_v61, %v4167_v30  ;;  %v1591_v46 = vsel %vm922_vm5, %v1535_v7, %v4166_v31  ;;  %v1590_v47 = vsel %vm922_vm5, %v1533_v6, %v4162_v32  ;;  %v1589_v40 = vsel %vm922_vm5, %v1543_v59, %v4161_v33 }
 0x97f   : > { %v4175_v34 = vpop.permute.xlu1 %4174  ;;  %v4170_v35 = vpop.permute.xlu0 %4169 }
 0x980   : > { %v4177_v37 = vunpack.i.h.bf16 %v4175_v34  ;;  %v4176_v38 = vunpack.i.l.bf16 %v4175_v34  ;;  %v4172_v39 = vunpack.i.h.bf16 %v4170_v35  ;;  %v4171_v42 = vunpack.i.l.bf16 %v4170_v35 }
 0x982   : > { %v1595_v44 = vsel %vm1049_vm10, %v1591_v46, %v4176_v38  ;;  %v1596_v49 = vsel %vm1049_vm10, %v1592_v43, %v4177_v37  ;;  %v1593_v51 = vsel %vm1049_vm10, %v1589_v40, %v4171_v42  ;;  %v1594_v52 = vsel %vm1049_vm10, %v1590_v47, %v4172_v39 }
 0x983   : > { %v1598_v36 = vpack.c.bf16 %v1596_v49, %v1595_v44  ;;  %v1597_v41 = vpack.c.bf16 %v1594_v52, %v1593_v51 }
 0x985   : > { %3764 = vmatprep.mubr.msk.bf16.mxu1 %vm6352_vm11, %v1597_v41 }
 0x986   : > { %3765 = vmatmul.mubr.msk.bf16.vlgmr.msra.gmra.mrb[8].mxu1 %vm6352_vm11, %v1598_v36 }
 0xa59   : > { %v3766_v56 = vpop.f32.mrb[8].mxu1 }
 0xa5a   : > { %v5866_v57 = vadd.f32 %v3766_v56, %v3512_v55  ;;  %v1681_v58 = vpop.f32.mrb[9].mxu1 }
 0xa5b   : > { %v5868_v59 = vadd.f32 %v3512_v55, %v1681_v58  ;;  %v3767_v60 = vpop.f32.mrb[10].mxu1 }
 0xa5c   : > { %v1698_v61 = vmax.f32 %v5866_v57, 0.0  ;;  %v5871_v62 = vadd.f32 %v3767_v60, %v3512_v55  ;;  %v1684_v63 = vpop.f32.mrb[11].mxu1 }
 0xa5d   : > { %v1696_v1 = vmax.f32 %v5868_v59, 0.0  ;;  %v5874_v2 = vadd.f32 %v3512_v55, %v1684_v63 }
 0xa5e   : > { %v1699_v3 = vmax.f32 %v5871_v62, 0.0  ;;  %v1720_v7 = vrot.slane %v1698_v61, 5 }
 0xa5f   : > { %v1717_v5 = vrot.slane %v1696_v1, 5  ;;  %v1697_v6 = vmax.f32 %v5874_v2, 0.0 }
 0xa60   : > { %v1722_v8 = vrot.slane %v1699_v3, 5 }
 0xa61   : > { %v1729_v9 = vsel %vm1012_vm7, 0.0, %v1717_v5  ;;  %v1718_v10 = vrot.slane %v1697_v6, 5  ;;  %v4370_v6 = vld [vmem:[#allocation20 + $0x8] sm:$0xff]  }
 0xa62   : > { %v1733_v11 = vrot.slane %v1729_v9, 3  ;;  %v1723_v12 = vsel %vm1012_vm7, %v1720_v7, %v1722_v8  ;;  %v1730_v13 = vsel %vm1012_vm7, %v1722_v8, 0.0  ;;  %v1754_v25 = vrot.slane %v1729_v9, 6 }
 0xa63   : > { %v1740_v15 = vrot.slane %v1730_v13, 3  ;;  %v1761_v16 = vrot.slane %v1730_v13, 6  ;;  %v1719_v17 = vsel %vm1012_vm7, %v1717_v5, %v1718_v10  ;;  %v1721_v18 = vsel %vm1012_vm7, %v1718_v10, %v1720_v7  ;;  %v4369_v5 = vld [vmem:[#allocation20] sm:$0xff]   ;;  %v3521_v7 = vld [vmem:[#allocation19] ss:$0 sm:$0xff] }
 0xa64   : > { %v1736_v19 = vrot.slane %v1721_v18, 3  ;;  %v1738_v20 = vrot.slane %v1723_v12, 3  ;;  %v1734_v22 = vrot.slane %v1719_v17, 3  ;;  %v1757_v23 = vrot.slane %v1721_v18, 6  ;;  %3784 = vmatprep.subr.bf16.mxu1 %v4369_v5 }
 0xa65   : > { %v1759_v26 = vrot.slane %v1723_v12, 6  ;;  %v1755_v27 = vrot.slane %v1719_v17, 6  ;;  %3785 = vmatpush3.bf16.msra.mxu1 %v4369_v5 }
 0xa66   : > { %v1739_v28 = vsel %vm1023_vm8, %v1736_v19, %v1738_v20  ;;  %v1741_v30 = vsel %vm1023_vm8, %v1738_v20, %v1740_v15  ;;  %v1735_v31 = vsel %vm1023_vm8, %v1733_v11, %v1734_v22  ;;  %v1737_v32 = vsel %vm1023_vm8, %v1734_v22, %v1736_v19  ;;  %3786 = vmatprep.subr.bf16.mxu1 %v4370_v6 }
 0xa67   : > { %v4183_v33 = vpack.i.bf16 %v1741_v30, %v1739_v28  ;;  %v4178_v34 = vpack.i.bf16 %v1737_v32, %v1735_v31  ;;  %v1760_v35 = vsel %vm1035_vm9, %v1757_v23, %v1759_v26  ;;  %v1762_v37 = vsel %vm1035_vm9, %v1759_v26, %v1761_v16  ;;  %v4373_v26 = vld [vmem:[#allocation17 + $0x40] sm:$0xff]  }
 0xa68   : > { %v1756_v38 = vsel %vm1035_vm9, %v1754_v25, %v1755_v27  ;;  %v1758_v39 = vsel %vm1035_vm9, %v1755_v27, %v1757_v23  ;;  %v4193_v42 = vpack.i.bf16 %v1762_v37, %v1760_v35  ;;  %v4371_v23 = vld [vmem:[#allocation17 + $0x30] sm:$0xff]   ;;  %v4372_v25 = vld [vmem:[#allocation17 + $0x38] sm:$0xff]   ;;  %v4374_v27 = vld [vmem:[#allocation17 + $0x48] sm:$0xff]  }
 0xa69   : > { %4184 = vrot.lane.b32.xlu1 %v4183_v33, %s5063_s7  ;;  %4179 = vrot.lane.b32.xlu0 %v4178_v34, %s5063_s7  ;;  %v4188_v43 = vpack.i.bf16 %v1758_v39, %v1756_v38  ;;  %v3530_v28 = vld [vmem:[#allocation22] ss:$0 sm:$0xff] }
 0xa6a   : > { %3787 = vmatpush3.bf16.msra.mxu1 %v4370_v6  ;;  %3792 = vmatprep.subr.bf16.mxu0 %v4371_v23 }
 0xa6d   : > { %4194 = vrot.lane.b32.xlu1 %v4193_v42, %s5064_s2  ;;  %4189 = vrot.lane.b32.xlu0 %v4188_v43, %s5064_s2 }
 0xadb   : > { %v4185_v46 = vpop.permute.xlu1 %4184  ;;  %v4180_v47 = vpop.permute.xlu0 %4179 }
 0xadc   : > { %v4187_v40 = vunpack.i.h.bf16 %v4185_v46  ;;  %v4186_v44 = vunpack.i.l.bf16 %v4185_v46  ;;  %v4182_v49 = vunpack.i.h.bf16 %v4180_v47  ;;  %v4181_v51 = vunpack.i.l.bf16 %v4180_v47 }
 0xade   : > { %v1778_v54 = vsel %vm922_vm5, %v1723_v12, %v4187_v40  ;;  %v1777_v55 = vsel %vm922_vm5, %v1721_v18, %v4186_v44  ;;  %v1776_v56 = vsel %vm922_vm5, %v1719_v17, %v4182_v49  ;;  %v1775_v58 = vsel %vm922_vm5, %v1729_v9, %v4181_v51 }
 0xadf   : > { %v4195_v52 = vpop.permute.xlu1 %4194  ;;  %v4190_v36 = vpop.permute.xlu0 %4189 }
 0xae0   : > { %v4197_v41 = vunpack.i.h.bf16 %v4195_v52  ;;  %v4196_v45 = vunpack.i.l.bf16 %v4195_v52  ;;  %v4192_v48 = vunpack.i.h.bf16 %v4190_v36  ;;  %v4191_v53 = vunpack.i.l.bf16 %v4190_v36 }
 0xae2   : > { %v1781_v60 = vsel %vm1049_vm10, %v1777_v55, %v4196_v45  ;;  %v1782_v61 = vsel %vm1049_vm10, %v1778_v54, %v4197_v41  ;;  %v1779_v63 = vsel %vm1049_vm10, %v1775_v58, %v4191_v53  ;;  %v1780_v1 = vsel %vm1049_vm10, %v1776_v56, %v4192_v48 }
 0xae3   : > { %v1784_v3 = vpack.c.bf16 %v1782_v61, %v1781_v60  ;;  %v1783_v4 = vpack.c.bf16 %v1780_v1, %v1779_v63 }
 0xae5   : > { %3780 = vmatprep.mubr.msk.bf16.mxu0 %vm6352_vm11, %v1783_v4 }
 0xae6   : > { %3781 = vmatmul.mubr.msk.bf16.vlgmr.msra.gmra.mrb[16].mxu0 %vm6352_vm11, %v1784_v3 }
 0xae7   : > { %3793 = vmatpush3.bf16.msra.mxu0 %v4371_v23 }
 0xae8   : > { %3794 = vmatprep.subr.bf16.mxu0 %v4372_v25 }
 0xaeb   : > { %3795 = vmatpush3.bf16.msra.mxu0 %v4372_v25 }
 0xaec   : > { %3796 = vmatprep.subr.bf16.mxu0 %v4373_v26 }
 0xaef   : > { %3797 = vmatpush3.bf16.msra.mxu0 %v4373_v26 }
 0xaf0   : > { %3798 = vmatprep.subr.bf16.mxu0 %v4374_v27 }
 0xaf3   : > { %3799 = vmatpush3.bf16.msra.mxu0 %v4374_v27 }
 0xbb9   : > { %v3782_v8 = vpop.f32.mrb[16].mxu0 }
 0xbba   : > { %v1876_v9 = vadd.f32 %v3782_v8, %v3521_v7  ;;  %v1867_v10 = vpop.f32.mrb[17].mxu0 }
 0xbbb   : > { %v1868_v11 = vadd.f32 %v3521_v7, %v1867_v10  ;;  %v3783_v12 = vpop.f32.mrb[18].mxu0 }
 0xbbc   : > { %v1879_v13 = vadd.f32 %v3783_v12, %v3521_v7  ;;  %v1870_v14 = vpop.f32.mrb[19].mxu0  ;;  %v1884_v16 = vmax.f32 %v1876_v9, 0.0 }
 0xbbd   : > { %v1871_v15 = vadd.f32 %v3521_v7, %v1870_v14  ;;  %v1882_v18 = vmax.f32 %v1868_v11, 0.0 }
 0xbbe   : > { %v1885_v17 = vmax.f32 %v1879_v13, 0.0 }
 0xbbf   : > { %v1883_v19 = vmax.f32 %v1871_v15, 0.0 }
 0xbc0   : > { %v1887_v20 = vpack.c.bf16 %v1885_v17, %v1884_v16 }
 0xbc1   : > { %v1886_v22 = vpack.c.bf16 %v1883_v19, %v1882_v18 }
 0xbc3   : > { %3788 = vmatprep.mubr.msk.bf16.mxu1 %vm922_vm5, %v1886_v22 }
 0xbc4   : > { %3789 = vmatmul.mubr.msk.bf16.vlgmr.msra.gmra.mrb[12].mxu1 %vm922_vm5, %v1887_v20 }
 0xc97   : > { %v3790_v30 = vpop.f32.mrb[12].mxu1 }
 0xc98   : > { %v1960_v31 = vadd.f32 %v3790_v30, %v3530_v28  ;;  %v1951_v32 = vpop.f32.mrb[13].mxu1 }
 0xc99   : > { %v1952_v33 = vadd.f32 %v3530_v28, %v1951_v32  ;;  %v3791_v34 = vpop.f32.mrb[14].mxu1 }
 0xc9a   : > { %v5908_v35 = vadd.f32 %v1960_v31, %v5866_v57  ;;  %v1963_v37 = vadd.f32 %v3791_v34, %v3530_v28  ;;  %v1954_v38 = vpop.f32.mrb[15].mxu1  ;;  %v4375_v57 = vld [vmem:[#allocation17 + $0x50] sm:$0xff]  }
 0xc9b   : > { %v5911_v39 = vadd.f32 %v1952_v33, %v5868_v59  ;;  %v1955_v42 = vadd.f32 %v3530_v28, %v1954_v38  ;;  %3800 = vmatprep.subr.bf16.mxu0 %v4375_v57 }
 0xc9c   : > { %v1972_v43 = vmax.f32 %v5908_v35, 0.0  ;;  %v5915_v46 = vadd.f32 %v1963_v37, %v5871_v62  ;;  %3801 = vmatpush3.bf16.msra.mxu0 %v4375_v57 }
 0xc9d   : > { %v1970_v47 = vmax.f32 %v5911_v39, 0.0  ;;  %v5919_v40 = vadd.f32 %v1955_v42, %v5874_v2  ;;  %v4376_v2 = vld [vmem:[#allocation17 + $0x58] sm:$0xff]  }
 0xc9e   : > { %v1973_v44 = vmax.f32 %v5915_v46, 0.0  ;;  %v1996_v52 = vrot.slane %v1972_v43, 7  ;;  %3802 = vmatprep.subr.bf16.mxu0 %v4376_v2 }
 0xc9f   : > { %v1993_v49 = vrot.slane %v1970_v47, 7  ;;  %v1971_v51 = vmax.f32 %v5919_v40, 0.0 }
 0xca0   : > { %v1998_v59 = vrot.slane %v1973_v44, 7  ;;  %3803 = vmatpush3.bf16.msra.mxu0 %v4376_v2 }
 0xca1   : > { %v2005_v36 = vsel %vm884_vm0, 0.0, %v1993_v49  ;;  %v1994_v41 = vrot.slane %v1971_v51, 7  ;;  %v4378_v51 = vld [vmem:[#allocation20 + $0x18] sm:$0xff]  }
 0xca2   : > { %v2009_v62 = vrot.slane %v2005_v36, 1  ;;  %v1999_v45 = vsel %vm884_vm0, %v1996_v52, %v1998_v59  ;;  %v2006_v48 = vsel %vm884_vm0, %v1998_v59, 0.0  ;;  %v2030_v1 = vrot.slane %v2005_v36, 2 }
 0xca3   : > { %v2016_v53 = vrot.slane %v2006_v48, 1  ;;  %v2037_v54 = vrot.slane %v2006_v48, 2  ;;  %v1995_v55 = vsel %vm884_vm0, %v1993_v49, %v1994_v41  ;;  %v1997_v56 = vsel %vm884_vm0, %v1994_v41, %v1996_v52  ;;  %v4377_v49 = vld [vmem:[#allocation20 + $0x10] sm:$0xff]   ;;  %v3535_v52 = vld [vmem:[#allocation19 + $0x1] ss:$0 sm:$0xff] }
 0xca4   : > { %v2012_v58 = vrot.slane %v1997_v56, 1  ;;  %v2014_v60 = vrot.slane %v1999_v45, 1  ;;  %v2010_v61 = vrot.slane %v1995_v55, 1  ;;  %v2033_v63 = vrot.slane %v1997_v56, 2  ;;  %3808 = vmatprep.subr.bf16.mxu1 %v4377_v49 }
 0xca5   : > { %v2035_v3 = vrot.slane %v1999_v45, 2  ;;  %v2031_v4 = vrot.slane %v1995_v55, 2  ;;  %3809 = vmatpush3.bf16.msra.mxu1 %v4377_v49 }
 0xca6   : > { %v2015_v5 = vsel %vm895_vm1, %v2012_v58, %v2014_v60  ;;  %v2017_v6 = vsel %vm895_vm1, %v2014_v60, %v2016_v53  ;;  %v2011_v7 = vsel %vm895_vm1, %v2009_v62, %v2010_v61  ;;  %v2013_v8 = vsel %vm895_vm1, %v2010_v61, %v2012_v58  ;;  %3810 = vmatprep.subr.bf16.mxu1 %v4378_v51 }
 0xca7   : > { %v4203_v9 = vpack.i.bf16 %v2017_v6, %v2015_v5  ;;  %v4198_v10 = vpack.i.bf16 %v2013_v8, %v2011_v7  ;;  %v2036_v11 = vsel %vm907_vm2, %v2033_v63, %v2035_v3  ;;  %v2038_v12 = vsel %vm907_vm2, %v2035_v3, %v2037_v54 }
 0xca8   : > { %v2032_v13 = vsel %vm907_vm2, %v2030_v1, %v2031_v4  ;;  %v2034_v14 = vsel %vm907_vm2, %v2031_v4, %v2033_v63  ;;  %v4213_v15 = vpack.i.bf16 %v2038_v12, %v2036_v11  ;;  %v2248_v63 = vadd.s32 32, %v5813_v21  ;;  %v3544_v1 = vld [vmem:[#allocation22 + $0x1] ss:$0 sm:$0xff] }
 0xca9   : > { %4204 = vrot.lane.b32.xlu1 %v4203_v9, %s5063_s7  ;;  %4199 = vrot.lane.b32.xlu0 %v4198_v10, %s5063_s7  ;;  %v4208_v16 = vpack.i.bf16 %v2034_v14, %v2032_v13  ;;  %v2249_v3 = vadd.s32 40, %v5813_v21  ;;  %v2250_v14 = vadd.s32 48, %v5813_v21 }
 0xcaa   : > { %3811 = vmatpush3.bf16.msra.mxu1 %v4378_v51  ;;  %v2252_v7 = vsub.s32 %v2248_v63, %v5816_v24 }
 0xcab   : > { %v2253_v10 = vsub.s32 %v2249_v3, %v5816_v24 }
 0xcac   : > { %vm2256_vm4 = vcmp.ge.s32.totalorder %v2252_v7, 0  ;;  %vm2260_vm7 = vcmp.le.s32.totalorder %v2252_v7, 1 }
 0xcad   : > { %4214 = vrot.lane.b32.xlu1 %v4213_v15, %s5064_s2  ;;  %4209 = vrot.lane.b32.xlu0 %v4208_v16, %s5064_s2  ;;  %vm2257_vm8 = vcmp.ge.s32.totalorder %v2253_v10, 0  ;;  %vm2261_vm9 = vcmp.le.s32.totalorder %v2253_v10, 1  ;;  %vm2264_vm12 = vmand %vm2256_vm4, %vm2260_vm7 }
 0xcae   : > { %vm2265_vm13 = vmand %vm2257_vm8, %vm2261_vm9 }
 0xd1b   : > { %v4205_v17 = vpop.permute.xlu1 %4204  ;;  %v4200_v18 = vpop.permute.xlu0 %4199 }
 0xd1c   : > { %v4207_v19 = vunpack.i.h.bf16 %v4205_v17  ;;  %v4206_v20 = vunpack.i.l.bf16 %v4205_v17  ;;  %v4202_v22 = vunpack.i.h.bf16 %v4200_v18  ;;  %v4201_v23 = vunpack.i.l.bf16 %v4200_v18 }
 0xd1e   : > { %v2054_v32 = vsel %vm922_vm5, %v1999_v45, %v4207_v19  ;;  %v2053_v33 = vsel %vm922_vm5, %v1997_v56, %v4206_v20  ;;  %v2052_v34 = vsel %vm922_vm5, %v1995_v55, %v4202_v22  ;;  %v2051_v37 = vsel %vm922_vm5, %v2005_v36, %v4201_v23 }
 0xd1f   : > { %v4215_v25 = vpop.permute.xlu1 %4214  ;;  %v4210_v26 = vpop.permute.xlu0 %4209  ;;  %v2254_v22 = vsub.s32 %v2250_v14, %v5816_v24 }
 0xd20   : > { %v4217_v27 = vunpack.i.h.bf16 %v4215_v25  ;;  %v4216_v28 = vunpack.i.l.bf16 %v4215_v25  ;;  %v4212_v30 = vunpack.i.h.bf16 %v4210_v26  ;;  %v4211_v31 = vunpack.i.l.bf16 %v4210_v26  ;;  %v4379_v25 = vld [vmem:[#allocation23] sm:$0xff]   ;;  %v4380_v26 = vld [vmem:[#allocation23 + $0x8] sm:$0xff]  }
 0xd21   : > { %vm2258_vm14 = vcmp.ge.s32.totalorder %v2254_v22, 0  ;;  %vm2262_vm15 = vcmp.le.s32.totalorder %v2254_v22, 1 }
 0xd22   : > { %v2057_v38 = vsel %vm1049_vm10, %v2053_v33, %v4216_v28  ;;  %v2058_v42 = vsel %vm1049_vm10, %v2054_v32, %v4217_v27  ;;  %v2055_v43 = vsel %vm1049_vm10, %v2051_v37, %v4211_v31  ;;  %v2056_v47 = vsel %vm1049_vm10, %v2052_v34, %v4212_v30  ;;  %v4381_v27 = vld [vmem:[#allocation23 + $0x10] sm:$0xff]   ;;  %v4382_v30 = vld [vmem:[#allocation23 + $0x18] sm:$0xff]  }
 0xd23   : > { %v2060_v44 = vpack.c.bf16 %v2058_v42, %v2057_v38  ;;  %v2059_v57 = vpack.c.bf16 %v2056_v47, %v2055_v43 }
 0xd25   : > { %3804 = vmatprep.mubr.msk.bf16.mxu0 %vm6352_vm11, %v2059_v57  ;;  %v4383_v57 = vld [vmem:[#allocation23 + $0x20] sm:$0xff]  }
 0xd26   : > { %3805 = vmatmul.mubr.msk.bf16.vlgmr.msra.gmra.mrb[20].mxu0 %vm6352_vm11, %v2060_v44  ;;  %vm2266_vm11 = vmand %vm2258_vm14, %vm2262_vm15 }
 0xdf9   : > { %v3806_v59 = vpop.f32.mrb[20].mxu0 }
 0xdfa   : > { %v2152_v36 = vadd.f32 %v3806_v59, %v3535_v52  ;;  %v2143_v41 = vpop.f32.mrb[21].mxu0 }
 0xdfb   : > { %v2144_v62 = vadd.f32 %v3535_v52, %v2143_v41  ;;  %v3807_v45 = vpop.f32.mrb[22].mxu0 }
 0xdfc   : > { %v2155_v48 = vadd.f32 %v3807_v45, %v3535_v52  ;;  %v2146_v2 = vpop.f32.mrb[23].mxu0  ;;  %v2160_v54 = vmax.f32 %v2152_v36, 0.0 }
 0xdfd   : > { %v2147_v53 = vadd.f32 %v3535_v52, %v2146_v2  ;;  %v2158_v56 = vmax.f32 %v2144_v62, 0.0 }
 0xdfe   : > { %v2161_v55 = vmax.f32 %v2155_v48, 0.0 }
 0xdff   : > { %v2159_v58 = vmax.f32 %v2147_v53, 0.0 }
 0xe00   : > { %v2163_v60 = vpack.c.bf16 %v2161_v55, %v2160_v54 }
 0xe01   : > { %v2162_v61 = vpack.c.bf16 %v2159_v58, %v2158_v56  ;;  %v4384_v56 = vld [vmem:[#allocation23 + $0x28] sm:$0xff]  }
 0xe03   : > { %3812 = vmatprep.mubr.msk.bf16.mxu1 %vm922_vm5, %v2162_v61 }
 0xe04   : > { %3813 = vmatmul.mubr.msk.bf16.vlgmr.msra.gmra.mrb[16].mxu1 %vm922_vm5, %v2163_v60 }
 0xe05   : > { %3820 = vmatprep.mubr.msk.bf16.mxu1 %vm922_vm5, %v5823_v29  ;;  %v2251_v29 = vadd.s32 56, %v5813_v21 }
 0xe07   : > { %v2255_v21 = vsub.s32 %v2251_v29, %v5816_v24  ;;  %v2270_v24 = vsel %vm2266_vm11, 1.0, %v5060_v0  ;;  %vm6423_vm11 = vcmask 785408  }
 0xe08   : > { %vm6424_vm7 = vmmov %vm6423_vm11 }
 0xe09   : > { %vm2259_vm3 = vcmp.ge.s32.totalorder %v2255_v21, 0  ;;  %vm2263_vm6 = vcmp.le.s32.totalorder %v2255_v21, 1  ;;  %vm6425_vm8 = vmmov %vm6424_vm7 }
 0xe0a   : > { %vm2267_vm4 = vmand %vm2259_vm3, %vm2263_vm6  ;;  %vm3169_vm6 = vcmask 64512  }
 0xe0b   : > { %vm6426_vm9 = vmmov %vm6424_vm7 }
 0xe0c   : > { %vm6429_vm14 = vmmov %vm6424_vm7 }
 0xe0d   : > { %vm6430_vm15 = vmmov %vm6424_vm7 }
 0xed7   : > { %v3814_v4 = vpop.f32.mrb[16].mxu1 }
 0xed8   : > { %v2238_v5 = vadd.f32 %v3814_v4, %v3544_v1  ;;  %v2229_v6 = vpop.f32.mrb[17].mxu1 }
 0xed9   : > { %v2230_v8 = vadd.f32 %v3544_v1, %v2229_v6  ;;  %v3815_v9 = vpop.f32.mrb[18].mxu1 }
 0xeda   : > { %v2241_v11 = vadd.f32 %v3815_v9, %v3544_v1  ;;  %v2232_v12 = vpop.f32.mrb[19].mxu1  ;;  %v2246_v15 = vadd.f32 %v2238_v5, %v5908_v35  ;;  %v2268_v35 = vsel %vm2264_vm12, 1.0, %v5060_v0  ;;  %vm6427_vm12 = vmmov %vm6424_vm7 }
 0xedb   : > { %v2233_v13 = vadd.f32 %v3544_v1, %v2232_v12  ;;  %v2244_v17 = vadd.f32 %v2230_v8, %v5911_v39 }
 0xedc   : > { %v2247_v16 = vadd.f32 %v2241_v11, %v5915_v46  ;;  %v2269_v46 = vsel %vm2265_vm13, 1.0, %v5060_v0  ;;  %vm6428_vm13 = vmmov %vm6424_vm7 }
 0xedd   : > { %v2245_v18 = vadd.f32 %v2233_v13, %v5919_v40  ;;  %v2272_v39 = vpack.c.bf16 %v2269_v46, %v2268_v35  ;;  %v2271_v40 = vsel %vm2267_vm4, 1.0, %v5060_v0 }
 0xede   : > { %v2275_v19 = vpack.c.bf16 %v2247_v16, %v2246_v15  ;;  %v2273_v23 = vpack.c.bf16 %v2271_v40, %v2270_v24 }
 0xedf   : > { %v2274_v20 = vpack.c.bf16 %v2245_v18, %v2244_v17 }
 0xee1   : > { %3816 = vmatprep.subr.bf16.mxu1 %v2274_v20 }
 0xee2   : > { %3817 = vmatpush3.bf16.msra.mxu1 %v2274_v20 }
 0xee3   : > { %3818 = vmatprep.subr.bf16.mxu1 %v2275_v19 }
 0xee6   : > { %3819 = vmatpush3.bf16.msra.mxu1 %v2275_v19 }
 0xee7   : > { %3828 = vmatprep.subr.bf16.mxu1 %v4379_v25 }
 0xee9   : > { %3821 = vmatmul.mubr.msk.bf16.vlgmr.msra.gmra.mrb[20].mxu1 %vm922_vm5, %v5835_v50 }
 0xeea   : > { %3824 = vmatprep.mubr.msk.bf16.mxu1 %vm922_vm5, %v2272_v39  ;;  %3829 = vmatpush3.bf16.msra.mxu1 %v4379_v25 }
 0xeeb   : > { %3830 = vmatprep.subr.bf16.mxu1 %v4380_v26 }
 0xeee   : > { %3831 = vmatpush3.bf16.msra.mxu1 %v4380_v26 }
 0xeef   : > { %3832 = vmatprep.subr.bf16.mxu1 %v4381_v27 }
 0xef1   : > { %3825 = vmatmul.mubr.msk.bf16.gmra.mrb[24].mxu1 %vm922_vm5, %v2273_v23 }
 0xef2   : > { %3833 = vmatpush3.bf16.msra.mxu1 %v4381_v27 }
 0xef3   : > { %3834 = vmatprep.subr.bf16.mxu1 %v4382_v30 }
 0xef6   : > { %3835 = vmatpush3.bf16.msra.mxu1 %v4382_v30 }
 0xef7   : > { %3836 = vmatprep.subr.bf16.mxu1 %v4383_v57 }
 0xefa   : > { %3837 = vmatpush3.bf16.msra.mxu1 %v4383_v57 }
 0xefb   : > { %3838 = vmatprep.subr.bf16.mxu1 %v4384_v56 }
 0xefe   : > { %3839 = vmatpush3.bf16.msra.mxu1 %v4384_v56 }
 0xfbc   : > { %v3822_v28 = vpop.f32.mrb[20].mxu1 }
 0xfbd   : > { %v2320_v50 = vpop.f32.mrb[21].mxu1  ;;  %v2375_v33 = vrot.slane %v3822_v28, 7 }
 0xfbe   : > { %v2372_v31 = vrot.slane %v2320_v50, 7  ;;  %v3823_v32 = vpop.f32.mrb[22].mxu1 }
 0xfbf   : > { %v2377_v34 = vrot.slane %v3823_v32, 7  ;;  %v2323_v0 = vpop.f32.mrb[23].mxu1 }
 0xfc0   : > { %v5975_v37 = vsel %vm884_vm0, 0.0, %v2372_v31  ;;  %v2373_v38 = vrot.slane %v2323_v0, 7 }
 0xfc1   : > { %v5978_v42 = vsel %vm884_vm0, %v2375_v33, %v2377_v34  ;;  %v2400_v43 = vrot.slane %v5975_v37, 1  ;;  %v2441_v41 = vrot.slane %v5975_v37, 2 }
 0xfc2   : > { %v5982_v47 = vsel %vm884_vm0, %v2372_v31, %v2373_v38  ;;  %v5985_v44 = vsel %vm884_vm0, %v2373_v38, %v2375_v33  ;;  %v2405_v2 = vrot.slane %v5978_v42, 1  ;;  %v2446_v7 = vrot.slane %v5978_v42, 2 }
 0xfc3   : > { %v2401_v49 = vrot.slane %v5982_v47, 1  ;;  %v2403_v51 = vrot.slane %v5985_v44, 1  ;;  %v2442_v52 = vrot.slane %v5982_v47, 2  ;;  %v2444_v59 = vrot.slane %v5985_v44, 2 }
 0xfc4   : > { %v3826_v36 = vpop.f32.mrb[24].mxu1 }
 0xfc5   : > { %v2336_v62 = vpop.f32.mrb[25].mxu1  ;;  %v2402_v45 = vsel %vm895_vm1, %v2400_v43, %v2401_v49  ;;  %v2404_v48 = vsel %vm895_vm1, %v2401_v49, %v2403_v51  ;;  %v2383_v58 = vrot.slane %v3826_v36, 7  ;;  %v2443_v63 = vsel %vm907_vm2, %v2441_v41, %v2442_v52 }
 0xfc6   : > { %v2379_v53 = vrot.slane %v2336_v62, 7  ;;  %v3827_v54 = vpop.f32.mrb[26].mxu1  ;;  %v4218_v55 = vpack.i.bf16 %v2404_v48, %v2402_v45  ;;  %v2445_v1 = vsel %vm907_vm2, %v2442_v52, %v2444_v59  ;;  %v2406_v10 = vsel %vm895_vm1, %v2403_v51, %v2405_v2 }
 0xfc7   : > { %v2385_v60 = vrot.slane %v3827_v54, 7  ;;  %v2339_v61 = vpop.f32.mrb[27].mxu1  ;;  %v4223_v9 = vpack.i.bf16 %v2445_v1, %v2443_v63  ;;  %v2447_v39 = vsel %vm907_vm2, %v2444_v59, %v2446_v7 }
 0xfc8   : > { %v5998_v3 = vsel %vm884_vm0, %v2377_v34, %v2379_v53  ;;  %v2381_v4 = vrot.slane %v2339_v61, 7  ;;  %4219 = vrot.lane.b32.xlu0 %v4218_v55, %s5063_s7 }
 0xfc9   : > { %v2407_v5 = vrot.slane %v5998_v3, 1  ;;  %v6003_v6 = vsel %vm884_vm0, %v2383_v58, %v2385_v60  ;;  %v2448_v8 = vrot.slane %v5998_v3, 2  ;;  %v2397_v11 = vsel %vm884_vm0, %v2385_v60, 0.0 }
 0xfca   : > { %v6010_v12 = vsel %vm884_vm0, %v2379_v53, %v2381_v4  ;;  %v6013_v13 = vsel %vm884_vm0, %v2381_v4, %v2383_v58  ;;  %v2413_v18 = vrot.slane %v6003_v6, 1  ;;  %v2415_v20 = vrot.slane %v2397_v11, 1 }
 0xfcb   : > { %v2408_v14 = vsel %vm895_vm1, %v2405_v2, %v2407_v5  ;;  %v2409_v29 = vrot.slane %v6010_v12, 1  ;;  %v2411_v15 = vrot.slane %v6013_v13, 1  ;;  %v2450_v16 = vrot.slane %v6010_v12, 2 }
 0xfcc   : > { %v2452_v17 = vrot.slane %v6013_v13, 2  ;;  %4224 = vrot.lane.b32.xlu0 %v4223_v9, %s5064_s2  ;;  %v4228_v19 = vpack.i.bf16 %v2408_v14, %v2406_v10  ;;  %v2449_v35 = vsel %vm907_vm2, %v2446_v7, %v2448_v8  ;;  %v2454_v25 = vrot.slane %v6003_v6, 2 }
 0xfcd   : > { %v2410_v22 = vsel %vm895_vm1, %v2407_v5, %v2409_v29  ;;  %v2412_v21 = vsel %vm895_vm1, %v2409_v29, %v2411_v15  ;;  %v2451_v24 = vsel %vm907_vm2, %v2448_v8, %v2450_v16  ;;  %v4233_v23 = vpack.i.bf16 %v2449_v35, %v2447_v39 }
 0xfce   : > { %4229 = vrot.lane.b32.xlu1 %v4228_v19, %s5063_s7  ;;  %v4238_v46 = vpack.i.bf16 %v2412_v21, %v2410_v22  ;;  %v2453_v40 = vsel %vm907_vm2, %v2450_v16, %v2452_v17  ;;  %v2456_v26 = vrot.slane %v2397_v11, 2  ;;  %v2414_v27 = vsel %vm895_vm1, %v2411_v15, %v2413_v18  ;;  %v4386_v22 = vld [vmem:[#allocation26 + $0x8] sm:$0xff]   ;;  %v4387_v21 = vld [vmem:[#allocation26 + $0x10] sm:$0xff]  }
 0xfcf   : > { %v2416_v28 = vsel %vm895_vm1, %v2413_v18, %v2415_v20  ;;  %v4248_v50 = vpack.i.bf16 %v2453_v40, %v2451_v24  ;;  %v2455_v31 = vsel %vm907_vm2, %v2452_v17, %v2454_v25  ;;  %v4385_v20 = vld [vmem:[#allocation26] sm:$0xff]  }
 0xfd0   : > { %4239 = vrot.lane.b32.xlu0 %v4238_v46, %s5063_s7  ;;  %v4243_v30 = vpack.i.bf16 %v2416_v28, %v2414_v27  ;;  %v2457_v32 = vsel %vm907_vm2, %v2454_v25, %v2456_v26  ;;  %3848 = vmatprep.subr.bf16.mxu0 %v4385_v20  ;;  %v4388_v25 = vld [vmem:[#allocation26 + $0x18] sm:$0xff]  }
 0xfd1   : > { %v4253_v33 = vpack.i.bf16 %v2457_v32, %v2455_v31  ;;  %3849 = vmatpush3.bf16.msra.mxu0 %v4385_v20 }
 0xfd2   : > { %4234 = vrot.lane.b32.xlu1 %v4233_v23, %s5064_s2  ;;  %3850 = vmatprep.subr.bf16.mxu0 %v4386_v22 }
 0xfd4   : > { %4249 = vrot.lane.b32.xlu0 %v4248_v50, %s5064_s2 }
 0xfd5   : > { %3851 = vmatpush3.bf16.msra.mxu0 %v4386_v22 }
 0xfd6   : > { %4244 = vrot.lane.b32.xlu1 %v4243_v30, %s5063_s7  ;;  %3852 = vmatprep.subr.bf16.mxu0 %v4387_v21 }
 0xfd9   : > { %3853 = vmatpush3.bf16.msra.mxu0 %v4387_v21 }
 0xfda   : > { %4254 = vrot.lane.b32.xlu1 %v4253_v33, %s5064_s2  ;;  %3854 = vmatprep.subr.bf16.mxu0 %v4388_v25 }
 0xfdd   : > { %3855 = vmatpush3.bf16.msra.mxu0 %v4388_v25 }
0x103a   : > { %v4220_v34 = vpop.permute.xlu0 %4219 }
0x103b   : > { %v4222_v0 = vunpack.i.h.bf16 %v4220_v34  ;;  %v4221_v38 = vunpack.i.l.bf16 %v4220_v34 }
0x103d   : > { %v2483_v51 = vsel %vm922_vm5, %v5982_v47, %v4222_v0  ;;  %v2482_v52 = vsel %vm922_vm5, %v5975_v37, %v4221_v38 }
0x103e   : > { %v4225_v43 = vpop.permute.xlu0 %4224 }
0x103f   : > { %v4227_v57 = vunpack.i.h.bf16 %v4225_v43  ;;  %v4226_v49 = vunpack.i.l.bf16 %v4225_v43  ;;  %v4389_v43 = vld [vmem:[#allocation26 + $0x20] sm:$0xff]  }
0x1040   : > { %v4230_v41 = vpop.permute.xlu1 %4229  ;;  %3856 = vmatprep.subr.bf16.mxu0 %v4389_v43 }
0x1041   : > { %v2490_v59 = vsel %vm1049_vm10, %v2482_v52, %v4226_v49  ;;  %v2491_v36 = vsel %vm1049_vm10, %v2483_v51, %v4227_v57  ;;  %v4232_v45 = vunpack.i.h.bf16 %v4230_v41  ;;  %v4231_v48 = vunpack.i.l.bf16 %v4230_v41  ;;  %3857 = vmatpush3.bf16.msra.mxu0 %v4389_v43 }
0x1042   : > { %v2498_v62 = vpack.c.bf16 %v2491_v36, %v2490_v59  ;;  %v4240_v2 = vpop.permute.xlu0 %4239 }
0x1043   : > { %v4242_v53 = vunpack.i.h.bf16 %v4240_v2  ;;  %v4241_v54 = vunpack.i.l.bf16 %v4240_v2  ;;  %v2485_v47 = vsel %vm922_vm5, %v5978_v42, %v4232_v45  ;;  %v2484_v37 = vsel %vm922_vm5, %v5985_v44, %v4231_v48 }
0x1044   : > { %3840 = vmatprep.mubr.msk.bf16.mxu1 %vm6423_vm11, %v2498_v62  ;;  %v4235_v55 = vpop.permute.xlu1 %4234 }
0x1045   : > { %v4237_v56 = vunpack.i.h.bf16 %v4235_v55  ;;  %v4236_v58 = vunpack.i.l.bf16 %v4235_v55  ;;  %v2487_v5 = vsel %vm922_vm5, %v6010_v12, %v4242_v53  ;;  %v2486_v7 = vsel %vm922_vm5, %v5998_v3, %v4241_v54 }
0x1046   : > { %v4250_v60 = vpop.permute.xlu0 %4249 }
0x1047   : > { %v2492_v61 = vsel %vm1049_vm10, %v2484_v37, %v4236_v58  ;;  %v2493_v63 = vsel %vm1049_vm10, %v2485_v47, %v4237_v56  ;;  %v4252_v1 = vunpack.i.h.bf16 %v4250_v60  ;;  %v4251_v4 = vunpack.i.l.bf16 %v4250_v60  ;;  %v4390_v37 = vld [vmem:[#allocation26 + $0x28] sm:$0xff]  }
0x1048   : > { %v2499_v8 = vpack.c.bf16 %v2493_v63, %v2492_v61  ;;  %v4245_v9 = vpop.permute.xlu1 %4244  ;;  %3858 = vmatprep.subr.bf16.mxu0 %v4390_v37 }
0x1049   : > { %v2494_v42 = vsel %vm1049_vm10, %v2486_v7, %v4251_v4  ;;  %v2495_v10 = vsel %vm1049_vm10, %v2487_v5, %v4252_v1  ;;  %v4247_v11 = vunpack.i.h.bf16 %v4245_v9  ;;  %v4246_v14 = vunpack.i.l.bf16 %v4245_v9  ;;  %3859 = vmatpush3.bf16.msra.mxu0 %v4390_v37 }
0x104a   : > { %v2500_v44 = vpack.c.bf16 %v2495_v10, %v2494_v42  ;;  %3841 = vmatmul.mubr.msk.bf16.vlgmr.msra.gmra.mrb[28].mxu1 %vm6424_vm7, %v2499_v8 }
0x104b   : > { %v2489_v12 = vsel %vm922_vm5, %v6003_v6, %v4247_v11  ;;  %v2488_v3 = vsel %vm922_vm5, %v6013_v13, %v4246_v14  ;;  %v3553_v6 = vld [vmem:[#allocation25] ss:$0 sm:$0xff] }
0x104c   : > { %v4255_v29 = vpop.permute.xlu1 %4254  ;;  %3844 = vmatprep.mubr.msk.bf16.mxu1 %vm6425_vm8, %v2500_v44 }
0x104d   : > { %v4257_v15 = vunpack.i.h.bf16 %v4255_v29  ;;  %v4256_v16 = vunpack.i.l.bf16 %v4255_v29 }
0x104f   : > { %v2496_v17 = vsel %vm1049_vm10, %v2488_v3, %v4256_v16  ;;  %v2497_v18 = vsel %vm1049_vm10, %v2489_v12, %v4257_v15 }
0x1050   : > { %v2501_v19 = vpack.c.bf16 %v2497_v18, %v2496_v17 }
0x1052   : > { %3845 = vmatmul.mubr.msk.bf16.gmra.mrb[32].mxu1 %vm6426_vm9, %v2501_v19 }
0x111d   : > { %v3842_v35 = vpop.f32.mrb[28].mxu1 }
0x111e   : > { %v2599_v46 = vadd.f32 %v3842_v35, %v3553_v6  ;;  %v2590_v13 = vpop.f32.mrb[29].mxu1 }
0x111f   : > { %v2591_v39 = vadd.f32 %v3553_v6, %v2590_v13  ;;  %v3843_v24 = vpop.f32.mrb[30].mxu1 }
0x1120   : > { %v2602_v40 = vadd.f32 %v3843_v24, %v3553_v6  ;;  %v2593_v23 = vpop.f32.mrb[31].mxu1  ;;  %v2645_v28 = vrot.slane %v2599_v46, 7 }
0x1121   : > { %v2642_v26 = vrot.slane %v2591_v39, 7  ;;  %v2594_v27 = vadd.f32 %v3553_v6, %v2593_v23 }
0x1122   : > { %v2647_v50 = vrot.slane %v2602_v40, 7 }
0x1123   : > { %v6068_v30 = vsel %vm884_vm0, 0.0, %v2642_v26  ;;  %v2643_v31 = vrot.slane %v2594_v27, 7 }
0x1124   : > { %v6071_v32 = vsel %vm884_vm0, %v2645_v28, %v2647_v50  ;;  %v2670_v33 = vrot.slane %v6068_v30, 1  ;;  %v2711_v45 = vrot.slane %v6068_v30, 2 }
0x1125   : > { %v6075_v34 = vsel %vm884_vm0, %v2642_v26, %v2643_v31  ;;  %v6078_v0 = vsel %vm884_vm0, %v2643_v31, %v2645_v28  ;;  %v3846_v38 = vpop.f32.mrb[32].mxu1  ;;  %v2675_v55 = vrot.slane %v6071_v32, 1  ;;  %v2716_v9 = vrot.slane %v6071_v32, 2 }
0x1126   : > { %v2671_v57 = vrot.slane %v6075_v34, 1  ;;  %v2673_v49 = vrot.slane %v6078_v0, 1  ;;  %v2712_v51 = vrot.slane %v6075_v34, 2  ;;  %v2714_v52 = vrot.slane %v6078_v0, 2  ;;  %v2606_v59 = vpop.f32.mrb[33].mxu1 }
0x1127   : > { %v2615_v36 = vadd.f32 %v3846_v38, %v3553_v6  ;;  %v2607_v41 = vadd.f32 %v3553_v6, %v2606_v59  ;;  %v3847_v62 = vpop.f32.mrb[34].mxu1 }
0x1128   : > { %v2618_v48 = vadd.f32 %v3847_v62, %v3553_v6  ;;  %v2609_v2 = vpop.f32.mrb[35].mxu1  ;;  %v2672_v53 = vsel %vm895_vm1, %v2670_v33, %v2671_v57  ;;  %v2674_v54 = vsel %vm895_vm1, %v2671_v57, %v2673_v49  ;;  %v2713_v63 = vsel %vm907_vm2, %v2711_v45, %v2712_v51 }
0x1129   : > { %v2649_v56 = vrot.slane %v2607_v41, 7  ;;  %v2610_v58 = vadd.f32 %v3553_v6, %v2609_v2  ;;  %v4258_v47 = vpack.i.bf16 %v2674_v54, %v2672_v53  ;;  %v2653_v60 = vrot.slane %v2615_v36, 7 }
0x112a   : > { %v2655_v61 = vrot.slane %v2618_v48, 7  ;;  %v2715_v1 = vsel %vm907_vm2, %v2712_v51, %v2714_v52  ;;  %v2676_v44 = vsel %vm895_vm1, %v2673_v49, %v2675_v55  ;;  %v2717_v46 = vsel %vm907_vm2, %v2714_v52, %v2716_v9 }
0x112b   : > { %v6091_v4 = vsel %vm884_vm0, %v2647_v50, %v2649_v56  ;;  %v2651_v5 = vrot.slane %v2610_v58, 7  ;;  %4259 = vrot.lane.b32.xlu0 %v4258_v47, %s5063_s7  ;;  %v4263_v10 = vpack.i.bf16 %v2715_v1, %v2713_v63 }
0x112c   : > { %v2677_v7 = vrot.slane %v6091_v4, 1  ;;  %v6096_v8 = vsel %vm884_vm0, %v2653_v60, %v2655_v61  ;;  %v2718_v42 = vrot.slane %v6091_v4, 2  ;;  %v2667_v11 = vsel %vm884_vm0, %v2655_v61, 0.0 }
0x112d   : > { %v6103_v14 = vsel %vm884_vm0, %v2649_v56, %v2651_v5  ;;  %v6106_v29 = vsel %vm884_vm0, %v2651_v5, %v2653_v60  ;;  %v2683_v18 = vrot.slane %v6096_v8, 1  ;;  %v2685_v20 = vrot.slane %v2667_v11, 1 }
0x112e   : > { %v2678_v15 = vsel %vm895_vm1, %v2675_v55, %v2677_v7  ;;  %v2679_v16 = vrot.slane %v6103_v14, 1  ;;  %v2681_v12 = vrot.slane %v6106_v29, 1  ;;  %v2720_v3 = vrot.slane %v6103_v14, 2 }
0x112f   : > { %v2722_v17 = vrot.slane %v6106_v29, 2  ;;  %4264 = vrot.lane.b32.xlu0 %v4263_v10, %s5064_s2  ;;  %v4268_v19 = vpack.i.bf16 %v2678_v15, %v2676_v44  ;;  %v2719_v6 = vsel %vm907_vm2, %v2716_v9, %v2718_v42  ;;  %v2724_v40 = vrot.slane %v6096_v8, 2 }
0x1130   : > { %v2680_v22 = vsel %vm895_vm1, %v2677_v7, %v2679_v16  ;;  %v2682_v21 = vsel %vm895_vm1, %v2679_v16, %v2681_v12  ;;  %v2721_v13 = vsel %vm907_vm2, %v2718_v42, %v2720_v3  ;;  %v4273_v24 = vpack.i.bf16 %v2719_v6, %v2717_v46 }
0x1131   : > { %4269 = vrot.lane.b32.xlu1 %v4268_v19, %s5063_s7  ;;  %v4278_v35 = vpack.i.bf16 %v2682_v21, %v2680_v22  ;;  %v2723_v39 = vsel %vm907_vm2, %v2720_v3, %v2722_v17  ;;  %v2726_v23 = vrot.slane %v2667_v11, 2  ;;  %v2684_v25 = vsel %vm895_vm1, %v2681_v12, %v2683_v18  ;;  %v4392_v22 = vld [vmem:[#allocation29 + $0x8] sm:$0xff]   ;;  %v4393_v21 = vld [vmem:[#allocation29 + $0x10] sm:$0xff]  }
0x1132   : > { %v2686_v26 = vsel %vm895_vm1, %v2683_v18, %v2685_v20  ;;  %v4288_v27 = vpack.i.bf16 %v2723_v39, %v2721_v13  ;;  %v2725_v50 = vsel %vm907_vm2, %v2722_v17, %v2724_v40  ;;  %v4391_v20 = vld [vmem:[#allocation29] sm:$0xff]  }
0x1133   : > { %4279 = vrot.lane.b32.xlu0 %v4278_v35, %s5063_s7  ;;  %v4283_v28 = vpack.i.bf16 %v2686_v26, %v2684_v25  ;;  %v2727_v31 = vsel %vm907_vm2, %v2724_v40, %v2726_v23  ;;  %3868 = vmatprep.subr.bf16.mxu1 %v4391_v20 }
0x1134   : > { %v4293_v33 = vpack.i.bf16 %v2727_v31, %v2725_v50  ;;  %3869 = vmatpush3.bf16.msra.mxu1 %v4391_v20  ;;  %v4394_v50 = vld [vmem:[#allocation29 + $0x18] sm:$0xff]  }
0x1135   : > { %4274 = vrot.lane.b32.xlu1 %v4273_v24, %s5064_s2  ;;  %3870 = vmatprep.subr.bf16.mxu1 %v4392_v22 }
0x1137   : > { %4289 = vrot.lane.b32.xlu0 %v4288_v27, %s5064_s2 }
0x1138   : > { %3871 = vmatpush3.bf16.msra.mxu1 %v4392_v22 }
0x1139   : > { %4284 = vrot.lane.b32.xlu1 %v4283_v28, %s5063_s7  ;;  %3872 = vmatprep.subr.bf16.mxu1 %v4393_v21 }
0x113c   : > { %3873 = vmatpush3.bf16.msra.mxu1 %v4393_v21 }
0x113d   : > { %4294 = vrot.lane.b32.xlu1 %v4293_v33, %s5064_s2  ;;  %3874 = vmatprep.subr.bf16.mxu1 %v4394_v50 }
0x1140   : > { %3875 = vmatpush3.bf16.msra.mxu1 %v4394_v50 }
0x119d   : > { %v4260_v38 = vpop.permute.xlu0 %4259 }
0x119e   : > { %v4262_v43 = vunpack.i.h.bf16 %v4260_v38  ;;  %v4261_v57 = vunpack.i.l.bf16 %v4260_v38 }
0x11a0   : > { %v2753_v59 = vsel %vm922_vm5, %v6075_v34, %v4262_v43  ;;  %v2752_v36 = vsel %vm922_vm5, %v6068_v30, %v4261_v57 }
0x11a1   : > { %v4265_v49 = vpop.permute.xlu0 %4264 }
0x11a2   : > { %v4267_v51 = vunpack.i.h.bf16 %v4265_v49  ;;  %v4266_v52 = vunpack.i.l.bf16 %v4265_v49 }
0x11a3   : > { %v4270_v45 = vpop.permute.xlu1 %4269 }
0x11a4   : > { %v2760_v41 = vsel %vm1049_vm10, %v2752_v36, %v4266_v52  ;;  %v2761_v62 = vsel %vm1049_vm10, %v2753_v59, %v4267_v51  ;;  %v4272_v2 = vunpack.i.h.bf16 %v4270_v45  ;;  %v4271_v53 = vunpack.i.l.bf16 %v4270_v45 }
0x11a5   : > { %v2768_v48 = vpack.c.bf16 %v2761_v62, %v2760_v41  ;;  %v4280_v54 = vpop.permute.xlu0 %4279 }
0x11a6   : > { %v4282_v55 = vunpack.i.h.bf16 %v4280_v54  ;;  %v4281_v56 = vunpack.i.l.bf16 %v4280_v54  ;;  %v2755_v34 = vsel %vm922_vm5, %v6071_v32, %v4272_v2  ;;  %v2754_v30 = vsel %vm922_vm5, %v6078_v0, %v4271_v53 }
0x11a7   : > { %3860 = vmatprep.mubr.msk.bf16.mxu0 %vm6427_vm12, %v2768_v48  ;;  %v4275_v58 = vpop.permute.xlu1 %4274 }
0x11a8   : > { %v4277_v47 = vunpack.i.h.bf16 %v4275_v58  ;;  %v4276_v37 = vunpack.i.l.bf16 %v4275_v58  ;;  %v2757_v7 = vsel %vm922_vm5, %v6103_v14, %v4282_v55  ;;  %v2756_v9 = vsel %vm922_vm5, %v6091_v4, %v4281_v56 }
0x11a9   : > { %v4290_v60 = vpop.permute.xlu0 %4289 }
0x11aa   : > { %v2762_v61 = vsel %vm1049_vm10, %v2754_v30, %v4276_v37  ;;  %v2763_v63 = vsel %vm1049_vm10, %v2755_v34, %v4277_v47  ;;  %v4292_v1 = vunpack.i.h.bf16 %v4290_v60  ;;  %v4291_v5 = vunpack.i.l.bf16 %v4290_v60  ;;  %v4395_v60 = vld [vmem:[#allocation29 + $0x20] sm:$0xff]  }
0x11ab   : > { %v2769_v42 = vpack.c.bf16 %v2763_v63, %v2762_v61  ;;  %v4285_v10 = vpop.permute.xlu1 %4284  ;;  %3876 = vmatprep.subr.bf16.mxu1 %v4395_v60 }
0x11ac   : > { %v2764_v32 = vsel %vm1049_vm10, %v2756_v9, %v4291_v5  ;;  %v2765_v44 = vsel %vm1049_vm10, %v2757_v7, %v4292_v1  ;;  %v4287_v11 = vunpack.i.h.bf16 %v4285_v10  ;;  %v4286_v15 = vunpack.i.l.bf16 %v4285_v10  ;;  %3877 = vmatpush3.bf16.msra.mxu1 %v4395_v60 }
0x11ad   : > { %v2770_v0 = vpack.c.bf16 %v2765_v44, %v2764_v32  ;;  %3861 = vmatmul.mubr.msk.bf16.vlgmr.msra.gmra.mrb[24].mxu0 %vm6428_vm13, %v2769_v42 }
0x11ae   : > { %v2759_v14 = vsel %vm922_vm5, %v6096_v8, %v4287_v11  ;;  %v2758_v4 = vsel %vm922_vm5, %v6106_v29, %v4286_v15  ;;  %v3564_v8 = vld [vmem:[#allocation28] ss:$0 sm:$0xff]  ;;  %v4396_v11 = vld [vmem:[#allocation29 + $0x28] sm:$0xff]  }
0x11af   : > { %v4295_v16 = vpop.permute.xlu1 %4294  ;;  %3864 = vmatprep.mubr.msk.bf16.mxu0 %vm6429_vm14, %v2770_v0  ;;  %3878 = vmatprep.subr.bf16.mxu1 %v4396_v11 }
0x11b0   : > { %v4297_v12 = vunpack.i.h.bf16 %v4295_v16  ;;  %v4296_v3 = vunpack.i.l.bf16 %v4295_v16  ;;  %3879 = vmatpush3.bf16.msra.mxu1 %v4396_v11 }
0x11b2   : > { %v2766_v17 = vsel %vm1049_vm10, %v2758_v4, %v4296_v3  ;;  %v2767_v18 = vsel %vm1049_vm10, %v2759_v14, %v4297_v12 }
0x11b3   : > { %v2771_v19 = vpack.c.bf16 %v2767_v18, %v2766_v17 }
0x11b5   : > { %3865 = vmatmul.mubr.msk.bf16.gmra.mrb[28].mxu0 %vm6430_vm15, %v2771_v19 }
0x1280   : > { %v3862_v6 = vpop.f32.mrb[24].mxu0 }
0x1281   : > { %v2869_v35 = vadd.f32 %v3862_v6, %v3564_v8  ;;  %v2860_v29 = vpop.f32.mrb[25].mxu0 }
0x1282   : > { %v2861_v46 = vadd.f32 %v3564_v8, %v2860_v29  ;;  %v3863_v13 = vpop.f32.mrb[26].mxu0 }
0x1283   : > { %v2893_v39 = vmax.f32 %v2869_v35, 0.0  ;;  %v2872_v24 = vadd.f32 %v3863_v13, %v3564_v8  ;;  %v2863_v40 = vpop.f32.mrb[27].mxu0 }
0x1284   : > { %v2891_v23 = vmax.f32 %v2861_v46, 0.0  ;;  %v2864_v25 = vadd.f32 %v3564_v8, %v2863_v40 }
0x1285   : > { %v2894_v26 = vmax.f32 %v2872_v24, 0.0  ;;  %v2923_v31 = vrot.slane %v2893_v39, 7 }
0x1286   : > { %v2920_v27 = vrot.slane %v2891_v23, 7  ;;  %v2892_v28 = vmax.f32 %v2864_v25, 0.0 }
0x1287   : > { %v2925_v33 = vrot.slane %v2894_v26, 7 }
0x1288   : > { %v6161_v38 = vsel %vm884_vm0, 0.0, %v2920_v27  ;;  %v2921_v43 = vrot.slane %v2892_v28, 7  ;;  %v3866_v57 = vpop.f32.mrb[28].mxu0 }
0x1289   : > { %v6164_v49 = vsel %vm884_vm0, %v2923_v31, %v2925_v33  ;;  %v2885_v51 = vadd.f32 %v3866_v57, %v3564_v8  ;;  %v2876_v52 = vpop.f32.mrb[29].mxu0  ;;  %v2948_v59 = vrot.slane %v6161_v38, 1  ;;  %v2989_v37 = vrot.slane %v6161_v38, 2 }
0x128a   : > { %v6168_v36 = vsel %vm884_vm0, %v2920_v27, %v2921_v43  ;;  %v6171_v41 = vsel %vm884_vm0, %v2921_v43, %v2923_v31  ;;  %v3867_v62 = vpop.f32.mrb[30].mxu0  ;;  %v2877_v56 = vadd.f32 %v3564_v8, %v2876_v52  ;;  %v2953_v5 = vrot.slane %v6164_v49, 1 }
0x128b   : > { %v2949_v45 = vrot.slane %v6168_v36, 1  ;;  %v2951_v48 = vrot.slane %v6171_v41, 1  ;;  %v2990_v2 = vrot.slane %v6168_v36, 2  ;;  %v2992_v53 = vrot.slane %v6171_v41, 2  ;;  %v2879_v54 = vpop.f32.mrb[31].mxu0 }
0x128c   : > { %v2897_v55 = vmax.f32 %v2885_v51, 0.0  ;;  %v2888_v58 = vadd.f32 %v3867_v62, %v3564_v8  ;;  %v2880_v47 = vadd.f32 %v3564_v8, %v2879_v54  ;;  %v2895_v61 = vmax.f32 %v2877_v56, 0.0 }
0x128d   : > { %v2950_v34 = vsel %vm895_vm1, %v2948_v59, %v2949_v45  ;;  %v2952_v30 = vsel %vm895_vm1, %v2949_v45, %v2951_v48  ;;  %v2991_v9 = vsel %vm907_vm2, %v2989_v37, %v2990_v2  ;;  %v2993_v42 = vsel %vm907_vm2, %v2990_v2, %v2992_v53 }
0x128e   : > { %v2898_v63 = vmax.f32 %v2888_v58, 0.0  ;;  %v2896_v1 = vmax.f32 %v2880_v47, 0.0  ;;  %v4298_v7 = vpack.i.bf16 %v2952_v30, %v2950_v34  ;;  %v2931_v10 = vrot.slane %v2897_v55, 7 }
0x128f   : > { %v2927_v32 = vrot.slane %v2895_v61, 7  ;;  %v2994_v3 = vrot.slane %v6164_v49, 2  ;;  %v4303_v17 = vpack.i.bf16 %v2993_v42, %v2991_v9  ;;  %v2954_v22 = vsel %vm895_vm1, %v2951_v48, %v2953_v5 }
0x1290   : > { %v2933_v44 = vrot.slane %v2898_v63, 7  ;;  %v2929_v0 = vrot.slane %v2896_v1, 7  ;;  %4299 = vrot.lane.b32.xlu0 %v4298_v7, %s5063_s7 }
0x1291   : > { %v6185_v15 = vsel %vm884_vm0, %v2925_v33, %v2927_v32  ;;  %v2995_v25 = vsel %vm907_vm2, %v2992_v53, %v2994_v3 }
0x1292   : > { %v6188_v16 = vsel %vm884_vm0, %v2931_v10, %v2933_v44  ;;  %v6191_v12 = vsel %vm884_vm0, %v2927_v32, %v2929_v0  ;;  %v2955_v14 = vrot.slane %v6185_v15, 1  ;;  %v2996_v4 = vrot.slane %v6185_v15, 2 }
0x1293   : > { %v2945_v18 = vsel %vm884_vm0, %v2933_v44, 0.0  ;;  %v6198_v19 = vsel %vm884_vm0, %v2929_v0, %v2931_v10  ;;  %v2957_v20 = vrot.slane %v6191_v12, 1  ;;  %v2998_v8 = vrot.slane %v6191_v12, 2  ;;  %vm6431_vm0 = vmmov %vm6424_vm7 }
0x1294   : > { %v2959_v21 = vrot.slane %v6198_v19, 1  ;;  %v3000_v6 = vrot.slane %v6198_v19, 2  ;;  %4304 = vrot.lane.b32.xlu0 %v4303_v17, %s5064_s2  ;;  %v2956_v35 = vsel %vm895_vm1, %v2953_v5, %v2955_v14  ;;  %v2961_v13 = vrot.slane %v6188_v16, 1  ;;  %vm6434_vm3 = vmmov %vm6431_vm0 }
0x1295   : > { %v4308_v29 = vpack.i.bf16 %v2956_v35, %v2954_v22  ;;  %v2958_v46 = vsel %vm895_vm1, %v2955_v14, %v2957_v20  ;;  %v2963_v39 = vrot.slane %v2945_v18, 1  ;;  %v2997_v40 = vsel %vm907_vm2, %v2994_v3, %v2996_v4 }
0x1296   : > { %v2960_v24 = vsel %vm895_vm1, %v2957_v20, %v2959_v21  ;;  %v2999_v26 = vsel %vm907_vm2, %v2996_v4, %v2998_v8  ;;  %v3001_v27 = vsel %vm907_vm2, %v2998_v8, %v3000_v6  ;;  %v4313_v28 = vpack.i.bf16 %v2997_v40, %v2995_v25 }
0x1297   : > { %4309 = vrot.lane.b32.xlu1 %v4308_v29, %s5063_s7  ;;  %v4318_v23 = vpack.i.bf16 %v2960_v24, %v2958_v46  ;;  %v3002_v50 = vrot.slane %v6188_v16, 2  ;;  %v3004_v31 = vrot.slane %v2945_v18, 2  ;;  %v2962_v33 = vsel %vm895_vm1, %v2959_v21, %v2961_v13 }
0x1298   : > { %v2964_v43 = vsel %vm895_vm1, %v2961_v13, %v2963_v39  ;;  %v4328_v57 = vpack.i.bf16 %v3001_v27, %v2999_v26  ;;  %vm6432_vm1 = vmmov %vm6431_vm0  ;;  %v3575_v13 = vld [vmem:[#allocation31] ss:$0 sm:$0xff] }
0x1299   : > { %4319 = vrot.lane.b32.xlu0 %v4318_v23, %s5063_s7  ;;  %v4323_v51 = vpack.i.bf16 %v2964_v43, %v2962_v33  ;;  %v3003_v52 = vsel %vm907_vm2, %v3000_v6, %v3002_v50  ;;  %v3005_v59 = vsel %vm907_vm2, %v3002_v50, %v3004_v31  ;;  %vm6433_vm2 = vmmov %vm6431_vm0 }
0x129a   : > { %v4333_v62 = vpack.i.bf16 %v3005_v59, %v3003_v52 }
0x129b   : > { %4314 = vrot.lane.b32.xlu1 %v4313_v28, %s5064_s2 }
0x129d   : > { %4329 = vrot.lane.b32.xlu0 %v4328_v57, %s5064_s2 }
0x129f   : > { %4324 = vrot.lane.b32.xlu1 %v4323_v51, %s5063_s7  ;;  %s4935_s7 = sshll.u32 %s5065_s6, 4  ;;  %s4936_s7 = int_to_ptr.vmem [resolvable:$false] %s4935_s7 }
0x12a0   : > { %p4938_p12 = scmp.lt.s32.totalorder %s6265_s24, %s4936_s7 }
0x12a3   : > { %4334 = vrot.lane.b32.xlu1 %v4333_v62, %s5064_s2  ;;  %s4937_s2 = scalar_lea.vmem %s4936_s7, 2048 }
0x12a4   : > { %p4939_p1 = scmp.lt.s32.totalorder %s4937_s2, %s4931_s30 }
0x12a6   : > { %p4940_p13 = por %p4939_p1, %p4938_p12 }
0x12a8   : > { %p4941_p0 = pnand %p4940_p13, %p4934_p9 }
0x1302   : > { %v4300_v45 = vpop.permute.xlu0 %4299 }
0x1303   : > { %v4302_v48 = vunpack.i.h.bf16 %v4300_v45  ;;  %v4301_v2 = vunpack.i.l.bf16 %v4300_v45 }
0x1305   : > { %v3031_v56 = vsel %vm922_vm5, %v6168_v36, %v4302_v48  ;;  %v3030_v58 = vsel %vm922_vm5, %v6161_v38, %v4301_v2 }
0x1306   : > { %v4305_v53 = vpop.permute.xlu0 %4304 }
0x1307   : > { %v4307_v54 = vunpack.i.h.bf16 %v4305_v53  ;;  %v4306_v55 = vunpack.i.l.bf16 %v4305_v53 }
0x1309   : > { %v3038_v47 = vsel %vm1049_vm10, %v3030_v58, %v4306_v55  ;;  %v3039_v37 = vsel %vm1049_vm10, %v3031_v56, %v4307_v54  ;;  %v4310_v34 = vpop.permute.xlu1 %4309 }
0x130a   : > { %v3046_v30 = vpack.c.bf16 %v3039_v37, %v3038_v47  ;;  %v4312_v60 = vunpack.i.h.bf16 %v4310_v34  ;;  %v4311_v61 = vunpack.i.l.bf16 %v4310_v34 }
0x130b   : > { %v4320_v63 = vpop.permute.xlu0 %4319 }
0x130c   : > { %3880 = vmatprep.mubr.msk.bf16.mxu1 %vm6431_vm0, %v3046_v30  ;;  %v4322_v1 = vunpack.i.h.bf16 %v4320_v63  ;;  %v4321_v5 = vunpack.i.l.bf16 %v4320_v63  ;;  %v3033_v36 = vsel %vm922_vm5, %v6164_v49, %v4312_v60  ;;  %v3032_v38 = vsel %vm922_vm5, %v6171_v41, %v4311_v61 }
0x130d   : > { %v4315_v7 = vpop.permute.xlu1 %4314 }
0x130e   : > { %v4317_v9 = vunpack.i.h.bf16 %v4315_v7  ;;  %v4316_v42 = vunpack.i.l.bf16 %v4315_v7  ;;  %v3035_v3 = vsel %vm922_vm5, %v6191_v12, %v4322_v1  ;;  %v3034_v14 = vsel %vm922_vm5, %v6185_v15, %v4321_v5 }
0x130f   : > { %v4330_v10 = vpop.permute.xlu0 %4329 }
0x1310   : > { %v3040_v32 = vsel %vm1049_vm10, %v3032_v38, %v4316_v42  ;;  %v3041_v44 = vsel %vm1049_vm10, %v3033_v36, %v4317_v9  ;;  %v4332_v0 = vunpack.i.h.bf16 %v4330_v10  ;;  %v4331_v11 = vunpack.i.l.bf16 %v4330_v10 }
0x1311   : > { %v3047_v4 = vpack.c.bf16 %v3041_v44, %v3040_v32  ;;  %v4325_v17 = vpop.permute.xlu1 %4324 }
0x1312   : > { %v3042_v49 = vsel %vm1049_vm10, %v3034_v14, %v4331_v11  ;;  %v3043_v41 = vsel %vm1049_vm10, %v3035_v3, %v4332_v0  ;;  %v4327_v20 = vunpack.i.h.bf16 %v4325_v17  ;;  %v4326_v22 = vunpack.i.l.bf16 %v4325_v17 }
0x1313   : > { %v3048_v18 = vpack.c.bf16 %v3043_v41, %v3042_v49  ;;  %3881 = vmatmul.mubr.msk.bf16.vlgmr.msra.gmra.mrb[36].mxu1 %vm6432_vm1, %v3047_v4 }
0x1314   : > { %v3037_v15 = vsel %vm922_vm5, %v6188_v16, %v4327_v20  ;;  %v3036_v6 = vsel %vm922_vm5, %v6198_v19, %v4326_v22 }
0x1315   : > { %v4335_v21 = vpop.permute.xlu1 %4334  ;;  %3884 = vmatprep.mubr.msk.bf16.mxu1 %vm6433_vm2, %v3048_v18 }
0x1316   : > { %v4337_v8 = vunpack.i.h.bf16 %v4335_v21  ;;  %v4336_v12 = vunpack.i.l.bf16 %v4335_v21 }
0x1318   : > { %v3044_v35 = vsel %vm1049_vm10, %v3036_v6, %v4336_v12  ;;  %v3045_v29 = vsel %vm1049_vm10, %v3037_v15, %v4337_v8 }
0x1319   : > { %v3049_v46 = vpack.c.bf16 %v3045_v29, %v3044_v35 }
0x131b   : > { %3885 = vmatmul.mubr.msk.bf16.gmra.mrb[40].mxu1 %vm6434_vm3, %v3049_v46 }
0x13e6   : > { %v3882_v39 = vpop.f32.mrb[36].mxu1 }
0x13e7   : > { %v3147_v24 = vadd.f32 %v3882_v39, %v3575_v13  ;;  %v3138_v40 = vpop.f32.mrb[37].mxu1 }
0x13e8   : > { %v3139_v23 = vadd.f32 %v3575_v13, %v3138_v40  ;;  %v3883_v25 = vpop.f32.mrb[38].mxu1 }
0x13e9   : > { %3172 = vst.msk [vmem:[%s871_s1 + $0x10] sm:$0xff] %vm3169_vm6, %v3147_v24  ;;  %v3150_v16 = vadd.f32 %v3883_v25, %v3575_v13  ;;  %v3141_v19 = vpop.f32.mrb[39].mxu1 }
0x13ea   : > { %3170 = vst.msk [vmem:[%s871_s1] sm:$0xff] %vm3169_vm6, %v3139_v23  ;;  %v3142_v26 = vadd.f32 %v3575_v13, %v3141_v19 }
0x13eb   : > { %3173 = vst.msk [vmem:[%s871_s1 + $0x18] sm:$0xff] %vm3169_vm6, %v3150_v16 }
0x13ec   : > { %3171 = vst.msk [vmem:[%s871_s1 + $0x8] sm:$0xff] %vm3169_vm6, %v3142_v26 }
0x13ee   : > { %v3886_v27 = vpop.f32.mrb[40].mxu1 }
0x13ef   : > { %v3163_v28 = vadd.f32 %v3886_v27, %v3575_v13  ;;  %v3154_v50 = vpop.f32.mrb[41].mxu1 }
0x13f0   : > { %v3155_v31 = vadd.f32 %v3575_v13, %v3154_v50  ;;  %v3887_v33 = vpop.f32.mrb[42].mxu1 }
0x13f1   : > { %3176 = vst.msk [vmem:[%s871_s1 + $0x30] sm:$0xff] %vm3169_vm6, %v3163_v28  ;;  %v3166_v43 = vadd.f32 %v3887_v33, %v3575_v13  ;;  %v3157_v57 = vpop.f32.mrb[43].mxu1 }
0x13f2   : > { %3174 = vst.msk [vmem:[%s871_s1 + $0x20] sm:$0xff] %vm3169_vm6, %v3155_v31  ;;  %v3158_v51 = vadd.f32 %v3575_v13, %v3157_v57 }
0x13f3   : > { %3177 = vst.msk [vmem:[%s871_s1 + $0x38] sm:$0xff] %vm3169_vm6, %v3166_v43 }
0x13f4   : > { %3175 = vst.msk [vmem:[%s871_s1 + $0x28] sm:$0xff] %vm3169_vm6, %v3158_v51 }
0x13f5   : > { %4944 = shalt.err (!%p4941_p0)
}
0x13f6   : > { %s4945_s20 = scalar_lea.hbm %s6263_s4, 1024  ;;  %s4949_s16 = scalar_lea.hbm %s6435_s5, 2048 }
0x13f7   : > { %p4946_p2 = scmp.ne.s32.totalorder %s6263_s4, %s4945_s20  ;;  %p4950_p10 = scmp.lt.u32.totalorder %s6263_s4, %s6435_s5 }
0x13f8   : > { %p4951_p11 = scmp.lt.u32.totalorder %s4949_s16, %s4945_s20  ;;  %p4953_p5 = scmp.lt.u32.totalorder %s4945_s20, %s6263_s4 }
0x13f9   : > { %p4947_p8 = pnand %p4946_p2, %p6436_p7 }
0x13fa   : > { %p4952_p3 = por %p4951_p11, %p4950_p10 }
0x13fb   : > { %p4948_p4 = pneg %p4947_p8 }
0x13fc   : > { %p4954_p6 = por %p4953_p5, %p4952_p3 }
0x13fe   : > { %p4955_p9 = pnand %p4954_p6, %p4948_p4 }
0x1400   : > { %4958 = shalt.err (!%p4955_p9)
}
0x1401   : > { %s5066_s30 = smov 128   ;;  %s5067_s7 = smov 8  }
0x1402   : > { %3962 = dma.vmem_to_hbm [thread:$0]  (%p6436_p7), %s6265_s24, 1024, %s6263_s4, %s3179_s8, %s5066_s30, %s5066_s30, %s5067_s7  }
0x1403 PF: > { %s6437_s2 = sld [smem:[#allocation44_spill]]  ;;  %s6438_s1 = sld [smem:[#allocation47_spill]] }
0x1404   : > { %p6439_p12 = scmp.ne.s32.totalorder %s6398_s23, 0 }
0x1409   : > { %s3207_s22 = sand.u32 1, %s6437_s2   ;;  %p6440_p1 = scmp.ge.s32.totalorder %s6438_s1, 2 }
0x140a   : > { %s3208_s20 = scalar_lea.sflag [#allocation4], %s3207_s22 }
0x140b   : > { %p4024_p13 = pnand %p6440_p1, %p6439_p12 }
0x140d   : > { %5016 = dma.done.wait (!%p4024_p13), %s3208_s20, 1024  }
0x140e   : > { %5018 = vsyncadd (!%p4024_p13), %s3208_s20, 4294966272  ;;  %s6441_s16 = sld [smem:[#allocation45_spill]]  ;;  %s6442_s30 = sld [smem:[#allocation46_spill]] }
0x140f   : > { %s6443_s21 = smov %s5610_s0  ;;  %p41_p0 = scmp.ge.s32.totalorder %s5599_s3, 4  }
0x1410   : > { %s6445_s20 = smov %s6443_s21  ;;  %s6446_s21 = smov %s5599_s3 }
0x1411   :  { %43 = sbr.rel (!%p41_p0) target bundleno = 28 (0x1c), region = 221 }
0x1414   : > { %s6444_s0 = smov %s6441_s16 }
0x1418   :  { %3213 = vsyncpa [#allocation3], 1 }
0x1419   :  { %3215 = vsyncpa [#allocation3 + $0x1], 1 }
0x141a   :  { %3216 = vsyncpa [#allocation6], 1 }
0x141b   :  { %3217 = vsyncpa [#allocation9], 1 }
0x141c   :  { %3218 = vsyncpa [#allocation12], 1 }
0x141d   :  { %3219 = vsyncpa [#allocation15], 1 }
0x141e   :  { %3220 = vsyncpa [#allocation18], 1 }
0x141f   :  { %3221 = vsyncpa [#allocation21], 1 }
0x1420   :  { %3222 = vsyncpa [#allocation24], 1 }
0x1421   :  { %3223 = vsyncpa [#allocation27], 1 }
0x1422   :  { %3224 = vsyncpa [#allocation30], 1 }
0x1423   :  { %3225 = vsyncpa [#allocation4], 1 }
0x1424   :  { %3227 = vsyncpa [#allocation4 + $0x1], 1 }

// kernel: _decoder_forward.1
= control target key start
LH: loop header
LB: loop body
LE: loop exit
PB: predicated region body
PF: predicated region fallthrough
CT: control target
= control target key end

     0   :  { %s6312_s0 = inlined_call_operand.hbm [shape: f32[2,16,16], index: 0, kind: input, shape index: {}]   ;;  %s6313_s1 = inlined_call_operand.hbm [shape: bf16[48,32], index: 1, kind: input, shape index: {}]   ;;  %s6314_s2 = inlined_call_operand.hbm [shape: f32[1,32], index: 2, kind: input, shape index: {}]   ;;  %s6315_s3 = inlined_call_operand.hbm [shape: bf16[2,96,32], index: 3, kind: input, shape index: {}]   ;;  %s6316_s4 = inlined_call_operand.hbm [shape: f32[2,1,32], index: 4, kind: input, shape index: {}]   ;;  %s6317_s5 = inlined_call_operand.hbm [shape: bf16[2,32,32], index: 5, kind: input, shape index: {}]   ;;  %s6318_s6 = inlined_call_operand.hbm [shape: f32[2,1,32], index: 6, kind: input, shape index: {}]   ;;  %s6319_s7 = inlined_call_operand.hbm [shape: bf16[96,32], index: 7, kind: input, shape index: {}]   ;;  %s6320_s8 = inlined_call_operand.hbm [shape: f32[1,32], index: 8, kind: input, shape index: {}]   ;;  %s6321_s9 = inlined_call_operand.hbm [shape: bf16[2,96,32], index: 9, kind: input, shape index: {}]   ;;  %s6322_s10 = inlined_call_operand.hbm [shape: f32[2,1,32], index: 10, kind: input, shape index: {}]   ;;  %s6323_s11 = inlined_call_operand.hbm [shape: bf16[2,32,32], index: 11, kind: input, shape index: {}]   ;;  %s6324_s12 = inlined_call_operand.hbm [shape: f32[2,1,32], index: 12, kind: input, shape index: {}]   ;;  %s6325_s13 = inlined_call_operand.hbm [shape: bf16[96,32], index: 13, kind: input, shape index: {}]   ;;  %s6326_s14 = inlined_call_operand.hbm [shape: f32[1,32], index: 14, kind: input, shape index: {}]   ;;  %s6327_s15 = inlined_call_operand.hbm [shape: bf16[96,32], index: 15, kind: input, shape index: {}]   ;;  %s6328_s16 = inlined_call_operand.hbm [shape: f32[1,32], index: 16, kind: input, shape index: {}]   ;;  %s6329_s17 = inlined_call_operand.hbm [shape: bf16[96,8], index: 17, kind: input, shape index: {}]   ;;  %s6330_s18 = inlined_call_operand.hbm [shape: f32[1,8], index: 18, kind: input, shape index: {}]   ;;  %s6331_s19 = inlined_call_operand.hbm [shape: f32[2,64,8], index: 19, kind: output, shape index: {}]  }
   0x1   :  { %6353 = sst [smem:[#allocation50_spill]] %s6312_s0 }
   0x2   :  { %6354 = sst [smem:[#allocation51_spill]] %s6313_s1 }
   0x3   :  { %6355 = sst [smem:[#allocation52_spill]] %s6314_s2 }
   0x4   :  { %6356 = sst [smem:[#allocation53_spill]] %s6315_s3 }
   0x5   :  { %6357 = sst [smem:[#allocation54_spill]] %s6316_s4 }
   0x6   :  { %6358 = sst [smem:[#allocation55_spill]] %s6317_s5 }
   0x7   :  { %6359 = sst [smem:[#allocation56_spill]] %s6318_s6 }
   0x8   :  { %6360 = sst [smem:[#allocation57_spill]] %s6319_s7 }
   0x9   :  { %6361 = sst [smem:[#allocation58_spill]] %s6320_s8 }
   0xa   :  { %6362 = sst [smem:[#allocation59_spill]] %s6326_s14 }
   0xb   :  { %6363 = sst [smem:[#allocation60_spill]] %s6328_s16 }
   0xc   :  { %6364 = sst [smem:[#allocation61_spill]] %s6330_s18 }
   0xd   :  { %6365 = sst [smem:[#allocation62_spill]] %s6331_s19 }
   0xe   :  { %24 = vsyncpa [#allocation3], 0 }
   0xf   :  { %26 = vsyncpa [#allocation3 + $0x1], 0 }
  0x10   :  { %27 = vsyncpa [#allocation6], 0 }
  0x11   :  { %28 = vsyncpa [#allocation9], 0 }
  0x12   :  { %29 = vsyncpa [#allocation12], 0 }
  0x13   :  { %30 = vsyncpa [#allocation15], 0 }
  0x14   :  { %31 = vsyncpa [#allocation18], 0 }
  0x15   :  { %32 = vsyncpa [#allocation21], 0 }
  0x16   :  { %33 = vsyncpa [#allocation24], 0 }
  0x17   :  { %34 = vsyncpa [#allocation27], 0 }
  0x18   :  { %35 = vsyncpa [#allocation30], 0 }
  0x19   :  { %36 = vsyncpa [#allocation4], 0 }
  0x1a   :  { %38 = vsyncpa [#allocation4 + $0x1], 0  ;;  %s5168_s0 = smov 0   ;;  %s5170_s30 = smov 0  }
  0x1b   :  { %s5172_s20 = smov 0   ;;  %s5174_s21 = smov 0  }
  0x1c LB: > { %6366 = sst [smem:[#allocation44_spill]] %s5021_s0  ;;  %s5035_s1 = smov [#allocation5]   ;;  %s5033_s21 = sphi %s5174_s21, %s6446_s21   ;;  %s5029_s20 = sphi %s5172_s20, %s6445_s20   ;;  %s5025_s30 = sphi %s5170_s30, %s6442_s30   ;;  %s5021_s0 = sphi %s5168_s0, %s6444_s0  }
  0x1d   : > { %6367 = sst [smem:[#allocation45_spill]] %s5025_s30  ;;  %s491_s22 = sshll.u32 %s5035_s1, 4  ;;  %s5194_s22 = int_to_ptr.vmem [resolvable:$true] %s491_s22 }
  0x1e   : > { %6368 = sst [smem:[#allocation46_spill]] %s5029_s20  ;;  %s5189_s2 = sadd.s32 4294967295, %s5033_s21  }
  0x1f   : > { %6369 = sst [smem:[#allocation47_spill]] %s5033_s21  ;;  %p3437_p0 = scmp.ge.s32.totalorder %s5033_s21, 1 }
  0x20   : > { %6370 = sst [smem:[#allocation48_spill]] %s5189_s2  ;;  %p6348_p1 = scmp.eq.s32.totalorder %s5189_s2, 0 }
  0x21   : > { %p479_p2 = scmp.lt.s32.totalorder %s5033_s21, 3  ;;  %s5036_s24 = smov [#allocation8]  }
  0x22   : > { %s515_s25 = sshll.u32 %s5036_s24, 4  ;;  %s5037_s26 = smov [#allocation11]   ;;  %s5209_s25 = int_to_ptr.vmem [resolvable:$true] %s515_s25 }
  0x23   : > { %p5196_p3 = pnand %p3437_p0, %p479_p2  ;;  %s541_s27 = sshll.u32 %s5037_s26, 4  ;;  %s5211_s27 = int_to_ptr.vmem [resolvable:$true] %s541_s27 }
  0x24   : > { %s6374_s1 = sld [smem:[#allocation51_spill]] }
  0x25   : > { %s6371_s23 = scalar_select %p5196_p3, 1, 0 }
  0x26   : > { %p3964_p5 = pneg %p5196_p3 }
  0x27   : > { %6372 = sst [smem:[#allocation49_spill]] %s6371_s23 }
  0x28   : > { %p5205_p6 = pnand %p3964_p5, %p6348_p1 }
  0x2a   : > { %s4397_s19 = scalar_lea.hbm %s6374_s1, 384  ;;  %p5221_p8 = pneg %p5205_p6 }
  0x2b   : > { %p4398_p7 = scmp.ne.s32.totalorder %s6374_s1, %s4397_s19  ;;  %p4404_p11 = scmp.lt.u32.totalorder %s4397_s19, %s6374_s1 }
  0x2d   : > { %p4400_p9 = pnand %p5221_p8, %p4398_p7 }
  0x2f   : > { %p4401_p10 = pneg %p4400_p9 }
  0x31   : > { %p4406_p12 = pnand %p4404_p11, %p4401_p10 }
  0x33   : > { %4409 = shalt.err (!%p4406_p12)
}
  0x34   : > { %s4410_s0 = scalar_lea.vmem %s5194_s22, 384  ;;  %p4418_p5 = scmp.lt.s32.totalorder %s5194_s22, %s5194_s22 }
  0x35   : > { %p4411_p13 = scmp.ne.s32.totalorder %s5194_s22, %s4410_s0  ;;  %p4419_p4 = scmp.lt.s32.totalorder %s4410_s0, %s4410_s0 }
  0x37   : > { %p4413_p0 = pnand %p4411_p13, %p5221_p8  ;;  %p4420_p7 = por %p4419_p4, %p4418_p5 }
  0x39   : > { %p4414_p2 = pneg %p4413_p0 }
  0x3b   : > { %p4421_p9 = pnand %p4420_p7, %p4414_p2 }
  0x3d   : > { %4424 = shalt.err (!%p4421_p9)
}
  0x3e   : > { %s5038_s23 = smov 64   ;;  %s5039_s19 = smov 4  }
  0x3f   : > { %3967 = dma.hbm_to_vmem [thread:$0]  (!%p5205_p6), %s6374_s1, 384, %s5194_s22, [#allocation6], %s5038_s23, %s5038_s23, %s5039_s19  }
  0x40   : > { %s6376_s30 = sld [smem:[#allocation53_spill]] }
  0x46   : > { %s6377_s18 = smov %s6376_s30  ;;  %s4425_s0 = scalar_lea.hbm %s6376_s30, 1536 }
  0x47   : > { %p4426_p4 = scmp.ne.s32.totalorder %s6377_s18, %s4425_s0  ;;  %p4432_p12 = scmp.lt.u32.totalorder %s4425_s0, %s6377_s18 }
  0x49   : > { %p4428_p10 = pnand %p4426_p4, %p5221_p8 }
  0x4b   : > { %p4429_p11 = pneg %p4428_p10 }
  0x4d   : > { %p4434_p13 = pnand %p4432_p12, %p4429_p11 }
  0x4f   : > { %4437 = shalt.err (!%p4434_p13)
}
  0x50   : > { %s4438_s22 = scalar_lea.vmem %s5209_s25, 1536  ;;  %p4446_p7 = scmp.lt.s32.totalorder %s5209_s25, %s5209_s25 }
  0x51   : > { %p4439_p0 = scmp.ne.s32.totalorder %s5209_s25, %s4438_s22  ;;  %p4447_p9 = scmp.lt.s32.totalorder %s4438_s22, %s4438_s22 }
  0x53   : > { %p4441_p2 = pnand %p4439_p0, %p5221_p8  ;;  %p4448_p4 = por %p4447_p9, %p4446_p7 }
  0x55   : > { %p4442_p5 = pneg %p4441_p2 }
  0x57   : > { %p4449_p10 = pnand %p4448_p4, %p4442_p5 }
  0x59   : > { %4452 = shalt.err (!%p4449_p10)
}
  0x5a   : > { %3973 = dma.hbm_to_vmem [thread:$0]  (!%p5205_p6), %s6377_s18, 1536, %s5209_s25, [#allocation9], %s5038_s23, %s5038_s23, %s5039_s19  }
  0x5b   : > { %s6378_s5 = sld [smem:[#allocation55_spill]] }
  0x61   : > { %s4453_s21 = scalar_lea.hbm %s6378_s5, 512 }
  0x62   : > { %p4454_p11 = scmp.ne.s32.totalorder %s6378_s5, %s4453_s21  ;;  %p4460_p0 = scmp.lt.u32.totalorder %s4453_s21, %s6378_s5 }
  0x64   : > { %p4456_p12 = pnand %p4454_p11, %p5221_p8 }
  0x66   : > { %p4457_p13 = pneg %p4456_p12 }
  0x68   : > { %p4462_p2 = pnand %p4460_p0, %p4457_p13 }
  0x6a   : > { %4465 = shalt.err (!%p4462_p2)
}
  0x6b   : > { %s4466_s25 = scalar_lea.vmem %s5211_s27, 512  ;;  %p4474_p4 = scmp.lt.s32.totalorder %s5211_s27, %s5211_s27 }
  0x6c   : > { %p4467_p5 = scmp.ne.s32.totalorder %s5211_s27, %s4466_s25  ;;  %p4475_p10 = scmp.lt.s32.totalorder %s4466_s25, %s4466_s25 }
  0x6e   : > { %p4469_p7 = pnand %p4467_p5, %p5221_p8  ;;  %p4476_p11 = por %p4475_p10, %p4474_p4 }
  0x70   : > { %p4470_p9 = pneg %p4469_p7 }
  0x72   : > { %p4477_p12 = pnand %p4476_p11, %p4470_p9 }
  0x74   : > { %4480 = shalt.err (!%p4477_p12)
}
  0x75   : > { %3979 = dma.hbm_to_vmem [thread:$0]  (!%p5205_p6), %s6378_s5, 512, %s5211_s27, [#allocation12], %s5038_s23, %s5038_s23, %s5039_s19  }
  0x76   : > { %s5040_s14 = smov [#allocation14]   ;;  %s5041_s30 = smov [#allocation17]  }
  0x77   : > { %s567_s16 = sshll.u32 %s5040_s14, 4  ;;  %s591_s20 = sshll.u32 %s5041_s30, 4  ;;  %s568_s16 = int_to_ptr.vmem [resolvable:$true] %s567_s16  ;;  %s592_s20 = int_to_ptr.vmem [resolvable:$true] %s591_s20 }
  0x78   : > { %s6379_s7 = sld [smem:[#allocation57_spill]] }
  0x7e   : > { %s4481_s28 = scalar_lea.hbm %s6379_s7, 768 }
  0x7f   : > { %p4482_p13 = scmp.ne.s32.totalorder %s6379_s7, %s4481_s28  ;;  %p4488_p5 = scmp.lt.u32.totalorder %s4481_s28, %s6379_s7 }
  0x81   : > { %p4484_p0 = pnand %p4482_p13, %p5221_p8 }
  0x83   : > { %p4485_p2 = pneg %p4484_p0 }
  0x85   : > { %p4490_p7 = pnand %p4488_p5, %p4485_p2 }
  0x87   : > { %4493 = shalt.err (!%p4490_p7)
}
  0x88   : > { %s4494_s27 = scalar_lea.vmem %s568_s16, 768  ;;  %p4502_p11 = scmp.lt.s32.totalorder %s568_s16, %s568_s16 }
  0x89   : > { %p4495_p9 = scmp.ne.s32.totalorder %s568_s16, %s4494_s27  ;;  %p4503_p12 = scmp.lt.s32.totalorder %s4494_s27, %s4494_s27 }
  0x8b   : > { %p4497_p4 = pnand %p4495_p9, %p5221_p8  ;;  %p4504_p1 = por %p4503_p12, %p4502_p11 }
  0x8d   : > { %p4498_p10 = pneg %p4497_p4 }
  0x8f   : > { %p4505_p3 = pnand %p4504_p1, %p4498_p10 }
  0x91   : > { %4508 = shalt.err (!%p4505_p3)
}
  0x92   : > { %3985 = dma.hbm_to_vmem [thread:$0]  (!%p5205_p6), %s6379_s7, 768, %s568_s16, [#allocation15], %s5038_s23, %s5038_s23, %s5039_s19  }
  0x93   : > { %s4509_s2 = scalar_lea.hbm %s6321_s9, 1536 }
  0x94   : > { %p4510_p1 = scmp.ne.s32.totalorder %s6321_s9, %s4509_s2  ;;  %p4516_p0 = scmp.lt.u32.totalorder %s4509_s2, %s6321_s9 }
  0x96   : > { %p4512_p3 = pnand %p4510_p1, %p5221_p8 }
  0x98   : > { %p4513_p13 = pneg %p4512_p3 }
  0x9a   : > { %p4518_p2 = pnand %p4516_p0, %p4513_p13 }
  0x9c   : > { %4521 = shalt.err (!%p4518_p2)
}
  0x9d   : > { %s4522_s0 = scalar_lea.vmem %s592_s20, 1536  ;;  %p4530_p4 = scmp.lt.s32.totalorder %s592_s20, %s592_s20 }
  0x9e   : > { %p4523_p5 = scmp.ne.s32.totalorder %s592_s20, %s4522_s0  ;;  %p4531_p10 = scmp.lt.s32.totalorder %s4522_s0, %s4522_s0 }
  0xa0   : > { %p4525_p7 = pnand %p4523_p5, %p5221_p8  ;;  %p4532_p11 = por %p4531_p10, %p4530_p4 }
  0xa2   : > { %p4526_p9 = pneg %p4525_p7 }
  0xa4   : > { %p4533_p12 = pnand %p4532_p11, %p4526_p9 }
  0xa6   : > { %4536 = shalt.err (!%p4533_p12)
}
  0xa7   : > { %3991 = dma.hbm_to_vmem [thread:$0]  (!%p5205_p6), %s6321_s9, 1536, %s592_s20, [#allocation18], %s5038_s23, %s5038_s23, %s5039_s19  }
  0xa8   : > { %s5042_s22 = smov [#allocation20]   ;;  %s5043_s30 = smov [#allocation23]  }
  0xa9   : > { %s617_s14 = sshll.u32 %s5042_s22, 4  ;;  %s643_s21 = sshll.u32 %s5043_s30, 4  ;;  %s618_s14 = int_to_ptr.vmem [resolvable:$true] %s617_s14  ;;  %s644_s21 = int_to_ptr.vmem [resolvable:$true] %s643_s21 }
  0xaa   : > { %s4537_s29 = scalar_lea.hbm %s6323_s11, 512 }
  0xab   : > { %p4538_p1 = scmp.ne.s32.totalorder %s6323_s11, %s4537_s29  ;;  %p4544_p0 = scmp.lt.u32.totalorder %s4537_s29, %s6323_s11 }
  0xad   : > { %p4540_p3 = pnand %p4538_p1, %p5221_p8 }
  0xaf   : > { %p4541_p13 = pneg %p4540_p3 }
  0xb1   : > { %p4546_p2 = pnand %p4544_p0, %p4541_p13 }
  0xb3   : > { %4549 = shalt.err (!%p4546_p2)
}
  0xb4   : > { %s4550_s20 = scalar_lea.vmem %s618_s14, 512  ;;  %p4558_p4 = scmp.lt.s32.totalorder %s618_s14, %s618_s14 }
  0xb5   : > { %p4551_p5 = scmp.ne.s32.totalorder %s618_s14, %s4550_s20  ;;  %p4559_p10 = scmp.lt.s32.totalorder %s4550_s20, %s4550_s20 }
  0xb7   : > { %p4553_p7 = pnand %p4551_p5, %p5221_p8  ;;  %p4560_p11 = por %p4559_p10, %p4558_p4 }
  0xb9   : > { %p4554_p9 = pneg %p4553_p7 }
  0xbb   : > { %p4561_p12 = pnand %p4560_p11, %p4554_p9 }
  0xbd   : > { %4564 = shalt.err (!%p4561_p12)
}
  0xbe   : > { %3997 = dma.hbm_to_vmem [thread:$0]  (!%p5205_p6), %s6323_s11, 512, %s618_s14, [#allocation21], %s5038_s23, %s5038_s23, %s5039_s19  }
  0xbf   : > { %s4565_s28 = scalar_lea.hbm %s6325_s13, 768 }
  0xc0   : > { %p4566_p1 = scmp.ne.s32.totalorder %s6325_s13, %s4565_s28  ;;  %p4572_p0 = scmp.lt.u32.totalorder %s4565_s28, %s6325_s13 }
  0xc2   : > { %p4568_p3 = pnand %p4566_p1, %p5221_p8 }
  0xc4   : > { %p4569_p13 = pneg %p4568_p3 }
  0xc6   : > { %p4574_p2 = pnand %p4572_p0, %p4569_p13 }
  0xc8   : > { %4577 = shalt.err (!%p4574_p2)
}
  0xc9   : > { %s4578_s16 = scalar_lea.vmem %s644_s21, 768  ;;  %p4586_p4 = scmp.lt.s32.totalorder %s644_s21, %s644_s21 }
  0xca   : > { %p4579_p5 = scmp.ne.s32.totalorder %s644_s21, %s4578_s16  ;;  %p4587_p10 = scmp.lt.s32.totalorder %s4578_s16, %s4578_s16 }
  0xcc   : > { %p4581_p7 = pnand %p4579_p5, %p5221_p8  ;;  %p4588_p11 = por %p4587_p10, %p4586_p4 }
  0xce   : > { %p4582_p9 = pneg %p4581_p7 }
  0xd0   : > { %p4589_p12 = pnand %p4588_p11, %p4582_p9 }
  0xd2   : > { %4592 = shalt.err (!%p4589_p12)
}
  0xd3   : > { %4003 = dma.hbm_to_vmem [thread:$0]  (!%p5205_p6), %s6325_s13, 768, %s644_s21, [#allocation24], %s5038_s23, %s5038_s23, %s5039_s19  }
  0xd4   : > { %s5044_s27 = smov [#allocation26]   ;;  %s5045_s30 = smov [#allocation29]  }
  0xd5   : > { %s667_s22 = sshll.u32 %s5044_s27, 4  ;;  %s691_s2 = sshll.u32 %s5045_s30, 4  ;;  %s668_s22 = int_to_ptr.vmem [resolvable:$true] %s667_s22  ;;  %s692_s2 = int_to_ptr.vmem [resolvable:$true] %s691_s2 }
  0xd6   : > { %s4593_s26 = scalar_lea.hbm %s6327_s15, 768 }
  0xd7   : > { %p4594_p1 = scmp.ne.s32.totalorder %s6327_s15, %s4593_s26  ;;  %p4600_p0 = scmp.lt.u32.totalorder %s4593_s26, %s6327_s15 }
  0xd9   : > { %p4596_p3 = pnand %p4594_p1, %p5221_p8 }
  0xdb   : > { %p4597_p13 = pneg %p4596_p3 }
  0xdd   : > { %p4602_p2 = pnand %p4600_p0, %p4597_p13 }
  0xdf   : > { %4605 = shalt.err (!%p4602_p2)
}
  0xe0   : > { %s4606_s21 = scalar_lea.vmem %s668_s22, 768  ;;  %p4614_p4 = scmp.lt.s32.totalorder %s668_s22, %s668_s22 }
  0xe1   : > { %p4607_p5 = scmp.ne.s32.totalorder %s668_s22, %s4606_s21  ;;  %p4615_p10 = scmp.lt.s32.totalorder %s4606_s21, %s4606_s21 }
  0xe3   : > { %p4609_p7 = pnand %p4607_p5, %p5221_p8  ;;  %p4616_p11 = por %p4615_p10, %p4614_p4 }
  0xe5   : > { %p4610_p9 = pneg %p4609_p7 }
  0xe7   : > { %p4617_p12 = pnand %p4616_p11, %p4610_p9 }
  0xe9   : > { %4620 = shalt.err (!%p4617_p12)
}
  0xea   : > { %4009 = dma.hbm_to_vmem [thread:$0]  (!%p5205_p6), %s6327_s15, 768, %s668_s22, [#allocation27], %s5038_s23, %s5038_s23, %s5039_s19  }
  0xeb   : > { %s4621_s29 = scalar_lea.hbm %s6329_s17, 768 }
  0xec   : > { %p4622_p1 = scmp.ne.s32.totalorder %s6329_s17, %s4621_s29  ;;  %p4628_p0 = scmp.lt.u32.totalorder %s4621_s29, %s6329_s17 }
  0xee   : > { %p4624_p3 = pnand %p4622_p1, %p5221_p8 }
  0xf0   : > { %p4625_p13 = pneg %p4624_p3 }
  0xf2   : > { %p4630_p2 = pnand %p4628_p0, %p4625_p13 }
  0xf4   : > { %4633 = shalt.err (!%p4630_p2)
}
  0xf5   : > { %s4634_s14 = scalar_lea.vmem %s692_s2, 768  ;;  %p4642_p4 = scmp.lt.s32.totalorder %s692_s2, %s692_s2 }
  0xf6   : > { %p4635_p5 = scmp.ne.s32.totalorder %s692_s2, %s4634_s14  ;;  %p4643_p10 = scmp.lt.s32.totalorder %s4634_s14, %s4634_s14 }
  0xf8   : > { %p4637_p7 = pnand %p4635_p5, %p5221_p8  ;;  %p4644_p11 = por %p4643_p10, %p4642_p4 }
  0xfa   : > { %p4638_p9 = pneg %p4637_p7 }
  0xfc   : > { %p4645_p12 = pnand %p4644_p11, %p4638_p9 }
  0xfe   : > { %4648 = shalt.err (!%p4645_p12)
}
  0xff   : > { %4015 = dma.hbm_to_vmem [thread:$0]  (!%p5205_p6), %s6329_s17, 768, %s692_s2, [#allocation30], %s5038_s23, %s5038_s23, %s5039_s19  }
 0x100   : > { %s5046_s20 = smov [#allocation7]   ;;  %s5047_s30 = smov [#allocation10]  }
 0x101   : > { %s505_s27 = sshll.u32 %s5046_s20, 4  ;;  %s528_s28 = sshll.u32 %s5047_s30, 4  ;;  %s506_s27 = int_to_ptr.vmem [resolvable:$true] %s505_s27  ;;  %s529_s28 = int_to_ptr.vmem [resolvable:$true] %s528_s28 }
 0x102   : > { %s6380_s25 = sld [smem:[#allocation52_spill]] }
 0x108   : > { %s4649_s0 = scalar_lea.hbm %s6380_s25, 16 }
 0x109   : > { %p4650_p1 = scmp.ne.s32.totalorder %s6380_s25, %s4649_s0  ;;  %p4656_p0 = scmp.lt.u32.totalorder %s4649_s0, %s6380_s25 }
 0x10b   : > { %p4652_p3 = pnand %p4650_p1, %p5221_p8 }
 0x10d   : > { %p4653_p13 = pneg %p4652_p3 }
 0x10f   : > { %p4658_p2 = pnand %p4656_p0, %p4653_p13 }
 0x111   : > { %4661 = shalt.err (!%p4658_p2)
}
 0x112   : > { %s4662_s23 = scalar_lea.vmem %s506_s27, 16  ;;  %s4669_s19 = scalar_lea.vmem %s506_s27, 32 }
 0x113   : > { %p4663_p5 = scmp.ne.s32.totalorder %s506_s27, %s4662_s23  ;;  %p4670_p4 = scmp.lt.s32.totalorder %s506_s27, %s506_s27 }
 0x114   : > { %p4671_p10 = scmp.lt.s32.totalorder %s4669_s19, %s4662_s23 }
 0x115   : > { %p4665_p7 = pnand %p4663_p5, %p5221_p8 }
 0x116   : > { %p4672_p11 = por %p4671_p10, %p4670_p4 }
 0x117   : > { %p4666_p9 = pneg %p4665_p7 }
 0x119   : > { %p4673_p12 = pnand %p4672_p11, %p4666_p9 }
 0x11b   : > { %4676 = shalt.err (!%p4673_p12)
}
 0x11c   : > { %3970 = dma.hbm_to_vmem [thread:$0]  (!%p5205_p6), %s6380_s25, 16, %s506_s27, [#allocation6]  }
 0x11d   : > { %s6381_s4 = sld [smem:[#allocation54_spill]] }
 0x123   : > { %s4677_s30 = scalar_lea.hbm %s6381_s4, 32 }
 0x124   : > { %p4678_p1 = scmp.ne.s32.totalorder %s6381_s4, %s4677_s30  ;;  %p4684_p0 = scmp.lt.u32.totalorder %s4677_s30, %s6381_s4 }
 0x126   : > { %p4680_p3 = pnand %p4678_p1, %p5221_p8 }
 0x128   : > { %p4681_p13 = pneg %p4680_p3 }
 0x12a   : > { %p4686_p2 = pnand %p4684_p0, %p4681_p13 }
 0x12c   : > { %4689 = shalt.err (!%p4686_p2)
}
 0x12d   : > { %s4690_s14 = scalar_lea.vmem %s529_s28, 32  ;;  %p4698_p4 = scmp.lt.s32.totalorder %s529_s28, %s529_s28 }
 0x12e   : > { %p4691_p5 = scmp.ne.s32.totalorder %s529_s28, %s4690_s14  ;;  %p4699_p10 = scmp.lt.s32.totalorder %s4690_s14, %s4690_s14 }
 0x130   : > { %p4693_p7 = pnand %p4691_p5, %p5221_p8  ;;  %p4700_p11 = por %p4699_p10, %p4698_p4 }
 0x132   : > { %p4694_p9 = pneg %p4693_p7 }
 0x134   : > { %p4701_p12 = pnand %p4700_p11, %p4694_p9 }
 0x136   : > { %4704 = shalt.err (!%p4701_p12)
}
 0x137   : > { %s5048_s27 = smov 16   ;;  %s5049_s22 = smov 1  }
 0x138   : > { %3976 = dma.hbm_to_vmem [thread:$0]  (!%p5205_p6), %s6381_s4, 32, %s529_s28, [#allocation9], %s5048_s27, %s5048_s27, %s5049_s22  }
 0x139   : > { %s5050_s2 = smov [#allocation13]   ;;  %s5051_s1 = smov [#allocation16]  }
 0x13a   : > { %s554_s21 = sshll.u32 %s5050_s2, 4  ;;  %s581_s20 = sshll.u32 %s5051_s1, 4  ;;  %s555_s21 = int_to_ptr.vmem [resolvable:$true] %s554_s21  ;;  %s582_s20 = int_to_ptr.vmem [resolvable:$true] %s581_s20 }
 0x13b   : > { %s6382_s6 = sld [smem:[#allocation56_spill]] }
 0x141   : > { %s4705_s26 = scalar_lea.hbm %s6382_s6, 32 }
 0x142   : > { %p4706_p1 = scmp.ne.s32.totalorder %s6382_s6, %s4705_s26  ;;  %p4712_p0 = scmp.lt.u32.totalorder %s4705_s26, %s6382_s6 }
 0x144   : > { %p4708_p3 = pnand %p4706_p1, %p5221_p8 }
 0x146   : > { %p4709_p13 = pneg %p4708_p3 }
 0x148   : > { %p4714_p2 = pnand %p4712_p0, %p4709_p13 }
 0x14a   : > { %4717 = shalt.err (!%p4714_p2)
}
 0x14b   : > { %s4718_s28 = scalar_lea.vmem %s555_s21, 32  ;;  %p4726_p4 = scmp.lt.s32.totalorder %s555_s21, %s555_s21 }
 0x14c   : > { %p4719_p5 = scmp.ne.s32.totalorder %s555_s21, %s4718_s28  ;;  %p4727_p10 = scmp.lt.s32.totalorder %s4718_s28, %s4718_s28 }
 0x14e   : > { %p4721_p7 = pnand %p4719_p5, %p5221_p8  ;;  %p4728_p11 = por %p4727_p10, %p4726_p4 }
 0x150   : > { %p4722_p9 = pneg %p4721_p7 }
 0x152   : > { %p4729_p12 = pnand %p4728_p11, %p4722_p9 }
 0x154   : > { %4732 = shalt.err (!%p4729_p12)
}
 0x155   : > { %3982 = dma.hbm_to_vmem [thread:$0]  (!%p5205_p6), %s6382_s6, 32, %s555_s21, [#allocation12], %s5048_s27, %s5048_s27, %s5049_s22  }
 0x156   : > { %s6383_s8 = sld [smem:[#allocation58_spill]] }
 0x15c   : > { %s4733_s1 = scalar_lea.hbm %s6383_s8, 16 }
 0x15d   : > { %p4734_p1 = scmp.ne.s32.totalorder %s6383_s8, %s4733_s1  ;;  %p4740_p0 = scmp.lt.u32.totalorder %s4733_s1, %s6383_s8 }
 0x15f   : > { %p4736_p3 = pnand %p4734_p1, %p5221_p8 }
 0x161   : > { %p4737_p13 = pneg %p4736_p3 }
 0x163   : > { %p4742_p2 = pnand %p4740_p0, %p4737_p13 }
 0x165   : > { %4745 = shalt.err (!%p4742_p2)
}
 0x166   : > { %s4746_s16 = scalar_lea.vmem %s582_s20, 16  ;;  %s4753_s21 = scalar_lea.vmem %s582_s20, 32 }
 0x167   : > { %p4747_p5 = scmp.ne.s32.totalorder %s582_s20, %s4746_s16  ;;  %p4754_p4 = scmp.lt.s32.totalorder %s582_s20, %s582_s20 }
 0x168   : > { %p4755_p10 = scmp.lt.s32.totalorder %s4753_s21, %s4746_s16 }
 0x169   : > { %p4749_p7 = pnand %p4747_p5, %p5221_p8 }
 0x16a   : > { %p4756_p11 = por %p4755_p10, %p4754_p4 }
 0x16b   : > { %p4750_p9 = pneg %p4749_p7 }
 0x16d   : > { %p4757_p12 = pnand %p4756_p11, %p4750_p9 }
 0x16f   : > { %4760 = shalt.err (!%p4757_p12)
}
 0x170   : > { %3988 = dma.hbm_to_vmem [thread:$0]  (!%p5205_p6), %s6383_s8, 16, %s582_s20, [#allocation15]  }
 0x171   : > { %s5052_s5 = smov [#allocation19]   ;;  %s5053_s19 = smov [#allocation22]  }
 0x172   : > { %s604_s23 = sshll.u32 %s5052_s5, 4  ;;  %s630_s2 = sshll.u32 %s5053_s19, 4  ;;  %s605_s23 = int_to_ptr.vmem [resolvable:$true] %s604_s23  ;;  %s631_s2 = int_to_ptr.vmem [resolvable:$true] %s630_s2 }
 0x173   : > { %s4761_s29 = scalar_lea.hbm %s6322_s10, 32 }
 0x174   : > { %p4762_p1 = scmp.ne.s32.totalorder %s6322_s10, %s4761_s29  ;;  %p4768_p0 = scmp.lt.u32.totalorder %s4761_s29, %s6322_s10 }
 0x176   : > { %p4764_p3 = pnand %p4762_p1, %p5221_p8 }
 0x178   : > { %p4765_p13 = pneg %p4764_p3 }
 0x17a   : > { %p4770_p2 = pnand %p4768_p0, %p4765_p13 }
 0x17c   : > { %4773 = shalt.err (!%p4770_p2)
}
 0x17d   : > { %s4774_s20 = scalar_lea.vmem %s605_s23, 32  ;;  %p4782_p4 = scmp.lt.s32.totalorder %s605_s23, %s605_s23 }
 0x17e   : > { %p4775_p5 = scmp.ne.s32.totalorder %s605_s23, %s4774_s20  ;;  %p4783_p10 = scmp.lt.s32.totalorder %s4774_s20, %s4774_s20 }
 0x180   : > { %p4777_p7 = pnand %p4775_p5, %p5221_p8  ;;  %p4784_p11 = por %p4783_p10, %p4782_p4 }
 0x182   : > { %p4778_p9 = pneg %p4777_p7 }
 0x184   : > { %p4785_p12 = pnand %p4784_p11, %p4778_p9 }
 0x186   : > { %4788 = shalt.err (!%p4785_p12)
}
 0x187   : > { %3994 = dma.hbm_to_vmem [thread:$0]  (!%p5205_p6), %s6322_s10, 32, %s605_s23, [#allocation18], %s5048_s27, %s5048_s27, %s5049_s22  }
 0x188   : > { %s4789_s1 = scalar_lea.hbm %s6324_s12, 32 }
 0x189   : > { %p4790_p1 = scmp.ne.s32.totalorder %s6324_s12, %s4789_s1  ;;  %p4796_p0 = scmp.lt.u32.totalorder %s4789_s1, %s6324_s12 }
 0x18b   : > { %p4792_p3 = pnand %p4790_p1, %p5221_p8 }
 0x18d   : > { %p4793_p13 = pneg %p4792_p3 }
 0x18f   : > { %p4798_p2 = pnand %p4796_p0, %p4793_p13 }
 0x191   : > { %4801 = shalt.err (!%p4798_p2)
}
 0x192   : > { %s4802_s16 = scalar_lea.vmem %s631_s2, 32  ;;  %p4810_p4 = scmp.lt.s32.totalorder %s631_s2, %s631_s2 }
 0x193   : > { %p4803_p5 = scmp.ne.s32.totalorder %s631_s2, %s4802_s16  ;;  %p4811_p10 = scmp.lt.s32.totalorder %s4802_s16, %s4802_s16 }
 0x195   : > { %p4805_p7 = pnand %p4803_p5, %p5221_p8  ;;  %p4812_p11 = por %p4811_p10, %p4810_p4 }
 0x197   : > { %p4806_p9 = pneg %p4805_p7 }
 0x199   : > { %p4813_p12 = pnand %p4812_p11, %p4806_p9 }
 0x19b   : > { %4816 = shalt.err (!%p4813_p12)
}
 0x19c   : > { %4000 = dma.hbm_to_vmem [thread:$0]  (!%p5205_p6), %s6324_s12, 32, %s631_s2, [#allocation21], %s5048_s27, %s5048_s27, %s5049_s22  }
 0x19d   : > { %s5054_s20 = smov [#allocation25]   ;;  %s5055_s28 = smov [#allocation28]  }
 0x19e   : > { %s657_s14 = sshll.u32 %s5054_s20, 4  ;;  %s681_s5 = sshll.u32 %s5055_s28, 4  ;;  %s658_s14 = int_to_ptr.vmem [resolvable:$true] %s657_s14  ;;  %s682_s5 = int_to_ptr.vmem [resolvable:$true] %s681_s5 }
 0x19f   : > { %s6384_s30 = sld [smem:[#allocation59_spill]] }
 0x1a5   : > { %s6385_s29 = smov %s6384_s30  ;;  %s4817_s26 = scalar_lea.hbm %s6384_s30, 16 }
 0x1a6   : > { %p4818_p1 = scmp.ne.s32.totalorder %s6385_s29, %s4817_s26  ;;  %p4824_p0 = scmp.lt.u32.totalorder %s4817_s26, %s6385_s29 }
 0x1a8   : > { %p4820_p3 = pnand %p4818_p1, %p5221_p8 }
 0x1aa   : > { %p4821_p13 = pneg %p4820_p3 }
 0x1ac   : > { %p4826_p2 = pnand %p4824_p0, %p4821_p13 }
 0x1ae   : > { %4829 = shalt.err (!%p4826_p2)
}
 0x1af   : > { %s4830_s27 = scalar_lea.vmem %s658_s14, 16  ;;  %s4837_s22 = scalar_lea.vmem %s658_s14, 32 }
 0x1b0   : > { %p4831_p5 = scmp.ne.s32.totalorder %s658_s14, %s4830_s27  ;;  %p4838_p4 = scmp.lt.s32.totalorder %s658_s14, %s658_s14 }
 0x1b1   : > { %p4839_p10 = scmp.lt.s32.totalorder %s4837_s22, %s4830_s27 }
 0x1b2   : > { %p4833_p7 = pnand %p4831_p5, %p5221_p8 }
 0x1b3   : > { %p4840_p11 = por %p4839_p10, %p4838_p4 }
 0x1b4   : > { %p4834_p9 = pneg %p4833_p7 }
 0x1b6   : > { %p4841_p12 = pnand %p4840_p11, %p4834_p9 }
 0x1b8   : > { %4844 = shalt.err (!%p4841_p12)
}
 0x1b9   : > { %4006 = dma.hbm_to_vmem [thread:$0]  (!%p5205_p6), %s6385_s29, 16, %s658_s14, [#allocation24]  }
 0x1ba   : > { %s6386_s28 = sld [smem:[#allocation60_spill]] }
 0x1c0   : > { %s4845_s19 = scalar_lea.hbm %s6386_s28, 16 }
 0x1c1   : > { %p4846_p1 = scmp.ne.s32.totalorder %s6386_s28, %s4845_s19  ;;  %p4852_p0 = scmp.lt.u32.totalorder %s4845_s19, %s6386_s28 }
 0x1c3   : > { %p4848_p3 = pnand %p4846_p1, %p5221_p8 }
 0x1c5   : > { %p4849_p13 = pneg %p4848_p3 }
 0x1c7   : > { %p4854_p2 = pnand %p4852_p0, %p4849_p13 }
 0x1c9   : > { %4857 = shalt.err (!%p4854_p2)
}
 0x1ca   : > { %s4858_s16 = scalar_lea.vmem %s682_s5, 16  ;;  %s4865_s14 = scalar_lea.vmem %s682_s5, 32 }
 0x1cb   : > { %p4859_p5 = scmp.ne.s32.totalorder %s682_s5, %s4858_s16  ;;  %p4866_p4 = scmp.lt.s32.totalorder %s682_s5, %s682_s5 }
 0x1cc   : > { %p4867_p10 = scmp.lt.s32.totalorder %s4865_s14, %s4858_s16 }
 0x1cd   : > { %p4861_p7 = pnand %p4859_p5, %p5221_p8 }
 0x1ce   : > { %p4868_p11 = por %p4867_p10, %p4866_p4 }
 0x1cf   : > { %p4862_p9 = pneg %p4861_p7 }
 0x1d1   : > { %p4869_p12 = pnand %p4868_p11, %p4862_p9 }
 0x1d3   : > { %4872 = shalt.err (!%p4869_p12)
}
 0x1d4   : > { %4012 = dma.hbm_to_vmem [thread:$0]  (!%p5205_p6), %s6386_s28, 16, %s682_s5, [#allocation27]  }
 0x1d5   : > { %s5056_s22 = smov [#allocation31]   ;;  %s6387_s20 = sld [smem:[#allocation61_spill]] }
 0x1d6   : > { %s705_s2 = sshll.u32 %s5056_s22, 4  ;;  %s706_s2 = int_to_ptr.vmem [resolvable:$true] %s705_s2 }
 0x1db   : > { %s6388_s19 = smov %s6387_s20  ;;  %s4873_s1 = scalar_lea.hbm %s6387_s20, 16 }
 0x1dc   : > { %p4874_p1 = scmp.ne.s32.totalorder %s6388_s19, %s4873_s1  ;;  %p4880_p0 = scmp.lt.u32.totalorder %s4873_s1, %s6388_s19 }
 0x1de   : > { %p4876_p3 = pnand %p4874_p1, %p5221_p8 }
 0x1e0   : > { %p4877_p13 = pneg %p4876_p3 }
 0x1e2   : > { %p4882_p2 = pnand %p4880_p0, %p4877_p13 }
 0x1e4   : > { %4885 = shalt.err (!%p4882_p2)
}
 0x1e5   : > { %s4886_s5 = scalar_lea.vmem %s706_s2, 16  ;;  %s4893_s14 = scalar_lea.vmem %s706_s2, 32 }
 0x1e6   : > { %p4887_p5 = scmp.ne.s32.totalorder %s706_s2, %s4886_s5  ;;  %p4894_p4 = scmp.lt.s32.totalorder %s706_s2, %s706_s2 }
 0x1e7   : > { %p4895_p10 = scmp.lt.s32.totalorder %s4893_s14, %s4886_s5 }
 0x1e8   : > { %p4889_p7 = pnand %p4887_p5, %p5221_p8 }
 0x1e9   : > { %p4896_p11 = por %p4895_p10, %p4894_p4 }
 0x1ea   : > { %p4890_p9 = pneg %p4889_p7 }
 0x1ec   : > { %p4897_p12 = pnand %p4896_p11, %p4890_p9 }
 0x1ee   : > { %4900 = shalt.err (!%p4897_p12)
}
 0x1ef   : > { %s6389_s22 = sld [smem:[#allocation47_spill]]  ;;  %s6390_s21 = sld [smem:[#allocation46_spill]] }
 0x1f0   : > { %s6391_s4 = sld [smem:[#allocation45_spill]]  ;;  %s6392_s24 = sld [smem:[#allocation44_spill]] }
 0x1f1   : > { %s6393_s20 = sld [smem:[#allocation48_spill]] }
 0x1f2   : > { %4018 = dma.hbm_to_vmem [thread:$0]  (!%p5205_p6), %s6388_s19, 16, %s706_s2, [#allocation30]  }
 0x1f5   : > { %s3436_s1 = sadd.s32 4294967294, %s6389_s22   ;;  %s5599_s3 = sadd.s32 1, %s6389_s22  }
 0x1f6   : > { %s48_s30 = ssub.s32 %s6389_s22, %s5599_s3  ;;  %s51_s26 = sadd.s32 1, %s6390_s21 }
 0x1f7   : > { %p49_p8 = scmp.eq.s32.totalorder %s48_s30, 0  ;;  %p58_p1 = scmp.ne.s32.totalorder %s6390_s21, %s6391_s4 }
 0x1f8   : > { %p59_p3 = scmp.eq.s32.totalorder %s6389_s22, 0  ;;  %p64_p13 = scmp.ne.s32.totalorder %s6391_s4, %s6392_s24 }
 0x1f9   : > { %s5610_s0 = scalar_select %p49_p8, %s6390_s21, %s51_s26  }
 0x1fa   : > { %p5612_p0 = por %p59_p3, %p58_p1  ;;  %p6395_p2 = scmp.eq.s32.totalorder %s6393_s20, 0 }
 0x1fb   : > { %p466_p5 = scmp.eq.s32.totalorder %s6393_s20, 1  ;;  %p472_p7 = scmp.eq.s32.totalorder %s3436_s1, 1 }
 0x1fc   : > { %p5618_p6 = por %p6395_p2, %p64_p13  ;;  %p4045_p9 = scmp.lt.s32.totalorder %s6389_s22, 2 }
 0x1fd   : > { %s716_s5 = sand.u32 1, %s6390_s21   ;;  %p5625_p4 = por %p466_p5, %p58_p1 }
 0x1fe   : > { %p5629_p10 = por %p472_p7, %p64_p13  ;;  %s3457_s27 = sshll.u32 %s716_s5, 4 }
 0x1ff   : > { %s6397_s14 = scalar_select %p5625_p4, 1, 0 }
 0x200   : > { %s6398_s23 = scalar_select %p5629_p10, 1, 0 }
 0x201   : > { %s3591_s4 = sshll.u32 %s6389_s22, 8  ;;  %s6399_s26 = sld [smem:[#allocation50_spill]] }
 0x202   : > { %s720_s21 = scalar_lea.vmem [#allocation2], %s3457_s27  ;;  %p5643_p11 = pnand %p4045_p9, %p5612_p0 }
 0x203   : > { %s727_s20 = sshll.u32 %s720_s21, 4  ;;  %s5647_s22 = scalar_lea.sflag [#allocation3], %s716_s5  ;;  %s5639_s20 = int_to_ptr.vmem [resolvable:$true] %s727_s20 }
 0x204   : > { %p4903_p8 = pneg %p5643_p11 }
 0x207   : > { %s5637_s6 = scalar_lea.hbm %s6399_s26, %s3591_s4  ;;  %s4906_s16 = scalar_lea.hbm %s6399_s26, 512 }
 0x208   : > { %s4901_s24 = scalar_lea.hbm %s5637_s6, 256  ;;  %p4907_p13 = scmp.lt.u32.totalorder %s5637_s6, %s6399_s26 }
 0x209   : > { %p4902_p12 = scmp.ne.s32.totalorder %s5637_s6, %s4901_s24  ;;  %p4908_p0 = scmp.lt.u32.totalorder %s4906_s16, %s4901_s24 }
 0x20a   : > { %p4910_p5 = scmp.lt.u32.totalorder %s4901_s24, %s5637_s6 }
 0x20b   : > { %p4904_p1 = pnand %p4903_p8, %p4902_p12  ;;  %p4909_p2 = por %p4908_p0, %p4907_p13 }
 0x20d   : > { %p4905_p3 = pneg %p4904_p1  ;;  %p4911_p7 = por %p4910_p5, %p4909_p2 }
 0x20f   : > { %p4912_p9 = pnand %p4911_p7, %p4905_p3 }
 0x211   : > { %4915 = shalt.err (!%p4912_p9)
}
 0x212   : > { %s4916_s5 = scalar_lea.vmem %s5639_s20, 256  ;;  %s5057_s27 = smov [#allocation2]  }
 0x213   : > { %p4917_p12 = scmp.ne.s32.totalorder %s5639_s20, %s4916_s5  ;;  %s4921_s4 = sshll.u32 %s5057_s27, 4  ;;  %s4922_s4 = int_to_ptr.vmem [resolvable:$false] %s4921_s4 }
 0x214   : > { %s4923_s30 = scalar_lea.vmem %s4922_s4, 512  ;;  %p4924_p4 = scmp.lt.s32.totalorder %s5639_s20, %s4922_s4 }
 0x215   : > { %p4919_p1 = pnand %p4917_p12, %p4903_p8  ;;  %p4925_p13 = scmp.lt.s32.totalorder %s4923_s30, %s4916_s5 }
 0x217   : > { %p4920_p10 = pneg %p4919_p1  ;;  %p4926_p0 = por %p4925_p13, %p4924_p4 }
 0x219   : > { %p4927_p2 = pnand %p4926_p0, %p4920_p10 }
 0x21b   : > { %4930 = shalt.err (!%p4927_p2)
}
 0x21c   : > { %s5058_s24 = smov 128   ;;  %s5059_s16 = smov 8  }
 0x21d   : > { %4022 = dma.hbm_to_vmem [thread:$0]  (!%p5643_p11), %s5637_s6, 256, %s5639_s20, %s5647_s22, %s5058_s24, %s5058_s24, %s5059_s16  }
 0x21e   : > { %s6401_s21 = sld [smem:[#allocation49_spill]] }
 0x224   : > { %p6402_p8 = scmp.ne.s32.totalorder %s6401_s21, 0 }
 0x225   : > { %s6403_s7 = sld [smem:[#allocation45_spill]] (!%p6402_p8) }
 0x226   : > { %739 = sbr.rel (%p6402_p8) target bundleno = 5123 (0x1403), region = 96 }
 0x22b   : > { %s5678_s27 = sand.u32 (!%p6402_p8), 1, %s6403_s7  }
 0x22c   : > { %s3461_s5 = sshll.u32 (!%p6402_p8), %s5678_s27, 4  ;;  %s742_s4 = scalar_lea.sflag (!%p6402_p8), [#allocation3], %s5678_s27 }
 0x22d   : > { %s745_s30 = scalar_lea.vmem [#allocation2], %s3461_s5 }
 0x22e   : > { %4976 = dma.done.wait (%p5618_p6), %s742_s4, 256  }
 0x22f   : > { %4978 = vsyncadd (%p5618_p6), %s742_s4, 4294967040  ;;  %s6404_s8 = sld [smem:[#allocation48_spill]] }
 0x235   : > { %p6405_p4 = scmp.eq.s32.totalorder %s6404_s8, 0 }
 0x237   : > { %4980 = dma.done.wait (%p6405_p4), [#allocation6], 400   ;;  %p6406_p10 = pmov %p6405_p4 }
 0x238   : > { %p6407_p11 = pmov %p6405_p4 }
 0x239   : > { %4982 = vsyncadd (%p6406_p10), [#allocation6], 4294966896 }
 0x23a   : > { %4984 = dma.done.wait (%p6407_p11), [#allocation9], 1568   ;;  %p6408_p3 = pmov %p6405_p4 }
 0x23c   : > { %4986 = vsyncadd (%p6408_p3), [#allocation9], 4294965728  ;;  %p6409_p5 = pmov %p6408_p3 }
 0x23d   : > { %p6410_p7 = pmov %p6408_p3 }
 0x23e   : > { %4988 = dma.done.wait (%p6409_p5), [#allocation12], 544  }
 0x23f   : > { %4990 = vsyncadd (%p6410_p7), [#allocation12], 4294966752  ;;  %p6411_p6 = pmov %p6408_p3 }
 0x240   : > { %p6412_p9 = pmov %p6408_p3 }
 0x241   : > { %4992 = dma.done.wait (%p6411_p6), [#allocation15], 784  }
 0x242   : > { %4994 = vsyncadd (%p6412_p9), [#allocation15], 4294966512  ;;  %p6413_p12 = pmov %p6408_p3 }
 0x243   : > { %p6414_p1 = pmov %p6408_p3 }
 0x244   : > { %4996 = dma.done.wait (%p6413_p12), [#allocation18], 1568  }
 0x245   : > { %4998 = vsyncadd (%p6414_p1), [#allocation18], 4294965728  ;;  %p6415_p13 = pmov %p6414_p1 }
 0x246   : > { %p6416_p0 = pmov %p6414_p1 }
 0x247   : > { %5000 = dma.done.wait (%p6415_p13), [#allocation21], 544  }
 0x248   : > { %5002 = vsyncadd (%p6416_p0), [#allocation21], 4294966752  ;;  %p6417_p2 = pmov %p6416_p0 }
 0x249   : > { %p6418_p8 = pmov %p6416_p0 }
 0x24a   : > { %5004 = dma.done.wait (%p6417_p2), [#allocation24], 784  }
 0x24b   : > { %5006 = vsyncadd (%p6418_p8), [#allocation24], 4294966512  ;;  %p6419_p4 = pmov %p6416_p0 }
 0x24c   : > { %p6420_p10 = pmov %p6416_p0 }
 0x24d   : > { %5008 = dma.done.wait (%p6419_p4), [#allocation27], 784  }
 0x24e   : > { %5010 = vsyncadd (%p6420_p10), [#allocation27], 4294966512  ;;  %p6421_p11 = pmov %p6416_p0 }
 0x24f   : > { %p6422_p3 = pmov %p6416_p0 }
 0x250   : > { %5012 = dma.done.wait (%p6421_p11), [#allocation30], 784  }
 0x251   : > { %5014 = vsyncadd (%p6422_p3), [#allocation30], 4294966512  ;;  %v5060_v0 = vmov 0.0   ;;  %v873_v1 = vld [vmem:[%s745_s30] sm:$0xff]  ;;  %v874_v2 = vld [vmem:[%s745_s30 + $0x8] sm:$0xff]  ;;  %vm884_vm0 = vcmask 1040384  }
 0x252   : > { %3688 = vmatprep.subr.bf16.mxu0 %v5060_v0  ;;  %3698 = vmatprep.subr.bf16.mxu1 %v5060_v0  ;;  %vm895_vm1 = vcmask 1046528   ;;  %v885_v3 = vrot.slane %v873_v1, 7  ;;  %v886_v4 = vrot.slane %v874_v2, 7  ;;  %vm907_vm2 = vcmask 1045504   ;;  %v4338_v5 = vld [vmem:[#allocation5] sm:$0xff]   ;;  %v4339_v9 = vld [vmem:[#allocation5 + $0x8] sm:$0xff]  }
 0x253   : > { %3689 = vmatpush3.bf16.msra.mxu0 %v4338_v5  ;;  %vm5061_vm3 = vmmov 0   ;;  %v4340_v16 = vld [vmem:[#allocation5 + $0x10] sm:$0xff]   ;;  %s5062_s6 = smov 16   ;;  %s5063_s7 = smov 32   ;;  %vm919_vm4 = vcmask 130048   ;;  %vm922_vm5 = vcmask 261120  }
 0x254   : > { %v887_v6 = vsel %vm884_vm0, %v885_v3, %v886_v4  ;;  %v891_v7 = vsel %vm884_vm0, 0.0, %v885_v3  ;;  %v892_v8 = vsel %vm884_vm0, %v886_v4, 0.0  ;;  %3690 = vmatprep.subr.bf16.mxu0 %v5060_v0  ;;  %3694 = vmatprep.mubr.msk.bf16.mxu0 %vm5061_vm3, %v5060_v0  ;;  %vm950_vm6 = vcmask 392192   ;;  %v4341_v34 = vld [vmem:[#allocation8] sm:$0xff]   ;;  %v4342_v35 = vld [vmem:[#allocation8 + $0x8] sm:$0xff]   ;;  %v4343_v36 = vld [vmem:[#allocation8 + $0x10] sm:$0xff]  }
 0x255   : > { %v896_v10 = vrot.slane %v891_v7, 1  ;;  %v897_v11 = vrot.slane %v887_v6, 1  ;;  %v899_v12 = vrot.slane %v892_v8, 1  ;;  %v911_v13 = vrot.slane %v892_v8, 2  ;;  %3710 = vmatprep.mubr.msk.bf16.mxu1 %vm5061_vm3, %v5060_v0  ;;  %3699 = vmatpush3.bf16.msra.mxu1 %v4341_v34  ;;  %v4344_v37 = vld [vmem:[#allocation8 + $0x18] sm:$0xff]   ;;  %v4345_v43 = vld [vmem:[#allocation8 + $0x20] sm:$0xff]  }
 0x256   : > { %v908_v14 = vrot.slane %v891_v7, 2  ;;  %v909_v15 = vrot.slane %v887_v6, 2  ;;  %3700 = vmatprep.subr.bf16.mxu1 %v5060_v0  ;;  %v3481_v38 = vld [vmem:[#allocation7] ss:$0 sm:$0xff]  ;;  %vm1012_vm7 = vcmask 1042432   ;;  %v4346_v49 = vld [vmem:[#allocation8 + $0x28] sm:$0xff]  }
 0x257   : > { %v898_v17 = vsel %vm895_vm1, %v896_v10, %v897_v11  ;;  %v900_v18 = vsel %vm895_vm1, %v897_v11, %v899_v12  ;;  %3691 = vmatpush3.bf16.msra.mxu0 %v4339_v9  ;;  %vm1023_vm8 = vcmask 1044480   ;;  %vm1035_vm9 = vcmask 1041408   ;;  %s5064_s2 = smov 64   ;;  %s3480_s20 = sshll.u32 %s5678_s27, 6 }
 0x258   : > { %v4128_v19 = vpack.i.bf16 %v900_v18, %v898_v17  ;;  %v910_v20 = vsel %vm907_vm2, %v908_v14, %v909_v15  ;;  %v912_v21 = vsel %vm907_vm2, %v909_v15, %v911_v13  ;;  %3692 = vmatprep.subr.bf16.mxu0 %v5060_v0  ;;  %vm1049_vm10 = vcmask 523264   ;;  %v4347_v14 = vld [vmem:[#allocation11] sm:$0xff]   ;;  %v4348_v15 = vld [vmem:[#allocation11 + $0x8] sm:$0xff]   ;;  %s871_s1 = scalar_lea.vmem [#allocation32], %s3480_s20  ;;  %s3592_s22 = sshll.u32 %s6404_s8, 10 }
 0x259   : > { %v4133_v22 = vpack.i.bf16 %v912_v21, %v910_v20  ;;  %3701 = vmatpush3.bf16.msra.mxu1 %v4342_v35  ;;  %vm6352_vm11 = vcmask 785408   ;;  %s3192_s24 = sshll.u32 %s871_s1, 4  ;;  %s6435_s5 = sld [smem:[#allocation62_spill]]  ;;  %s6265_s24 = int_to_ptr.vmem [resolvable:$true] %s3192_s24 }
 0x25a   : > { %4129 = vrot.lane.b32.xlu0 %v4128_v19, %s5062_s6  ;;  %3702 = vmatprep.subr.bf16.mxu1 %v5060_v0  ;;  %s3179_s8 = scalar_lea.sflag [#allocation4], %s5678_s27  ;;  %s4931_s30 = scalar_lea.vmem %s6265_s24, 1024 }
 0x25b   : > { %3693 = vmatpush3.bf16.msra.mxu0 %v4340_v16  ;;  %v3486_v16 = vld [vmem:[#allocation10] ss:$0 sm:$0xff]  ;;  %p4932_p5 = scmp.ne.s32.totalorder %s6265_s24, %s4931_s30  ;;  %p6436_p7 = scmp.ne.s32.totalorder %s6397_s14, 0 }
 0x25c   : > { %3714 = vmatprep.subr.bf16.mxu0 %v5060_v0  ;;  %s5065_s6 = smov [#allocation32]  }
 0x25d   : > { %3703 = vmatpush3.bf16.msra.mxu1 %v4343_v36  ;;  %p4933_p6 = pnand %p4932_p5, %p6436_p7 }
 0x25e   : > { %4134 = vrot.lane.b32.xlu0 %v4133_v22, %s5063_s7  ;;  %3704 = vmatprep.subr.bf16.mxu1 %v5060_v0 }
 0x25f   : > { %s6263_s4 = scalar_lea.hbm %s6435_s5, %s3592_s22  ;;  %p4934_p9 = pneg %p4933_p6 }
 0x261   : > { %3705 = vmatpush3.bf16.msra.mxu1 %v4344_v37 }
 0x262   : > { %3706 = vmatprep.subr.bf16.mxu1 %v5060_v0 }
 0x265   : > { %3707 = vmatpush3.bf16.msra.mxu1 %v4345_v43 }
 0x266   : > { %3708 = vmatprep.subr.bf16.mxu1 %v5060_v0 }
 0x269   : > { %3709 = vmatpush3.bf16.msra.mxu1 %v4346_v49 }
 0x2cc   : > { %v4130_v23 = vpop.permute.xlu0 %4129 }
 0x2cd   : > { %v4132_v24 = vunpack.i.h.bf16 %v4130_v23  ;;  %v4131_v25 = vunpack.i.l.bf16 %v4130_v23 }
 0x2cf   : > { %v921_v29 = vsel %vm919_vm4, %v887_v6, %v4132_v24  ;;  %v920_v30 = vsel %vm919_vm4, %v891_v7, %v4131_v25 }
 0x2d0   : > { %v4135_v26 = vpop.permute.xlu0 %4134 }
 0x2d1   : > { %v4137_v27 = vunpack.i.h.bf16 %v4135_v26  ;;  %v4136_v28 = vunpack.i.l.bf16 %v4135_v26  ;;  %v4349_v26 = vld [vmem:[#allocation8 + $0x30] sm:$0xff]  }
 0x2d3   : > { %v923_v31 = vsel %vm922_vm5, %v920_v30, %v4136_v28  ;;  %v924_v32 = vsel %vm922_vm5, %v921_v29, %v4137_v27  ;;  %v4350_v27 = vld [vmem:[#allocation8 + $0x38] sm:$0xff]   ;;  %v4351_v28 = vld [vmem:[#allocation8 + $0x40] sm:$0xff]   ;;  %v4352_v29 = vld [vmem:[#allocation8 + $0x48] sm:$0xff]  }
 0x2d4   : > { %v925_v33 = vpack.c.bf16 %v924_v32, %v923_v31  ;;  %v4353_v30 = vld [vmem:[#allocation8 + $0x50] sm:$0xff]   ;;  %v3494_v31 = vld [vmem:[#allocation13] ss:$0 sm:$0xff] }
 0x2d6   : > { %3695 = vmatmul.mubr.msk.bf16.vlgmr.msra.gmra.mrb[0].mxu0 %vm950_vm6, %v925_v33 }
 0x2d7   : > { %3718 = vmatprep.mubr.msk.bf16.mxu0 %vm5061_vm3, %v5060_v0  ;;  %3715 = vmatpush3.bf16.msra.mxu0 %v4347_v14 }
 0x2d8   : > { %3716 = vmatprep.subr.bf16.mxu0 %v5060_v0 }
 0x2db   : > { %3717 = vmatpush3.bf16.msra.mxu0 %v4348_v15 }
 0x2dc   : > { %3722 = vmatprep.subr.bf16.mxu0 %v5060_v0 }
 0x3a9   : > { %v988_v39 = vpop.f32.mrb[0].mxu0 }
 0x3aa   : > { %v5749_v40 = vadd.f32 %v3481_v38, %v988_v39  ;;  %v3696_v41 = vpop.f32.mrb[1].mxu0 }
 0x3ab   : > { %v991_v42 = vpop.f32.mrb[2].mxu0 }
 0x3ac   : > { %v995_v44 = vmax.f32 %v5749_v40, 0.0  ;;  %v5752_v45 = vadd.f32 %v3481_v38, %v991_v42  ;;  %v3697_v46 = vpop.f32.mrb[3].mxu0  ;;  %v4354_v42 = vld [vmem:[#allocation8 + $0x58] sm:$0xff]  }
 0x3ae   : > { %v1013_v47 = vrot.slane %v995_v44, 5  ;;  %v996_v48 = vmax.f32 %v5752_v45, 0.0 }
 0x3b0   : > { %v1019_v50 = vsel %vm1012_vm7, 0.0, %v1013_v47  ;;  %v1014_v51 = vrot.slane %v996_v48, 5 }
 0x3b1   : > { %v1024_v54 = vrot.slane %v1019_v50, 3  ;;  %v1036_v59 = vrot.slane %v1019_v50, 6 }
 0x3b2   : > { %v1015_v52 = vsel %vm1012_vm7, %v1013_v47, %v1014_v51  ;;  %v1020_v53 = vsel %vm1012_vm7, %v1014_v51, 0.0 }
 0x3b3   : > { %v1027_v55 = vrot.slane %v1020_v53, 3  ;;  %v1039_v56 = vrot.slane %v1020_v53, 6  ;;  %v1025_v57 = vrot.slane %v1015_v52, 3  ;;  %v1037_v58 = vrot.slane %v1015_v52, 6 }
 0x3b5   : > { %v1026_v60 = vsel %vm1023_vm8, %v1024_v54, %v1025_v57  ;;  %v1028_v61 = vsel %vm1023_vm8, %v1025_v57, %v1027_v55  ;;  %v1038_v63 = vsel %vm1035_vm9, %v1036_v59, %v1037_v58  ;;  %v1040_v1 = vsel %vm1035_vm9, %v1037_v58, %v1039_v56 }
 0x3b6   : > { %v4138_v62 = vpack.i.bf16 %v1028_v61, %v1026_v60  ;;  %v4143_v2 = vpack.i.bf16 %v1040_v1, %v1038_v63 }
 0x3b8   : > { %4139 = vrot.lane.b32.xlu1 %v4138_v62, %s5063_s7 }
 0x3bc   : > { %4144 = vrot.lane.b32.xlu1 %v4143_v2, %s5064_s2 }
 0x42a   : > { %v4140_v3 = vpop.permute.xlu1 %4139 }
 0x42b   : > { %v4142_v4 = vunpack.i.h.bf16 %v4140_v3  ;;  %v4141_v5 = vunpack.i.l.bf16 %v4140_v3 }
 0x42d   : > { %v1048_v9 = vsel %vm922_vm5, %v1015_v52, %v4142_v4  ;;  %v1047_v10 = vsel %vm922_vm5, %v1019_v50, %v4141_v5 }
 0x42e   : > { %v4145_v6 = vpop.permute.xlu1 %4144 }
 0x42f   : > { %v4147_v7 = vunpack.i.h.bf16 %v4145_v6  ;;  %v4146_v8 = vunpack.i.l.bf16 %v4145_v6 }
 0x431   : > { %v1050_v11 = vsel %vm1049_vm10, %v1047_v10, %v4146_v8  ;;  %v1051_v12 = vsel %vm1049_vm10, %v1048_v9, %v4147_v7  ;;  %v4355_v8 = vld [vmem:[#allocation11 + $0x10] sm:$0xff]   ;;  %v4356_v9 = vld [vmem:[#allocation11 + $0x18] sm:$0xff]  }
 0x432   : > { %v1052_v13 = vpack.c.bf16 %v1051_v12, %v1050_v11  ;;  %v3498_v10 = vld [vmem:[#allocation10 + $0x1] ss:$0 sm:$0xff] }
 0x434   : > { %3711 = vmatmul.mubr.msk.bf16.vlgmr.msra.gmra.mrb[0].mxu1 %vm6352_vm11, %v1052_v13 }
 0x507   : > { %v1133_v17 = vpop.f32.mrb[0].mxu1 }
 0x508   : > { %v1134_v18 = vadd.f32 %v3486_v16, %v1133_v17  ;;  %v3712_v19 = vpop.f32.mrb[1].mxu1 }
 0x509   : > { %v1136_v20 = vpop.f32.mrb[2].mxu1 }
 0x50a   : > { %v1137_v21 = vadd.f32 %v3486_v16, %v1136_v20  ;;  %v3713_v22 = vpop.f32.mrb[3].mxu1  ;;  %v1140_v23 = vmax.f32 %v1134_v18, 0.0  ;;  %v1428_v20 = vlaneseq }
 0x50c   : > { %v1141_v24 = vmax.f32 %v1137_v21, 0.0  ;;  %v5813_v21 = vshrl.u32 %v1428_v20, 7  ;;  %v1434_v22 = vand.u32 127, %v1428_v20 }
 0x50e   : > { %v1142_v25 = vpack.c.bf16 %v1141_v24, %v1140_v23  ;;  %v1430_v23 = vadd.s32 8, %v5813_v21  ;;  %v5816_v24 = vmul.u32 2, %v1434_v22 }
 0x510   : > { %3719 = vmatmul.mubr.msk.bf16.vlgmr.msra.gmra.mrb[4].mxu0 %vm922_vm5, %v1142_v25  ;;  %v1436_v25 = vsub.s32 %v5813_v21, %v5816_v24 }
 0x511   : > { %3734 = vmatprep.mubr.msk.bf16.mxu0 %vm5061_vm3, %v5060_v0  ;;  %3723 = vmatpush3.bf16.msra.mxu0 %v4349_v26  ;;  %v1437_v26 = vsub.s32 %v1430_v23, %v5816_v24 }
 0x512   : > { %3724 = vmatprep.subr.bf16.mxu0 %v5060_v0  ;;  %vm1440_vm12 = vcmp.ge.s32.totalorder %v1436_v25, 0  ;;  %vm1444_vm14 = vcmp.le.s32.totalorder %v1436_v25, 1 }
 0x513   : > { %vm1441_vm13 = vcmp.ge.s32.totalorder %v1437_v26, 0  ;;  %vm1445_vm15 = vcmp.le.s32.totalorder %v1437_v26, 1 }
 0x514   : > { %vm1449_vm6 = vmand %vm1441_vm13, %vm1445_vm15 }
 0x515   : > { %3725 = vmatpush3.bf16.msra.mxu0 %v4350_v27 }
 0x516   : > { %3726 = vmatprep.subr.bf16.mxu0 %v5060_v0 }
 0x519   : > { %3727 = vmatpush3.bf16.msra.mxu0 %v4351_v28  ;;  %v1453_v28 = vsel %vm1449_vm6, 1.0, %v5060_v0 }
 0x51a   : > { %3728 = vmatprep.subr.bf16.mxu0 %v5060_v0 }
 0x51d   : > { %3729 = vmatpush3.bf16.msra.mxu0 %v4352_v29 }
 0x51e   : > { %3730 = vmatprep.subr.bf16.mxu0 %v5060_v0 }
 0x521   : > { %3731 = vmatpush3.bf16.msra.mxu0 %v4353_v30  ;;  %v1431_v30 = vadd.s32 16, %v5813_v21 }
 0x522   : > { %3732 = vmatprep.subr.bf16.mxu0 %v5060_v0 }
 0x525   : > { %3733 = vmatpush3.bf16.msra.mxu0 %v4354_v42 }
 0x526   : > { %3738 = vmatprep.subr.bf16.mxu0 %v5060_v0 }
 0x5e3   : > { %v1203_v32 = vpop.f32.mrb[4].mxu0 }
 0x5e4   : > { %v1204_v33 = vadd.f32 %v3494_v31, %v1203_v32  ;;  %v3720_v34 = vpop.f32.mrb[5].mxu0  ;;  %v1438_v32 = vsub.s32 %v1431_v30, %v5816_v24 }
 0x5e5   : > { %v1206_v35 = vpop.f32.mrb[6].mxu0  ;;  %v3506_v34 = vld [vmem:[#allocation13 + $0x1] ss:$0 sm:$0xff] }
 0x5e6   : > { %v5786_v36 = vadd.f32 %v1204_v33, %v995_v44  ;;  %v1207_v37 = vadd.f32 %v3494_v31, %v1206_v35  ;;  %v3721_v38 = vpop.f32.mrb[7].mxu0  ;;  %v1432_v31 = vadd.s32 24, %v5813_v21  ;;  %vm1446_vm13 = vcmp.le.s32.totalorder %v1438_v32, 1 }
 0x5e8   : > { %v1212_v39 = vmax.f32 %v5786_v36, 0.0  ;;  %v5791_v41 = vadd.f32 %v1207_v37, %v996_v48  ;;  %v1439_v33 = vsub.s32 %v1432_v31, %v5816_v24 }
 0x5ea   : > { %v1231_v43 = vrot.slane %v1212_v39, 7  ;;  %v1213_v46 = vmax.f32 %v5791_v41, 0.0  ;;  %vm1447_vm15 = vcmp.le.s32.totalorder %v1439_v33, 1 }
 0x5ec   : > { %v1237_v47 = vsel %vm884_vm0, 0.0, %v1231_v43  ;;  %v1232_v40 = vrot.slane %v1213_v46, 7 }
 0x5ed   : > { %v1241_v44 = vrot.slane %v1237_v47, 1  ;;  %v1252_v49 = vrot.slane %v1237_v47, 2 }
 0x5ee   : > { %v1233_v50 = vsel %vm884_vm0, %v1231_v43, %v1232_v40  ;;  %v1238_v51 = vsel %vm884_vm0, %v1232_v40, 0.0 }
 0x5ef   : > { %v1244_v52 = vrot.slane %v1238_v51, 1  ;;  %v1255_v45 = vrot.slane %v1238_v51, 2  ;;  %v1253_v48 = vrot.slane %v1233_v50, 2  ;;  %v1242_v53 = vrot.slane %v1233_v50, 1  ;;  %v4357_v51 = vld [vmem:[#allocation14] sm:$0xff]  }
 0x5f1   : > { %v1254_v54 = vsel %vm907_vm2, %v1252_v49, %v1253_v48  ;;  %v1256_v55 = vsel %vm907_vm2, %v1253_v48, %v1255_v45  ;;  %v1243_v56 = vsel %vm895_vm1, %v1241_v44, %v1242_v53  ;;  %v1245_v57 = vsel %vm895_vm1, %v1242_v53, %v1244_v52  ;;  %v4358_v52 = vld [vmem:[#allocation14 + $0x8] sm:$0xff]  }
 0x5f2   : > { %v4153_v58 = vpack.i.bf16 %v1256_v55, %v1254_v54  ;;  %v4148_v59 = vpack.i.bf16 %v1245_v57, %v1243_v56  ;;  %v4361_v55 = vld [vmem:[#allocation14 + $0x20] sm:$0xff]  }
 0x5f4   : > { %4154 = vrot.lane.b32.xlu1 %v4153_v58, %s5064_s2  ;;  %4149 = vrot.lane.b32.xlu0 %v4148_v59, %s5063_s7 }
 0x666   : > { %v4155_v60 = vpop.permute.xlu1 %4154  ;;  %v4150_v61 = vpop.permute.xlu0 %4149 }
 0x667   : > { %v4157_v62 = vunpack.i.h.bf16 %v4155_v60  ;;  %v4156_v63 = vunpack.i.l.bf16 %v4155_v60  ;;  %v4152_v1 = vunpack.i.h.bf16 %v4150_v61  ;;  %v4151_v2 = vunpack.i.l.bf16 %v4150_v61 }
 0x669   : > { %v1264_v3 = vsel %vm922_vm5, %v1233_v50, %v4152_v1  ;;  %v1263_v4 = vsel %vm922_vm5, %v1237_v47, %v4151_v2 }
 0x66a   : > { %v1266_v5 = vsel %vm1049_vm10, %v1264_v3, %v4157_v62  ;;  %v1265_v6 = vsel %vm1049_vm10, %v1263_v4, %v4156_v63  ;;  %v4362_v3 = vld [vmem:[#allocation14 + $0x28] sm:$0xff]  }
 0x66b   : > { %v1267_v7 = vpack.c.bf16 %v1266_v5, %v1265_v6 }
 0x66d   : > { %3735 = vmatmul.mubr.msk.bf16.vlgmr.msra.gmra.mrb[8].mxu0 %vm6352_vm11, %v1267_v7 }
 0x66e   : > { %3742 = vmatprep.mubr.msk.bf16.mxu0 %vm5061_vm3, %v5060_v0  ;;  %3739 = vmatpush3.bf16.msra.mxu0 %v4355_v8  ;;  %vm1448_vm3 = vmand %vm1440_vm12, %vm1444_vm14  ;;  %vm1442_vm12 = vcmp.ge.s32.totalorder %v1438_v32, 0  ;;  %vm1443_vm14 = vcmp.ge.s32.totalorder %v1439_v33, 0 }
 0x66f   : > { %3740 = vmatprep.subr.bf16.mxu0 %v5060_v0  ;;  %v1452_v27 = vsel %vm1448_vm3, 1.0, %v5060_v0  ;;  %vm1450_vm3 = vmand %vm1442_vm12, %vm1446_vm13 }
 0x670   : > { %v5823_v29 = vpack.c.bf16 %v1453_v28, %v1452_v27  ;;  %vm1451_vm6 = vmand %vm1443_vm14, %vm1447_vm15  ;;  %v1454_v40 = vsel %vm1450_vm3, 1.0, %v5060_v0 }
 0x671   : > { %v1455_v44 = vsel %vm1451_vm6, 1.0, %v5060_v0 }
 0x672   : > { %3741 = vmatpush3.bf16.msra.mxu0 %v4356_v9  ;;  %3748 = vmatprep.mubr.msk.bf16.mxu1 %vm919_vm4, %v5823_v29  ;;  %v5835_v50 = vpack.c.bf16 %v1455_v44, %v1454_v40 }
 0x740   : > { %v1347_v11 = vpop.f32.mrb[8].mxu0 }
 0x741   : > { %v1348_v12 = vadd.f32 %v3498_v10, %v1347_v11  ;;  %v3736_v13 = vpop.f32.mrb[9].mxu0 }
 0x742   : > { %v1350_v14 = vpop.f32.mrb[10].mxu0 }
 0x743   : > { %v1351_v15 = vadd.f32 %v3498_v10, %v1350_v14  ;;  %v3737_v16 = vpop.f32.mrb[11].mxu0  ;;  %v1354_v17 = vmax.f32 %v1348_v12, 0.0 }
 0x745   : > { %v1355_v18 = vmax.f32 %v1351_v15, 0.0 }
 0x747   : > { %v1356_v19 = vpack.c.bf16 %v1355_v18, %v1354_v17 }
 0x749   : > { %3743 = vmatmul.mubr.msk.bf16.vlgmr.msra.gmra.mrb[12].mxu0 %vm922_vm5, %v1356_v19 }
 0x81c   : > { %v1419_v35 = vpop.f32.mrb[12].mxu0 }
 0x81d   : > { %v1420_v37 = vadd.f32 %v3506_v34, %v1419_v35  ;;  %v3744_v38 = vpop.f32.mrb[13].mxu0 }
 0x81e   : > { %v1422_v39 = vpop.f32.mrb[14].mxu0 }
 0x81f   : > { %v1423_v42 = vadd.f32 %v3506_v34, %v1422_v39  ;;  %v3745_v43 = vpop.f32.mrb[15].mxu0  ;;  %v1426_v46 = vadd.f32 %v1420_v37, %v5786_v36  ;;  %v4359_v36 = vld [vmem:[#allocation14 + $0x10] sm:$0xff]  }
 0x821   : > { %v1427_v47 = vadd.f32 %v1423_v42, %v5791_v41  ;;  %v4360_v41 = vld [vmem:[#allocation14 + $0x18] sm:$0xff]  }
 0x823   : > { %v1458_v49 = vpack.c.bf16 %v1427_v47, %v1426_v46 }
 0x825   : > { %3746 = vmatprep.subr.bf16.mxu1 %v1458_v49 }
 0x826   : > { %3747 = vmatpush3.bf16.msra.mxu1 %v1458_v49 }
 0x827   : > { %3752 = vmatprep.subr.bf16.mxu1 %v4357_v51 }
 0x829   : > { %3749 = vmatmul.mubr.msk.bf16.vlgmr.msra.gmra.mrb[4].mxu1 %vm919_vm4, %v5835_v50 }
 0x82a   : > { %3753 = vmatpush3.bf16.msra.mxu1 %v4357_v51 }
 0x82b   : > { %3754 = vmatprep.subr.bf16.mxu1 %v4358_v52 }
 0x82e   : > { %3755 = vmatpush3.bf16.msra.mxu1 %v4358_v52 }
 0x82f   : > { %3756 = vmatprep.subr.bf16.mxu1 %v4359_v36 }
 0x832   : > { %3757 = vmatpush3.bf16.msra.mxu1 %v4359_v36 }
 0x833   : > { %3758 = vmatprep.subr.bf16.mxu1 %v4360_v41 }
 0x836   : > { %3759 = vmatpush3.bf16.msra.mxu1 %v4360_v41 }
 0x837   : > { %3760 = vmatprep.subr.bf16.mxu1 %v4361_v55 }
 0x83a   : > { %3761 = vmatpush3.bf16.msra.mxu1 %v4361_v55  ;;  %v3512_v55 = vld [vmem:[#allocation16] ss:$0 sm:$0xff] }
 0x83b   : > { %3762 = vmatprep.subr.bf16.mxu1 %v4362_v3 }
 0x83e   : > { %3763 = vmatpush3.bf16.msra.mxu1 %v4362_v3 }
 0x8fc   : > { %v3750_v45 = vpop.f32.mrb[4].mxu1 }
 0x8fd   : > { %v1499_v48 = vpop.f32.mrb[5].mxu1  ;;  %v1534_v56 = vrot.slane %v3750_v45, 7  ;;  %v4363_v45 = vld [vmem:[#allocation17] sm:$0xff]  }
 0x8fe   : > { %v1531_v53 = vrot.slane %v1499_v48, 7  ;;  %v3751_v54 = vpop.f32.mrb[6].mxu1  ;;  %v4364_v48 = vld [vmem:[#allocation17 + $0x8] sm:$0xff]   ;;  %3768 = vmatprep.subr.bf16.mxu0 %v4363_v45 }
 0x8ff   : > { %v1536_v57 = vrot.slane %v3751_v54, 7  ;;  %v1502_v58 = vpop.f32.mrb[7].mxu1  ;;  %3769 = vmatpush3.bf16.msra.mxu0 %v4363_v45  ;;  %v4366_v54 = vld [vmem:[#allocation17 + $0x18] sm:$0xff]  }
 0x900   : > { %v1543_v59 = vsel %vm884_vm0, 0.0, %v1531_v53  ;;  %v1532_v60 = vrot.slane %v1502_v58, 7  ;;  %3770 = vmatprep.subr.bf16.mxu0 %v4364_v48 }
 0x901   : > { %v1537_v61 = vsel %vm884_vm0, %v1534_v56, %v1536_v57  ;;  %v1544_v62 = vsel %vm884_vm0, %v1536_v57, 0.0  ;;  %v1547_v63 = vrot.slane %v1543_v59, 1  ;;  %v1568_v13 = vrot.slane %v1543_v59, 2 }
 0x902   : > { %v1552_v1 = vrot.slane %v1537_v61, 1  ;;  %v1554_v2 = vrot.slane %v1544_v62, 1  ;;  %v1573_v4 = vrot.slane %v1537_v61, 2  ;;  %v1575_v5 = vrot.slane %v1544_v62, 2 }
 0x903   : > { %v1533_v6 = vsel %vm884_vm0, %v1531_v53, %v1532_v60  ;;  %v1535_v7 = vsel %vm884_vm0, %v1532_v60, %v1534_v56  ;;  %v4365_v53 = vld [vmem:[#allocation17 + $0x10] sm:$0xff]   ;;  %3771 = vmatpush3.bf16.msra.mxu0 %v4364_v48 }
 0x904   : > { %v1548_v8 = vrot.slane %v1533_v6, 1  ;;  %v1550_v9 = vrot.slane %v1535_v7, 1  ;;  %v1569_v10 = vrot.slane %v1533_v6, 2  ;;  %v1571_v11 = vrot.slane %v1535_v7, 2  ;;  %3772 = vmatprep.subr.bf16.mxu0 %v4365_v53 }
 0x905   : > { %v1555_v12 = vsel %vm895_vm1, %v1552_v1, %v1554_v2  ;;  %v1576_v20 = vsel %vm907_vm2, %v1573_v4, %v1575_v5 }
 0x906   : > { %v1553_v14 = vsel %vm895_vm1, %v1550_v9, %v1552_v1  ;;  %v1549_v15 = vsel %vm895_vm1, %v1547_v63, %v1548_v8  ;;  %v1551_v16 = vsel %vm895_vm1, %v1548_v8, %v1550_v9  ;;  %v1574_v19 = vsel %vm907_vm2, %v1571_v11, %v1573_v4  ;;  %v4367_v4 = vld [vmem:[#allocation17 + $0x20] sm:$0xff]  }
 0x907   : > { %v4163_v17 = vpack.i.bf16 %v1555_v12, %v1553_v14  ;;  %v4158_v18 = vpack.i.bf16 %v1551_v16, %v1549_v15  ;;  %v1570_v22 = vsel %vm907_vm2, %v1568_v13, %v1569_v10  ;;  %v1572_v23 = vsel %vm907_vm2, %v1569_v10, %v1571_v11  ;;  %3773 = vmatpush3.bf16.msra.mxu0 %v4365_v53  ;;  %v4368_v14 = vld [vmem:[#allocation17 + $0x28] sm:$0xff]  }
 0x908   : > { %v4173_v25 = vpack.i.bf16 %v1576_v20, %v1574_v19  ;;  %v4168_v26 = vpack.i.bf16 %v1572_v23, %v1570_v22  ;;  %3774 = vmatprep.subr.bf16.mxu0 %v4366_v54 }
 0x909   : > { %4164 = vrot.lane.b32.xlu1 %v4163_v17, %s5063_s7  ;;  %4159 = vrot.lane.b32.xlu0 %v4158_v18, %s5063_s7 }
 0x90b   : > { %3775 = vmatpush3.bf16.msra.mxu0 %v4366_v54 }
 0x90c   : > { %3776 = vmatprep.subr.bf16.mxu0 %v4367_v4 }
 0x90d   : > { %4174 = vrot.lane.b32.xlu1 %v4173_v25, %s5064_s2  ;;  %4169 = vrot.lane.b32.xlu0 %v4168_v26, %s5064_s2 }
 0x90f   : > { %3777 = vmatpush3.bf16.msra.mxu0 %v4367_v4 }
 0x910   : > { %3778 = vmatprep.subr.bf16.mxu0 %v4368_v14 }
 0x913   : > { %3779 = vmatpush3.bf16.msra.mxu0 %v4368_v14 }
 0x97b   : > { %v4165_v27 = vpop.permute.xlu1 %4164  ;;  %v4160_v28 = vpop.permute.xlu0 %4159 }
 0x97c   : > { %v4167_v30 = vunpack.i.h.bf16 %v4165_v27  ;;  %v4166_v31 = vunpack.i.l.bf16 %v4165_v27  ;;  %v4162_v32 = vunpack.i.h.bf16 %v4160_v28  ;;  %v4161_v33 = vunpack.i.l.bf16 %v4160_v28 }
 0x97e   : > { %v1592_v43 = vsel %vm922_vm5, %v1537_v61, %v4167_v30  ;;  %v1591_v46 = vsel %vm922_vm5, %v1535_v7, %v4166_v31  ;;  %v1590_v47 = vsel %vm922_vm5, %v1533_v6, %v4162_v32  ;;  %v1589_v40 = vsel %vm922_vm5, %v1543_v59, %v4161_v33 }
 0x97f   : > { %v4175_v34 = vpop.permute.xlu1 %4174  ;;  %v4170_v35 = vpop.permute.xlu0 %4169 }
 0x980   : > { %v4177_v37 = vunpack.i.h.bf16 %v4175_v34  ;;  %v4176_v38 = vunpack.i.l.bf16 %v4175_v34  ;;  %v4172_v39 = vunpack.i.h.bf16 %v4170_v35  ;;  %v4171_v42 = vunpack.i.l.bf16 %v4170_v35 }
 0x982   : > { %v1595_v44 = vsel %vm1049_vm10, %v1591_v46, %v4176_v38  ;;  %v1596_v49 = vsel %vm1049_vm10, %v1592_v43, %v4177_v37  ;;  %v1593_v51 = vsel %vm1049_vm10, %v1589_v40, %v4171_v42  ;;  %v1594_v52 = vsel %vm1049_vm10, %v1590_v47, %v4172_v39 }
 0x983   : > { %v1598_v36 = vpack.c.bf16 %v1596_v49, %v1595_v44  ;;  %v1597_v41 = vpack.c.bf16 %v1594_v52, %v1593_v51 }
 0x985   : > { %3764 = vmatprep.mubr.msk.bf16.mxu1 %vm6352_vm11, %v1597_v41 }
 0x986   : > { %3765 = vmatmul.mubr.msk.bf16.vlgmr.msra.gmra.mrb[8].mxu1 %vm6352_vm11, %v1598_v36 }
 0xa59   : > { %v3766_v56 = vpop.f32.mrb[8].mxu1 }
 0xa5a   : > { %v5866_v57 = vadd.f32 %v3766_v56, %v3512_v55  ;;  %v1681_v58 = vpop.f32.mrb[9].mxu1 }
 0xa5b   : > { %v5868_v59 = vadd.f32 %v3512_v55, %v1681_v58  ;;  %v3767_v60 = vpop.f32.mrb[10].mxu1 }
 0xa5c   : > { %v1698_v61 = vmax.f32 %v5866_v57, 0.0  ;;  %v5871_v62 = vadd.f32 %v3767_v60, %v3512_v55  ;;  %v1684_v63 = vpop.f32.mrb[11].mxu1 }
 0xa5d   : > { %v1696_v1 = vmax.f32 %v5868_v59, 0.0  ;;  %v5874_v2 = vadd.f32 %v3512_v55, %v1684_v63 }
 0xa5e   : > { %v1699_v3 = vmax.f32 %v5871_v62, 0.0  ;;  %v1720_v7 = vrot.slane %v1698_v61, 5 }
 0xa5f   : > { %v1717_v5 = vrot.slane %v1696_v1, 5  ;;  %v1697_v6 = vmax.f32 %v5874_v2, 0.0 }
 0xa60   : > { %v1722_v8 = vrot.slane %v1699_v3, 5 }
 0xa61   : > { %v1729_v9 = vsel %vm1012_vm7, 0.0, %v1717_v5  ;;  %v1718_v10 = vrot.slane %v1697_v6, 5  ;;  %v4370_v6 = vld [vmem:[#allocation20 + $0x8] sm:$0xff]  }
 0xa62   : > { %v1733_v11 = vrot.slane %v1729_v9, 3  ;;  %v1723_v12 = vsel %vm1012_vm7, %v1720_v7, %v1722_v8  ;;  %v1730_v13 = vsel %vm1012_vm7, %v1722_v8, 0.0  ;;  %v1754_v25 = vrot.slane %v1729_v9, 6 }
 0xa63   : > { %v1740_v15 = vrot.slane %v1730_v13, 3  ;;  %v1761_v16 = vrot.slane %v1730_v13, 6  ;;  %v1719_v17 = vsel %vm1012_vm7, %v1717_v5, %v1718_v10  ;;  %v1721_v18 = vsel %vm1012_vm7, %v1718_v10, %v1720_v7  ;;  %v4369_v5 = vld [vmem:[#allocation20] sm:$0xff]   ;;  %v3521_v7 = vld [vmem:[#allocation19] ss:$0 sm:$0xff] }
 0xa64   : > { %v1736_v19 = vrot.slane %v1721_v18, 3  ;;  %v1738_v20 = vrot.slane %v1723_v12, 3  ;;  %v1734_v22 = vrot.slane %v1719_v17, 3  ;;  %v1757_v23 = vrot.slane %v1721_v18, 6  ;;  %3784 = vmatprep.subr.bf16.mxu1 %v4369_v5 }
 0xa65   : > { %v1759_v26 = vrot.slane %v1723_v12, 6  ;;  %v1755_v27 = vrot.slane %v1719_v17, 6  ;;  %3785 = vmatpush3.bf16.msra.mxu1 %v4369_v5 }
 0xa66   : > { %v1739_v28 = vsel %vm1023_vm8, %v1736_v19, %v1738_v20  ;;  %v1741_v30 = vsel %vm1023_vm8, %v1738_v20, %v1740_v15  ;;  %v1735_v31 = vsel %vm1023_vm8, %v1733_v11, %v1734_v22  ;;  %v1737_v32 = vsel %vm1023_vm8, %v1734_v22, %v1736_v19  ;;  %3786 = vmatprep.subr.bf16.mxu1 %v4370_v6 }
 0xa67   : > { %v4183_v33 = vpack.i.bf16 %v1741_v30, %v1739_v28  ;;  %v4178_v34 = vpack.i.bf16 %v1737_v32, %v1735_v31  ;;  %v1760_v35 = vsel %vm1035_vm9, %v1757_v23, %v1759_v26  ;;  %v1762_v37 = vsel %vm1035_vm9, %v1759_v26, %v1761_v16  ;;  %v4373_v26 = vld [vmem:[#allocation17 + $0x40] sm:$0xff]  }
 0xa68   : > { %v1756_v38 = vsel %vm1035_vm9, %v1754_v25, %v1755_v27  ;;  %v1758_v39 = vsel %vm1035_vm9, %v1755_v27, %v1757_v23  ;;  %v4193_v42 = vpack.i.bf16 %v1762_v37, %v1760_v35  ;;  %v4371_v23 = vld [vmem:[#allocation17 + $0x30] sm:$0xff]   ;;  %v4372_v25 = vld [vmem:[#allocation17 + $0x38] sm:$0xff]   ;;  %v4374_v27 = vld [vmem:[#allocation17 + $0x48] sm:$0xff]  }
 0xa69   : > { %4184 = vrot.lane.b32.xlu1 %v4183_v33, %s5063_s7  ;;  %4179 = vrot.lane.b32.xlu0 %v4178_v34, %s5063_s7  ;;  %v4188_v43 = vpack.i.bf16 %v1758_v39, %v1756_v38  ;;  %v3530_v28 = vld [vmem:[#allocation22] ss:$0 sm:$0xff] }
 0xa6a   : > { %3787 = vmatpush3.bf16.msra.mxu1 %v4370_v6  ;;  %3792 = vmatprep.subr.bf16.mxu0 %v4371_v23 }
 0xa6d   : > { %4194 = vrot.lane.b32.xlu1 %v4193_v42, %s5064_s2  ;;  %4189 = vrot.lane.b32.xlu0 %v4188_v43, %s5064_s2 }
 0xadb   : > { %v4185_v46 = vpop.permute.xlu1 %4184  ;;  %v4180_v47 = vpop.permute.xlu0 %4179 }
 0xadc   : > { %v4187_v40 = vunpack.i.h.bf16 %v4185_v46  ;;  %v4186_v44 = vunpack.i.l.bf16 %v4185_v46  ;;  %v4182_v49 = vunpack.i.h.bf16 %v4180_v47  ;;  %v4181_v51 = vunpack.i.l.bf16 %v4180_v47 }
 0xade   : > { %v1778_v54 = vsel %vm922_vm5, %v1723_v12, %v4187_v40  ;;  %v1777_v55 = vsel %vm922_vm5, %v1721_v18, %v4186_v44  ;;  %v1776_v56 = vsel %vm922_vm5, %v1719_v17, %v4182_v49  ;;  %v1775_v58 = vsel %vm922_vm5, %v1729_v9, %v4181_v51 }
 0xadf   : > { %v4195_v52 = vpop.permute.xlu1 %4194  ;;  %v4190_v36 = vpop.permute.xlu0 %4189 }
 0xae0   : > { %v4197_v41 = vunpack.i.h.bf16 %v4195_v52  ;;  %v4196_v45 = vunpack.i.l.bf16 %v4195_v52  ;;  %v4192_v48 = vunpack.i.h.bf16 %v4190_v36  ;;  %v4191_v53 = vunpack.i.l.bf16 %v4190_v36 }
 0xae2   : > { %v1781_v60 = vsel %vm1049_vm10, %v1777_v55, %v4196_v45  ;;  %v1782_v61 = vsel %vm1049_vm10, %v1778_v54, %v4197_v41  ;;  %v1779_v63 = vsel %vm1049_vm10, %v1775_v58, %v4191_v53  ;;  %v1780_v1 = vsel %vm1049_vm10, %v1776_v56, %v4192_v48 }
 0xae3   : > { %v1784_v3 = vpack.c.bf16 %v1782_v61, %v1781_v60  ;;  %v1783_v4 = vpack.c.bf16 %v1780_v1, %v1779_v63 }
 0xae5   : > { %3780 = vmatprep.mubr.msk.bf16.mxu0 %vm6352_vm11, %v1783_v4 }
 0xae6   : > { %3781 = vmatmul.mubr.msk.bf16.vlgmr.msra.gmra.mrb[16].mxu0 %vm6352_vm11, %v1784_v3 }
 0xae7   : > { %3793 = vmatpush3.bf16.msra.mxu0 %v4371_v23 }
 0xae8   : > { %3794 = vmatprep.subr.bf16.mxu0 %v4372_v25 }
 0xaeb   : > { %3795 = vmatpush3.bf16.msra.mxu0 %v4372_v25 }
 0xaec   : > { %3796 = vmatprep.subr.bf16.mxu0 %v4373_v26 }
 0xaef   : > { %3797 = vmatpush3.bf16.msra.mxu0 %v4373_v26 }
 0xaf0   : > { %3798 = vmatprep.subr.bf16.mxu0 %v4374_v27 }
 0xaf3   : > { %3799 = vmatpush3.bf16.msra.mxu0 %v4374_v27 }
 0xbb9   : > { %v3782_v8 = vpop.f32.mrb[16].mxu0 }
 0xbba   : > { %v1876_v9 = vadd.f32 %v3782_v8, %v3521_v7  ;;  %v1867_v10 = vpop.f32.mrb[17].mxu0 }
 0xbbb   : > { %v1868_v11 = vadd.f32 %v3521_v7, %v1867_v10  ;;  %v3783_v12 = vpop.f32.mrb[18].mxu0 }
 0xbbc   : > { %v1879_v13 = vadd.f32 %v3783_v12, %v3521_v7  ;;  %v1870_v14 = vpop.f32.mrb[19].mxu0  ;;  %v1884_v16 = vmax.f32 %v1876_v9, 0.0 }
 0xbbd   : > { %v1871_v15 = vadd.f32 %v3521_v7, %v1870_v14  ;;  %v1882_v18 = vmax.f32 %v1868_v11, 0.0 }
 0xbbe   : > { %v1885_v17 = vmax.f32 %v1879_v13, 0.0 }
 0xbbf   : > { %v1883_v19 = vmax.f32 %v1871_v15, 0.0 }
 0xbc0   : > { %v1887_v20 = vpack.c.bf16 %v1885_v17, %v1884_v16 }
 0xbc1   : > { %v1886_v22 = vpack.c.bf16 %v1883_v19, %v1882_v18 }
 0xbc3   : > { %3788 = vmatprep.mubr.msk.bf16.mxu1 %vm922_vm5, %v1886_v22 }
 0xbc4   : > { %3789 = vmatmul.mubr.msk.bf16.vlgmr.msra.gmra.mrb[12].mxu1 %vm922_vm5, %v1887_v20 }
 0xc97   : > { %v3790_v30 = vpop.f32.mrb[12].mxu1 }
 0xc98   : > { %v1960_v31 = vadd.f32 %v3790_v30, %v3530_v28  ;;  %v1951_v32 = vpop.f32.mrb[13].mxu1 }
 0xc99   : > { %v1952_v33 = vadd.f32 %v3530_v28, %v1951_v32  ;;  %v3791_v34 = vpop.f32.mrb[14].mxu1 }
 0xc9a   : > { %v5908_v35 = vadd.f32 %v1960_v31, %v5866_v57  ;;  %v1963_v37 = vadd.f32 %v3791_v34, %v3530_v28  ;;  %v1954_v38 = vpop.f32.mrb[15].mxu1  ;;  %v4375_v57 = vld [vmem:[#allocation17 + $0x50] sm:$0xff]  }
 0xc9b   : > { %v5911_v39 = vadd.f32 %v1952_v33, %v5868_v59  ;;  %v1955_v42 = vadd.f32 %v3530_v28, %v1954_v38  ;;  %3800 = vmatprep.subr.bf16.mxu0 %v4375_v57 }
 0xc9c   : > { %v1972_v43 = vmax.f32 %v5908_v35, 0.0  ;;  %v5915_v46 = vadd.f32 %v1963_v37, %v5871_v62  ;;  %3801 = vmatpush3.bf16.msra.mxu0 %v4375_v57 }
 0xc9d   : > { %v1970_v47 = vmax.f32 %v5911_v39, 0.0  ;;  %v5919_v40 = vadd.f32 %v1955_v42, %v5874_v2  ;;  %v4376_v2 = vld [vmem:[#allocation17 + $0x58] sm:$0xff]  }
 0xc9e   : > { %v1973_v44 = vmax.f32 %v5915_v46, 0.0  ;;  %v1996_v52 = vrot.slane %v1972_v43, 7  ;;  %3802 = vmatprep.subr.bf16.mxu0 %v4376_v2 }
 0xc9f   : > { %v1993_v49 = vrot.slane %v1970_v47, 7  ;;  %v1971_v51 = vmax.f32 %v5919_v40, 0.0 }
 0xca0   : > { %v1998_v59 = vrot.slane %v1973_v44, 7  ;;  %3803 = vmatpush3.bf16.msra.mxu0 %v4376_v2 }
 0xca1   : > { %v2005_v36 = vsel %vm884_vm0, 0.0, %v1993_v49  ;;  %v1994_v41 = vrot.slane %v1971_v51, 7  ;;  %v4378_v51 = vld [vmem:[#allocation20 + $0x18] sm:$0xff]  }
 0xca2   : > { %v2009_v62 = vrot.slane %v2005_v36, 1  ;;  %v1999_v45 = vsel %vm884_vm0, %v1996_v52, %v1998_v59  ;;  %v2006_v48 = vsel %vm884_vm0, %v1998_v59, 0.0  ;;  %v2030_v1 = vrot.slane %v2005_v36, 2 }
 0xca3   : > { %v2016_v53 = vrot.slane %v2006_v48, 1  ;;  %v2037_v54 = vrot.slane %v2006_v48, 2  ;;  %v1995_v55 = vsel %vm884_vm0, %v1993_v49, %v1994_v41  ;;  %v1997_v56 = vsel %vm884_vm0, %v1994_v41, %v1996_v52  ;;  %v4377_v49 = vld [vmem:[#allocation20 + $0x10] sm:$0xff]   ;;  %v3535_v52 = vld [vmem:[#allocation19 + $0x1] ss:$0 sm:$0xff] }
 0xca4   : > { %v2012_v58 = vrot.slane %v1997_v56, 1  ;;  %v2014_v60 = vrot.slane %v1999_v45, 1  ;;  %v2010_v61 = vrot.slane %v1995_v55, 1  ;;  %v2033_v63 = vrot.slane %v1997_v56, 2  ;;  %3808 = vmatprep.subr.bf16.mxu1 %v4377_v49 }
 0xca5   : > { %v2035_v3 = vrot.slane %v1999_v45, 2  ;;  %v2031_v4 = vrot.slane %v1995_v55, 2  ;;  %3809 = vmatpush3.bf16.msra.mxu1 %v4377_v49 }
 0xca6   : > { %v2015_v5 = vsel %vm895_vm1, %v2012_v58, %v2014_v60  ;;  %v2017_v6 = vsel %vm895_vm1, %v2014_v60, %v2016_v53  ;;  %v2011_v7 = vsel %vm895_vm1, %v2009_v62, %v2010_v61  ;;  %v2013_v8 = vsel %vm895_vm1, %v2010_v61, %v2012_v58  ;;  %3810 = vmatprep.subr.bf16.mxu1 %v4378_v51 }
 0xca7   : > { %v4203_v9 = vpack.i.bf16 %v2017_v6, %v2015_v5  ;;  %v4198_v10 = vpack.i.bf16 %v2013_v8, %v2011_v7  ;;  %v2036_v11 = vsel %vm907_vm2, %v2033_v63, %v2035_v3  ;;  %v2038_v12 = vsel %vm907_vm2, %v2035_v3, %v2037_v54 }
 0xca8   : > { %v2032_v13 = vsel %vm907_vm2, %v2030_v1, %v2031_v4  ;;  %v2034_v14 = vsel %vm907_vm2, %v2031_v4, %v2033_v63  ;;  %v4213_v15 = vpack.i.bf16 %v2038_v12, %v2036_v11  ;;  %v2248_v63 = vadd.s32 32, %v5813_v21  ;;  %v3544_v1 = vld [vmem:[#allocation22 + $0x1] ss:$0 sm:$0xff] }
 0xca9   : > { %4204 = vrot.lane.b32.xlu1 %v4203_v9, %s5063_s7  ;;  %4199 = vrot.lane.b32.xlu0 %v4198_v10, %s5063_s7  ;;  %v4208_v16 = vpack.i.bf16 %v2034_v14, %v2032_v13  ;;  %v2249_v3 = vadd.s32 40, %v5813_v21  ;;  %v2250_v14 = vadd.s32 48, %v5813_v21 }
 0xcaa   : > { %3811 = vmatpush3.bf16.msra.mxu1 %v4378_v51  ;;  %v2252_v7 = vsub.s32 %v2248_v63, %v5816_v24 }
 0xcab   : > { %v2253_v10 = vsub.s32 %v2249_v3, %v5816_v24 }
 0xcac   : > { %vm2256_vm4 = vcmp.ge.s32.totalorder %v2252_v7, 0  ;;  %vm2260_vm7 = vcmp.le.s32.totalorder %v2252_v7, 1 }
 0xcad   : > { %4214 = vrot.lane.b32.xlu1 %v4213_v15, %s5064_s2  ;;  %4209 = vrot.lane.b32.xlu0 %v4208_v16, %s5064_s2  ;;  %vm2257_vm8 = vcmp.ge.s32.totalorder %v2253_v10, 0  ;;  %vm2261_vm9 = vcmp.le.s32.totalorder %v2253_v10, 1  ;;  %vm2264_vm12 = vmand %vm2256_vm4, %vm2260_vm7 }
 0xcae   : > { %vm2265_vm13 = vmand %vm2257_vm8, %vm2261_vm9 }
 0xd1b   : > { %v4205_v17 = vpop.permute.xlu1 %4204  ;;  %v4200_v18 = vpop.permute.xlu0 %4199 }
 0xd1c   : > { %v4207_v19 = vunpack.i.h.bf16 %v4205_v17  ;;  %v4206_v20 = vunpack.i.l.bf16 %v4205_v17  ;;  %v4202_v22 = vunpack.i.h.bf16 %v4200_v18  ;;  %v4201_v23 = vunpack.i.l.bf16 %v4200_v18 }
 0xd1e   : > { %v2054_v32 = vsel %vm922_vm5, %v1999_v45, %v4207_v19  ;;  %v2053_v33 = vsel %vm922_vm5, %v1997_v56, %v4206_v20  ;;  %v2052_v34 = vsel %vm922_vm5, %v1995_v55, %v4202_v22  ;;  %v2051_v37 = vsel %vm922_vm5, %v2005_v36, %v4201_v23 }
 0xd1f   : > { %v4215_v25 = vpop.permute.xlu1 %4214  ;;  %v4210_v26 = vpop.permute.xlu0 %4209  ;;  %v2254_v22 = vsub.s32 %v2250_v14, %v5816_v24 }
 0xd20   : > { %v4217_v27 = vunpack.i.h.bf16 %v4215_v25  ;;  %v4216_v28 = vunpack.i.l.bf16 %v4215_v25  ;;  %v4212_v30 = vunpack.i.h.bf16 %v4210_v26  ;;  %v4211_v31 = vunpack.i.l.bf16 %v4210_v26  ;;  %v4379_v25 = vld [vmem:[#allocation23] sm:$0xff]   ;;  %v4380_v26 = vld [vmem:[#allocation23 + $0x8] sm:$0xff]  }
 0xd21   : > { %vm2258_vm14 = vcmp.ge.s32.totalorder %v2254_v22, 0  ;;  %vm2262_vm15 = vcmp.le.s32.totalorder %v2254_v22, 1 }
 0xd22   : > { %v2057_v38 = vsel %vm1049_vm10, %v2053_v33, %v4216_v28  ;;  %v2058_v42 = vsel %vm1049_vm10, %v2054_v32, %v4217_v27  ;;  %v2055_v43 = vsel %vm1049_vm10, %v2051_v37, %v4211_v31  ;;  %v2056_v47 = vsel %vm1049_vm10, %v2052_v34, %v4212_v30  ;;  %v4381_v27 = vld [vmem:[#allocation23 + $0x10] sm:$0xff]   ;;  %v4382_v30 = vld [vmem:[#allocation23 + $0x18] sm:$0xff]  }
 0xd23   : > { %v2060_v44 = vpack.c.bf16 %v2058_v42, %v2057_v38  ;;  %v2059_v57 = vpack.c.bf16 %v2056_v47, %v2055_v43 }
 0xd25   : > { %3804 = vmatprep.mubr.msk.bf16.mxu0 %vm6352_vm11, %v2059_v57  ;;  %v4383_v57 = vld [vmem:[#allocation23 + $0x20] sm:$0xff]  }
 0xd26   : > { %3805 = vmatmul.mubr.msk.bf16.vlgmr.msra.gmra.mrb[20].mxu0 %vm6352_vm11, %v2060_v44  ;;  %vm2266_vm11 = vmand %vm2258_vm14, %vm2262_vm15 }
 0xdf9   : > { %v3806_v59 = vpop.f32.mrb[20].mxu0 }
 0xdfa   : > { %v2152_v36 = vadd.f32 %v3806_v59, %v3535_v52  ;;  %v2143_v41 = vpop.f32.mrb[21].mxu0 }
 0xdfb   : > { %v2144_v62 = vadd.f32 %v3535_v52, %v2143_v41  ;;  %v3807_v45 = vpop.f32.mrb[22].mxu0 }
 0xdfc   : > { %v2155_v48 = vadd.f32 %v3807_v45, %v3535_v52  ;;  %v2146_v2 = vpop.f32.mrb[23].mxu0  ;;  %v2160_v54 = vmax.f32 %v2152_v36, 0.0 }
 0xdfd   : > { %v2147_v53 = vadd.f32 %v3535_v52, %v2146_v2  ;;  %v2158_v56 = vmax.f32 %v2144_v62, 0.0 }
 0xdfe   : > { %v2161_v55 = vmax.f32 %v2155_v48, 0.0 }
 0xdff   : > { %v2159_v58 = vmax.f32 %v2147_v53, 0.0 }
 0xe00   : > { %v2163_v60 = vpack.c.bf16 %v2161_v55, %v2160_v54 }
 0xe01   : > { %v2162_v61 = vpack.c.bf16 %v2159_v58, %v2158_v56  ;;  %v4384_v56 = vld [vmem:[#allocation23 + $0x28] sm:$0xff]  }
 0xe03   : > { %3812 = vmatprep.mubr.msk.bf16.mxu1 %vm922_vm5, %v2162_v61 }
 0xe04   : > { %3813 = vmatmul.mubr.msk.bf16.vlgmr.msra.gmra.mrb[16].mxu1 %vm922_vm5, %v2163_v60 }
 0xe05   : > { %3820 = vmatprep.mubr.msk.bf16.mxu1 %vm922_vm5, %v5823_v29  ;;  %v2251_v29 = vadd.s32 56, %v5813_v21 }
 0xe07   : > { %v2255_v21 = vsub.s32 %v2251_v29, %v5816_v24  ;;  %v2270_v24 = vsel %vm2266_vm11, 1.0, %v5060_v0  ;;  %vm6423_vm11 = vcmask 785408  }
 0xe08   : > { %vm6424_vm7 = vmmov %vm6423_vm11 }
 0xe09   : > { %vm2259_vm3 = vcmp.ge.s32.totalorder %v2255_v21, 0  ;;  %vm2263_vm6 = vcmp.le.s32.totalorder %v2255_v21, 1  ;;  %vm6425_vm8 = vmmov %vm6424_vm7 }
 0xe0a   : > { %vm2267_vm4 = vmand %vm2259_vm3, %vm2263_vm6  ;;  %vm3169_vm6 = vcmask 64512  }
 0xe0b   : > { %vm6426_vm9 = vmmov %vm6424_vm7 }
 0xe0c   : > { %vm6429_vm14 = vmmov %vm6424_vm7 }
 0xe0d   : > { %vm6430_vm15 = vmmov %vm6424_vm7 }
 0xed7   : > { %v3814_v4 = vpop.f32.mrb[16].mxu1 }
 0xed8   : > { %v2238_v5 = vadd.f32 %v3814_v4, %v3544_v1  ;;  %v2229_v6 = vpop.f32.mrb[17].mxu1 }
 0xed9   : > { %v2230_v8 = vadd.f32 %v3544_v1, %v2229_v6  ;;  %v3815_v9 = vpop.f32.mrb[18].mxu1 }
 0xeda   : > { %v2241_v11 = vadd.f32 %v3815_v9, %v3544_v1  ;;  %v2232_v12 = vpop.f32.mrb[19].mxu1  ;;  %v2246_v15 = vadd.f32 %v2238_v5, %v5908_v35  ;;  %v2268_v35 = vsel %vm2264_vm12, 1.0, %v5060_v0  ;;  %vm6427_vm12 = vmmov %vm6424_vm7 }
 0xedb   : > { %v2233_v13 = vadd.f32 %v3544_v1, %v2232_v12  ;;  %v2244_v17 = vadd.f32 %v2230_v8, %v5911_v39 }
 0xedc   : > { %v2247_v16 = vadd.f32 %v2241_v11, %v5915_v46  ;;  %v2269_v46 = vsel %vm2265_vm13, 1.0, %v5060_v0  ;;  %vm6428_vm13 = vmmov %vm6424_vm7 }
 0xedd   : > { %v2245_v18 = vadd.f32 %v2233_v13, %v5919_v40  ;;  %v2272_v39 = vpack.c.bf16 %v2269_v46, %v2268_v35  ;;  %v2271_v40 = vsel %vm2267_vm4, 1.0, %v5060_v0 }
 0xede   : > { %v2275_v19 = vpack.c.bf16 %v2247_v16, %v2246_v15  ;;  %v2273_v23 = vpack.c.bf16 %v2271_v40, %v2270_v24 }
 0xedf   : > { %v2274_v20 = vpack.c.bf16 %v2245_v18, %v2244_v17 }
 0xee1   : > { %3816 = vmatprep.subr.bf16.mxu1 %v2274_v20 }
 0xee2   : > { %3817 = vmatpush3.bf16.msra.mxu1 %v2274_v20 }
 0xee3   : > { %3818 = vmatprep.subr.bf16.mxu1 %v2275_v19 }
 0xee6   : > { %3819 = vmatpush3.bf16.msra.mxu1 %v2275_v19 }
 0xee7   : > { %3828 = vmatprep.subr.bf16.mxu1 %v4379_v25 }
 0xee9   : > { %3821 = vmatmul.mubr.msk.bf16.vlgmr.msra.gmra.mrb[20].mxu1 %vm922_vm5, %v5835_v50 }
 0xeea   : > { %3824 = vmatprep.mubr.msk.bf16.mxu1 %vm922_vm5, %v2272_v39  ;;  %3829 = vmatpush3.bf16.msra.mxu1 %v4379_v25 }
 0xeeb   : > { %3830 = vmatprep.subr.bf16.mxu1 %v4380_v26 }
 0xeee   : > { %3831 = vmatpush3.bf16.msra.mxu1 %v4380_v26 }
 0xeef   : > { %3832 = vmatprep.subr.bf16.mxu1 %v4381_v27 }
 0xef1   : > { %3825 = vmatmul.mubr.msk.bf16.gmra.mrb[24].mxu1 %vm922_vm5, %v2273_v23 }
 0xef2   : > { %3833 = vmatpush3.bf16.msra.mxu1 %v4381_v27 }
 0xef3   : > { %3834 = vmatprep.subr.bf16.mxu1 %v4382_v30 }
 0xef6   : > { %3835 = vmatpush3.bf16.msra.mxu1 %v4382_v30 }
 0xef7   : > { %3836 = vmatprep.subr.bf16.mxu1 %v4383_v57 }
 0xefa   : > { %3837 = vmatpush3.bf16.msra.mxu1 %v4383_v57 }
 0xefb   : > { %3838 = vmatprep.subr.bf16.mxu1 %v4384_v56 }
 0xefe   : > { %3839 = vmatpush3.bf16.msra.mxu1 %v4384_v56 }
 0xfbc   : > { %v3822_v28 = vpop.f32.mrb[20].mxu1 }
 0xfbd   : > { %v2320_v50 = vpop.f32.mrb[21].mxu1  ;;  %v2375_v33 = vrot.slane %v3822_v28, 7 }
 0xfbe   : > { %v2372_v31 = vrot.slane %v2320_v50, 7  ;;  %v3823_v32 = vpop.f32.mrb[22].mxu1 }
 0xfbf   : > { %v2377_v34 = vrot.slane %v3823_v32, 7  ;;  %v2323_v0 = vpop.f32.mrb[23].mxu1 }
 0xfc0   : > { %v5975_v37 = vsel %vm884_vm0, 0.0, %v2372_v31  ;;  %v2373_v38 = vrot.slane %v2323_v0, 7 }
 0xfc1   : > { %v5978_v42 = vsel %vm884_vm0, %v2375_v33, %v2377_v34  ;;  %v2400_v43 = vrot.slane %v5975_v37, 1  ;;  %v2441_v41 = vrot.slane %v5975_v37, 2 }
 0xfc2   : > { %v5982_v47 = vsel %vm884_vm0, %v2372_v31, %v2373_v38  ;;  %v5985_v44 = vsel %vm884_vm0, %v2373_v38, %v2375_v33  ;;  %v2405_v2 = vrot.slane %v5978_v42, 1  ;;  %v2446_v7 = vrot.slane %v5978_v42, 2 }
 0xfc3   : > { %v2401_v49 = vrot.slane %v5982_v47, 1  ;;  %v2403_v51 = vrot.slane %v5985_v44, 1  ;;  %v2442_v52 = vrot.slane %v5982_v47, 2  ;;  %v2444_v59 = vrot.slane %v5985_v44, 2 }
 0xfc4   : > { %v3826_v36 = vpop.f32.mrb[24].mxu1 }
 0xfc5   : > { %v2336_v62 = vpop.f32.mrb[25].mxu1  ;;  %v2402_v45 = vsel %vm895_vm1, %v2400_v43, %v2401_v49  ;;  %v2404_v48 = vsel %vm895_vm1, %v2401_v49, %v2403_v51  ;;  %v2383_v58 = vrot.slane %v3826_v36, 7  ;;  %v2443_v63 = vsel %vm907_vm2, %v2441_v41, %v2442_v52 }
 0xfc6   : > { %v2379_v53 = vrot.slane %v2336_v62, 7  ;;  %v3827_v54 = vpop.f32.mrb[26].mxu1  ;;  %v4218_v55 = vpack.i.bf16 %v2404_v48, %v2402_v45  ;;  %v2445_v1 = vsel %vm907_vm2, %v2442_v52, %v2444_v59  ;;  %v2406_v10 = vsel %vm895_vm1, %v2403_v51, %v2405_v2 }
 0xfc7   : > { %v2385_v60 = vrot.slane %v3827_v54, 7  ;;  %v2339_v61 = vpop.f32.mrb[27].mxu1  ;;  %v4223_v9 = vpack.i.bf16 %v2445_v1, %v2443_v63  ;;  %v2447_v39 = vsel %vm907_vm2, %v2444_v59, %v2446_v7 }
 0xfc8   : > { %v5998_v3 = vsel %vm884_vm0, %v2377_v34, %v2379_v53  ;;  %v2381_v4 = vrot.slane %v2339_v61, 7  ;;  %4219 = vrot.lane.b32.xlu0 %v4218_v55, %s5063_s7 }
 0xfc9   : > { %v2407_v5 = vrot.slane %v5998_v3, 1  ;;  %v6003_v6 = vsel %vm884_vm0, %v2383_v58, %v2385_v60  ;;  %v2448_v8 = vrot.slane %v5998_v3, 2  ;;  %v2397_v11 = vsel %vm884_vm0, %v2385_v60, 0.0 }
 0xfca   : > { %v6010_v12 = vsel %vm884_vm0, %v2379_v53, %v2381_v4  ;;  %v6013_v13 = vsel %vm884_vm0, %v2381_v4, %v2383_v58  ;;  %v2413_v18 = vrot.slane %v6003_v6, 1  ;;  %v2415_v20 = vrot.slane %v2397_v11, 1 }
 0xfcb   : > { %v2408_v14 = vsel %vm895_vm1, %v2405_v2, %v2407_v5  ;;  %v2409_v29 = vrot.slane %v6010_v12, 1  ;;  %v2411_v15 = vrot.slane %v6013_v13, 1  ;;  %v2450_v16 = vrot.slane %v6010_v12, 2 }
 0xfcc   : > { %v2452_v17 = vrot.slane %v6013_v13, 2  ;;  %4224 = vrot.lane.b32.xlu0 %v4223_v9, %s5064_s2  ;;  %v4228_v19 = vpack.i.bf16 %v2408_v14, %v2406_v10  ;;  %v2449_v35 = vsel %vm907_vm2, %v2446_v7, %v2448_v8  ;;  %v2454_v25 = vrot.slane %v6003_v6, 2 }
 0xfcd   : > { %v2410_v22 = vsel %vm895_vm1, %v2407_v5, %v2409_v29  ;;  %v2412_v21 = vsel %vm895_vm1, %v2409_v29, %v2411_v15  ;;  %v2451_v24 = vsel %vm907_vm2, %v2448_v8, %v2450_v16  ;;  %v4233_v23 = vpack.i.bf16 %v2449_v35, %v2447_v39 }
 0xfce   : > { %4229 = vrot.lane.b32.xlu1 %v4228_v19, %s5063_s7  ;;  %v4238_v46 = vpack.i.bf16 %v2412_v21, %v2410_v22  ;;  %v2453_v40 = vsel %vm907_vm2, %v2450_v16, %v2452_v17  ;;  %v2456_v26 = vrot.slane %v2397_v11, 2  ;;  %v2414_v27 = vsel %vm895_vm1, %v2411_v15, %v2413_v18  ;;  %v4386_v22 = vld [vmem:[#allocation26 + $0x8] sm:$0xff]   ;;  %v4387_v21 = vld [vmem:[#allocation26 + $0x10] sm:$0xff]  }
 0xfcf   : > { %v2416_v28 = vsel %vm895_vm1, %v2413_v18, %v2415_v20  ;;  %v4248_v50 = vpack.i.bf16 %v2453_v40, %v2451_v24  ;;  %v2455_v31 = vsel %vm907_vm2, %v2452_v17, %v2454_v25  ;;  %v4385_v20 = vld [vmem:[#allocation26] sm:$0xff]  }
 0xfd0   : > { %4239 = vrot.lane.b32.xlu0 %v4238_v46, %s5063_s7  ;;  %v4243_v30 = vpack.i.bf16 %v2416_v28, %v2414_v27  ;;  %v2457_v32 = vsel %vm907_vm2, %v2454_v25, %v2456_v26  ;;  %3848 = vmatprep.subr.bf16.mxu0 %v4385_v20  ;;  %v4388_v25 = vld [vmem:[#allocation26 + $0x18] sm:$0xff]  }
 0xfd1   : > { %v4253_v33 = vpack.i.bf16 %v2457_v32, %v2455_v31  ;;  %3849 = vmatpush3.bf16.msra.mxu0 %v4385_v20 }
 0xfd2   : > { %4234 = vrot.lane.b32.xlu1 %v4233_v23, %s5064_s2  ;;  %3850 = vmatprep.subr.bf16.mxu0 %v4386_v22 }
 0xfd4   : > { %4249 = vrot.lane.b32.xlu0 %v4248_v50, %s5064_s2 }
 0xfd5   : > { %3851 = vmatpush3.bf16.msra.mxu0 %v4386_v22 }
 0xfd6   : > { %4244 = vrot.lane.b32.xlu1 %v4243_v30, %s5063_s7  ;;  %3852 = vmatprep.subr.bf16.mxu0 %v4387_v21 }
 0xfd9   : > { %3853 = vmatpush3.bf16.msra.mxu0 %v4387_v21 }
 0xfda   : > { %4254 = vrot.lane.b32.xlu1 %v4253_v33, %s5064_s2  ;;  %3854 = vmatprep.subr.bf16.mxu0 %v4388_v25 }
 0xfdd   : > { %3855 = vmatpush3.bf16.msra.mxu0 %v4388_v25 }
0x103a   : > { %v4220_v34 = vpop.permute.xlu0 %4219 }
0x103b   : > { %v4222_v0 = vunpack.i.h.bf16 %v4220_v34  ;;  %v4221_v38 = vunpack.i.l.bf16 %v4220_v34 }
0x103d   : > { %v2483_v51 = vsel %vm922_vm5, %v5982_v47, %v4222_v0  ;;  %v2482_v52 = vsel %vm922_vm5, %v5975_v37, %v4221_v38 }
0x103e   : > { %v4225_v43 = vpop.permute.xlu0 %4224 }
0x103f   : > { %v4227_v57 = vunpack.i.h.bf16 %v4225_v43  ;;  %v4226_v49 = vunpack.i.l.bf16 %v4225_v43  ;;  %v4389_v43 = vld [vmem:[#allocation26 + $0x20] sm:$0xff]  }
0x1040   : > { %v4230_v41 = vpop.permute.xlu1 %4229  ;;  %3856 = vmatprep.subr.bf16.mxu0 %v4389_v43 }
0x1041   : > { %v2490_v59 = vsel %vm1049_vm10, %v2482_v52, %v4226_v49  ;;  %v2491_v36 = vsel %vm1049_vm10, %v2483_v51, %v4227_v57  ;;  %v4232_v45 = vunpack.i.h.bf16 %v4230_v41  ;;  %v4231_v48 = vunpack.i.l.bf16 %v4230_v41  ;;  %3857 = vmatpush3.bf16.msra.mxu0 %v4389_v43 }
0x1042   : > { %v2498_v62 = vpack.c.bf16 %v2491_v36, %v2490_v59  ;;  %v4240_v2 = vpop.permute.xlu0 %4239 }
0x1043   : > { %v4242_v53 = vunpack.i.h.bf16 %v4240_v2  ;;  %v4241_v54 = vunpack.i.l.bf16 %v4240_v2  ;;  %v2485_v47 = vsel %vm922_vm5, %v5978_v42, %v4232_v45  ;;  %v2484_v37 = vsel %vm922_vm5, %v5985_v44, %v4231_v48 }
0x1044   : > { %3840 = vmatprep.mubr.msk.bf16.mxu1 %vm6423_vm11, %v2498_v62  ;;  %v4235_v55 = vpop.permute.xlu1 %4234 }
0x1045   : > { %v4237_v56 = vunpack.i.h.bf16 %v4235_v55  ;;  %v4236_v58 = vunpack.i.l.bf16 %v4235_v55  ;;  %v2487_v5 = vsel %vm922_vm5, %v6010_v12, %v4242_v53  ;;  %v2486_v7 = vsel %vm922_vm5, %v5998_v3, %v4241_v54 }
0x1046   : > { %v4250_v60 = vpop.permute.xlu0 %4249 }
0x1047   : > { %v2492_v61 = vsel %vm1049_vm10, %v2484_v37, %v4236_v58  ;;  %v2493_v63 = vsel %vm1049_vm10, %v2485_v47, %v4237_v56  ;;  %v4252_v1 = vunpack.i.h.bf16 %v4250_v60  ;;  %v4251_v4 = vunpack.i.l.bf16 %v4250_v60  ;;  %v4390_v37 = vld [vmem:[#allocation26 + $0x28] sm:$0xff]  }
0x1048   : > { %v2499_v8 = vpack.c.bf16 %v2493_v63, %v2492_v61  ;;  %v4245_v9 = vpop.permute.xlu1 %4244  ;;  %3858 = vmatprep.subr.bf16.mxu0 %v4390_v37 }
0x1049   : > { %v2494_v42 = vsel %vm1049_vm10, %v2486_v7, %v4251_v4  ;;  %v2495_v10 = vsel %vm1049_vm10, %v2487_v5, %v4252_v1  ;;  %v4247_v11 = vunpack.i.h.bf16 %v4245_v9  ;;  %v4246_v14 = vunpack.i.l.bf16 %v4245_v9  ;;  %3859 = vmatpush3.bf16.msra.mxu0 %v4390_v37 }
0x104a   : > { %v2500_v44 = vpack.c.bf16 %v2495_v10, %v2494_v42  ;;  %3841 = vmatmul.mubr.msk.bf16.vlgmr.msra.gmra.mrb[28].mxu1 %vm6424_vm7, %v2499_v8 }
0x104b   : > { %v2489_v12 = vsel %vm922_vm5, %v6003_v6, %v4247_v11  ;;  %v2488_v3 = vsel %vm922_vm5, %v6013_v13, %v4246_v14  ;;  %v3553_v6 = vld [vmem:[#allocation25] ss:$0 sm:$0xff] }
0x104c   : > { %v4255_v29 = vpop.permute.xlu1 %4254  ;;  %3844 = vmatprep.mubr.msk.bf16.mxu1 %vm6425_vm8, %v2500_v44 }
0x104d   : > { %v4257_v15 = vunpack.i.h.bf16 %v4255_v29  ;;  %v4256_v16 = vunpack.i.l.bf16 %v4255_v29 }
0x104f   : > { %v2496_v17 = vsel %vm1049_vm10, %v2488_v3, %v4256_v16  ;;  %v2497_v18 = vsel %vm1049_vm10, %v2489_v12, %v4257_v15 }
0x1050   : > { %v2501_v19 = vpack.c.bf16 %v2497_v18, %v2496_v17 }
0x1052   : > { %3845 = vmatmul.mubr.msk.bf16.gmra.mrb[32].mxu1 %vm6426_vm9, %v2501_v19 }
0x111d   : > { %v3842_v35 = vpop.f32.mrb[28].mxu1 }
0x111e   : > { %v2599_v46 = vadd.f32 %v3842_v35, %v3553_v6  ;;  %v2590_v13 = vpop.f32.mrb[29].mxu1 }
0x111f   : > { %v2591_v39 = vadd.f32 %v3553_v6, %v2590_v13  ;;  %v3843_v24 = vpop.f32.mrb[30].mxu1 }
0x1120   : > { %v2602_v40 = vadd.f32 %v3843_v24, %v3553_v6  ;;  %v2593_v23 = vpop.f32.mrb[31].mxu1  ;;  %v2645_v28 = vrot.slane %v2599_v46, 7 }
0x1121   : > { %v2642_v26 = vrot.slane %v2591_v39, 7  ;;  %v2594_v27 = vadd.f32 %v3553_v6, %v2593_v23 }
0x1122   : > { %v2647_v50 = vrot.slane %v2602_v40, 7 }
0x1123   : > { %v6068_v30 = vsel %vm884_vm0, 0.0, %v2642_v26  ;;  %v2643_v31 = vrot.slane %v2594_v27, 7 }
0x1124   : > { %v6071_v32 = vsel %vm884_vm0, %v2645_v28, %v2647_v50  ;;  %v2670_v33 = vrot.slane %v6068_v30, 1  ;;  %v2711_v45 = vrot.slane %v6068_v30, 2 }
0x1125   : > { %v6075_v34 = vsel %vm884_vm0, %v2642_v26, %v2643_v31  ;;  %v6078_v0 = vsel %vm884_vm0, %v2643_v31, %v2645_v28  ;;  %v3846_v38 = vpop.f32.mrb[32].mxu1  ;;  %v2675_v55 = vrot.slane %v6071_v32, 1  ;;  %v2716_v9 = vrot.slane %v6071_v32, 2 }
0x1126   : > { %v2671_v57 = vrot.slane %v6075_v34, 1  ;;  %v2673_v49 = vrot.slane %v6078_v0, 1  ;;  %v2712_v51 = vrot.slane %v6075_v34, 2  ;;  %v2714_v52 = vrot.slane %v6078_v0, 2  ;;  %v2606_v59 = vpop.f32.mrb[33].mxu1 }
0x1127   : > { %v2615_v36 = vadd.f32 %v3846_v38, %v3553_v6  ;;  %v2607_v41 = vadd.f32 %v3553_v6, %v2606_v59  ;;  %v3847_v62 = vpop.f32.mrb[34].mxu1 }
0x1128   : > { %v2618_v48 = vadd.f32 %v3847_v62, %v3553_v6  ;;  %v2609_v2 = vpop.f32.mrb[35].mxu1  ;;  %v2672_v53 = vsel %vm895_vm1, %v2670_v33, %v2671_v57  ;;  %v2674_v54 = vsel %vm895_vm1, %v2671_v57, %v2673_v49  ;;  %v2713_v63 = vsel %vm907_vm2, %v2711_v45, %v2712_v51 }
0x1129   : > { %v2649_v56 = vrot.slane %v2607_v41, 7  ;;  %v2610_v58 = vadd.f32 %v3553_v6, %v2609_v2  ;;  %v4258_v47 = vpack.i.bf16 %v2674_v54, %v2672_v53  ;;  %v2653_v60 = vrot.slane %v2615_v36, 7 }
0x112a   : > { %v2655_v61 = vrot.slane %v2618_v48, 7  ;;  %v2715_v1 = vsel %vm907_vm2, %v2712_v51, %v2714_v52  ;;  %v2676_v44 = vsel %vm895_vm1, %v2673_v49, %v2675_v55  ;;  %v2717_v46 = vsel %vm907_vm2, %v2714_v52, %v2716_v9 }
0x112b   : > { %v6091_v4 = vsel %vm884_vm0, %v2647_v50, %v2649_v56  ;;  %v2651_v5 = vrot.slane %v2610_v58, 7  ;;  %4259 = vrot.lane.b32.xlu0 %v4258_v47, %s5063_s7  ;;  %v4263_v10 = vpack.i.bf16 %v2715_v1, %v2713_v63 }
0x112c   : > { %v2677_v7 = vrot.slane %v6091_v4, 1  ;;  %v6096_v8 = vsel %vm884_vm0, %v2653_v60, %v2655_v61  ;;  %v2718_v42 = vrot.slane %v6091_v4, 2  ;;  %v2667_v11 = vsel %vm884_vm0, %v2655_v61, 0.0 }
0x112d   : > { %v6103_v14 = vsel %vm884_vm0, %v2649_v56, %v2651_v5  ;;  %v6106_v29 = vsel %vm884_vm0, %v2651_v5, %v2653_v60  ;;  %v2683_v18 = vrot.slane %v6096_v8, 1  ;;  %v2685_v20 = vrot.slane %v2667_v11, 1 }
0x112e   : > { %v2678_v15 = vsel %vm895_vm1, %v2675_v55, %v2677_v7  ;;  %v2679_v16 = vrot.slane %v6103_v14, 1  ;;  %v2681_v12 = vrot.slane %v6106_v29, 1  ;;  %v2720_v3 = vrot.slane %v6103_v14, 2 }
0x112f   : > { %v2722_v17 = vrot.slane %v6106_v29, 2  ;;  %4264 = vrot.lane.b32.xlu0 %v4263_v10, %s5064_s2  ;;  %v4268_v19 = vpack.i.bf16 %v2678_v15, %v2676_v44  ;;  %v2719_v6 = vsel %vm907_vm2, %v2716_v9, %v2718_v42  ;;  %v2724_v40 = vrot.slane %v6096_v8, 2 }
0x1130   : > { %v2680_v22 = vsel %vm895_vm1, %v2677_v7, %v2679_v16  ;;  %v2682_v21 = vsel %vm895_vm1, %v2679_v16, %v2681_v12  ;;  %v2721_v13 = vsel %vm907_vm2, %v2718_v42, %v2720_v3  ;;  %v4273_v24 = vpack.i.bf16 %v2719_v6, %v2717_v46 }
0x1131   : > { %4269 = vrot.lane.b32.xlu1 %v4268_v19, %s5063_s7  ;;  %v4278_v35 = vpack.i.bf16 %v2682_v21, %v2680_v22  ;;  %v2723_v39 = vsel %vm907_vm2, %v2720_v3, %v2722_v17  ;;  %v2726_v23 = vrot.slane %v2667_v11, 2  ;;  %v2684_v25 = vsel %vm895_vm1, %v2681_v12, %v2683_v18  ;;  %v4392_v22 = vld [vmem:[#allocation29 + $0x8] sm:$0xff]   ;;  %v4393_v21 = vld [vmem:[#allocation29 + $0x10] sm:$0xff]  }
0x1132   : > { %v2686_v26 = vsel %vm895_vm1, %v2683_v18, %v2685_v20  ;;  %v4288_v27 = vpack.i.bf16 %v2723_v39, %v2721_v13  ;;  %v2725_v50 = vsel %vm907_vm2, %v2722_v17, %v2724_v40  ;;  %v4391_v20 = vld [vmem:[#allocation29] sm:$0xff]  }
0x1133   : > { %4279 = vrot.lane.b32.xlu0 %v4278_v35, %s5063_s7  ;;  %v4283_v28 = vpack.i.bf16 %v2686_v26, %v2684_v25  ;;  %v2727_v31 = vsel %vm907_vm2, %v2724_v40, %v2726_v23  ;;  %3868 = vmatprep.subr.bf16.mxu1 %v4391_v20 }
0x1134   : > { %v4293_v33 = vpack.i.bf16 %v2727_v31, %v2725_v50  ;;  %3869 = vmatpush3.bf16.msra.mxu1 %v4391_v20  ;;  %v4394_v50 = vld [vmem:[#allocation29 + $0x18] sm:$0xff]  }
0x1135   : > { %4274 = vrot.lane.b32.xlu1 %v4273_v24, %s5064_s2  ;;  %3870 = vmatprep.subr.bf16.mxu1 %v4392_v22 }
0x1137   : > { %4289 = vrot.lane.b32.xlu0 %v4288_v27, %s5064_s2 }
0x1138   : > { %3871 = vmatpush3.bf16.msra.mxu1 %v4392_v22 }
0x1139   : > { %4284 = vrot.lane.b32.xlu1 %v4283_v28, %s5063_s7  ;;  %3872 = vmatprep.subr.bf16.mxu1 %v4393_v21 }
0x113c   : > { %3873 = vmatpush3.bf16.msra.mxu1 %v4393_v21 }
0x113d   : > { %4294 = vrot.lane.b32.xlu1 %v4293_v33, %s5064_s2  ;;  %3874 = vmatprep.subr.bf16.mxu1 %v4394_v50 }
0x1140   : > { %3875 = vmatpush3.bf16.msra.mxu1 %v4394_v50 }
0x119d   : > { %v4260_v38 = vpop.permute.xlu0 %4259 }
0x119e   : > { %v4262_v43 = vunpack.i.h.bf16 %v4260_v38  ;;  %v4261_v57 = vunpack.i.l.bf16 %v4260_v38 }
0x11a0   : > { %v2753_v59 = vsel %vm922_vm5, %v6075_v34, %v4262_v43  ;;  %v2752_v36 = vsel %vm922_vm5, %v6068_v30, %v4261_v57 }
0x11a1   : > { %v4265_v49 = vpop.permute.xlu0 %4264 }
0x11a2   : > { %v4267_v51 = vunpack.i.h.bf16 %v4265_v49  ;;  %v4266_v52 = vunpack.i.l.bf16 %v4265_v49 }
0x11a3   : > { %v4270_v45 = vpop.permute.xlu1 %4269 }
0x11a4   : > { %v2760_v41 = vsel %vm1049_vm10, %v2752_v36, %v4266_v52  ;;  %v2761_v62 = vsel %vm1049_vm10, %v2753_v59, %v4267_v51  ;;  %v4272_v2 = vunpack.i.h.bf16 %v4270_v45  ;;  %v4271_v53 = vunpack.i.l.bf16 %v4270_v45 }
0x11a5   : > { %v2768_v48 = vpack.c.bf16 %v2761_v62, %v2760_v41  ;;  %v4280_v54 = vpop.permute.xlu0 %4279 }
0x11a6   : > { %v4282_v55 = vunpack.i.h.bf16 %v4280_v54  ;;  %v4281_v56 = vunpack.i.l.bf16 %v4280_v54  ;;  %v2755_v34 = vsel %vm922_vm5, %v6071_v32, %v4272_v2  ;;  %v2754_v30 = vsel %vm922_vm5, %v6078_v0, %v4271_v53 }
0x11a7   : > { %3860 = vmatprep.mubr.msk.bf16.mxu0 %vm6427_vm12, %v2768_v48  ;;  %v4275_v58 = vpop.permute.xlu1 %4274 }
0x11a8   : > { %v4277_v47 = vunpack.i.h.bf16 %v4275_v58  ;;  %v4276_v37 = vunpack.i.l.bf16 %v4275_v58  ;;  %v2757_v7 = vsel %vm922_vm5, %v6103_v14, %v4282_v55  ;;  %v2756_v9 = vsel %vm922_vm5, %v6091_v4, %v4281_v56 }
0x11a9   : > { %v4290_v60 = vpop.permute.xlu0 %4289 }
0x11aa   : > { %v2762_v61 = vsel %vm1049_vm10, %v2754_v30, %v4276_v37  ;;  %v2763_v63 = vsel %vm1049_vm10, %v2755_v34, %v4277_v47  ;;  %v4292_v1 = vunpack.i.h.bf16 %v4290_v60  ;;  %v4291_v5 = vunpack.i.l.bf16 %v4290_v60  ;;  %v4395_v60 = vld [vmem:[#allocation29 + $0x20] sm:$0xff]  }
0x11ab   : > { %v2769_v42 = vpack.c.bf16 %v2763_v63, %v2762_v61  ;;  %v4285_v10 = vpop.permute.xlu1 %4284  ;;  %3876 = vmatprep.subr.bf16.mxu1 %v4395_v60 }
0x11ac   : > { %v2764_v32 = vsel %vm1049_vm10, %v2756_v9, %v4291_v5  ;;  %v2765_v44 = vsel %vm1049_vm10, %v2757_v7, %v4292_v1  ;;  %v4287_v11 = vunpack.i.h.bf16 %v4285_v10  ;;  %v4286_v15 = vunpack.i.l.bf16 %v4285_v10  ;;  %3877 = vmatpush3.bf16.msra.mxu1 %v4395_v60 }
0x11ad   : > { %v2770_v0 = vpack.c.bf16 %v2765_v44, %v2764_v32  ;;  %3861 = vmatmul.mubr.msk.bf16.vlgmr.msra.gmra.mrb[24].mxu0 %vm6428_vm13, %v2769_v42 }
0x11ae   : > { %v2759_v14 = vsel %vm922_vm5, %v6096_v8, %v4287_v11  ;;  %v2758_v4 = vsel %vm922_vm5, %v6106_v29, %v4286_v15  ;;  %v3564_v8 = vld [vmem:[#allocation28] ss:$0 sm:$0xff]  ;;  %v4396_v11 = vld [vmem:[#allocation29 + $0x28] sm:$0xff]  }
0x11af   : > { %v4295_v16 = vpop.permute.xlu1 %4294  ;;  %3864 = vmatprep.mubr.msk.bf16.mxu0 %vm6429_vm14, %v2770_v0  ;;  %3878 = vmatprep.subr.bf16.mxu1 %v4396_v11 }
0x11b0   : > { %v4297_v12 = vunpack.i.h.bf16 %v4295_v16  ;;  %v4296_v3 = vunpack.i.l.bf16 %v4295_v16  ;;  %3879 = vmatpush3.bf16.msra.mxu1 %v4396_v11 }
0x11b2   : > { %v2766_v17 = vsel %vm1049_vm10, %v2758_v4, %v4296_v3  ;;  %v2767_v18 = vsel %vm1049_vm10, %v2759_v14, %v4297_v12 }
0x11b3   : > { %v2771_v19 = vpack.c.bf16 %v2767_v18, %v2766_v17 }
0x11b5   : > { %3865 = vmatmul.mubr.msk.bf16.gmra.mrb[28].mxu0 %vm6430_vm15, %v2771_v19 }
0x1280   : > { %v3862_v6 = vpop.f32.mrb[24].mxu0 }
0x1281   : > { %v2869_v35 = vadd.f32 %v3862_v6, %v3564_v8  ;;  %v2860_v29 = vpop.f32.mrb[25].mxu0 }
0x1282   : > { %v2861_v46 = vadd.f32 %v3564_v8, %v2860_v29  ;;  %v3863_v13 = vpop.f32.mrb[26].mxu0 }
0x1283   : > { %v2893_v39 = vmax.f32 %v2869_v35, 0.0  ;;  %v2872_v24 = vadd.f32 %v3863_v13, %v3564_v8  ;;  %v2863_v40 = vpop.f32.mrb[27].mxu0 }
0x1284   : > { %v2891_v23 = vmax.f32 %v2861_v46, 0.0  ;;  %v2864_v25 = vadd.f32 %v3564_v8, %v2863_v40 }
0x1285   : > { %v2894_v26 = vmax.f32 %v2872_v24, 0.0  ;;  %v2923_v31 = vrot.slane %v2893_v39, 7 }
0x1286   : > { %v2920_v27 = vrot.slane %v2891_v23, 7  ;;  %v2892_v28 = vmax.f32 %v2864_v25, 0.0 }
0x1287   : > { %v2925_v33 = vrot.slane %v2894_v26, 7 }
0x1288   : > { %v6161_v38 = vsel %vm884_vm0, 0.0, %v2920_v27  ;;  %v2921_v43 = vrot.slane %v2892_v28, 7  ;;  %v3866_v57 = vpop.f32.mrb[28].mxu0 }
0x1289   : > { %v6164_v49 = vsel %vm884_vm0, %v2923_v31, %v2925_v33  ;;  %v2885_v51 = vadd.f32 %v3866_v57, %v3564_v8  ;;  %v2876_v52 = vpop.f32.mrb[29].mxu0  ;;  %v2948_v59 = vrot.slane %v6161_v38, 1  ;;  %v2989_v37 = vrot.slane %v6161_v38, 2 }
0x128a   : > { %v6168_v36 = vsel %vm884_vm0, %v2920_v27, %v2921_v43  ;;  %v6171_v41 = vsel %vm884_vm0, %v2921_v43, %v2923_v31  ;;  %v3867_v62 = vpop.f32.mrb[30].mxu0  ;;  %v2877_v56 = vadd.f32 %v3564_v8, %v2876_v52  ;;  %v2953_v5 = vrot.slane %v6164_v49, 1 }
0x128b   : > { %v2949_v45 = vrot.slane %v6168_v36, 1  ;;  %v2951_v48 = vrot.slane %v6171_v41, 1  ;;  %v2990_v2 = vrot.slane %v6168_v36, 2  ;;  %v2992_v53 = vrot.slane %v6171_v41, 2  ;;  %v2879_v54 = vpop.f32.mrb[31].mxu0 }
0x128c   : > { %v2897_v55 = vmax.f32 %v2885_v51, 0.0  ;;  %v2888_v58 = vadd.f32 %v3867_v62, %v3564_v8  ;;  %v2880_v47 = vadd.f32 %v3564_v8, %v2879_v54  ;;  %v2895_v61 = vmax.f32 %v2877_v56, 0.0 }
0x128d   : > { %v2950_v34 = vsel %vm895_vm1, %v2948_v59, %v2949_v45  ;;  %v2952_v30 = vsel %vm895_vm1, %v2949_v45, %v2951_v48  ;;  %v2991_v9 = vsel %vm907_vm2, %v2989_v37, %v2990_v2  ;;  %v2993_v42 = vsel %vm907_vm2, %v2990_v2, %v2992_v53 }
0x128e   : > { %v2898_v63 = vmax.f32 %v2888_v58, 0.0  ;;  %v2896_v1 = vmax.f32 %v2880_v47, 0.0  ;;  %v4298_v7 = vpack.i.bf16 %v2952_v30, %v2950_v34  ;;  %v2931_v10 = vrot.slane %v2897_v55, 7 }
0x128f   : > { %v2927_v32 = vrot.slane %v2895_v61, 7  ;;  %v2994_v3 = vrot.slane %v6164_v49, 2  ;;  %v4303_v17 = vpack.i.bf16 %v2993_v42, %v2991_v9  ;;  %v2954_v22 = vsel %vm895_vm1, %v2951_v48, %v2953_v5 }
0x1290   : > { %v2933_v44 = vrot.slane %v2898_v63, 7  ;;  %v2929_v0 = vrot.slane %v2896_v1, 7  ;;  %4299 = vrot.lane.b32.xlu0 %v4298_v7, %s5063_s7 }
0x1291   : > { %v6185_v15 = vsel %vm884_vm0, %v2925_v33, %v2927_v32  ;;  %v2995_v25 = vsel %vm907_vm2, %v2992_v53, %v2994_v3 }
0x1292   : > { %v6188_v16 = vsel %vm884_vm0, %v2931_v10, %v2933_v44  ;;  %v6191_v12 = vsel %vm884_vm0, %v2927_v32, %v2929_v0  ;;  %v2955_v14 = vrot.slane %v6185_v15, 1  ;;  %v2996_v4 = vrot.slane %v6185_v15, 2 }
0x1293   : > { %v2945_v18 = vsel %vm884_vm0, %v2933_v44, 0.0  ;;  %v6198_v19 = vsel %vm884_vm0, %v2929_v0, %v2931_v10  ;;  %v2957_v20 = vrot.slane %v6191_v12, 1  ;;  %v2998_v8 = vrot.slane %v6191_v12, 2  ;;  %vm6431_vm0 = vmmov %vm6424_vm7 }
0x1294   : > { %v2959_v21 = vrot.slane %v6198_v19, 1  ;;  %v3000_v6 = vrot.slane %v6198_v19, 2  ;;  %4304 = vrot.lane.b32.xlu0 %v4303_v17, %s5064_s2  ;;  %v2956_v35 = vsel %vm895_vm1, %v2953_v5, %v2955_v14  ;;  %v2961_v13 = vrot.slane %v6188_v16, 1  ;;  %vm6434_vm3 = vmmov %vm6431_vm0 }
0x1295   : > { %v4308_v29 = vpack.i.bf16 %v2956_v35, %v2954_v22  ;;  %v2958_v46 = vsel %vm895_vm1, %v2955_v14, %v2957_v20  ;;  %v2963_v39 = vrot.slane %v2945_v18, 1  ;;  %v2997_v40 = vsel %vm907_vm2, %v2994_v3, %v2996_v4 }
0x1296   : > { %v2960_v24 = vsel %vm895_vm1, %v2957_v20, %v2959_v21  ;;  %v2999_v26 = vsel %vm907_vm2, %v2996_v4, %v2998_v8  ;;  %v3001_v27 = vsel %vm907_vm2, %v2998_v8, %v3000_v6  ;;  %v4313_v28 = vpack.i.bf16 %v2997_v40, %v2995_v25 }
0x1297   : > { %4309 = vrot.lane.b32.xlu1 %v4308_v29, %s5063_s7  ;;  %v4318_v23 = vpack.i.bf16 %v2960_v24, %v2958_v46  ;;  %v3002_v50 = vrot.slane %v6188_v16, 2  ;;  %v3004_v31 = vrot.slane %v2945_v18, 2  ;;  %v2962_v33 = vsel %vm895_vm1, %v2959_v21, %v2961_v13 }
0x1298   : > { %v2964_v43 = vsel %vm895_vm1, %v2961_v13, %v2963_v39  ;;  %v4328_v57 = vpack.i.bf16 %v3001_v27, %v2999_v26  ;;  %vm6432_vm1 = vmmov %vm6431_vm0  ;;  %v3575_v13 = vld [vmem:[#allocation31] ss:$0 sm:$0xff] }
0x1299   : > { %4319 = vrot.lane.b32.xlu0 %v4318_v23, %s5063_s7  ;;  %v4323_v51 = vpack.i.bf16 %v2964_v43, %v2962_v33  ;;  %v3003_v52 = vsel %vm907_vm2, %v3000_v6, %v3002_v50  ;;  %v3005_v59 = vsel %vm907_vm2, %v3002_v50, %v3004_v31  ;;  %vm6433_vm2 = vmmov %vm6431_vm0 }
0x129a   : > { %v4333_v62 = vpack.i.bf16 %v3005_v59, %v3003_v52 }
0x129b   : > { %4314 = vrot.lane.b32.xlu1 %v4313_v28, %s5064_s2 }
0x129d   : > { %4329 = vrot.lane.b32.xlu0 %v4328_v57, %s5064_s2 }
0x129f   : > { %4324 = vrot.lane.b32.xlu1 %v4323_v51, %s5063_s7  ;;  %s4935_s7 = sshll.u32 %s5065_s6, 4  ;;  %s4936_s7 = int_to_ptr.vmem [resolvable:$false] %s4935_s7 }
0x12a0   : > { %p4938_p12 = scmp.lt.s32.totalorder %s6265_s24, %s4936_s7 }
0x12a3   : > { %4334 = vrot.lane.b32.xlu1 %v4333_v62, %s5064_s2  ;;  %s4937_s2 = scalar_lea.vmem %s4936_s7, 2048 }
0x12a4   : > { %p4939_p1 = scmp.lt.s32.totalorder %s4937_s2, %s4931_s30 }
0x12a6   : > { %p4940_p13 = por %p4939_p1, %p4938_p12 }
0x12a8   : > { %p4941_p0 = pnand %p4940_p13, %p4934_p9 }
0x1302   : > { %v4300_v45 = vpop.permute.xlu0 %4299 }
0x1303   : > { %v4302_v48 = vunpack.i.h.bf16 %v4300_v45  ;;  %v4301_v2 = vunpack.i.l.bf16 %v4300_v45 }
0x1305   : > { %v3031_v56 = vsel %vm922_vm5, %v6168_v36, %v4302_v48  ;;  %v3030_v58 = vsel %vm922_vm5, %v6161_v38, %v4301_v2 }
0x1306   : > { %v4305_v53 = vpop.permute.xlu0 %4304 }
0x1307   : > { %v4307_v54 = vunpack.i.h.bf16 %v4305_v53  ;;  %v4306_v55 = vunpack.i.l.bf16 %v4305_v53 }
0x1309   : > { %v3038_v47 = vsel %vm1049_vm10, %v3030_v58, %v4306_v55  ;;  %v3039_v37 = vsel %vm1049_vm10, %v3031_v56, %v4307_v54  ;;  %v4310_v34 = vpop.permute.xlu1 %4309 }
0x130a   : > { %v3046_v30 = vpack.c.bf16 %v3039_v37, %v3038_v47  ;;  %v4312_v60 = vunpack.i.h.bf16 %v4310_v34  ;;  %v4311_v61 = vunpack.i.l.bf16 %v4310_v34 }
0x130b   : > { %v4320_v63 = vpop.permute.xlu0 %4319 }
0x130c   : > { %3880 = vmatprep.mubr.msk.bf16.mxu1 %vm6431_vm0, %v3046_v30  ;;  %v4322_v1 = vunpack.i.h.bf16 %v4320_v63  ;;  %v4321_v5 = vunpack.i.l.bf16 %v4320_v63  ;;  %v3033_v36 = vsel %vm922_vm5, %v6164_v49, %v4312_v60  ;;  %v3032_v38 = vsel %vm922_vm5, %v6171_v41, %v4311_v61 }
0x130d   : > { %v4315_v7 = vpop.permute.xlu1 %4314 }
0x130e   : > { %v4317_v9 = vunpack.i.h.bf16 %v4315_v7  ;;  %v4316_v42 = vunpack.i.l.bf16 %v4315_v7  ;;  %v3035_v3 = vsel %vm922_vm5, %v6191_v12, %v4322_v1  ;;  %v3034_v14 = vsel %vm922_vm5, %v6185_v15, %v4321_v5 }
0x130f   : > { %v4330_v10 = vpop.permute.xlu0 %4329 }
0x1310   : > { %v3040_v32 = vsel %vm1049_vm10, %v3032_v38, %v4316_v42  ;;  %v3041_v44 = vsel %vm1049_vm10, %v3033_v36, %v4317_v9  ;;  %v4332_v0 = vunpack.i.h.bf16 %v4330_v10  ;;  %v4331_v11 = vunpack.i.l.bf16 %v4330_v10 }
0x1311   : > { %v3047_v4 = vpack.c.bf16 %v3041_v44, %v3040_v32  ;;  %v4325_v17 = vpop.permute.xlu1 %4324 }
0x1312   : > { %v3042_v49 = vsel %vm1049_vm10, %v3034_v14, %v4331_v11  ;;  %v3043_v41 = vsel %vm1049_vm10, %v3035_v3, %v4332_v0  ;;  %v4327_v20 = vunpack.i.h.bf16 %v4325_v17  ;;  %v4326_v22 = vunpack.i.l.bf16 %v4325_v17 }
0x1313   : > { %v3048_v18 = vpack.c.bf16 %v3043_v41, %v3042_v49  ;;  %3881 = vmatmul.mubr.msk.bf16.vlgmr.msra.gmra.mrb[36].mxu1 %vm6432_vm1, %v3047_v4 }
0x1314   : > { %v3037_v15 = vsel %vm922_vm5, %v6188_v16, %v4327_v20  ;;  %v3036_v6 = vsel %vm922_vm5, %v6198_v19, %v4326_v22 }
0x1315   : > { %v4335_v21 = vpop.permute.xlu1 %4334  ;;  %3884 = vmatprep.mubr.msk.bf16.mxu1 %vm6433_vm2, %v3048_v18 }
0x1316   : > { %v4337_v8 = vunpack.i.h.bf16 %v4335_v21  ;;  %v4336_v12 = vunpack.i.l.bf16 %v4335_v21 }
0x1318   : > { %v3044_v35 = vsel %vm1049_vm10, %v3036_v6, %v4336_v12  ;;  %v3045_v29 = vsel %vm1049_vm10, %v3037_v15, %v4337_v8 }
0x1319   : > { %v3049_v46 = vpack.c.bf16 %v3045_v29, %v3044_v35 }
0x131b   : > { %3885 = vmatmul.mubr.msk.bf16.gmra.mrb[40].mxu1 %vm6434_vm3, %v3049_v46 }
0x13e6   : > { %v3882_v39 = vpop.f32.mrb[36].mxu1 }
0x13e7   : > { %v3147_v24 = vadd.f32 %v3882_v39, %v3575_v13  ;;  %v3138_v40 = vpop.f32.mrb[37].mxu1 }
0x13e8   : > { %v3139_v23 = vadd.f32 %v3575_v13, %v3138_v40  ;;  %v3883_v25 = vpop.f32.mrb[38].mxu1 }
0x13e9   : > { %3172 = vst.msk [vmem:[%s871_s1 + $0x10] sm:$0xff] %vm3169_vm6, %v3147_v24  ;;  %v3150_v16 = vadd.f32 %v3883_v25, %v3575_v13  ;;  %v3141_v19 = vpop.f32.mrb[39].mxu1 }
0x13ea   : > { %3170 = vst.msk [vmem:[%s871_s1] sm:$0xff] %vm3169_vm6, %v3139_v23  ;;  %v3142_v26 = vadd.f32 %v3575_v13, %v3141_v19 }
0x13eb   : > { %3173 = vst.msk [vmem:[%s871_s1 + $0x18] sm:$0xff] %vm3169_vm6, %v3150_v16 }
0x13ec   : > { %3171 = vst.msk [vmem:[%s871_s1 + $0x8] sm:$0xff] %vm3169_vm6, %v3142_v26 }
0x13ee   : > { %v3886_v27 = vpop.f32.mrb[40].mxu1 }
0x13ef   : > { %v3163_v28 = vadd.f32 %v3886_v27, %v3575_v13  ;;  %v3154_v50 = vpop.f32.mrb[41].mxu1 }
0x13f0   : > { %v3155_v31 = vadd.f32 %v3575_v13, %v3154_v50  ;;  %v3887_v33 = vpop.f32.mrb[42].mxu1 }
0x13f1   : > { %3176 = vst.msk [vmem:[%s871_s1 + $0x30] sm:$0xff] %vm3169_vm6, %v3163_v28  ;;  %v3166_v43 = vadd.f32 %v3887_v33, %v3575_v13  ;;  %v3157_v57 = vpop.f32.mrb[43].mxu1 }
0x13f2   : > { %3174 = vst.msk [vmem:[%s871_s1 + $0x20] sm:$0xff] %vm3169_vm6, %v3155_v31  ;;  %v3158_v51 = vadd.f32 %v3575_v13, %v3157_v57 }
0x13f3   : > { %3177 = vst.msk [vmem:[%s871_s1 + $0x38] sm:$0xff] %vm3169_vm6, %v3166_v43 }
0x13f4   : > { %3175 = vst.msk [vmem:[%s871_s1 + $0x28] sm:$0xff] %vm3169_vm6, %v3158_v51 }
0x13f5   : > { %4944 = shalt.err (!%p4941_p0)
}
0x13f6   : > { %s4945_s20 = scalar_lea.hbm %s6263_s4, 1024  ;;  %s4949_s16 = scalar_lea.hbm %s6435_s5, 2048 }
0x13f7   : > { %p4946_p2 = scmp.ne.s32.totalorder %s6263_s4, %s4945_s20  ;;  %p4950_p10 = scmp.lt.u32.totalorder %s6263_s4, %s6435_s5 }
0x13f8   : > { %p4951_p11 = scmp.lt.u32.totalorder %s4949_s16, %s4945_s20  ;;  %p4953_p5 = scmp.lt.u32.totalorder %s4945_s20, %s6263_s4 }
0x13f9   : > { %p4947_p8 = pnand %p4946_p2, %p6436_p7 }
0x13fa   : > { %p4952_p3 = por %p4951_p11, %p4950_p10 }
0x13fb   : > { %p4948_p4 = pneg %p4947_p8 }
0x13fc   : > { %p4954_p6 = por %p4953_p5, %p4952_p3 }
0x13fe   : > { %p4955_p9 = pnand %p4954_p6, %p4948_p4 }
0x1400   : > { %4958 = shalt.err (!%p4955_p9)
}
0x1401   : > { %s5066_s30 = smov 128   ;;  %s5067_s7 = smov 8  }
0x1402   : > { %3962 = dma.vmem_to_hbm [thread:$0]  (%p6436_p7), %s6265_s24, 1024, %s6263_s4, %s3179_s8, %s5066_s30, %s5066_s30, %s5067_s7  }
0x1403 PF: > { %s6437_s2 = sld [smem:[#allocation44_spill]]  ;;  %s6438_s1 = sld [smem:[#allocation47_spill]] }
0x1404   : > { %p6439_p12 = scmp.ne.s32.totalorder %s6398_s23, 0 }
0x1409   : > { %s3207_s22 = sand.u32 1, %s6437_s2   ;;  %p6440_p1 = scmp.ge.s32.totalorder %s6438_s1, 2 }
0x140a   : > { %s3208_s20 = scalar_lea.sflag [#allocation4], %s3207_s22 }
0x140b   : > { %p4024_p13 = pnand %p6440_p1, %p6439_p12 }
0x140d   : > { %5016 = dma.done.wait (!%p4024_p13), %s3208_s20, 1024  }
0x140e   : > { %5018 = vsyncadd (!%p4024_p13), %s3208_s20, 4294966272  ;;  %s6441_s16 = sld [smem:[#allocation45_spill]]  ;;  %s6442_s30 = sld [smem:[#allocation46_spill]] }
0x140f   : > { %s6443_s21 = smov %s5610_s0  ;;  %p41_p0 = scmp.ge.s32.totalorder %s5599_s3, 4  }
0x1410   : > { %s6445_s20 = smov %s6443_s21  ;;  %s6446_s21 = smov %s5599_s3 }
0x1411   :  { %43 = sbr.rel (!%p41_p0) target bundleno = 28 (0x1c), region = 221 }
0x1414   : > { %s6444_s0 = smov %s6441_s16 }
0x1418   :  { %3213 = vsyncpa [#allocation3], 1 }
0x1419   :  { %3215 = vsyncpa [#allocation3 + $0x1], 1 }
0x141a   :  { %3216 = vsyncpa [#allocation6], 1 }
0x141b   :  { %3217 = vsyncpa [#allocation9], 1 }
0x141c   :  { %3218 = vsyncpa [#allocation12], 1 }
0x141d   :  { %3219 = vsyncpa [#allocation15], 1 }
0x141e   :  { %3220 = vsyncpa [#allocation18], 1 }
0x141f   :  { %3221 = vsyncpa [#allocation21], 1 }
0x1420   :  { %3222 = vsyncpa [#allocation24], 1 }
0x1421   :  { %3223 = vsyncpa [#allocation27], 1 }
0x1422   :  { %3224 = vsyncpa [#allocation30], 1 }
0x1423   :  { %3225 = vsyncpa [#allocation4], 1 }
0x1424   :  { %3227 = vsyncpa [#allocation4 + $0x1], 1 }

</bundles_post_ra>
